<compile_context>
chip_gen: v5e
topology: v5e:2x2
jax: 0.10.0
libtpu: 0.0.40
codegen_flags: <defaults>
</compile_context>

<pallas_src>
import functools
import math

import jax
import jax.numpy as jnp
from jax.experimental import pallas as pl
from jax.experimental.pallas import tpu as pltpu

LN_EPS = 1e-6  # timm ViT LayerNorm eps


def _gelu(x):
    # nn.GELU() default: exact erf formulation.
    return 0.5 * x * (1.0 + jax.lax.erf(x * (1.0 / math.sqrt(2.0))))


def _layer_norm_1pass(x, gamma, beta):
    # Single-pass stats in f32: var = E[x^2] - mean^2.
    mean = jnp.mean(x, axis=-1, keepdims=True)
    mean_sq = jnp.mean(x * x, axis=-1, keepdims=True)
    var = mean_sq - mean * mean
    return (x - mean) * jax.lax.rsqrt(var + LN_EPS) * gamma + beta


def _vit_encoder_kernel(num_heads,
                        patches_ref, mask_ref, wp_ref, bp_ref, pos_ref,
                        ln1g_ref, ln1b_ref, wqkv_ref, bqkv_ref,
                        wo_ref, bo_ref, ln2g_ref, ln2b_ref,
                        wm1_ref, bm1_ref, wm2_ref, bm2_ref,
                        lnfg_ref, lnfb_ref, o_ref, tok_ref):
    tb, n, pd = patches_ref.shape
    d = wp_ref.shape[1]
    dh = d // num_heads
    rows = tb * n
    scale = 1.0 / math.sqrt(dh)

    # ---- patch embedding + positional embedding (flat, no reshapes) -------
    patches = patches_ref[...].reshape(rows, pd)           # bf16 -> MXU
    tok = jnp.dot(patches, wp_ref[...], preferred_element_type=jnp.float32)
    tok = tok + bp_ref[...] + pos_ref[...]                  # f32 VPU adds
    tok_ref[...] = tok                                      # park residual in VMEM

    # ---- pre-LN multi-head self-attention (block-diagonal over images) ----
    h = _layer_norm_1pass(tok, ln1g_ref[...], ln1b_ref[...]).astype(jnp.bfloat16)
    # Three lane-aligned projections (column offsets 0/D/2D), no (rows,3D) qkv.
    q = (jnp.dot(h, wqkv_ref[:, 0 * d:1 * d], preferred_element_type=jnp.float32)
         + bqkv_ref[:, 0 * d:1 * d]).astype(jnp.bfloat16)
    k = (jnp.dot(h, wqkv_ref[:, 1 * d:2 * d], preferred_element_type=jnp.float32)
         + bqkv_ref[:, 1 * d:2 * d]).astype(jnp.bfloat16)
    v = (jnp.dot(h, wqkv_ref[:, 2 * d:3 * d], preferred_element_type=jnp.float32)
         + bqkv_ref[:, 2 * d:3 * d]).astype(jnp.bfloat16)

    head_outs = []
    for head in range(num_heads):           # static unroll; static head slices
        sl = slice(head * dh, (head + 1) * dh)
        qh, kh, vh = q[:, sl], k[:, sl], v[:, sl]
        # S = Q_h @ K_h^T : one full-sized (rows, dh) x (dh, rows) MXU matmul.
        s = jax.lax.dot_general(qh, kh, (((1,), (1,)), ((), ())),
                                preferred_element_type=jnp.float32)
        s = s * scale + mask_ref[...]        # -1e30 across different images
        s = s - jnp.max(s, axis=-1, keepdims=True)
        p = jnp.exp(s)
        denom = jnp.sum(p, axis=-1, keepdims=True)
        p = p * pl.reciprocal(denom, approx=True)            # EUP slot
        oh = jnp.dot(p.astype(jnp.bfloat16), vh,
                     preferred_element_type=jnp.float32)
        head_outs.append(oh.astype(jnp.bfloat16))
    attn = jnp.concatenate(head_outs, axis=-1)                # (rows, d) bf16
    proj = jnp.dot(attn, wo_ref[...],
                   preferred_element_type=jnp.float32) + bo_ref[...]
    tok = tok_ref[...] + proj                 # residual 1 (dropout = identity)
    tok_ref[...] = tok

    # ---- pre-LN MLP block (exact-erf GELU) ---------------------------------
    h2 = _layer_norm_1pass(tok, ln2g_ref[...], ln2b_ref[...]).astype(jnp.bfloat16)
    m = jnp.dot(h2, wm1_ref[...], preferred_element_type=jnp.float32) + bm1_ref[...]
    m = _gelu(m).astype(jnp.bfloat16)
    m = jnp.dot(m, wm2_ref[...], preferred_element_type=jnp.float32) + bm2_ref[...]
    tok = tok_ref[...] + m                    # residual 2 (dropout = identity)

    # ---- final LayerNorm + global average pool over tokens ----------------
    tok = _layer_norm_1pass(tok, lnfg_ref[...], lnfb_ref[...])
    pooled = jnp.mean(tok.reshape(tb, n, d), axis=1)          # (tb, d)
    o_ref[...] = pooled.astype(o_ref.dtype)


def _patchify(x, patch):
    """(B, C, H, W) -> (B, N, C*patch*patch). Stride==kernel conv as reshape."""
    B, C, H, W = x.shape
    gh, gw = H // patch, W // patch
    x = x.reshape(B, C, gh, patch, gw, patch)
    x = x.transpose(0, 2, 4, 1, 3, 5)
    return x.reshape(B, gh * gw, C * patch * patch)


def image_encoder(x, params, *, patch_size, num_heads, batch_block=8):
    """x: (B, C, H, W) images -> (B, D) fixed latent representation."""
    B = x.shape[0]
    patches = _patchify(x, patch_size)
    _, N, Pd = patches.shape
    D = params['wp'].shape[1]
    Hm = params['wm1'].shape[1]
    assert D % num_heads == 0

    # Batch tile: aim for ~128 rows/step, but keep >= 2 "parallel" grid steps
    # so the batch axis can shard across v7x's two TensorCores.
    bb = min(batch_block, B)
    while B % bb:
        bb -= 1
    if B // bb < 2 and B > 1 and B % 2 == 0:
        bb = B // 2
    grid = (B // bb,)
    rows = bb * N

    # Host-side layout plumbing (not compute hoisting):
    #  * zero-pad patch_dim to a multiple of 128 (K=256 fills the MXU, patches
    #    tile is lane-unmasked), * pre-tile pos to (rows, D), * bf16 patches.
    Pd_pad = ((Pd + 127) // 128) * 128
    patches = jnp.pad(patches, ((0, 0), (0, 0), (0, Pd_pad - Pd))).astype(jnp.bfloat16)
    wp = jnp.pad(params['wp'].astype(jnp.float32),
                 ((0, Pd_pad - Pd), (0, 0))).astype(jnp.bfloat16)
    pos = jnp.tile(params['pos'].astype(jnp.float32), (bb, 1))

    # Block-diagonal attention mask: tokens attend only within their own image.
    img_id = jnp.repeat(jnp.arange(bb, dtype=jnp.int32), N)
    mask = jnp.where(img_id[:, None] == img_id[None, :], 0.0, -1e30
                     ).astype(jnp.float32)

    def resident(shape):
        # Weights/biases: constant block index -> VMEM resident across steps.
        return pl.BlockSpec(shape, lambda i: (0, 0))

    in_specs = [
        pl.BlockSpec((bb, N, Pd_pad), lambda i: (i, 0, 0)),  # patches (tiled)
        resident((rows, rows)),                              # attention mask
        resident((Pd_pad, D)), resident((1, D)), resident((rows, D)),  # Wp,bp,pos
        resident((1, D)), resident((1, D)),                  # LN1 g, b
        resident((D, 3 * D)), resident((1, 3 * D)),          # Wqkv, bqkv
        resident((D, D)), resident((1, D)),                  # Wo, bo
        resident((1, D)), resident((1, D)),                  # LN2 g, b
        resident((D, Hm)), resident((1, Hm)),                # Wm1, bm1
        resident((Hm, D)), resident((1, D)),                 # Wm2, bm2
        resident((1, D)), resident((1, D)),                  # LNf g, b
    ]
    out_specs = pl.BlockSpec((bb, D), lambda i: (i, 0))      # lane-dense out

    args = (patches, mask, wp, params['bp'], pos,
            params['ln1_g'], params['ln1_b'], params['wqkv'], params['bqkv'],
            params['wo'], params['bo'], params['ln2_g'], params['ln2_b'],
            params['wm1'], params['bm1'], params['wm2'], params['bm2'],
            params['lnf_g'], params['lnf_b'])

    # VMEM budget: double-buffered per-step tiles + resident weights (x2 for
    # the pipeline's buffering) + scratch + in-kernel temporaries; clamped to
    # v7x's 64 MiB physical VMEM (v5e/v6e have 128 MiB headroom above this).
    def nbytes(a):
        return int(a.size) * jnp.dtype(a.dtype).itemsize
    tile_bytes = 2 * (bb * N * Pd_pad * 2 + bb * D * 4)
    resident_bytes = sum(nbytes(a) for a in args[1:])
    scratch_bytes = rows * D * 4
    temp_bytes = rows * (4 * D + Hm) * 4 + 2 * rows * rows * 4
    vmem_limit = int(min(max(tile_bytes + 2 * resident_bytes + scratch_bytes
                             + temp_bytes + (4 << 20), 32 << 20), 64 << 20))

    kernel = functools.partial(_vit_encoder_kernel, num_heads)
    return pl.pallas_call(
        kernel,
        out_shape=jax.ShapeDtypeStruct((B, D), x.dtype),
        grid=grid,
        in_specs=in_specs,
        out_specs=out_specs,
        scratch_shapes=[pltpu.VMEM((rows, D), jnp.float32)],   # token residual
        compiler_params=pltpu.CompilerParams(
            dimension_semantics=("parallel",),
            vmem_limit_bytes=vmem_limit),
    )(*args)


def init_params(key, *, patch_dim, num_tokens, embed_dim, mlp_dim,
                mxu_dtype=jnp.bfloat16, dtype=jnp.float32):
    ks = jax.random.split(key, 18)

    def lin(k, fan_in, shape, out_dtype=dtype):
        lim = 1.0 / math.sqrt(fan_in)
        return jax.random.uniform(k, shape, dtype, -lim, lim).astype(out_dtype)

    D, Hm = embed_dim, mlp_dim
    ln = lambda kg, kb: (1.0 + 0.1 * jax.random.normal(kg, (1, D), dtype),
                         0.1 * jax.random.normal(kb, (1, D), dtype))
    ln1_g, ln1_b = ln(ks[11], ks[12])
    ln2_g, ln2_b = ln(ks[13], ks[14])
    lnf_g, lnf_b = ln(ks[15], ks[16])
    # Matmul weights stored in bf16 (MXU feeds); biases / LN / pos stay f32.
    return dict(
        wp=lin(ks[0], patch_dim, (patch_dim, D), mxu_dtype),
        bp=lin(ks[1], patch_dim, (1, D)),
        pos=0.02 * jax.random.normal(ks[2], (num_tokens, D), dtype),
        ln1_g=ln1_g, ln1_b=ln1_b,
        wqkv=lin(ks[3], D, (D, 3 * D), mxu_dtype),
        bqkv=lin(ks[4], D, (1, 3 * D)),
        wo=lin(ks[5], D, (D, D), mxu_dtype),
        bo=lin(ks[6], D, (1, D)),
        ln2_g=ln2_g, ln2_b=ln2_b,
        wm1=lin(ks[7], D, (D, Hm), mxu_dtype),
        bm1=lin(ks[8], D, (1, Hm)),
        wm2=lin(ks[9], Hm, (Hm, D), mxu_dtype),
        bm2=lin(ks[10], Hm, (1, D)),
        lnf_g=lnf_g, lnf_b=lnf_b,
    )


def reference_forward(x, params, *, patch_size, num_heads):
    """Pure-JAX f32 reference (two-pass LayerNorm, jax.nn.softmax)."""
    p = {k: v.astype(jnp.float32) for k, v in params.items()}  # bf16->f32 exact
    patches = _patchify(x.astype(jnp.float32), patch_size)
    B, N, _ = patches.shape
    D = p['wp'].shape[1]
    dh = D // num_heads

    def ln(v, g, b):
        mean = jnp.mean(v, axis=-1, keepdims=True)
        var = jnp.mean((v - mean) ** 2, axis=-1, keepdims=True)
        return (v - mean) / jnp.sqrt(var + LN_EPS) * g + b

    tok = patches @ p['wp'] + p['bp'] + p['pos'][None]
    h = ln(tok, p['ln1_g'], p['ln1_b'])
    qkv = h @ p['wqkv'] + p['bqkv']
    q, k, v = jnp.split(qkv, 3, axis=-1)
    heads = lambda t: t.reshape(B, N, num_heads, dh).transpose(0, 2, 1, 3)
    qh, kh, vh = heads(q), heads(k), heads(v)
    s = jnp.einsum('bhnd,bhmd->bhnm', qh, kh) / math.sqrt(dh)
    a = jax.nn.softmax(s, axis=-1)
    o = jnp.einsum('bhnm,bhmd->bhnd', a, vh)
    o = o.transpose(0, 2, 1, 3).reshape(B, N, D)
    tok = tok + o @ p['wo'] + p['bo']
    h = ln(tok, p['ln2_g'], p['ln2_b'])
    m = _gelu(h @ p['wm1'] + p['bm1'])
    tok = tok + m @ p['wm2'] + p['bm2']
    tok = ln(tok, p['lnf_g'], p['lnf_b'])
    return jnp.mean(tok, axis=1)


if __name__ == "__main__":
    batch, channels, image_size = 16, 3, 32
    patch_size = 8
    embed_dim, num_heads, mlp_dim = 128, 2, 256   # lane-dense (multiples of 128)
    num_tokens = (image_size // patch_size) ** 2  # 16 tokens
    patch_dim = channels * patch_size * patch_size  # 192 (padded to 256 for MXU)

    key = jax.random.PRNGKey(0)
    kx, kp = jax.random.split(key)
    x = jax.random.normal(kx, (batch, channels, image_size, image_size),
                          jnp.float32)
    params = init_params(kp, patch_dim=patch_dim, num_tokens=num_tokens,
                         embed_dim=embed_dim, mlp_dim=mlp_dim)

    out = image_encoder(x, params, patch_size=patch_size,
                        num_heads=num_heads, batch_block=8)
    out = jax.block_until_ready(out)

    ref = reference_forward(x, params, patch_size=patch_size,
                            num_heads=num_heads)
    assert out.shape == (batch, embed_dim)
    err = float(jnp.max(jnp.abs(out - ref)))
    # bf16 MXU feeds + approx reciprocal => loosened tolerance vs f32 reference.
    assert jnp.allclose(out, ref, atol=5e-2, rtol=5e-2), f"max abs err = {err}"

    print("KERNEL_OK")
</pallas_src>

<mosaic_0001>
module attributes {stable_mosaic.version = 11 : i64} {
  func.func @_vit_encoder_kernel(%arg0: i32, %arg1: memref<8x16x256xbf16, #tpu.memory_space<vmem>>, %arg2: memref<128x128xf32, #tpu.memory_space<vmem>>, %arg3: memref<256x128xbf16, #tpu.memory_space<vmem>>, %arg4: memref<1x128xf32, #tpu.memory_space<vmem>>, %arg5: memref<128x128xf32, #tpu.memory_space<vmem>>, %arg6: memref<1x128xf32, #tpu.memory_space<vmem>>, %arg7: memref<1x128xf32, #tpu.memory_space<vmem>>, %arg8: memref<128x384xbf16, #tpu.memory_space<vmem>>, %arg9: memref<1x384xf32, #tpu.memory_space<vmem>>, %arg10: memref<128x128xbf16, #tpu.memory_space<vmem>>, %arg11: memref<1x128xf32, #tpu.memory_space<vmem>>, %arg12: memref<1x128xf32, #tpu.memory_space<vmem>>, %arg13: memref<1x128xf32, #tpu.memory_space<vmem>>, %arg14: memref<128x256xbf16, #tpu.memory_space<vmem>>, %arg15: memref<1x256xf32, #tpu.memory_space<vmem>>, %arg16: memref<256x128xbf16, #tpu.memory_space<vmem>>, %arg17: memref<1x128xf32, #tpu.memory_space<vmem>>, %arg18: memref<1x128xf32, #tpu.memory_space<vmem>>, %arg19: memref<1x128xf32, #tpu.memory_space<vmem>>, %arg20: memref<8x128xf32, #tpu.memory_space<vmem>>, %arg21: memref<128x128xf32, #tpu.memory_space<vmem>>) attributes {dimension_semantics = [#tpu.dimension_semantics<parallel>], iteration_bounds = array<i64: 2>, scalar_prefetch = 0 : i64, scratch_operands = 1 : i64, tpu.core_type = #tpu.core_type<tc>, window_params = [{transform_indices = @transform_0, window_bounds = array<i64: 8, 16, 256>}, {pipeline_mode = #tpu.pipeline_mode<synchronous>, transform_indices = @transform_1, window_bounds = array<i64: 128, 128>}, {pipeline_mode = #tpu.pipeline_mode<synchronous>, transform_indices = @transform_2, window_bounds = array<i64: 256, 128>}, {pipeline_mode = #tpu.pipeline_mode<synchronous>, transform_indices = @transform_3, window_bounds = array<i64: 1, 128>}, {pipeline_mode = #tpu.pipeline_mode<synchronous>, transform_indices = @transform_4, window_bounds = array<i64: 128, 128>}, {pipeline_mode = #tpu.pipeline_mode<synchronous>, transform_indices = @transform_5, window_bounds = array<i64: 1, 128>}, {pipeline_mode = #tpu.pipeline_mode<synchronous>, transform_indices = @transform_6, window_bounds = array<i64: 1, 128>}, {pipeline_mode = #tpu.pipeline_mode<synchronous>, transform_indices = @transform_7, window_bounds = array<i64: 128, 384>}, {pipeline_mode = #tpu.pipeline_mode<synchronous>, transform_indices = @transform_8, window_bounds = array<i64: 1, 384>}, {pipeline_mode = #tpu.pipeline_mode<synchronous>, transform_indices = @transform_9, window_bounds = array<i64: 128, 128>}, {pipeline_mode = #tpu.pipeline_mode<synchronous>, transform_indices = @transform_10, window_bounds = array<i64: 1, 128>}, {pipeline_mode = #tpu.pipeline_mode<synchronous>, transform_indices = @transform_11, window_bounds = array<i64: 1, 128>}, {pipeline_mode = #tpu.pipeline_mode<synchronous>, transform_indices = @transform_12, window_bounds = array<i64: 1, 128>}, {pipeline_mode = #tpu.pipeline_mode<synchronous>, transform_indices = @transform_13, window_bounds = array<i64: 128, 256>}, {pipeline_mode = #tpu.pipeline_mode<synchronous>, transform_indices = @transform_14, window_bounds = array<i64: 1, 256>}, {pipeline_mode = #tpu.pipeline_mode<synchronous>, transform_indices = @transform_15, window_bounds = array<i64: 256, 128>}, {pipeline_mode = #tpu.pipeline_mode<synchronous>, transform_indices = @transform_16, window_bounds = array<i64: 1, 128>}, {pipeline_mode = #tpu.pipeline_mode<synchronous>, transform_indices = @transform_17, window_bounds = array<i64: 1, 128>}, {pipeline_mode = #tpu.pipeline_mode<synchronous>, transform_indices = @transform_18, window_bounds = array<i64: 1, 128>}, {transform_indices = @transform_19, window_bounds = array<i64: 8, 128>}]} {
    %c0 = arith.constant 0 : index
    %c0_0 = arith.constant 0 : index
    %c0_1 = arith.constant 0 : index
    %0 = vector.load %arg1[%c0, %c0_0, %c0_1] : memref<8x16x256xbf16, #tpu.memory_space<vmem>>, vector<8x16x256xbf16>
    %1 = vector.shape_cast %0 : vector<8x16x256xbf16> to vector<128x256xbf16>
    %c0_2 = arith.constant 0 : index
    %c0_3 = arith.constant 0 : index
    %2 = vector.load %arg3[%c0_2, %c0_3] : memref<256x128xbf16, #tpu.memory_space<vmem>>, vector<256x128xbf16>
    %cst = arith.constant dense<0.000000e+00> : vector<128x128xf32>
    %3 = tpu.matmul %1, %2, %cst {dimension_numbers = #tpu.dot_dimension_numbers<[1], [0], [0], [1], [0, 0, 1, 1], [], []>} : vector<128x256xbf16>, vector<256x128xbf16>, vector<128x128xf32> -> vector<128x128xf32>
    %c0_4 = arith.constant 0 : index
    %c0_5 = arith.constant 0 : index
    %4 = vector.load %arg4[%c0_4, %c0_5] : memref<1x128xf32, #tpu.memory_space<vmem>>, vector<1x128xf32>
    %5 = vector.broadcast %4 : vector<1x128xf32> to vector<128x128xf32>
    %6 = arith.addf %3, %5 : vector<128x128xf32>
    %c0_6 = arith.constant 0 : index
    %c0_7 = arith.constant 0 : index
    %7 = vector.load %arg5[%c0_6, %c0_7] : memref<128x128xf32, #tpu.memory_space<vmem>>, vector<128x128xf32>
    %8 = arith.addf %6, %7 : vector<128x128xf32>
    %c0_8 = arith.constant 0 : index
    %c0_9 = arith.constant 0 : index
    %9 = vector.load %arg21[%c0_8, %c0_9] : memref<128x128xf32, #tpu.memory_space<vmem>>, vector<128x128xf32>
    tpu.vector_store %arg21[%c0_8, %c0_9], %8 {strides = array<i32>} : memref<128x128xf32, #tpu.memory_space<vmem>>, vector<128x128xf32>,
    %c0_10 = arith.constant 0 : index
    %c0_11 = arith.constant 0 : index
    %10 = vector.load %arg6[%c0_10, %c0_11] : memref<1x128xf32, #tpu.memory_space<vmem>>, vector<1x128xf32>
    %c0_12 = arith.constant 0 : index
    %c0_13 = arith.constant 0 : index
    %11 = vector.load %arg7[%c0_12, %c0_13] : memref<1x128xf32, #tpu.memory_space<vmem>>, vector<1x128xf32>
    %cst_14 = arith.constant dense<0.000000e+00> : vector<128xf32>
    %12 = vector.multi_reduction <add>, %8, %cst_14 [1] : vector<128x128xf32> to vector<128xf32>
    %13 = vector.shape_cast %12 : vector<128xf32> to vector<128x1xf32>
    %cst_15 = arith.constant 1.280000e+02 : f32
    %14 = vector.broadcast %cst_15 : f32 to vector<128x1xf32>
    %15 = arith.divf %13, %14 : vector<128x1xf32>
    %16 = arith.mulf %8, %8 : vector<128x128xf32>
    %cst_16 = arith.constant dense<0.000000e+00> : vector<128xf32>
    %17 = vector.multi_reduction <add>, %16, %cst_16 [1] : vector<128x128xf32> to vector<128xf32>
    %18 = vector.shape_cast %17 : vector<128xf32> to vector<128x1xf32>
    %cst_17 = arith.constant 1.280000e+02 : f32
    %19 = vector.broadcast %cst_17 : f32 to vector<128x1xf32>
    %20 = arith.divf %18, %19 : vector<128x1xf32>
    %21 = arith.mulf %15, %15 : vector<128x1xf32>
    %22 = arith.subf %20, %21 : vector<128x1xf32>
    %23 = vector.broadcast %15 : vector<128x1xf32> to vector<128x128xf32>
    %24 = arith.subf %8, %23 : vector<128x128xf32>
    %cst_18 = arith.constant 9.99999997E-7 : f32
    %25 = vector.broadcast %cst_18 : f32 to vector<128x1xf32>
    %26 = arith.addf %22, %25 : vector<128x1xf32>
    %27 = math.rsqrt %26 : vector<128x1xf32>
    %28 = vector.broadcast %27 : vector<128x1xf32> to vector<128x128xf32>
    %29 = arith.mulf %24, %28 : vector<128x128xf32>
    %30 = vector.broadcast %10 : vector<1x128xf32> to vector<128x128xf32>
    %31 = arith.mulf %29, %30 : vector<128x128xf32>
    %32 = vector.broadcast %11 : vector<1x128xf32> to vector<128x128xf32>
    %33 = arith.addf %31, %32 : vector<128x128xf32>
    %34 = arith.truncf %33 : vector<128x128xf32> to vector<128x128xbf16>
    %c0_19 = arith.constant 0 : index
    %c0_20 = arith.constant 0 : index
    %35 = vector.load %arg8[%c0_19, %c0_20] : memref<128x384xbf16, #tpu.memory_space<vmem>>, vector<128x128xbf16>
    %cst_21 = arith.constant dense<0.000000e+00> : vector<128x128xf32>
    %36 = tpu.matmul %34, %35, %cst_21 {dimension_numbers = #tpu.dot_dimension_numbers<[1], [0], [0], [1], [0, 0, 1, 1], [], []>} : vector<128x128xbf16>, vector<128x128xbf16>, vector<128x128xf32> -> vector<128x128xf32>
    %c0_22 = arith.constant 0 : index
    %c0_23 = arith.constant 0 : index
    %37 = vector.load %arg9[%c0_22, %c0_23] : memref<1x384xf32, #tpu.memory_space<vmem>>, vector<1x128xf32>
    %38 = vector.broadcast %37 : vector<1x128xf32> to vector<128x128xf32>
    %39 = arith.addf %36, %38 : vector<128x128xf32>
    %40 = arith.truncf %39 : vector<128x128xf32> to vector<128x128xbf16>
    %c0_24 = arith.constant 0 : index
    %c128 = arith.constant 128 : index
    %41 = vector.load %arg8[%c0_24, %c128] : memref<128x384xbf16, #tpu.memory_space<vmem>>, vector<128x128xbf16>
    %cst_25 = arith.constant dense<0.000000e+00> : vector<128x128xf32>
    %42 = tpu.matmul %34, %41, %cst_25 {dimension_numbers = #tpu.dot_dimension_numbers<[1], [0], [0], [1], [0, 0, 1, 1], [], []>} : vector<128x128xbf16>, vector<128x128xbf16>, vector<128x128xf32> -> vector<128x128xf32>
    %c0_26 = arith.constant 0 : index
    %c128_27 = arith.constant 128 : index
    %43 = vector.load %arg9[%c0_26, %c128_27] : memref<1x384xf32, #tpu.memory_space<vmem>>, vector<1x128xf32>
    %44 = vector.broadcast %43 : vector<1x128xf32> to vector<128x128xf32>
    %45 = arith.addf %42, %44 : vector<128x128xf32>
    %46 = arith.truncf %45 : vector<128x128xf32> to vector<128x128xbf16>
    %c0_28 = arith.constant 0 : index
    %c256 = arith.constant 256 : index
    %47 = vector.load %arg8[%c0_28, %c256] : memref<128x384xbf16, #tpu.memory_space<vmem>>, vector<128x128xbf16>
    %cst_29 = arith.constant dense<0.000000e+00> : vector<128x128xf32>
    %48 = tpu.matmul %34, %47, %cst_29 {dimension_numbers = #tpu.dot_dimension_numbers<[1], [0], [0], [1], [0, 0, 1, 1], [], []>} : vector<128x128xbf16>, vector<128x128xbf16>, vector<128x128xf32> -> vector<128x128xf32>
    %c0_30 = arith.constant 0 : index
    %c256_31 = arith.constant 256 : index
    %49 = vector.load %arg9[%c0_30, %c256_31] : memref<1x384xf32, #tpu.memory_space<vmem>>, vector<1x128xf32>
    %50 = vector.broadcast %49 : vector<1x128xf32> to vector<128x128xf32>
    %51 = arith.addf %48, %50 : vector<128x128xf32>
    %52 = arith.truncf %51 : vector<128x128xf32> to vector<128x128xbf16>
    %53 = vector.extract_strided_slice %40 {offsets = [0, 0], sizes = [128, 64], strides = [1, 1]} : vector<128x128xbf16> to vector<128x64xbf16>
    %54 = vector.extract_strided_slice %46 {offsets = [0, 0], sizes = [128, 64], strides = [1, 1]} : vector<128x128xbf16> to vector<128x64xbf16>
    %55 = vector.extract_strided_slice %52 {offsets = [0, 0], sizes = [128, 64], strides = [1, 1]} : vector<128x128xbf16> to vector<128x64xbf16>
    %cst_32 = arith.constant dense<0.000000e+00> : vector<128x128xf32>
    %56 = tpu.matmul %53, %54, %cst_32 {dimension_numbers = #tpu.dot_dimension_numbers<[1], [1], [0], [0], [0, 0, 1, 0], [], []>} : vector<128x64xbf16>, vector<128x64xbf16>, vector<128x128xf32> -> vector<128x128xf32>
    %cst_33 = arith.constant 1.250000e-01 : f32
    %57 = vector.broadcast %cst_33 : f32 to vector<128x128xf32>
    %58 = arith.mulf %56, %57 : vector<128x128xf32>
    %c0_34 = arith.constant 0 : index
    %c0_35 = arith.constant 0 : index
    %59 = vector.load %arg2[%c0_34, %c0_35] : memref<128x128xf32, #tpu.memory_space<vmem>>, vector<128x128xf32>
    %60 = arith.addf %58, %59 : vector<128x128xf32>
    %cst_36 = arith.constant dense<0xFF800000> : vector<128xf32>
    %61 = vector.multi_reduction <maximumf>, %60, %cst_36 [1] : vector<128x128xf32> to vector<128xf32>
    %62 = vector.shape_cast %61 : vector<128xf32> to vector<128x1xf32>
    %63 = vector.broadcast %62 : vector<128x1xf32> to vector<128x128xf32>
    %64 = arith.subf %60, %63 : vector<128x128xf32>
    %65 = math.exp %64 : vector<128x128xf32>
    %cst_37 = arith.constant dense<0.000000e+00> : vector<128xf32>
    %66 = vector.multi_reduction <add>, %65, %cst_37 [1] : vector<128x128xf32> to vector<128xf32>
    %67 = vector.shape_cast %66 : vector<128xf32> to vector<128x1xf32>
    %68 = tpu.reciprocal %67 {approx = true} : vector<128x1xf32> -> vector<128x1xf32>
    %69 = vector.broadcast %68 : vector<128x1xf32> to vector<128x128xf32>
    %70 = arith.mulf %65, %69 : vector<128x128xf32>
    %71 = arith.truncf %70 : vector<128x128xf32> to vector<128x128xbf16>
    %cst_38 = arith.constant dense<0.000000e+00> : vector<128x64xf32>
    %72 = tpu.matmul %71, %55, %cst_38 {dimension_numbers = #tpu.dot_dimension_numbers<[1], [0], [0], [1], [0, 0, 1, 1], [], []>} : vector<128x128xbf16>, vector<128x64xbf16>, vector<128x64xf32> -> vector<128x64xf32>
    %73 = arith.truncf %72 : vector<128x64xf32> to vector<128x64xbf16>
    %74 = vector.extract_strided_slice %40 {offsets = [0, 64], sizes = [128, 64], strides = [1, 1]} : vector<128x128xbf16> to vector<128x64xbf16>
    %75 = vector.extract_strided_slice %46 {offsets = [0, 64], sizes = [128, 64], strides = [1, 1]} : vector<128x128xbf16> to vector<128x64xbf16>
    %76 = vector.extract_strided_slice %52 {offsets = [0, 64], sizes = [128, 64], strides = [1, 1]} : vector<128x128xbf16> to vector<128x64xbf16>
    %cst_39 = arith.constant dense<0.000000e+00> : vector<128x128xf32>
    %77 = tpu.matmul %74, %75, %cst_39 {dimension_numbers = #tpu.dot_dimension_numbers<[1], [1], [0], [0], [0, 0, 1, 0], [], []>} : vector<128x64xbf16>, vector<128x64xbf16>, vector<128x128xf32> -> vector<128x128xf32>
    %cst_40 = arith.constant 1.250000e-01 : f32
    %78 = vector.broadcast %cst_40 : f32 to vector<128x128xf32>
    %79 = arith.mulf %77, %78 : vector<128x128xf32>
    %c0_41 = arith.constant 0 : index
    %c0_42 = arith.constant 0 : index
    %80 = vector.load %arg2[%c0_41, %c0_42] : memref<128x128xf32, #tpu.memory_space<vmem>>, vector<128x128xf32>
    %81 = arith.addf %79, %80 : vector<128x128xf32>
    %cst_43 = arith.constant dense<0xFF800000> : vector<128xf32>
    %82 = vector.multi_reduction <maximumf>, %81, %cst_43 [1] : vector<128x128xf32> to vector<128xf32>
    %83 = vector.shape_cast %82 : vector<128xf32> to vector<128x1xf32>
    %84 = vector.broadcast %83 : vector<128x1xf32> to vector<128x128xf32>
    %85 = arith.subf %81, %84 : vector<128x128xf32>
    %86 = math.exp %85 : vector<128x128xf32>
    %cst_44 = arith.constant dense<0.000000e+00> : vector<128xf32>
    %87 = vector.multi_reduction <add>, %86, %cst_44 [1] : vector<128x128xf32> to vector<128xf32>
    %88 = vector.shape_cast %87 : vector<128xf32> to vector<128x1xf32>
    %89 = tpu.reciprocal %88 {approx = true} : vector<128x1xf32> -> vector<128x1xf32>
    %90 = vector.broadcast %89 : vector<128x1xf32> to vector<128x128xf32>
    %91 = arith.mulf %86, %90 : vector<128x128xf32>
    %92 = arith.truncf %91 : vector<128x128xf32> to vector<128x128xbf16>
    %cst_45 = arith.constant dense<0.000000e+00> : vector<128x64xf32>
    %93 = tpu.matmul %92, %76, %cst_45 {dimension_numbers = #tpu.dot_dimension_numbers<[1], [0], [0], [1], [0, 0, 1, 1], [], []>} : vector<128x128xbf16>, vector<128x64xbf16>, vector<128x64xf32> -> vector<128x64xf32>
    %94 = arith.truncf %93 : vector<128x64xf32> to vector<128x64xbf16>
    %95 = tpu.concatenate %73, %94 in 1 : vector<128x64xbf16>, vector<128x64xbf16> -> vector<128x128xbf16>
    %c0_46 = arith.constant 0 : index
    %c0_47 = arith.constant 0 : index
    %96 = vector.load %arg10[%c0_46, %c0_47] : memref<128x128xbf16, #tpu.memory_space<vmem>>, vector<128x128xbf16>
    %cst_48 = arith.constant dense<0.000000e+00> : vector<128x128xf32>
    %97 = tpu.matmul %95, %96, %cst_48 {dimension_numbers = #tpu.dot_dimension_numbers<[1], [0], [0], [1], [0, 0, 1, 1], [], []>} : vector<128x128xbf16>, vector<128x128xbf16>, vector<128x128xf32> -> vector<128x128xf32>
    %c0_49 = arith.constant 0 : index
    %c0_50 = arith.constant 0 : index
    %98 = vector.load %arg11[%c0_49, %c0_50] : memref<1x128xf32, #tpu.memory_space<vmem>>, vector<1x128xf32>
    %99 = vector.broadcast %98 : vector<1x128xf32> to vector<128x128xf32>
    %100 = arith.addf %97, %99 : vector<128x128xf32>
    %c0_51 = arith.constant 0 : index
    %c0_52 = arith.constant 0 : index
    %101 = vector.load %arg21[%c0_51, %c0_52] : memref<128x128xf32, #tpu.memory_space<vmem>>, vector<128x128xf32>
    %102 = arith.addf %101, %100 : vector<128x128xf32>
    %c0_53 = arith.constant 0 : index
    %c0_54 = arith.constant 0 : index
    %103 = vector.load %arg21[%c0_53, %c0_54] : memref<128x128xf32, #tpu.memory_space<vmem>>, vector<128x128xf32>
    tpu.vector_store %arg21[%c0_53, %c0_54], %102 {strides = array<i32>} : memref<128x128xf32, #tpu.memory_space<vmem>>, vector<128x128xf32>,
    %c0_55 = arith.constant 0 : index
    %c0_56 = arith.constant 0 : index
    %104 = vector.load %arg12[%c0_55, %c0_56] : memref<1x128xf32, #tpu.memory_space<vmem>>, vector<1x128xf32>
    %c0_57 = arith.constant 0 : index
    %c0_58 = arith.constant 0 : index
    %105 = vector.load %arg13[%c0_57, %c0_58] : memref<1x128xf32, #tpu.memory_space<vmem>>, vector<1x128xf32>
    %cst_59 = arith.constant dense<0.000000e+00> : vector<128xf32>
    %106 = vector.multi_reduction <add>, %102, %cst_59 [1] : vector<128x128xf32> to vector<128xf32>
    %107 = vector.shape_cast %106 : vector<128xf32> to vector<128x1xf32>
    %cst_60 = arith.constant 1.280000e+02 : f32
    %108 = vector.broadcast %cst_60 : f32 to vector<128x1xf32>
    %109 = arith.divf %107, %108 : vector<128x1xf32>
    %110 = arith.mulf %102, %102 : vector<128x128xf32>
    %cst_61 = arith.constant dense<0.000000e+00> : vector<128xf32>
    %111 = vector.multi_reduction <add>, %110, %cst_61 [1] : vector<128x128xf32> to vector<128xf32>
    %112 = vector.shape_cast %111 : vector<128xf32> to vector<128x1xf32>
    %cst_62 = arith.constant 1.280000e+02 : f32
    %113 = vector.broadcast %cst_62 : f32 to vector<128x1xf32>
    %114 = arith.divf %112, %113 : vector<128x1xf32>
    %115 = arith.mulf %109, %109 : vector<128x1xf32>
    %116 = arith.subf %114, %115 : vector<128x1xf32>
    %117 = vector.broadcast %109 : vector<128x1xf32> to vector<128x128xf32>
    %118 = arith.subf %102, %117 : vector<128x128xf32>
    %cst_63 = arith.constant 9.99999997E-7 : f32
    %119 = vector.broadcast %cst_63 : f32 to vector<128x1xf32>
    %120 = arith.addf %116, %119 : vector<128x1xf32>
    %121 = math.rsqrt %120 : vector<128x1xf32>
    %122 = vector.broadcast %121 : vector<128x1xf32> to vector<128x128xf32>
    %123 = arith.mulf %118, %122 : vector<128x128xf32>
    %124 = vector.broadcast %104 : vector<1x128xf32> to vector<128x128xf32>
    %125 = arith.mulf %123, %124 : vector<128x128xf32>
    %126 = vector.broadcast %105 : vector<1x128xf32> to vector<128x128xf32>
    %127 = arith.addf %125, %126 : vector<128x128xf32>
    %128 = arith.truncf %127 : vector<128x128xf32> to vector<128x128xbf16>
    %c0_64 = arith.constant 0 : index
    %c0_65 = arith.constant 0 : index
    %129 = vector.load %arg14[%c0_64, %c0_65] : memref<128x256xbf16, #tpu.memory_space<vmem>>, vector<128x256xbf16>
    %cst_66 = arith.constant dense<0.000000e+00> : vector<128x256xf32>
    %130 = tpu.matmul %128, %129, %cst_66 {dimension_numbers = #tpu.dot_dimension_numbers<[1], [0], [0], [1], [0, 0, 1, 1], [], []>} : vector<128x128xbf16>, vector<128x256xbf16>, vector<128x256xf32> -> vector<128x256xf32>
    %c0_67 = arith.constant 0 : index
    %c0_68 = arith.constant 0 : index
    %131 = vector.load %arg15[%c0_67, %c0_68] : memref<1x256xf32, #tpu.memory_space<vmem>>, vector<1x256xf32>
    %132 = vector.broadcast %131 : vector<1x256xf32> to vector<128x256xf32>
    %133 = arith.addf %130, %132 : vector<128x256xf32>
    %cst_69 = arith.constant 5.000000e-01 : f32
    %134 = vector.broadcast %cst_69 : f32 to vector<128x256xf32>
    %135 = arith.mulf %134, %133 : vector<128x256xf32>
    %cst_70 = arith.constant 0.707106769 : f32
    %136 = vector.broadcast %cst_70 : f32 to vector<128x256xf32>
    %137 = arith.mulf %133, %136 : vector<128x256xf32>
    %138 = math.erf %137 : vector<128x256xf32>
    %cst_71 = arith.constant 1.000000e+00 : f32
    %139 = vector.broadcast %cst_71 : f32 to vector<128x256xf32>
    %140 = arith.addf %139, %138 : vector<128x256xf32>
    %141 = arith.mulf %135, %140 : vector<128x256xf32>
    %142 = arith.truncf %141 : vector<128x256xf32> to vector<128x256xbf16>
    %c0_72 = arith.constant 0 : index
    %c0_73 = arith.constant 0 : index
    %143 = vector.load %arg16[%c0_72, %c0_73] : memref<256x128xbf16, #tpu.memory_space<vmem>>, vector<256x128xbf16>
    %cst_74 = arith.constant dense<0.000000e+00> : vector<128x128xf32>
    %144 = tpu.matmul %142, %143, %cst_74 {dimension_numbers = #tpu.dot_dimension_numbers<[1], [0], [0], [1], [0, 0, 1, 1], [], []>} : vector<128x256xbf16>, vector<256x128xbf16>, vector<128x128xf32> -> vector<128x128xf32>
    %c0_75 = arith.constant 0 : index
    %c0_76 = arith.constant 0 : index
    %145 = vector.load %arg17[%c0_75, %c0_76] : memref<1x128xf32, #tpu.memory_space<vmem>>, vector<1x128xf32>
    %146 = vector.broadcast %145 : vector<1x128xf32> to vector<128x128xf32>
    %147 = arith.addf %144, %146 : vector<128x128xf32>
    %c0_77 = arith.constant 0 : index
    %c0_78 = arith.constant 0 : index
    %148 = vector.load %arg21[%c0_77, %c0_78] : memref<128x128xf32, #tpu.memory_space<vmem>>, vector<128x128xf32>
    %149 = arith.addf %148, %147 : vector<128x128xf32>
    %c0_79 = arith.constant 0 : index
    %c0_80 = arith.constant 0 : index
    %150 = vector.load %arg18[%c0_79, %c0_80] : memref<1x128xf32, #tpu.memory_space<vmem>>, vector<1x128xf32>
    %c0_81 = arith.constant 0 : index
    %c0_82 = arith.constant 0 : index
    %151 = vector.load %arg19[%c0_81, %c0_82] : memref<1x128xf32, #tpu.memory_space<vmem>>, vector<1x128xf32>
    %cst_83 = arith.constant dense<0.000000e+00> : vector<128xf32>
    %152 = vector.multi_reduction <add>, %149, %cst_83 [1] : vector<128x128xf32> to vector<128xf32>
    %153 = vector.shape_cast %152 : vector<128xf32> to vector<128x1xf32>
    %cst_84 = arith.constant 1.280000e+02 : f32
    %154 = vector.broadcast %cst_84 : f32 to vector<128x1xf32>
    %155 = arith.divf %153, %154 : vector<128x1xf32>
    %156 = arith.mulf %149, %149 : vector<128x128xf32>
    %cst_85 = arith.constant dense<0.000000e+00> : vector<128xf32>
    %157 = vector.multi_reduction <add>, %156, %cst_85 [1] : vector<128x128xf32> to vector<128xf32>
    %158 = vector.shape_cast %157 : vector<128xf32> to vector<128x1xf32>
    %cst_86 = arith.constant 1.280000e+02 : f32
    %159 = vector.broadcast %cst_86 : f32 to vector<128x1xf32>
    %160 = arith.divf %158, %159 : vector<128x1xf32>
    %161 = arith.mulf %155, %155 : vector<128x1xf32>
    %162 = arith.subf %160, %161 : vector<128x1xf32>
    %163 = vector.broadcast %155 : vector<128x1xf32> to vector<128x128xf32>
    %164 = arith.subf %149, %163 : vector<128x128xf32>
    %cst_87 = arith.constant 9.99999997E-7 : f32
    %165 = vector.broadcast %cst_87 : f32 to vector<128x1xf32>
    %166 = arith.addf %162, %165 : vector<128x1xf32>
    %167 = math.rsqrt %166 : vector<128x1xf32>
    %168 = vector.broadcast %167 : vector<128x1xf32> to vector<128x128xf32>
    %169 = arith.mulf %164, %168 : vector<128x128xf32>
    %170 = vector.broadcast %150 : vector<1x128xf32> to vector<128x128xf32>
    %171 = arith.mulf %169, %170 : vector<128x128xf32>
    %172 = vector.broadcast %151 : vector<1x128xf32> to vector<128x128xf32>
    %173 = arith.addf %171, %172 : vector<128x128xf32>
    %174 = vector.shape_cast %173 : vector<128x128xf32> to vector<8x16x128xf32>
    %cst_88 = arith.constant dense<0.000000e+00> : vector<8x128xf32>
    %175 = vector.multi_reduction <add>, %174, %cst_88 [1] : vector<8x16x128xf32> to vector<8x128xf32>
    %cst_89 = arith.constant 1.600000e+01 : f32
    %176 = vector.broadcast %cst_89 : f32 to vector<8x128xf32>
    %177 = arith.divf %175, %176 : vector<8x128xf32>
    %c0_90 = arith.constant 0 : index
    %c0_91 = arith.constant 0 : index
    %178 = vector.load %arg20[%c0_90, %c0_91] : memref<8x128xf32, #tpu.memory_space<vmem>>, vector<8x128xf32>
    tpu.vector_store %arg20[%c0_90, %c0_91], %177 {strides = array<i32>} : memref<8x128xf32, #tpu.memory_space<vmem>>, vector<8x128xf32>,
    return
  }
  func.func @transform_0(%arg0: i32) -> (i32, i32, i32) {
    %c0_i32 = arith.constant 0 : i32
    %c0_i32_0 = arith.constant 0 : i32
    %c0_i32_1 = arith.constant 0 : i32
    return %arg0, %c0_i32, %c0_i32_0 : i32, i32, i32
  }
  func.func @transform_1(%arg0: i32) -> (i32, i32) {
    %c0_i32 = arith.constant 0 : i32
    %c0_i32_0 = arith.constant 0 : i32
    %c0_i32_1 = arith.constant 0 : i32
    return %c0_i32, %c0_i32_0 : i32, i32
  }
  func.func @transform_2(%arg0: i32) -> (i32, i32) {
    %c0_i32 = arith.constant 0 : i32
    %c0_i32_0 = arith.constant 0 : i32
    %c0_i32_1 = arith.constant 0 : i32
    return %c0_i32, %c0_i32_0 : i32, i32
  }
  func.func @transform_3(%arg0: i32) -> (i32, i32) {
    %c0_i32 = arith.constant 0 : i32
    %c0_i32_0 = arith.constant 0 : i32
    %c0_i32_1 = arith.constant 0 : i32
    return %c0_i32, %c0_i32_0 : i32, i32
  }
  func.func @transform_4(%arg0: i32) -> (i32, i32) {
    %c0_i32 = arith.constant 0 : i32
    %c0_i32_0 = arith.constant 0 : i32
    %c0_i32_1 = arith.constant 0 : i32
    return %c0_i32, %c0_i32_0 : i32, i32
  }
  func.func @transform_5(%arg0: i32) -> (i32, i32) {
    %c0_i32 = arith.constant 0 : i32
    %c0_i32_0 = arith.constant 0 : i32
    %c0_i32_1 = arith.constant 0 : i32
    return %c0_i32, %c0_i32_0 : i32, i32
  }
  func.func @transform_6(%arg0: i32) -> (i32, i32) {
    %c0_i32 = arith.constant 0 : i32
    %c0_i32_0 = arith.constant 0 : i32
    %c0_i32_1 = arith.constant 0 : i32
    return %c0_i32, %c0_i32_0 : i32, i32
  }
  func.func @transform_7(%arg0: i32) -> (i32, i32) {
    %c0_i32 = arith.constant 0 : i32
    %c0_i32_0 = arith.constant 0 : i32
    %c0_i32_1 = arith.constant 0 : i32
    return %c0_i32, %c0_i32_0 : i32, i32
  }
  func.func @transform_8(%arg0: i32) -> (i32, i32) {
    %c0_i32 = arith.constant 0 : i32
    %c0_i32_0 = arith.constant 0 : i32
    %c0_i32_1 = arith.constant 0 : i32
    return %c0_i32, %c0_i32_0 : i32, i32
  }
  func.func @transform_9(%arg0: i32) -> (i32, i32) {
    %c0_i32 = arith.constant 0 : i32
    %c0_i32_0 = arith.constant 0 : i32
    %c0_i32_1 = arith.constant 0 : i32
    return %c0_i32, %c0_i32_0 : i32, i32
  }
  func.func @transform_10(%arg0: i32) -> (i32, i32) {
    %c0_i32 = arith.constant 0 : i32
    %c0_i32_0 = arith.constant 0 : i32
    %c0_i32_1 = arith.constant 0 : i32
    return %c0_i32, %c0_i32_0 : i32, i32
  }
  func.func @transform_11(%arg0: i32) -> (i32, i32) {
    %c0_i32 = arith.constant 0 : i32
    %c0_i32_0 = arith.constant 0 : i32
    %c0_i32_1 = arith.constant 0 : i32
    return %c0_i32, %c0_i32_0 : i32, i32
  }
  func.func @transform_12(%arg0: i32) -> (i32, i32) {
    %c0_i32 = arith.constant 0 : i32
    %c0_i32_0 = arith.constant 0 : i32
    %c0_i32_1 = arith.constant 0 : i32
    return %c0_i32, %c0_i32_0 : i32, i32
  }
  func.func @transform_13(%arg0: i32) -> (i32, i32) {
    %c0_i32 = arith.constant 0 : i32
    %c0_i32_0 = arith.constant 0 : i32
    %c0_i32_1 = arith.constant 0 : i32
    return %c0_i32, %c0_i32_0 : i32, i32
  }
  func.func @transform_14(%arg0: i32) -> (i32, i32) {
    %c0_i32 = arith.constant 0 : i32
    %c0_i32_0 = arith.constant 0 : i32
    %c0_i32_1 = arith.constant 0 : i32
    return %c0_i32, %c0_i32_0 : i32, i32
  }
  func.func @transform_15(%arg0: i32) -> (i32, i32) {
    %c0_i32 = arith.constant 0 : i32
    %c0_i32_0 = arith.constant 0 : i32
    %c0_i32_1 = arith.constant 0 : i32
    return %c0_i32, %c0_i32_0 : i32, i32
  }
  func.func @transform_16(%arg0: i32) -> (i32, i32) {
    %c0_i32 = arith.constant 0 : i32
    %c0_i32_0 = arith.constant 0 : i32
    %c0_i32_1 = arith.constant 0 : i32
    return %c0_i32, %c0_i32_0 : i32, i32
  }
  func.func @transform_17(%arg0: i32) -> (i32, i32) {
    %c0_i32 = arith.constant 0 : i32
    %c0_i32_0 = arith.constant 0 : i32
    %c0_i32_1 = arith.constant 0 : i32
    return %c0_i32, %c0_i32_0 : i32, i32
  }
  func.func @transform_18(%arg0: i32) -> (i32, i32) {
    %c0_i32 = arith.constant 0 : i32
    %c0_i32_0 = arith.constant 0 : i32
    %c0_i32_1 = arith.constant 0 : i32
    return %c0_i32, %c0_i32_0 : i32, i32
  }
  func.func @transform_19(%arg0: i32) -> (i32, i32) {
    %c0_i32 = arith.constant 0 : i32
    %c0_i32_0 = arith.constant 0 : i32
    return %arg0, %c0_i32 : i32, i32
  }
}

</mosaic_0001>

<bundles_post_ra>
// kernel: tpu_custom_call.1
= control target key start
LH: loop header
LB: loop body
LE: loop exit
PB: predicated region body
PF: predicated region fallthrough
CT: control target
= control target key end

     0   :  { %s11226_s0 = inlined_call_operand.hbm [shape: bf16[16,16,256], index: 0, kind: input, shape index: {}]   ;;  %s11227_s1 = inlined_call_operand.hbm [shape: f32[128,128], index: 1, kind: input, shape index: {}]   ;;  %s11228_s2 = inlined_call_operand.hbm [shape: bf16[256,128], index: 2, kind: input, shape index: {}]   ;;  %s11229_s3 = inlined_call_operand.hbm [shape: f32[1,128], index: 3, kind: input, shape index: {}]   ;;  %s11230_s4 = inlined_call_operand.hbm [shape: f32[128,128], index: 4, kind: input, shape index: {}]   ;;  %s11231_s5 = inlined_call_operand.hbm [shape: f32[1,128], index: 5, kind: input, shape index: {}]   ;;  %s11232_s6 = inlined_call_operand.hbm [shape: f32[1,128], index: 6, kind: input, shape index: {}]   ;;  %s11233_s7 = inlined_call_operand.hbm [shape: bf16[128,384], index: 7, kind: input, shape index: {}]   ;;  %s11234_s8 = inlined_call_operand.vmem [shape: f32[1,384], index: 8, kind: input, shape index: {}]   ;;  %s11235_s9 = inlined_call_operand.hbm [shape: bf16[128,128], index: 9, kind: input, shape index: {}]   ;;  %s11236_s10 = inlined_call_operand.vmem [shape: f32[1,128], index: 10, kind: input, shape index: {}]   ;;  %s11237_s11 = inlined_call_operand.vmem [shape: f32[1,128], index: 11, kind: input, shape index: {}]   ;;  %s11238_s12 = inlined_call_operand.vmem [shape: f32[1,128], index: 12, kind: input, shape index: {}]   ;;  %s11239_s13 = inlined_call_operand.hbm [shape: bf16[128,256], index: 13, kind: input, shape index: {}]   ;;  %s11240_s14 = inlined_call_operand.vmem [shape: f32[1,256], index: 14, kind: input, shape index: {}]   ;;  %s11241_s15 = inlined_call_operand.hbm [shape: bf16[256,128], index: 15, kind: input, shape index: {}]   ;;  %s11242_s16 = inlined_call_operand.vmem [shape: f32[1,128], index: 16, kind: input, shape index: {}]   ;;  %s11243_s17 = inlined_call_operand.vmem [shape: f32[1,128], index: 17, kind: input, shape index: {}]   ;;  %s11244_s18 = inlined_call_operand.vmem [shape: f32[1,128], index: 18, kind: input, shape index: {}]   ;;  %s11245_s19 = inlined_call_operand.hbm [shape: f32[16,128], index: 19, kind: output, shape index: {}]  }
   0x1   :  { %11276 = sst [smem:[#allocation42_spill]] %s11226_s0 }
   0x2   :  { %11277 = sst [smem:[#allocation43_spill]] %s11227_s1 }
   0x3   :  { %11278 = sst [smem:[#allocation44_spill]] %s11228_s2 }
   0x4   :  { %11279 = sst [smem:[#allocation45_spill]] %s11229_s3 }
   0x5   :  { %11280 = sst [smem:[#allocation46_spill]] %s11230_s4 }
   0x6   :  { %11281 = sst [smem:[#allocation47_spill]] %s11231_s5 }
   0x7   :  { %11282 = sst [smem:[#allocation48_spill]] %s11232_s6 }
   0x8   :  { %11283 = sst [smem:[#allocation49_spill]] %s11233_s7 }
   0x9   :  { %11284 = sst [smem:[#allocation50_spill]] %s11235_s9 }
   0xa   :  { %11285 = sst [smem:[#allocation51_spill]] %s11238_s12 }
   0xb   :  { %11286 = sst [smem:[#allocation52_spill]] %s11239_s13 }
   0xc   :  { %11287 = sst [smem:[#allocation53_spill]] %s11240_s14 }
   0xd   :  { %11288 = sst [smem:[#allocation54_spill]] %s11241_s15 }
   0xe   :  { %11289 = sst [smem:[#allocation55_spill]] %s11242_s16 }
   0xf   :  { %11290 = sst [smem:[#allocation56_spill]] %s11243_s17 }
  0x10   :  { %11291 = sst [smem:[#allocation57_spill]] %s11244_s18 }
  0x11   :  { %11292 = sst [smem:[#allocation58_spill]] %s11245_s19 }
  0x12   :  { %24 = vsyncpa [#allocation4], 0 }
  0x13   :  { %26 = vsyncpa [#allocation4 + $0x1], 0 }
  0x14   :  { %27 = vsyncpa [#allocation7], 0 }
  0x15   :  { %28 = vsyncpa [#allocation10], 0 }
  0x16   :  { %29 = vsyncpa [#allocation13], 0 }
  0x17   :  { %30 = vsyncpa [#allocation16], 0 }
  0x18   :  { %31 = vsyncpa [#allocation19], 0 }
  0x19   :  { %32 = vsyncpa [#allocation5], 0 }
  0x1a   :  { %34 = vsyncpa [#allocation5 + $0x1], 0  ;;  %s7684_s0 = smov 0   ;;  %s7686_s30 = smov 0  }
  0x1b   :  { %s7688_s20 = smov 0   ;;  %s7690_s21 = smov 0  }
  0x1c LB: > { %s11293_s2 = sld [smem:[#allocation43_spill]]  ;;  %s7708_s24 = sadd.s32 4294967295, %s7563_s21   ;;  %s7563_s21 = sphi %s7690_s21, %s11463_s21   ;;  %s7559_s20 = sphi %s7688_s20, %s11462_s20   ;;  %s7555_s30 = sphi %s7686_s30, %s11461_s30   ;;  %s7551_s0 = sphi %s7684_s0, %s11460_s0  }
  0x1d   : > { %p6105_p0 = scmp.ge.s32.totalorder %s7563_s21, 1  ;;  %p61_p1 = scmp.eq.s32.totalorder %s7708_s24, 0 }
  0x1e   : > { %p475_p2 = scmp.lt.s32.totalorder %s7563_s21, 3  ;;  %s7565_s3 = smov [#allocation6]  }
  0x1f   : > { %s488_s26 = sshll.u32 %s7565_s3, 4  ;;  %s11295_s29 = sld [smem:[#allocation45_spill]]  ;;  %s489_s26 = int_to_ptr.vmem [resolvable:$true] %s488_s26 }
  0x20   : > { %p7713_p3 = pnand %p6105_p0, %p475_p2  ;;  %s11297_s5 = sld [smem:[#allocation47_spill]] }
  0x21   : > { %s7566_s18 = smov [#allocation9]   ;;  %s11250_s16 = smov 128  }
  0x22   : > { %s486_s23 = sshll.u32 %s11293_s2, 4  ;;  %p6728_p4 = pneg %p7713_p3  ;;  %s487_s23 = int_to_ptr.hbm [resolvable:$true] %s486_s23 }
  0x23   : > { %s517_s17 = sshll.u32 %s7566_s18, 4  ;;  %s11252_s14 = smov 8   ;;  %s518_s17 = int_to_ptr.vmem [resolvable:$true] %s517_s17 }
  0x24   : > { %p7725_p6 = pnand %p6728_p4, %p61_p1  ;;  %s11298_s7 = sld [smem:[#allocation49_spill]] }
  0x25   : > { %s515_s1 = sshll.u32 %s11295_s29, 4  ;;  %s7569_s19 = smov [#allocation12]   ;;  %s516_s1 = int_to_ptr.hbm [resolvable:$true] %s515_s1 }
  0x26   : > { %s541_s3 = sshll.u32 %s11297_s5, 4  ;;  %s543_s2 = sshll.u32 %s7569_s19, 4  ;;  %s542_s3 = int_to_ptr.hbm [resolvable:$true] %s541_s3  ;;  %s544_s2 = int_to_ptr.vmem [resolvable:$true] %s543_s2 }
  0x27   : > { %6731 = dma.hbm_to_vmem [thread:$0]  (!%p7725_p6), %s487_s23, 2048, %s489_s26, [#allocation7], %s11250_s16, %s11250_s16, %s11252_s14  }
  0x28   : > { %6737 = dma.hbm_to_vmem [thread:$0]  (!%p7725_p6), %s516_s1, 16, %s518_s17, [#allocation10]  }
  0x29   : > { %6743 = dma.hbm_to_vmem [thread:$0]  (!%p7725_p6), %s542_s3, 16, %s544_s2, [#allocation13]  }
  0x2a   : > { %s564_s29 = sshll.u32 %s11298_s7, 4  ;;  %s7570_s18 = smov [#allocation15]   ;;  %s565_s29 = int_to_ptr.hbm [resolvable:$true] %s564_s29 }
  0x2b   : > { %s566_s5 = sshll.u32 %s7570_s18, 4  ;;  %s7571_s12 = smov 192   ;;  %s567_s5 = int_to_ptr.vmem [resolvable:$true] %s566_s5 }
  0x2c   : > { %s7572_s23 = smov 12   ;;  %s11299_s13 = sld [smem:[#allocation52_spill]] }
  0x2d   : > { %6749 = dma.hbm_to_vmem [thread:$0]  (!%p7725_p6), %s565_s29, 3072, %s567_s5, [#allocation16], %s7571_s12, %s7571_s12, %s7572_s23  }
  0x2e   : > { %s7573_s27 = smov [#allocation18]   ;;  %s11300_s14 = sld [smem:[#allocation44_spill]] }
  0x2f   : > { %s606_s28 = sshll.u32 %s7573_s27, 4  ;;  %s11301_s2 = smov 8   ;;  %s607_s28 = int_to_ptr.vmem [resolvable:$true] %s606_s28 }
  0x30   : > { %s11302_s18 = smov 128   ;;  %s7574_s5 = smov [#allocation8]  }
  0x31   : > { %s502_s12 = sshll.u32 %s7574_s5, 4  ;;  %s7575_s29 = smov 64   ;;  %s503_s12 = int_to_ptr.vmem [resolvable:$true] %s502_s12 }
  0x32   : > { %s604_s1 = sshll.u32 %s11299_s13, 4  ;;  %s7576_s23 = smov 4   ;;  %s605_s1 = int_to_ptr.hbm [resolvable:$true] %s604_s1 }
  0x33   : > { %6755 = dma.hbm_to_vmem [thread:$0]  (!%p7725_p6), %s605_s1, 2048, %s607_s28, [#allocation19], %s11302_s18, %s11302_s18, %s11301_s2  }
  0x34   : > { %s500_s3 = sshll.u32 %s11300_s14, 4  ;;  %s11303_s4 = sld [smem:[#allocation46_spill]]  ;;  %s501_s3 = int_to_ptr.hbm [resolvable:$true] %s500_s3 }
  0x35   : > { %6734 = dma.hbm_to_vmem [thread:$0]  (!%p7725_p6), %s501_s3, 2048, %s503_s12, [#allocation7], %s7575_s29, %s7575_s29, %s7576_s23  }
  0x36   : > { %s7577_s14 = smov [#allocation11]   ;;  %s11304_s6 = sld [smem:[#allocation48_spill]] }
  0x37   : > { %s528_s27 = sshll.u32 %s7577_s14, 4  ;;  %s7578_s3 = smov [#allocation14]   ;;  %s529_s27 = int_to_ptr.vmem [resolvable:$true] %s528_s27 }
  0x38   : > { %s555_s5 = sshll.u32 %s7578_s3, 4  ;;  %s11305_s9 = sld [smem:[#allocation50_spill]]  ;;  %s556_s5 = int_to_ptr.vmem [resolvable:$true] %s555_s5 }
  0x39   : > { %s11306_s15 = sld [smem:[#allocation54_spill]]  ;;  %s7580_s3 = smov [#allocation20]  }
  0x3a   : > { %s526_s16 = sshll.u32 %s11303_s4, 4  ;;  %s7784_s12 = sadd.s32 1, %s7563_s21   ;;  %s527_s16 = int_to_ptr.hbm [resolvable:$true] %s526_s16 }
  0x3b   : > { %6740 = dma.hbm_to_vmem [thread:$0]  (!%p7725_p6), %s527_s16, 2048, %s529_s27, [#allocation10], %s11302_s18, %s11302_s18, %s11301_s2  }
  0x3c   : > { %s553_s28 = sshll.u32 %s11304_s6, 4  ;;  %s7579_s27 = smov [#allocation17]   ;;  %s554_s28 = int_to_ptr.hbm [resolvable:$true] %s553_s28 }
  0x3d   : > { %6746 = dma.hbm_to_vmem [thread:$0]  (!%p7725_p6), %s554_s28, 16, %s556_s5, [#allocation13]  }
  0x3e   : > { %s581_s26 = sshll.u32 %s11305_s9, 4  ;;  %s583_s1 = sshll.u32 %s7579_s27, 4  ;;  %s582_s26 = int_to_ptr.hbm [resolvable:$true] %s581_s26  ;;  %s584_s1 = int_to_ptr.vmem [resolvable:$true] %s583_s1 }
  0x3f   : > { %s621_s16 = sshll.u32 %s11306_s15, 4  ;;  %s623_s28 = sshll.u32 %s7580_s3, 4  ;;  %s622_s16 = int_to_ptr.hbm [resolvable:$true] %s621_s16  ;;  %s624_s28 = int_to_ptr.vmem [resolvable:$true] %s623_s28 }
  0x40   : > { %6752 = dma.hbm_to_vmem [thread:$0]  (!%p7725_p6), %s582_s26, 1024, %s584_s1, [#allocation16], %s7575_s29, %s7575_s29, %s7576_s23  }
  0x41   : > { %6758 = dma.hbm_to_vmem [thread:$0]  (!%p7725_p6), %s622_s16, 2048, %s624_s28, [#allocation19], %s7575_s29, %s7575_s29, %s7576_s23  }
  0x42   : > { %s6104_s5 = sadd.s32 4294967294, %s7563_s21   ;;  %s44_s17 = ssub.s32 %s7563_s21, %s7784_s12 }
  0x43   : > { %s47_s14 = sadd.s32 1, %s7559_s20  ;;  %p45_p7 = scmp.eq.s32.totalorder %s44_s17, 0 }
  0x44   : > { %p54_p8 = scmp.ne.s32.totalorder %s7559_s20, %s7555_s30  ;;  %p55_p9 = scmp.eq.s32.totalorder %s7563_s21, 0 }
  0x45   : > { %p60_p10 = scmp.ne.s32.totalorder %s7555_s30, %s7551_s0  ;;  %p462_p13 = scmp.eq.s32.totalorder %s7708_s24, 1 }
  0x46   : > { %s7795_s26 = scalar_select %p45_p7, %s7559_s20, %s47_s14  }
  0x47   : > { %p7797_p11 = por %p55_p9, %p54_p8  ;;  %p7803_p12 = por %p61_p1, %p60_p10 }
  0x48   : > { %p468_p0 = scmp.eq.s32.totalorder %s6104_s5, 1  ;;  %p6777_p2 = scmp.lt.s32.totalorder %s7563_s21, 2 }
  0x49   : > { %s646_s29 = sand.u32 1, %s7559_s20   ;;  %p7810_p4 = por %p462_p13, %p54_p8 }
  0x4a   : > { %p7814_p6 = por %p468_p0, %p60_p10  ;;  %s6117_s27 = sshll.u32 %s646_s29, 7 }
  0x4b   : > { %s6571_s1 = sshll.u32 %s7563_s21, 7  ;;  %s11311_s17 = sld [smem:[#allocation42_spill]] }
  0x4c   : > { %s650_s4 = scalar_lea.vmem [#allocation3], %s6117_s27  ;;  %p7824_p7 = pnand %p6777_p2, %p7797_p11 }
  0x4d   : > { %s659_s6 = sshll.u32 %s650_s4, 4  ;;  %s647_s9 = scalar_lea.sflag [#allocation4], %s646_s29  ;;  %s660_s6 = int_to_ptr.vmem [resolvable:$true] %s659_s6 }
  0x4e   : > { %p7451_p9 = pneg %p7824_p7 }
  0x51   : > { %s656_s14 = scalar_lea.hbm %s11311_s17, %s6571_s1  ;;  %s7454_s1 = scalar_lea.hbm %s11311_s17, 256 }
  0x52   : > { %s657_s7 = sshll.u32 %s656_s14, 4  ;;  %s658_s7 = int_to_ptr.hbm [resolvable:$true] %s657_s7 }
  0x53   : > { %s7447_s13 = sshra.s32 %s658_s7, 4  ;;  %s7448_s13 = int_to_ptr.hbm [resolvable:$true] %s7447_s13 }
  0x54   : > { %s7449_s15 = scalar_lea.hbm %s7448_s13, 128  ;;  %p7455_p11 = scmp.lt.s32.totalorder %s7448_s13, %s11311_s17 }
  0x55   : > { %p7450_p8 = scmp.ne.s32.totalorder %s7448_s13, %s7449_s15  ;;  %p7456_p0 = scmp.lt.s32.totalorder %s7454_s1, %s7449_s15 }
  0x57   : > { %p7452_p10 = pnand %p7451_p9, %p7450_p8  ;;  %p7457_p2 = por %p7456_p0, %p7455_p11 }
  0x59   : > { %p7453_p13 = pneg %p7452_p10 }
  0x5b   : > { %p7458_p5 = pnand %p7457_p2, %p7453_p13 }
  0x5d   : > { %7461 = shalt.err (!%p7458_p5)
}
  0x5e   : > { %6762 = dma.hbm_to_vmem [thread:$0]  (!%p7824_p7), %s658_s7, 2048, %s660_s6, %s647_s9, %s11302_s18, %s11302_s18, %s11301_s2  }
  0x5f   : > { %671 = sbr.rel (%p7713_p3) target bundleno = 2633 (0xa49), region = 96 }
  0x64   : > { %s7844_s29 = sand.u32 1, %s7555_s30  }
  0x65   : > { %s6122_s13 = sshll.u32 %s7844_s29, 7  ;;  %s674_s15 = scalar_lea.sflag [#allocation4], %s7844_s29 }
  0x66   : > { %s7848_s28 = scalar_lea.vmem [#allocation3], %s6122_s13 }
  0x67   : > { %7522 = dma.done.wait (%p7803_p12), %s674_s15, 2048  }
  0x68   : > { %7524 = vsyncadd (%p7803_p12), %s674_s15, 4294965248 }
  0x69   : > { %7526 = dma.done.wait (%p61_p1), [#allocation7], 4096  }
  0x6a   : > { %7528 = vsyncadd (%p61_p1), [#allocation7], 4294963200 }
  0x6b   : > { %7530 = dma.done.wait (%p61_p1), [#allocation10], 2064  }
  0x6c   : > { %7532 = vsyncadd (%p61_p1), [#allocation10], 4294965232 }
  0x6d   : > { %7534 = dma.done.wait (%p61_p1), [#allocation13], 32  }
  0x6e   : > { %7536 = vsyncadd (%p61_p1), [#allocation13], 4294967264 }
  0x6f   : > { %7538 = dma.done.wait (%p61_p1), [#allocation16], 4096  }
  0x70   : > { %7540 = vsyncadd (%p61_p1), [#allocation16], 4294963200 }
  0x71   : > { %7542 = dma.done.wait (%p61_p1), [#allocation19], 4096  }
  0x72   : > { %7544 = vsyncadd (%p61_p1), [#allocation19], 4294963200  ;;  %v6595_v0 = vld [vmem:[#allocation8 + $0x38] sm:$0xff]  ;;  %v6594_v2 = vld [vmem:[#allocation8 + $0x30] sm:$0xff]  ;;  %s7582_s2 = smov 64   ;;  %s11347_s19 = sld [smem:[#allocation51_spill]] }
  0x73   : > { %v6603_v1 = vld [vmem:[#allocation8 + $0x78] sm:$0xff]  ;;  %1012 = vmatpush.bf16.msra.mxu0 %v6595_v0  ;;  %v6602_v3 = vld [vmem:[#allocation8 + $0x70] sm:$0xff]  ;;  %6668 = vmatpush.bf16.msra.mxu2 %v6595_v0  ;;  %v6593_v4 = vld [vmem:[#allocation8 + $0x28] sm:$0xff]  ;;  %s11423_s22 = sld [smem:[#allocation55_spill]]  ;;  %s6567_s6 = sshll.u32 %s7708_s24, 3 }
  0x74   : > { %1061 = vmatpush.bf16.msra.mxu1 %v6603_v1  ;;  %6676 = vmatpush.bf16.msra.mxu3 %v6603_v1  ;;  %v6601_v5 = vld [vmem:[#allocation8 + $0x68] sm:$0xff]  ;;  %v6592_v6 = vld [vmem:[#allocation8 + $0x20] sm:$0xff]  ;;  %v6591_v8 = vld [vmem:[#allocation8 + $0x18] sm:$0xff]  ;;  %s11440_s27 = sld [smem:[#allocation56_spill]]  ;;  %s5924_s5 = scalar_lea.sflag [#allocation5], %s7844_s29 }
  0x75   : > { %v6600_v7 = vld [vmem:[#allocation8 + $0x60] sm:$0xff]  ;;  %v6599_v9 = vld [vmem:[#allocation8 + $0x58] sm:$0xff]  ;;  %v6590_v10 = vld [vmem:[#allocation8 + $0x10] sm:$0xff]  ;;  %s11441_s3 = sld [smem:[#allocation57_spill]] }
  0x76   : > { %v6598_v11 = vld [vmem:[#allocation8 + $0x50] sm:$0xff]  ;;  %v6589_v12 = vld [vmem:[#allocation8 + $0x8] sm:$0xff]  ;;  %v6588_v14 = vld [vmem:[#allocation8] sm:$0xff]  ;;  %s11457_s25 = sld [smem:[#allocation58_spill]] }
  0x77   : > { %1013 = vmatpush.bf16.msra.mxu0 %v6594_v2  ;;  %6669 = vmatpush.bf16.msra.mxu2 %v6594_v2  ;;  %v6597_v13 = vld [vmem:[#allocation8 + $0x48] sm:$0xff]  ;;  %v6596_v15 = vld [vmem:[#allocation8 + $0x40] sm:$0xff]  ;;  %v6144_v28 = vld [vmem:[%s7848_s28 + $0x10] sm:$0xf] }
  0x78   : > { %1062 = vmatpush.bf16.msra.mxu1 %v6602_v3  ;;  %6677 = vmatpush.bf16.msra.mxu3 %v6602_v3  ;;  %v6136_v16 = vld [vmem:[%s7848_s28] sm:$0xf]  ;;  %v6573_v17 = vld [vmem:[%s7848_s28 + $0x4] sm:$0xf0]  ;;  %v6572_v18 = vld [vmem:[%s7848_s28 + $0x4] sm:$0xf] }
  0x79   : > { %v6138_v19 = vld [vmem:[%s7848_s28 + $0x8] sm:$0xf0]  ;;  %v6168_v20 = vld [vmem:[%s7848_s28 + $0x40] sm:$0xf]  ;;  %v6581_v21 = vld [vmem:[%s7848_s28 + $0x44] sm:$0xf0]  ;;  %v6137_v24 = vor.u32 %v6573_v17, %v6136_v16 }
  0x7a   : > { %v6580_v22 = vld [vmem:[%s7848_s28 + $0x44] sm:$0xf]  ;;  %v6170_v23 = vld [vmem:[%s7848_s28 + $0x48] sm:$0xf0]  ;;  %v6141_v25 = vor.u32 %v6572_v18, %v6138_v19  ;;  %v6169_v26 = vor.u32 %v6581_v21, %v6168_v20  ;;  %v6575_v29 = vld [vmem:[%s7848_s28 + $0x14] sm:$0xf0] }
  0x7b   : > { %1014 = vmatpush.bf16.msra.mxu0 %v6593_v4  ;;  %6670 = vmatpush.bf16.msra.mxu2 %v6593_v4  ;;  %v6173_v27 = vor.u32 %v6580_v22, %v6170_v23  ;;  %v6574_v30 = vld [vmem:[%s7848_s28 + $0x14] sm:$0xf]  ;;  %v6146_v31 = vld [vmem:[%s7848_s28 + $0x18] sm:$0xf0]  ;;  %v6176_v32 = vld [vmem:[%s7848_s28 + $0x50] sm:$0xf]  ;;  %v6145_v36 = vor.u32 %v6575_v29, %v6144_v28 }
  0x7c   : > { %1063 = vmatpush.bf16.msra.mxu1 %v6601_v5  ;;  %6678 = vmatpush.bf16.msra.mxu3 %v6601_v5  ;;  %v6583_v33 = vld [vmem:[%s7848_s28 + $0x54] sm:$0xf0]  ;;  %v6582_v34 = vld [vmem:[%s7848_s28 + $0x54] sm:$0xf]  ;;  %v6178_v35 = vld [vmem:[%s7848_s28 + $0x58] sm:$0xf0]  ;;  %v6149_v37 = vor.u32 %v6574_v30, %v6146_v31 }
  0x7d   : > { %v6177_v38 = vor.u32 %v6583_v33, %v6176_v32  ;;  %v6181_v39 = vor.u32 %v6582_v34, %v6178_v35  ;;  %v6152_v40 = vld [vmem:[%s7848_s28 + $0x20] sm:$0xf]  ;;  %v6577_v41 = vld [vmem:[%s7848_s28 + $0x24] sm:$0xf0]  ;;  %v6576_v42 = vld [vmem:[%s7848_s28 + $0x24] sm:$0xf] }
  0x7e   : > { %v6154_v43 = vld [vmem:[%s7848_s28 + $0x28] sm:$0xf0]  ;;  %v6184_v44 = vld [vmem:[%s7848_s28 + $0x60] sm:$0xf]  ;;  %v6585_v45 = vld [vmem:[%s7848_s28 + $0x64] sm:$0xf0]  ;;  %v6153_v48 = vor.u32 %v6577_v41, %v6152_v40 }
  0x7f   : > { %1015 = vmatpush.bf16.msra.mxu0 %v6592_v6  ;;  %6671 = vmatpush.bf16.msra.mxu2 %v6592_v6  ;;  %v6584_v46 = vld [vmem:[%s7848_s28 + $0x64] sm:$0xf]  ;;  %v6186_v47 = vld [vmem:[%s7848_s28 + $0x68] sm:$0xf0]  ;;  %v6157_v49 = vor.u32 %v6576_v42, %v6154_v43  ;;  %v6185_v50 = vor.u32 %v6585_v45, %v6184_v44  ;;  %v6160_v52 = vld [vmem:[%s7848_s28 + $0x30] sm:$0xf] }
  0x80   : > { %1064 = vmatpush.bf16.msra.mxu1 %v6600_v7  ;;  %6679 = vmatpush.bf16.msra.mxu3 %v6600_v7  ;;  %v6189_v51 = vor.u32 %v6584_v46, %v6186_v47  ;;  %v6579_v53 = vld [vmem:[%s7848_s28 + $0x34] sm:$0xf0]  ;;  %v6578_v54 = vld [vmem:[%s7848_s28 + $0x34] sm:$0xf]  ;;  %v6162_v55 = vld [vmem:[%s7848_s28 + $0x38] sm:$0xf0] }
  0x81   : > { %v6192_v56 = vld [vmem:[%s7848_s28 + $0x70] sm:$0xf]  ;;  %v6587_v57 = vld [vmem:[%s7848_s28 + $0x74] sm:$0xf0]  ;;  %v6586_v58 = vld [vmem:[%s7848_s28 + $0x74] sm:$0xf]  ;;  %v6161_v60 = vor.u32 %v6579_v53, %v6160_v52  ;;  %v6165_v61 = vor.u32 %v6578_v54, %v6162_v55 }
  0x82   : > { %v6194_v59 = vld [vmem:[%s7848_s28 + $0x78] sm:$0xf0]  ;;  %v6193_v62 = vor.u32 %v6587_v57, %v6192_v56  ;;  %v7906_v0 = vld [vmem:[#allocation9] ss:$0 sm:$0xff]  ;;  %v1110_v4 = vld [vmem:[#allocation11] sm:$0xff]  ;;  %s11354_s28 = sld [smem:[#allocation53_spill]] }
  0x83   : > { %1016 = vmatpush.bf16.msra.mxu0 %v6591_v8  ;;  %6672 = vmatpush.bf16.msra.mxu2 %v6591_v8  ;;  %v6197_v63 = vor.u32 %v6586_v58, %v6194_v59  ;;  %v1112_v20 = vld [vmem:[#allocation11 + $0x10] sm:$0xff]  ;;  %v1113_v28 = vld [vmem:[#allocation11 + $0x18] sm:$0xff]  ;;  %v1115_v45 = vld [vmem:[#allocation11 + $0x28] sm:$0xff]  ;;  %s7497_s13 = scalar_lea.hbm %s11457_s25, 16 }
  0x84   : > { %1065 = vmatpush.bf16.msra.mxu1 %v6599_v9  ;;  %6680 = vmatpush.bf16.msra.mxu3 %v6599_v9  ;;  %v1116_v54 = vld [vmem:[#allocation11 + $0x30] sm:$0xff] }
  0x87   : > { %1017 = vmatpush.bf16.msra.mxu0 %v6590_v10  ;;  %6673 = vmatpush.bf16.msra.mxu2 %v6590_v10 }
  0x88   : > { %1066 = vmatpush.bf16.msra.mxu1 %v6598_v11  ;;  %6681 = vmatpush.bf16.msra.mxu3 %v6598_v11  ;;  %v1111_v11 = vld [vmem:[#allocation11 + $0x8] sm:$0xff] }
  0x8b   : > { %1018 = vmatpush.bf16.msra.mxu0 %v6589_v12  ;;  %6674 = vmatpush.bf16.msra.mxu2 %v6589_v12 }
  0x8c   : > { %1067 = vmatpush.bf16.msra.mxu1 %v6597_v13  ;;  %6682 = vmatpush.bf16.msra.mxu3 %v6597_v13 }
  0x8f   : > { %1019 = vmatpush.bf16.msra.mxu0 %v6588_v14  ;;  %6675 = vmatpush.bf16.msra.mxu2 %v6588_v14 }
  0x90   : > { %1068 = vmatpush.bf16.msra.mxu1 %v6596_v15  ;;  %6683 = vmatpush.bf16.msra.mxu3 %v6596_v15 }
  0x92   : > { %1020 = vmatmul.bf16.vlgmr.msra.gmra.mxu0 %v6137_v24  ;;  %1040 = vmatmul.bf16.vlgmr.msra.gmra.mxu2 %v6169_v26 }
  0x93   : > { %1069 = vmatmul.bf16.vlgmr.msra.gmra.mxu1 %v6141_v25  ;;  %1089 = vmatmul.bf16.vlgmr.msra.gmra.mxu3 %v6173_v27 }
  0xa2   : > { %1025 = vmatmul.bf16.gmra.mxu0 %v6145_v36  ;;  %1045 = vmatmul.bf16.gmra.mxu2 %v6177_v38 }
  0xa3   : > { %1074 = vmatmul.bf16.gmra.mxu1 %v6149_v37  ;;  %1094 = vmatmul.bf16.gmra.mxu3 %v6181_v39  ;;  %v1114_v37 = vld [vmem:[#allocation11 + $0x20] sm:$0xff] }
  0xb2   : > { %1030 = vmatmul.bf16.gmra.mxu0 %v6153_v48  ;;  %1050 = vmatmul.bf16.gmra.mxu2 %v6185_v50 }
  0xb3   : > { %1079 = vmatmul.bf16.gmra.mxu1 %v6157_v49  ;;  %1099 = vmatmul.bf16.gmra.mxu3 %v6189_v51 }
  0xc2   : > { %1035 = vmatmul.bf16.gmra.mxu0 %v6161_v60  ;;  %1055 = vmatmul.bf16.gmra.mxu2 %v6193_v62 }
  0xc3   : > { %1084 = vmatmul.bf16.gmra.mxu1 %v6165_v61  ;;  %1104 = vmatmul.bf16.gmra.mxu3 %v6197_v63 }
 0x10f   : > { %v1021_v1 = vpop.f32.mrf.mxu0 }
 0x110   : > { %v1070_v2 = vpop.f32.mrf.mxu1  ;;  %v1022_v3 = vadd.f32 %v7906_v0, %v1021_v1 }
 0x112   : > { %v1071_v5 = vadd.f32 %v1070_v2, %v1022_v3  ;;  %v1119_v2 = vld [vmem:[#allocation11 + $0x48] sm:$0xff] }
 0x114   : > { %v7909_v6 = vadd.f32 %v1110_v4, %v1071_v5  ;;  %v1117_v4 = vld [vmem:[#allocation11 + $0x38] sm:$0xff] }
 0x115   : > { %v1041_v13 = vpop.f32.mrf.mxu2 }
 0x116   : > { %1160 = vadd.xlane.f32.xlu0 %v7909_v6  ;;  %v1215_v7 = vmul.f32 %v7909_v6, %v7909_v6  ;;  %v7920_v16 = vpop.f32.mrf.mxu3  ;;  %v1042_v62 = vadd.f32 %v7906_v0, %v1041_v13 }
 0x117   : > { %v1023_v8 = vpop.f32.mrf.mxu0 }
 0x118   : > { %v1072_v9 = vpop.f32.mrf.mxu1  ;;  %v1024_v10 = vadd.f32 %v7906_v0, %v1023_v8  ;;  %1231 = vadd.xlane.f32.xlu1 %v1215_v7  ;;  %v1091_v7 = vadd.f32 %v7920_v16, %v1042_v62  ;;  %v1120_v16 = vld [vmem:[#allocation11 + $0x50] sm:$0xff]  ;;  %v6627_v62 = vld [vmem:[#allocation15 + $0xb8] sm:$0xf0] }
 0x11a   : > { %v1073_v12 = vadd.f32 %v1072_v9, %v1024_v10 }
 0x11c   : > { %v7915_v14 = vadd.f32 %v1111_v11, %v1073_v12  ;;  %v1118_v11 = vld [vmem:[#allocation11 + $0x40] sm:$0xff] }
 0x11d   : > { %v1043_v23 = vpop.f32.mrf.mxu2 }
 0x11e   : > { %1162 = vadd.xlane.f32.xlu0 %v7915_v14  ;;  %v1216_v15 = vmul.f32 %v7915_v14, %v7915_v14  ;;  %v1092_v29 = vpop.f32.mrf.mxu3  ;;  %v1044_v57 = vadd.f32 %v7906_v0, %v1043_v23 }
 0x11f   : > { %v1026_v17 = vpop.f32.mrf.mxu0 }
 0x120   : > { %v1075_v18 = vpop.f32.mrf.mxu1  ;;  %v1027_v19 = vadd.f32 %v7906_v0, %v1026_v17  ;;  %1233 = vadd.xlane.f32.xlu1 %v1216_v15  ;;  %v1093_v63 = vadd.f32 %v1092_v29, %v1044_v57  ;;  %v7964_v15 = vadd.f32 %v1118_v11, %v1091_v7  ;;  %v6324_v57 = vld [vmem:[#allocation15 + $0xac] sm:$0xf]  ;;  %v6320_v7 = vld [vmem:[#allocation15 + $0x94] sm:$0xf]  ;;  %v6618_v11 = vld [vmem:[#allocation15 + $0x9c] sm:$0xf0] }
 0x122   : > { %v1076_v21 = vadd.f32 %v1075_v18, %v1027_v19  ;;  %v7956_v8 = vadd.f32 %v1119_v2, %v1093_v63  ;;  %11318 = vst [vmem:[#allocation34_spill] sm:$0xff] %v7964_v15  ;;  %v1223_v23 = vmul.f32 %v7964_v15, %v7964_v15 }
 0x124   : > { %v7923_v22 = vadd.f32 %v1112_v20, %v1076_v21  ;;  %11316 = vst [vmem:[#allocation32_spill] sm:$0xff] %v7956_v8 }
 0x125   : > { %v1046_v33 = vpop.f32.mrf.mxu2 }
 0x126   : > { %1164 = vadd.xlane.f32.xlu2 %v7923_v22  ;;  %v1217_v24 = vmul.f32 %v7923_v22, %v7923_v22  ;;  %v1095_v39 = vpop.f32.mrf.mxu3  ;;  %v1047_v9 = vadd.f32 %v7906_v0, %v1046_v33  ;;  %v1122_v33 = vld [vmem:[#allocation11 + $0x60] sm:$0xff] }
 0x127   : > { %v1028_v25 = vpop.f32.mrf.mxu0 }
 0x128   : > { %v1077_v26 = vpop.f32.mrf.mxu1  ;;  %v1029_v27 = vadd.f32 %v7906_v0, %v1028_v25  ;;  %1235 = vadd.xlane.f32.xlu0 %v1217_v24  ;;  %v1096_v17 = vadd.f32 %v1095_v39, %v1047_v9  ;;  %v1121_v24 = vld [vmem:[#allocation11 + $0x58] sm:$0xff] }
 0x12a   : > { %v1078_v30 = vadd.f32 %v1077_v26, %v1029_v27  ;;  %v7968_v20 = vadd.f32 %v1120_v16, %v1096_v17  ;;  %v6321_v17 = vor.u32 %v6618_v11, %v6320_v7 }
 0x12c   : > { %v7929_v31 = vadd.f32 %v1113_v28, %v1078_v30  ;;  %11319 = vst [vmem:[#allocation35_spill] sm:$0xff] %v7968_v20  ;;  %v1224_v30 = vmul.f32 %v7956_v8, %v7956_v8 }
 0x12d   : > { %v1048_v46 = vpop.f32.mrf.mxu2 }
 0x12e   : > { %1166 = vadd.xlane.f32.xlu2 %v7929_v31  ;;  %v1218_v32 = vmul.f32 %v7929_v31, %v7929_v31  ;;  %v1097_v49 = vpop.f32.mrf.mxu3  ;;  %v1049_v18 = vadd.f32 %v7906_v0, %v1048_v46 }
 0x12f   : > { %v1031_v34 = vpop.f32.mrf.mxu0 }
 0x130   : > { %v1080_v35 = vpop.f32.mrf.mxu1  ;;  %v1032_v36 = vadd.f32 %v7906_v0, %v1031_v34  ;;  %1237 = vadd.xlane.f32.xlu1 %v1218_v32  ;;  %v1098_v21 = vadd.f32 %v1097_v49, %v1049_v18 }
 0x132   : > { %v1081_v38 = vadd.f32 %v1080_v35, %v1032_v36  ;;  %v7973_v26 = vadd.f32 %v1121_v24, %v1098_v21  ;;  %v6284_v21 = vld [vmem:[#allocation15 + $0x78] sm:$0xf]  ;;  %v6316_v24 = vld [vmem:[#allocation15 + $0x7c] sm:$0xf] }
 0x134   : > { %v7935_v40 = vadd.f32 %v1114_v37, %v1081_v38  ;;  %11320 = vst [vmem:[#allocation36_spill] sm:$0xff] %v7973_v26  ;;  %v1226_v32 = vmul.f32 %v7973_v26, %v7973_v26  ;;  %v1225_v37 = vmul.f32 %v7968_v20, %v7968_v20 }
 0x135   : > { %v1051_v56 = vpop.f32.mrf.mxu2 }
 0x136   : > { %11313 = vst [vmem:[#allocation29_spill] sm:$0xff] %v7935_v40  ;;  %1168 = vadd.xlane.f32.xlu2 %v7935_v40  ;;  %v1219_v41 = vmul.f32 %v7935_v40, %v7935_v40  ;;  %v1100_v61 = vpop.f32.mrf.mxu3  ;;  %v1052_v27 = vadd.f32 %v7906_v0, %v1051_v56  ;;  %v6611_v56 = vld [vmem:[#allocation15 + $0xb0] sm:$0xf0] }
 0x137   : > { %v1033_v42 = vpop.f32.mrf.mxu0 }
 0x138   : > { %v1082_v43 = vpop.f32.mrf.mxu1  ;;  %v1034_v44 = vadd.f32 %v7906_v0, %v1033_v42  ;;  %1239 = vadd.xlane.f32.xlu1 %v1219_v41  ;;  %v1101_v29 = vadd.f32 %v1100_v61, %v1052_v27  ;;  %v1123_v42 = vld [vmem:[#allocation11 + $0x68] sm:$0xff]  ;;  %v6356_v61 = vld [vmem:[#allocation15 + $0xb0] sm:$0xf] }
 0x139   : > { %v6357_v2 = vor.u32 %v6627_v62, %v6356_v61  ;;  %v6617_v27 = vld [vmem:[#allocation15 + $0x84] sm:$0xf0]  ;;  %v6606_v61 = vld [vmem:[#allocation15 + $0x38] sm:$0xf0]  ;;  %v6304_v62 = vld [vmem:[#allocation15 + $0x34] sm:$0xf] }
 0x13a   : > { %v1083_v47 = vadd.f32 %v1082_v43, %v1034_v44  ;;  %v7981_v34 = vadd.f32 %v1122_v33, %v1101_v29  ;;  %v6625_v29 = vld [vmem:[#allocation15 + $0x88] sm:$0xf0]  ;;  %v6280_v33 = vld [vmem:[#allocation15 + $0x60] sm:$0xf] }
 0x13b   : > { %1899 = vmatpush.bf16.msrb.mxu0 %v6357_v2  ;;  %v6614_v2 = vld [vmem:[#allocation15 + $0x3c] sm:$0xf0] }
 0x13c   : > { %v7941_v48 = vadd.f32 %v1115_v45, %v1083_v47  ;;  %11321 = vst [vmem:[#allocation37_spill] sm:$0xff] %v7981_v34  ;;  %v1227_v39 = vmul.f32 %v7981_v34, %v7981_v34  ;;  %v1125_v47 = vld [vmem:[#allocation11 + $0x78] sm:$0xff] }
 0x13d   : > { %v1053_v12 = vpop.f32.mrf.mxu2 }
 0x13e   : > { %11314 = vst [vmem:[#allocation30_spill] sm:$0xff] %v7941_v48  ;;  %1170 = vadd.xlane.f32.xlu0 %v7941_v48  ;;  %v1220_v50 = vmul.f32 %v7941_v48, %v7941_v48  ;;  %v1102_v19 = vpop.f32.mrf.mxu3  ;;  %v1054_v35 = vadd.f32 %v7906_v0, %v1053_v12  ;;  %v6352_v12 = vld [vmem:[#allocation15 + $0x98] sm:$0xf] }
 0x13f   : > { %v1036_v51 = vpop.f32.mrf.mxu0 }
 0x140   : > { %v1085_v52 = vpop.f32.mrf.mxu1  ;;  %v1037_v53 = vadd.f32 %v7906_v0, %v1036_v51  ;;  %1241 = vadd.xlane.f32.xlu2 %v1220_v50  ;;  %v1103_v38 = vadd.f32 %v1102_v19, %v1054_v35  ;;  %v6608_v35 = vld [vmem:[#allocation15 + $0x68] sm:$0xf0] }
 0x142   : > { %v1086_v55 = vadd.f32 %v1085_v52, %v1037_v53  ;;  %v7990_v44 = vadd.f32 %v1123_v42, %v1103_v38  ;;  %v7581_v52 = vmov 128.0   ;;  %v1124_v53 = vld [vmem:[#allocation11 + $0x70] sm:$0xff]  ;;  %v6281_v38 = vor.u32 %v6608_v35, %v6280_v33  ;;  %v6624_v42 = vld [vmem:[#allocation15 + $0x70] sm:$0xf0] }
 0x143   : > { %6852 = vrcp.f32 %v7581_v52  ;;  %v6612_v35 = vld [vmem:[#allocation15 + $0xc] sm:$0xf0] }
 0x144   : > { %v7948_v58 = vadd.f32 %v1116_v54, %v1086_v55  ;;  %11322 = vst [vmem:[#allocation38_spill] sm:$0xff] %v7990_v44  ;;  %v1228_v51 = vmul.f32 %v7990_v44, %v7990_v44  ;;  %v6292_v55 = vld [vmem:[#allocation15 + $0xa8] sm:$0xf] }
 0x145   : > { %v1056_v25 = vpop.f32.mrf.mxu2 }
 0x146   : > { %11315 = vst [vmem:[#allocation31_spill] sm:$0xff] %v7948_v58  ;;  %1172 = vadd.xlane.f32.xlu0 %v7948_v58  ;;  %v1221_v59 = vmul.f32 %v7948_v58, %v7948_v58  ;;  %v1105_v28 = vpop.f32.mrf.mxu3  ;;  %v1057_v45 = vadd.f32 %v7906_v0, %v1056_v25 }
 0x147   : > { %v1038_v60 = vpop.f32.mrf.mxu0 }
 0x148   : > { %v1039_v1 = vadd.f32 %v7906_v0, %v1038_v60  ;;  %1243 = vadd.xlane.f32.xlu2 %v1221_v59  ;;  %v1087_v3 = vpop.f32.mrf.mxu1  ;;  %v1106_v49 = vadd.f32 %v1105_v28, %v1057_v45  ;;  %v6293_v59 = vor.u32 %v6611_v56, %v6292_v55  ;;  %v6619_v60 = vld [vmem:[#allocation15 + $0xb4] sm:$0xf0]  ;;  %v6348_v28 = vld [vmem:[#allocation15 + $0x80] sm:$0xf]  ;;  %v6340_v55 = vld [vmem:[#allocation15 + $0x50] sm:$0xf] }
 0x149   : > { %v6623_v56 = vld [vmem:[#allocation15 + $0x58] sm:$0xf0] }
 0x14a   : > { %v1088_v5 = vadd.f32 %v1087_v3, %v1039_v1  ;;  %v7999_v54 = vadd.f32 %v1124_v53, %v1106_v49  ;;  %v6325_v1 = vor.u32 %v6619_v60, %v6324_v57  ;;  %1633 = vmatpush.bf16.msrb.mxu2 %v6293_v59  ;;  %v6308_v49 = vld [vmem:[#allocation15 + $0x4c] sm:$0xf]  ;;  %v6615_v53 = vld [vmem:[#allocation15 + $0x54] sm:$0xf0]  ;;  %v6341_v59 = vor.u32 %v6623_v56, %v6340_v55  ;;  %v6272_v60 = vld [vmem:[#allocation15 + $0x30] sm:$0xf] }
 0x14b   : > { %v6309_v57 = vor.u32 %v6615_v53, %v6308_v49 }
 0x14c   : > { %v7959_v10 = vadd.f32 %v1117_v4, %v1088_v5  ;;  %11324 = vst [vmem:[#allocation40_spill] sm:$0xff] %v7999_v54  ;;  %v1229_v63 = vmul.f32 %v7999_v54, %v7999_v54  ;;  %1766 = vmatpush.bf16.msrb.mxu3 %v6325_v1  ;;  %v6288_v4 = vld [vmem:[#allocation15 + $0x90] sm:$0xf]  ;;  %v6610_v5 = vld [vmem:[#allocation15 + $0x98] sm:$0xf0]  ;;  %v6273_v1 = vor.u32 %v6606_v61, %v6272_v60 }
 0x14d   : > { %v1058_v36 = vpop.f32.mrf.mxu2  ;;  %v6289_v9 = vor.u32 %v6610_v5, %v6288_v4  ;;  %v6622_v4 = vld [vmem:[#allocation15 + $0x40] sm:$0xf0]  ;;  %v6305_v5 = vor.u32 %v6614_v2, %v6304_v62 }
 0x14e   : > { %11317 = vst [vmem:[#allocation33_spill] sm:$0xff] %v7959_v10  ;;  %1174 = vadd.xlane.f32.xlu1 %v7959_v10  ;;  %v1222_v13 = vmul.f32 %v7959_v10, %v7959_v10  ;;  %v1059_v41 = vadd.f32 %v7906_v0, %v1058_v36  ;;  %v1107_v43 = vpop.f32.mrf.mxu3  ;;  %v8002_v0 = vpop.eup %6852  ;;  %v6312_v36 = vld [vmem:[#allocation15 + $0x64] sm:$0xf] }
 0x14f   : > { %v1193_v3 = vmul.f32 128.0, %v8002_v0  ;;  %1634 = vmatpush.bf16.msrb.mxu2 %v6289_v9  ;;  %vm1197_vm0 = vweird.f32 %v8002_v0 }
 0x150   : > { %1178 = vadd.xlane.f32.xlu2 %v7956_v8  ;;  %1245 = vadd.xlane.f32.xlu0 %v1222_v13  ;;  %v1108_v46 = vadd.f32 %v1107_v43, %v1059_v41  ;;  %v6626_v13 = vld [vmem:[#allocation15 + $0xa0] sm:$0xf0]  ;;  %v6344_v41 = vld [vmem:[#allocation15 + $0x68] sm:$0xf] }
 0x151   : > { %v6353_v18 = vor.u32 %v6626_v13, %v6352_v12  ;;  %v1194_v16 = vsub.f32 1.0, %v1193_v3  ;;  %1767 = vmatpush.bf16.msrb.mxu3 %v6321_v17  ;;  %v6345_v45 = vor.u32 %v6624_v42, %v6344_v41  ;;  %v6336_v3 = vld [vmem:[#allocation15 + $0x38] sm:$0xf]  ;;  %v6605_v13 = vld [vmem:[#allocation15 + $0x20] sm:$0xf0] }
 0x152   : > { %v7994_v50 = vadd.f32 %v1125_v47, %v1108_v46  ;;  %v6276_v46 = vld [vmem:[#allocation15 + $0x48] sm:$0xf]  ;;  %v6607_v47 = vld [vmem:[#allocation15 + $0x50] sm:$0xf0]  ;;  %v6337_v7 = vor.u32 %v6622_v4, %v6336_v3  ;;  %v6268_v12 = vld [vmem:[#allocation15 + $0x18] sm:$0xf] }
 0x153   : > { %1900 = vmatpush.bf16.msrb.mxu0 %v6353_v18  ;;  %v6277_v52 = vor.u32 %v6607_v47, %v6276_v46  ;;  %v6300_v17 = vld [vmem:[#allocation15 + $0x1c] sm:$0xf] }
 0x154   : > { %11323 = vst [vmem:[#allocation39_spill] sm:$0xff] %v7994_v50  ;;  %v1230_v19 = vmul.f32 %v7994_v50, %v7994_v50 }
 0x156   : > { %1176 = vadd.xlane.f32.xlu1 %v7964_v15 }
 0x158   : > { %1180 = vadd.xlane.f32.xlu2 %v7968_v20  ;;  %1247 = vadd.xlane.f32.xlu0 %v1223_v23  ;;  %v6609_v23 = vld [vmem:[#allocation15 + $0x80] sm:$0xf0] }
 0x159   : > { %v6285_v25 = vor.u32 %v6609_v23, %v6284_v21  ;;  %v6621_v21 = vld [vmem:[#allocation15 + $0x28] sm:$0xf0] }
 0x15b   : > { %1635 = vmatpush.bf16.msrb.mxu2 %v6285_v25 }
 0x15e   : > { %1249 = vadd.xlane.f32.xlu1 %v1224_v30  ;;  %v6317_v30 = vor.u32 %v6617_v27, %v6316_v24 }
 0x15f   : > { %1636 = vmatpush.bf16.msrb.mxu2 %v6281_v38 }
 0x160   : > { %1253 = vadd.xlane.f32.xlu2 %v1226_v32  ;;  %1182 = vadd.xlane.f32.xlu0 %v7973_v26  ;;  %v6349_v32 = vor.u32 %v6625_v29, %v6348_v28  ;;  %v6264_v29 = vld [vmem:[#allocation15] sm:$0xf] }
 0x161   : > { %1768 = vmatpush.bf16.msrb.mxu3 %v6317_v30  ;;  %v6604_v30 = vld [vmem:[#allocation15 + $0x8] sm:$0xf0] }
 0x162   : > { %1901 = vmatpush.bf16.msrb.mxu0 %v6349_v32  ;;  %v6296_v32 = vld [vmem:[#allocation15 + $0x4] sm:$0xf]  ;;  %v6265_v33 = vor.u32 %v6604_v30, %v6264_v29  ;;  %v8038_v29 = vld [vmem:[#allocation12] ss:$0 sm:$0xff] }
 0x163   : > { %1637 = vmatpush.bf16.msrb.mxu2 %v6277_v52 }
 0x166   : > { %1251 = vadd.xlane.f32.xlu1 %v1225_v37  ;;  %v1195_v37 = vmul.f32 %v8002_v0, %v1194_v16  ;;  %1902 = vmatpush.bf16.msrb.mxu0 %v6345_v45  ;;  %v6613_v16 = vld [vmem:[#allocation15 + $0x24] sm:$0xf0] }
 0x167   : > { %1638 = vmatpush.bf16.msrb.mxu2 %v6273_v1  ;;  %v6301_v25 = vor.u32 %v6613_v16, %v6300_v17 }
 0x168   : > { %1255 = vadd.xlane.f32.xlu2 %v1227_v39  ;;  %1184 = vadd.xlane.f32.xlu0 %v7981_v34  ;;  %v6616_v39 = vld [vmem:[#allocation15 + $0x6c] sm:$0xf0] }
 0x169   : > { %v6313_v43 = vor.u32 %v6616_v39, %v6312_v36  ;;  %v6328_v36 = vld [vmem:[#allocation15 + $0x8] sm:$0xf]  ;;  %v6297_v39 = vor.u32 %v6612_v35, %v6296_v32 }
 0x16a   : > { %1903 = vmatpush.bf16.msrb.mxu0 %v6341_v59 }
 0x16b   : > { %1769 = vmatpush.bf16.msrb.mxu3 %v6313_v43 }
 0x16e   : > { %1186 = vadd.xlane.f32.xlu1 %v7990_v44  ;;  %1904 = vmatpush.bf16.msrb.mxu0 %v6337_v7 }
 0x16f   : > { %1770 = vmatpush.bf16.msrb.mxu3 %v6309_v57 }
 0x170   : > { %1190 = vadd.xlane.f32.xlu2 %v7994_v50  ;;  %1257 = vadd.xlane.f32.xlu0 %v1228_v51  ;;  %v1196_v51 = vadd.f32 %v8002_v0, %v1195_v37  ;;  %v6620_v37 = vld [vmem:[#allocation15 + $0x10] sm:$0xf0] }
 0x171   : > { %v6329_v41 = vor.u32 %v6620_v37, %v6328_v36 }
 0x173   : > { %1771 = vmatpush.bf16.msrb.mxu3 %v6305_v5 }
 0x176   : > { %1188 = vadd.xlane.f32.xlu1 %v7999_v54 }
 0x177   : > { %1772 = vmatpush.bf16.msrb.mxu3 %v6301_v25 }
 0x178   : > { %1259 = vadd.xlane.f32.xlu0 %v1229_v63  ;;  %v8014_v63 = vsel %vm1197_vm0, %v8002_v0, %v1196_v51  ;;  %v6269_v0 = vor.u32 %v6605_v13, %v6268_v12 }
 0x179   : > { %11325 = vst [vmem:[#allocation41_spill] sm:$0xff] %v8014_v63 }
 0x17a   : > { %1639 = vmatpush.bf16.msrb.mxu2 %v6269_v0 }
 0x17b   : > { %1773 = vmatpush.bf16.msrb.mxu3 %v6297_v39 }
 0x17e   : > { %1261 = vadd.xlane.f32.xlu1 %v1230_v19  ;;  %v6332_v19 = vld [vmem:[#allocation15 + $0x20] sm:$0xf]  ;;  %1640 = vmatpush.bf16.msrb.mxu2 %v6265_v33 }
 0x17f   : > { %v6333_v27 = vor.u32 %v6621_v21, %v6332_v19 }
 0x181   : > { %1905 = vmatpush.bf16.msrb.mxu0 %v6333_v27 }
 0x185   : > { %1906 = vmatpush.bf16.msrb.mxu0 %v6329_v41 }
 0x189   : > { %v1161_v9 = vpop.xlane.xlu0 %1160 }
 0x18a   : > { %v8017_v11 = vmul.f32 %v8014_v63, %v1161_v9 }
 0x18b   : > { %v1232_v18 = vpop.xlane.xlu1 %1231 }
 0x18c   : > { %v1279_v23 = vmul.f32 %v8017_v11, %v8017_v11  ;;  %v1263_v24 = vmul.f32 %v1232_v18, %v8014_v63  ;;  %v1311_v21 = vsub.f32 %v7909_v6, %v8017_v11 }
 0x18e   : > { %v1295_v28 = vsub.f32 %v1263_v24, %v1279_v23 }
 0x190   : > { %v1327_v38 = vadd.f32 1e-06, %v1295_v28 }
 0x191   : > { %v1163_v42 = vpop.xlane.xlu0 %1162 }
 0x192   : > { %6854 = vrsqrt.f32 %v1327_v38  ;;  %v1200_v43 = vmul.f32 %v8014_v63, %v1163_v42  ;;  %vm1349_vm2 = vweird.f32 %v1327_v38 }
 0x193   : > { %v1234_v45 = vpop.xlane.xlu1 %1233 }
 0x194   : > { %v1280_v46 = vmul.f32 %v1200_v43, %v1200_v43  ;;  %v1264_v47 = vmul.f32 %v1234_v45, %v8014_v63  ;;  %v1312_v35 = vsub.f32 %v7915_v14, %v1200_v43 }
 0x196   : > { %v1296_v49 = vsub.f32 %v1264_v47, %v1280_v46  ;;  %v8048_v46 = vld [vmem:[#allocation14] ss:$0 sm:$0xff] }
 0x198   : > { %v6855_v51 = vpop.eup %6854  ;;  %v1328_v52 = vadd.f32 1e-06, %v1296_v49 }
 0x199   : > { %v1344_v53 = vmul.f32 %v6855_v51, %v1327_v38  ;;  %v1165_v55 = vpop.xlane.xlu2 %1164  ;;  %vm1350_vm1 = vweird.f32 %v6855_v51 }
 0x19a   : > { %6856 = vrsqrt.f32 %v1328_v52  ;;  %v8025_v56 = vmul.f32 %v8014_v63, %v1165_v55  ;;  %vm1351_vm3 = vmor %vm1349_vm2, %vm1350_vm1  ;;  %vm1359_vm5 = vweird.f32 %v1328_v52 }
 0x19b   : > { %v1345_v57 = vmul.f32 %v6855_v51, %v1344_v53  ;;  %v1236_v59 = vpop.xlane.xlu0 %1235 }
 0x19c   : > { %v1281_v60 = vmul.f32 %v8025_v56, %v8025_v56  ;;  %v1265_v61 = vmul.f32 %v1236_v59, %v8014_v63 }
 0x19d   : > { %v1346_v62 = vmul.f32 0.5, %v1345_v57 }
 0x19e   : > { %v1297_v1 = vsub.f32 %v1265_v61, %v1281_v60 }
 0x19f   : > { %v1347_v2 = vsub.f32 1.5, %v1346_v62 }
 0x1a0   : > { %v6857_v3 = vpop.eup %6856  ;;  %v1329_v4 = vadd.f32 1e-06, %v1297_v1 }
 0x1a1   : > { %v1348_v5 = vmul.f32 %v6855_v51, %v1347_v2  ;;  %v1354_v7 = vmul.f32 %v6857_v3, %v1328_v52  ;;  %v1167_v9 = vpop.xlane.xlu2 %1166  ;;  %vm1360_vm4 = vweird.f32 %v6857_v3 }
 0x1a2   : > { %6858 = vrsqrt.f32 %v1329_v4  ;;  %v8031_v12 = vmul.f32 %v8014_v63, %v1167_v9  ;;  %vm1361_vm6 = vmor %vm1359_vm5, %vm1360_vm4  ;;  %vm1369_vm8 = vweird.f32 %v1329_v4 }
 0x1a3   : > { %v1355_v13 = vmul.f32 %v6857_v3, %v1354_v7  ;;  %v1238_v17 = vpop.xlane.xlu1 %1237  ;;  %v1352_v19 = vsel %vm1351_vm3, %v6855_v51, %v1348_v5 }
 0x1a4   : > { %v1282_v18 = vmul.f32 %v8031_v12, %v8031_v12  ;;  %v1266_v0 = vmul.f32 %v1238_v17, %v8014_v63  ;;  %v1503_v28 = vmul.f32 %v1352_v19, %v1311_v21  ;;  %v1313_v17 = vsub.f32 %v7923_v22, %v8025_v56 }
 0x1a5   : > { %v1356_v16 = vmul.f32 0.5, %v1355_v13 }
 0x1a6   : > { %v1298_v23 = vsub.f32 %v1266_v0, %v1282_v18  ;;  %v1522_v45 = vmul.f32 %v8038_v29, %v1503_v28  ;;  %v1314_v28 = vsub.f32 %v7929_v31, %v8031_v12 }
 0x1a7   : > { %v1357_v24 = vsub.f32 1.5, %v1356_v16 }
 0x1a8   : > { %v6859_v25 = vpop.eup %6858  ;;  %v1330_v27 = vadd.f32 1e-06, %v1298_v23  ;;  %v1541_v55 = vadd.f32 %v8048_v46, %v1522_v45 }
 0x1a9   : > { %v1358_v30 = vmul.f32 %v6857_v3, %v1357_v24  ;;  %v1364_v32 = vmul.f32 %v6859_v25, %v1329_v4  ;;  %v1169_v33 = vpop.xlane.xlu2 %1168  ;;  %vm1370_vm7 = vweird.f32 %v6859_v25 }
 0x1aa   : > { %6860 = vrsqrt.f32 %v1330_v27  ;;  %v8042_v36 = vmul.f32 %v8014_v63, %v1169_v33  ;;  %vm1371_vm9 = vmor %vm1369_vm8, %vm1370_vm7  ;;  %vm1379_vm11 = vweird.f32 %v1330_v27 }
 0x1ab   : > { %v1365_v11 = vmul.f32 %v6859_v25, %v1364_v32  ;;  %v1240_v37 = vpop.xlane.xlu1 %1239  ;;  %v1362_v38 = vsel %vm1361_vm6, %v6857_v3, %v1358_v30 }
 0x1ac   : > { %v1283_v39 = vmul.f32 %v8042_v36, %v8042_v36  ;;  %v1267_v41 = vmul.f32 %v1240_v37, %v8014_v63  ;;  %v1504_v42 = vmul.f32 %v1362_v38, %v1312_v35 }
 0x1ad   : > { %v1366_v47 = vmul.f32 0.5, %v1365_v11 }
 0x1ae   : > { %v1299_v43 = vsub.f32 %v1267_v41, %v1283_v39  ;;  %v1523_v49 = vmul.f32 %v8038_v29, %v1504_v42 }
 0x1af   : > { %v1367_v51 = vsub.f32 1.5, %v1366_v47 }
 0x1b0   : > { %v6861_v52 = vpop.eup %6860  ;;  %v8051_v53 = vadd.f32 1e-06, %v1299_v43  ;;  %v1542_v57 = vadd.f32 %v8048_v46, %v1523_v49 }
 0x1b1   : > { %v1368_v59 = vmul.f32 %v6859_v25, %v1367_v51  ;;  %v1374_v60 = vmul.f32 %v6861_v52, %v1330_v27  ;;  %v1171_v61 = vpop.xlane.xlu0 %1170  ;;  %vm1380_vm10 = vweird.f32 %v6861_v52 }
 0x1b2   : > { %6862 = vrsqrt.f32 %v8051_v53  ;;  %v8057_v62 = vmul.f32 %v8014_v63, %v1171_v61  ;;  %v1557_v1 = vpack.c.bf16 %v1542_v57, %v1541_v55  ;;  %vm1381_vm12 = vmor %vm1379_vm11, %vm1380_vm10  ;;  %vm1389_vm14 = vweird.f32 %v8051_v53 }
 0x1b3   : > { %v1375_v2 = vmul.f32 %v6861_v52, %v1374_v60  ;;  %v1242_v3 = vpop.xlane.xlu2 %1241  ;;  %v1372_v13 = vsel %vm1371_vm9, %v6859_v25, %v1368_v59 }
 0x1b4   : > { %v1284_v5 = vmul.f32 %v8057_v62, %v8057_v62  ;;  %v1268_v7 = vmul.f32 %v1242_v3, %v8014_v63  ;;  %1641 = vmatmul.bf16.vlgmr.msrb.gmra.mxu2 %v1557_v1  ;;  %1774 = vmatmul.bf16.vlgmr.msrb.gmra.mxu3 %v1557_v1  ;;  %v1505_v19 = vmul.f32 %v1372_v13, %v1313_v17 }
 0x1b5   : > { %v1376_v9 = vmul.f32 0.5, %v1375_v2  ;;  %1907 = vmatmul.bf16.vlgmr.msrb.gmra.mxu0 %v1557_v1 }
 0x1b6   : > { %v1300_v18 = vsub.f32 %v1268_v7, %v1284_v5  ;;  %v1524_v11 = vmul.f32 %v8038_v29, %v1505_v19  ;;  %v1315_v7 = vsub.f32 %v7935_v40, %v8042_v36  ;;  %v1316_v36 = vsub.f32 %v7941_v48, %v8057_v62 }
 0x1b7   : > { %v1377_v0 = vsub.f32 1.5, %v1376_v9 }
 0x1b8   : > { %v6863_v4 = vpop.eup %6862  ;;  %v1332_v16 = vadd.f32 1e-06, %v1300_v18  ;;  %v1543_v45 = vadd.f32 %v8048_v46, %v1524_v11 }
 0x1b9   : > { %v1378_v21 = vmul.f32 %v6861_v52, %v1377_v0  ;;  %v1384_v23 = vmul.f32 %v6863_v4, %v8051_v53  ;;  %v1173_v24 = vpop.xlane.xlu0 %1172  ;;  %vm1390_vm13 = vweird.f32 %v6863_v4 }
 0x1ba   : > { %6864 = vrsqrt.f32 %v1332_v16  ;;  %v8068_v25 = vmul.f32 %v8014_v63, %v1173_v24  ;;  %vm1391_vm15 = vmor %vm1389_vm14, %vm1390_vm13  ;;  %vm1399_vm1 = vweird.f32 %v1332_v16 }
 0x1bb   : > { %v1385_v56 = vmul.f32 %v6863_v4, %v1384_v23  ;;  %v1244_v30 = vpop.xlane.xlu2 %1243  ;;  %v1382_v32 = vsel %vm1381_vm12, %v6861_v52, %v1378_v21 }
 0x1bc   : > { %v1285_v33 = vmul.f32 %v8068_v25, %v8068_v25  ;;  %v1269_v35 = vmul.f32 %v1244_v30, %v8014_v63  ;;  %v1506_v27 = vmul.f32 %v1382_v32, %v1314_v28 }
 0x1bd   : > { %v1386_v37 = vmul.f32 0.5, %v1385_v56 }
 0x1be   : > { %v1301_v38 = vsub.f32 %v1269_v35, %v1285_v33  ;;  %v1525_v12 = vmul.f32 %v8038_v29, %v1506_v27 }
 0x1bf   : > { %v1387_v39 = vsub.f32 1.5, %v1386_v37 }
 0x1c0   : > { %v6865_v41 = vpop.eup %6864  ;;  %v8075_v42 = vadd.f32 1e-06, %v1301_v38  ;;  %v1544_v47 = vadd.f32 %v8048_v46, %v1525_v12 }
 0x1c1   : > { %v1394_v43 = vmul.f32 %v6865_v41, %v1332_v16  ;;  %v1175_v49 = vpop.xlane.xlu1 %1174  ;;  %v1388_v51 = vmul.f32 %v6863_v4, %v1387_v39  ;;  %vm1400_vm0 = vweird.f32 %v6865_v41 }
 0x1c2   : > { %6866 = vrsqrt.f32 %v8075_v42  ;;  %v8081_v52 = vmul.f32 %v8014_v63, %v1175_v49  ;;  %v1558_v55 = vpack.c.bf16 %v1544_v47, %v1543_v45  ;;  %vm1401_vm2 = vmor %vm1399_vm1, %vm1400_vm0  ;;  %vm1409_vm4 = vweird.f32 %v8075_v42 }
 0x1c3   : > { %v1395_v57 = vmul.f32 %v6865_v41, %v1394_v43  ;;  %v1179_v59 = vpop.xlane.xlu2 %1178  ;;  %v1246_v60 = vpop.xlane.xlu0 %1245  ;;  %v1392_v5 = vsel %vm1391_vm15, %v6863_v4, %v1388_v51 }
 0x1c4   : > { %v1286_v61 = vmul.f32 %v8081_v52, %v8081_v52  ;;  %v1270_v1 = vmul.f32 %v1246_v60, %v8014_v63  ;;  %1646 = vmatmul.bf16.gmra.mxu2 %v1558_v55  ;;  %1779 = vmatmul.bf16.gmra.mxu3 %v1558_v55  ;;  %v1507_v19 = vmul.f32 %v1392_v5, %v1315_v7 }
 0x1c5   : > { %v1396_v2 = vmul.f32 0.5, %v1395_v57  ;;  %1912 = vmatmul.bf16.gmra.mxu0 %v1558_v55  ;;  %v8105_v62 = vmul.f32 %v8014_v63, %v1179_v59 }
 0x1c6   : > { %v1302_v3 = vsub.f32 %v1270_v1, %v1286_v61  ;;  %v1526_v33 = vmul.f32 %v8038_v29, %v1507_v19 }
 0x1c7   : > { %v1397_v9 = vsub.f32 1.5, %v1396_v2  ;;  %v1288_v47 = vmul.f32 %v8105_v62, %v8105_v62 }
 0x1c8   : > { %v8089_v13 = vpop.eup %6866  ;;  %v1334_v53 = vadd.f32 1e-06, %v1302_v3 }
 0x1c9   : > { %v1398_v17 = vmul.f32 %v6865_v41, %v1397_v9  ;;  %v1404_v18 = vmul.f32 %v8089_v13, %v8075_v42  ;;  %v1177_v0 = vpop.xlane.xlu1 %1176  ;;  %vm1410_vm3 = vweird.f32 %v8089_v13 }
 0x1ca   : > { %6868 = vrsqrt.f32 %v1334_v53  ;;  %v8094_v21 = vmul.f32 %v8014_v63, %v1177_v0  ;;  %vm8131_vm5 = vmor %vm1409_vm4, %vm1410_vm3  ;;  %vm1419_vm7 = vweird.f32 %v1334_v53 }
 0x1cb   : > { %v1405_v4 = vmul.f32 %v8089_v13, %v1404_v18  ;;  %v1181_v23 = vpop.xlane.xlu2 %1180  ;;  %v1248_v24 = vpop.xlane.xlu0 %1247  ;;  %v1402_v28 = vsel %vm1401_vm2, %v6865_v41, %v1398_v17  ;;  %v1545_v41 = vadd.f32 %v8048_v46, %v1526_v33 }
 0x1cc   : > { %v1287_v16 = vmul.f32 %v8094_v21, %v8094_v21  ;;  %v1271_v56 = vmul.f32 %v1248_v24, %v8014_v63  ;;  %v1508_v32 = vmul.f32 %v1402_v28, %v1316_v36  ;;  %v8123_v3 = vmul.f32 %v8014_v63, %v1181_v23 }
 0x1cd   : > { %v1406_v30 = vmul.f32 0.5, %v1405_v4  ;;  %v1317_v36 = vsub.f32 %v7948_v58, %v8068_v25 }
 0x1ce   : > { %v1303_v35 = vsub.f32 %v1271_v56, %v1287_v16  ;;  %v1527_v27 = vmul.f32 %v8038_v29, %v1508_v32  ;;  %v1289_v42 = vmul.f32 %v8123_v3, %v8123_v3  ;;  %v1318_v56 = vsub.f32 %v7959_v10, %v8081_v52 }
 0x1cf   : > { %v1407_v37 = vsub.f32 1.5, %v1406_v30 }
 0x1d0   : > { %v6869_v11 = vpop.eup %6868  ;;  %v8107_v38 = vadd.f32 1e-06, %v1303_v35  ;;  %v1546_v45 = vadd.f32 %v8048_v46, %v1527_v27 }
 0x1d1   : > { %v1414_v12 = vmul.f32 %v6869_v11, %v1334_v53  ;;  %v1250_v39 = vpop.xlane.xlu1 %1249  ;;  %v1408_v59 = vmul.f32 %v8089_v13, %v1407_v37  ;;  %vm1420_vm6 = vweird.f32 %v6869_v11 }
 0x1d2   : > { %6870 = vrsqrt.f32 %v8107_v38  ;;  %v1272_v43 = vmul.f32 %v1250_v39, %v8014_v63  ;;  %v1559_v57 = vpack.c.bf16 %v1546_v45, %v1545_v41  ;;  %vm1421_vm8 = vmor %vm1419_vm7, %vm1420_vm6  ;;  %vm1429_vm11 = vweird.f32 %v8107_v38 }
 0x1d3   : > { %v1415_v49 = vmul.f32 %v6869_v11, %v1414_v12  ;;  %v1254_v51 = vpop.xlane.xlu2 %1253  ;;  %v1183_v55 = vpop.xlane.xlu0 %1182  ;;  %v1412_v19 = vsel %vm8131_vm5, %v8089_v13, %v1408_v59 }
 0x1d4   : > { %v1304_v60 = vsub.f32 %v1272_v43, %v1288_v47  ;;  %v1274_v61 = vmul.f32 %v1254_v51, %v8014_v63  ;;  %v8119_v1 = vmul.f32 %v8014_v63, %v1183_v55  ;;  %1651 = vmatmul.bf16.gmra.mxu2 %v1559_v57  ;;  %1784 = vmatmul.bf16.gmra.mxu3 %v1559_v57 }
 0x1d5   : > { %v1416_v2 = vmul.f32 0.5, %v1415_v49  ;;  %1917 = vmatmul.bf16.gmra.mxu0 %v1559_v57  ;;  %v1509_v33 = vmul.f32 %v1412_v19, %v1317_v36 }
 0x1d6   : > { %v8125_v5 = vadd.f32 1e-06, %v1304_v60  ;;  %v1290_v7 = vmul.f32 %v8119_v1, %v8119_v1 }
 0x1d7   : > { %v1417_v17 = vsub.f32 1.5, %v1416_v2  ;;  %v1528_v52 = vmul.f32 %v8038_v29, %v1509_v33 }
 0x1d8   : > { %v8135_v18 = vpop.eup %6870  ;;  %6872 = vrsqrt.f32 %v8125_v5  ;;  %v1306_v0 = vsub.f32 %v1274_v61, %v1290_v7  ;;  %vm1439_vm13 = vweird.f32 %v8125_v5 }
 0x1d9   : > { %v1418_v4 = vmul.f32 %v6869_v11, %v1417_v17  ;;  %v1424_v23 = vmul.f32 %v8135_v18, %v8107_v38  ;;  %v1252_v24 = vpop.xlane.xlu1 %1251  ;;  %v1547_v2 = vadd.f32 %v8048_v46, %v1528_v52  ;;  %vm1430_vm9 = vweird.f32 %v8135_v18 }
 0x1da   : > { %v8147_v28 = vadd.f32 1e-06, %v1306_v0  ;;  %v1273_v16 = vmul.f32 %v1252_v24, %v8014_v63  ;;  %vm8183_vm12 = vmor %vm1429_vm11, %vm1430_vm9 }
 0x1db   : > { %v1425_v30 = vmul.f32 %v8135_v18, %v1424_v23  ;;  %v1185_v13 = vpop.xlane.xlu0 %1184  ;;  %v1422_v32 = vsel %vm1421_vm8, %v6869_v11, %v1418_v4  ;;  %v1256_v41 = vpop.xlane.xlu2 %1255 }
 0x1dc   : > { %6874 = vrsqrt.f32 %v8147_v28  ;;  %v1305_v25 = vsub.f32 %v1273_v16, %v1289_v42  ;;  %v8155_v35 = vmul.f32 %v8014_v63, %v1185_v13  ;;  %v1510_v27 = vmul.f32 %v1422_v32, %v1318_v56 }
 0x1dd   : > { %v1426_v53 = vmul.f32 0.5, %v1425_v30  ;;  %v1275_v11 = vmul.f32 %v1256_v41, %v8014_v63  ;;  %v1320_v30 = vsub.f32 %v7956_v8, %v8105_v62  ;;  %v1319_v62 = vsub.f32 %v7964_v15, %v8094_v21 }
 0x1de   : > { %v6873_v37 = vpop.eup %6872  ;;  %v8157_v12 = vadd.f32 1e-06, %v1305_v25  ;;  %v1291_v45 = vmul.f32 %v8155_v35, %v8155_v35  ;;  %v1529_v47 = vmul.f32 %v8038_v29, %v1510_v27  ;;  %vm1459_vm0 = vweird.f32 %v8147_v28 }
 0x1df   : > { %v1434_v39 = vmul.f32 %v6873_v37, %v8125_v5  ;;  %v1427_v43 = vsub.f32 1.5, %v1426_v53  ;;  %vm1440_vm10 = vweird.f32 %v6873_v37 }
 0x1e0   : > { %6876 = vrsqrt.f32 %v8157_v12  ;;  %v1548_v59 = vadd.f32 %v8048_v46, %v1529_v47  ;;  %v1307_v7 = vsub.f32 %v1275_v11, %v1291_v45  ;;  %vm1441_vm14 = vmor %vm1439_vm13, %vm1440_vm10  ;;  %vm1449_vm2 = vweird.f32 %v8157_v12 }
 0x1e1   : > { %v1435_v49 = vmul.f32 %v6873_v37, %v1434_v39  ;;  %v1187_v51 = vpop.xlane.xlu1 %1186  ;;  %v1428_v42 = vmul.f32 %v8135_v18, %v1427_v43 }
 0x1e2   : > { %v8166_v55 = vpop.eup %6874  ;;  %v8169_v57 = vmul.f32 %v8014_v63, %v1187_v51  ;;  %v1560_v23 = vpack.c.bf16 %v1548_v59, %v1547_v2  ;;  %v8192_v13 = vadd.f32 1e-06, %v1307_v7 }
 0x1e3   : > { %v1436_v60 = vmul.f32 0.5, %v1435_v49  ;;  %v1258_v61 = vpop.xlane.xlu0 %1257  ;;  %v1454_v19 = vmul.f32 %v8166_v55, %v8147_v28  ;;  %v1432_v5 = vsel %vm8183_vm12, %v8135_v18, %v1428_v42  ;;  %v1191_v41 = vpop.xlane.xlu2 %1190  ;;  %vm1460_vm1 = vweird.f32 %v8166_v55 }
 0x1e4   : > { %v1292_v9 = vmul.f32 %v8169_v57, %v8169_v57  ;;  %v1276_v17 = vmul.f32 %v1258_v61, %v8014_v63  ;;  %1656 = vmatmul.bf16.gmra.mxu2 %v1560_v23  ;;  %1789 = vmatmul.bf16.gmra.mxu3 %v1560_v23  ;;  %v1511_v11 = vmul.f32 %v1432_v5, %v1319_v62  ;;  %vm1461_vm4 = vmor %vm1459_vm0, %vm1460_vm1  ;;  %vm1469_vm5 = vweird.f32 %v8192_v13 }
 0x1e5   : > { %v1437_v0 = vsub.f32 1.5, %v1436_v60  ;;  %v1455_v38 = vmul.f32 %v8166_v55, %v1454_v19  ;;  %1922 = vmatmul.bf16.gmra.mxu0 %v1560_v23  ;;  %v8209_v43 = vmul.f32 %v8014_v63, %v1191_v41  ;;  %vm2044_vm1 = vcmask 523264  }
 0x1e6   : > { %v8180_v36 = vpop.eup %6876  ;;  %v1308_v4 = vsub.f32 %v1276_v17, %v1292_v9  ;;  %v1530_v60 = vmul.f32 %v8038_v29, %v1511_v11 }
 0x1e7   : > { %v1438_v16 = vmul.f32 %v6873_v37, %v1437_v0  ;;  %v1444_v56 = vmul.f32 %v8180_v36, %v8157_v12  ;;  %v1456_v45 = vmul.f32 0.5, %v1455_v38  ;;  %v1294_v49 = vmul.f32 %v8209_v43, %v8209_v43 }
 0x1e8   : > { %v8194_v32 = vadd.f32 1e-06, %v1308_v4  ;;  %vm1450_vm15 = vweird.f32 %v8180_v36  ;;  %v1549_v23 = vadd.f32 %v8048_v46, %v1530_v60 }
 0x1e9   : > { %v1445_v33 = vmul.f32 %v8180_v36, %v1444_v56  ;;  %v1189_v25 = vpop.xlane.xlu1 %1188  ;;  %v1442_v53 = vsel %vm1441_vm14, %v6873_v37, %v1438_v16  ;;  %v1457_v61 = vsub.f32 1.5, %v1456_v45  ;;  %vm1451_vm3 = vmor %vm1449_vm2, %vm1450_vm15 }
 0x1ea   : > { %6878 = vrsqrt.f32 %v8194_v32  ;;  %v1512_v27 = vmul.f32 %v1442_v53, %v1320_v30  ;;  %v8206_v52 = vmul.f32 %v8014_v63, %v1189_v25  ;;  %v1322_v53 = vsub.f32 %v7973_v26, %v8119_v1 }
 0x1eb   : > { %v1446_v39 = vmul.f32 0.5, %v1445_v33  ;;  %6880 = vrsqrt.f32 %v8192_v13  ;;  %v1260_v47 = vpop.xlane.xlu0 %1259  ;;  %v1458_v24 = vmul.f32 %v8166_v55, %v1457_v61  ;;  %v1321_v33 = vsub.f32 %v7968_v20, %v8123_v3 }
 0x1ec   : > { %v1531_v18 = vmul.f32 %v8038_v29, %v1512_v27  ;;  %v1293_v51 = vmul.f32 %v8206_v52, %v8206_v52  ;;  %v1277_v59 = vmul.f32 %v1260_v47, %v8014_v63  ;;  %vm1479_vm7 = vweird.f32 %v8194_v32 }
 0x1ed   : > { %v1447_v37 = vsub.f32 1.5, %v1446_v39  ;;  %v1462_v12 = vsel %vm1461_vm4, %v8166_v55, %v1458_v24 }
 0x1ee   : > { %v1550_v17 = vadd.f32 %v8048_v46, %v1531_v18  ;;  %v1309_v19 = vsub.f32 %v1277_v59, %v1293_v51 }
 0x1ef   : > { %v1448_v42 = vmul.f32 %v8180_v36, %v1447_v37 }
 0x1f0   : > { %v8212_v21 = vpop.eup %6878  ;;  %v1561_v30 = vpack.c.bf16 %v1550_v17, %v1549_v23  ;;  %v1341_v25 = vadd.f32 1e-06, %v1309_v19  ;;  %v1323_v17 = vsub.f32 %v7981_v34, %v8155_v35 }
 0x1f1   : > { %v1262_v2 = vpop.xlane.xlu1 %1261  ;;  %v8220_v7 = vpop.eup %6880  ;;  %v1474_v0 = vmul.f32 %v8212_v21, %v8194_v32  ;;  %v1452_v28 = vsel %vm1451_vm3, %v8180_v36, %v1448_v42  ;;  %v1514_v36 = vmul.f32 %v1462_v12, %v1322_v53  ;;  %vm1480_vm8 = vweird.f32 %v8212_v21 }
 0x1f2   : > { %v1278_v9 = vmul.f32 %v1262_v2, %v8014_v63  ;;  %v1464_v16 = vmul.f32 %v8220_v7, %v8192_v13  ;;  %v1513_v62 = vmul.f32 %v1452_v28, %v1321_v33  ;;  %vm1470_vm6 = vweird.f32 %v8220_v7  ;;  %vm1481_vm10 = vmor %vm1479_vm7, %vm1480_vm8 }
 0x1f3   : > { %v1475_v38 = vmul.f32 %v8212_v21, %v1474_v0  ;;  %v1533_v45 = vmul.f32 %v8038_v29, %v1514_v36  ;;  %vm1471_vm9 = vmor %vm1469_vm5, %vm1470_vm6  ;;  %v1324_v2 = vsub.f32 %v7990_v44, %v8169_v57  ;;  %vm1489_vm11 = vweird.f32 %v1341_v25 }
 0x1f4   : > { %v1310_v4 = vsub.f32 %v1278_v9, %v1294_v49  ;;  %1661 = vmatmul.bf16.gmra.mxu2 %v1561_v30  ;;  %1794 = vmatmul.bf16.gmra.mxu3 %v1561_v30  ;;  %v1465_v5 = vmul.f32 %v8220_v7, %v1464_v16  ;;  %v1532_v3 = vmul.f32 %v8038_v29, %v1513_v62 }
 0x1f5   : > { %1927 = vmatmul.bf16.gmra.mxu0 %v1561_v30  ;;  %v1476_v27 = vmul.f32 0.5, %v1475_v38  ;;  %v1552_v49 = vadd.f32 %v8048_v46, %v1533_v45  ;;  %v1326_v33 = vsub.f32 %v7994_v50, %v8209_v43  ;;  %v1325_v12 = vsub.f32 %v7999_v54, %v8206_v52 }
 0x1f6   : > { %v8235_v56 = vadd.f32 1e-06, %v1310_v4  ;;  %v1466_v39 = vmul.f32 0.5, %v1465_v5  ;;  %v1551_v1 = vadd.f32 %v8048_v46, %v1532_v3 }
 0x1f7   : > { %v1477_v41 = vsub.f32 1.5, %v1476_v27 }
 0x1f8   : > { %6882 = vrsqrt.f32 %v8235_v56  ;;  %v1467_v55 = vsub.f32 1.5, %v1466_v39  ;;  %v1562_v13 = vpack.c.bf16 %v1552_v49, %v1551_v1  ;;  %vm1499_vm13 = vweird.f32 %v8235_v56 }
 0x1f9   : > { %6884 = vrsqrt.f32 %v1341_v25  ;;  %v1478_v18 = vmul.f32 %v8212_v21, %v1477_v41 }
 0x1fa   : > { %v1468_v51 = vmul.f32 %v8220_v7, %v1467_v55 }
 0x1fb   : > { %v1482_v61 = vsel %vm1481_vm10, %v8212_v21, %v1478_v18 }
 0x1fc   : > { %v1472_v32 = vsel %vm1471_vm9, %v8220_v7, %v1468_v51  ;;  %v1516_v42 = vmul.f32 %v1482_v61, %v1324_v2 }
 0x1fd   : > { %v1515_v19 = vmul.f32 %v1472_v32, %v1323_v17 }
 0x1fe   : > { %v6883_v11 = vpop.eup %6882  ;;  %v1535_v23 = vmul.f32 %v8038_v29, %v1516_v42 }
 0x1ff   : > { %v6885_v47 = vpop.eup %6884  ;;  %v1494_v37 = vmul.f32 %v6883_v11, %v8235_v56  ;;  %v1534_v21 = vmul.f32 %v8038_v29, %v1515_v19  ;;  %vm1500_vm14 = vweird.f32 %v6883_v11 }
 0x200   : > { %v1484_v59 = vmul.f32 %v6885_v47, %v1341_v25  ;;  %vm1490_vm12 = vweird.f32 %v6885_v47  ;;  %v1554_v57 = vadd.f32 %v8048_v46, %v1535_v23  ;;  %vm1501_vm0 = vmor %vm1499_vm13, %vm1500_vm14 }
 0x201   : > { %v1495_v60 = vmul.f32 %v6883_v11, %v1494_v37  ;;  %v1553_v35 = vadd.f32 %v8048_v46, %v1534_v21  ;;  %vm1491_vm15 = vmor %vm1489_vm11, %vm1490_vm12 }
 0x202   : > { %v1485_v9 = vmul.f32 %v6885_v47, %v1484_v59 }
 0x203   : > { %v1496_v0 = vmul.f32 0.5, %v1495_v60  ;;  %v1563_v38 = vpack.c.bf16 %v1554_v57, %v1553_v35  ;;  %v8327_v35 = vld [vmem:[%s11234_s8 + $0x1] ss:$0 sm:$0xff] }
 0x204   : > { %1666 = vmatmul.bf16.gmra.mxu2 %v1562_v13  ;;  %1799 = vmatmul.bf16.gmra.mxu3 %v1562_v13  ;;  %v1486_v4 = vmul.f32 0.5, %v1485_v9 }
 0x205   : > { %1932 = vmatmul.bf16.gmra.mxu0 %v1562_v13  ;;  %v1497_v24 = vsub.f32 1.5, %v1496_v0 }
 0x206   : > { %v1487_v16 = vsub.f32 1.5, %v1486_v4 }
 0x207   : > { %v1498_v7 = vmul.f32 %v6883_v11, %v1497_v24 }
 0x208   : > { %v1488_v30 = vmul.f32 %v6885_v47, %v1487_v16 }
 0x209   : > { %v1502_v28 = vsel %vm1501_vm0, %v6883_v11, %v1498_v7 }
 0x20a   : > { %v1492_v25 = vsel %vm1491_vm15, %v6885_v47, %v1488_v30  ;;  %v1518_v5 = vmul.f32 %v1502_v28, %v1326_v33 }
 0x20b   : > { %v1517_v56 = vmul.f32 %v1492_v25, %v1325_v12 }
 0x20c   : > { %v1537_v53 = vmul.f32 %v8038_v29, %v1518_v5 }
 0x20d   : > { %v1536_v62 = vmul.f32 %v8038_v29, %v1517_v56 }
 0x20e   : > { %v1556_v27 = vadd.f32 %v8048_v46, %v1537_v53 }
 0x20f   : > { %v1555_v36 = vadd.f32 %v8048_v46, %v1536_v62 }
 0x211   : > { %v1564_v39 = vpack.c.bf16 %v1556_v27, %v1555_v36 }
 0x214   : > { %1671 = vmatmul.bf16.gmra.mxu2 %v1563_v38  ;;  %1804 = vmatmul.bf16.gmra.mxu3 %v1563_v38 }
 0x215   : > { %1937 = vmatmul.bf16.gmra.mxu0 %v1563_v38 }
 0x224   : > { %1676 = vmatmul.bf16.gmra.mxu2 %v1564_v39  ;;  %1809 = vmatmul.bf16.gmra.mxu3 %v1564_v39 }
 0x225   : > { %1942 = vmatmul.bf16.gmra.mxu0 %v1564_v39 }
 0x232   : > { %v8276_v43 = vpop.f32.mrf.mxu0 }
 0x237   : > { %v8278_v3 = vpop.f32.mrf.mxu2  ;;  %v8280_v41 = vpop.f32.mrf.mxu3 }
 0x23a   : > { %v8282_v52 = vpop.f32.mrf.mxu0 }
 0x23f   : > { %v8284_v11 = vpop.f32.mrf.mxu2  ;;  %v8286_v45 = vpop.f32.mrf.mxu3 }
 0x242   : > { %v8288_v29 = vpop.f32.mrf.mxu0 }
 0x247   : > { %v1647_v55 = vpop.f32.mrf.mxu2  ;;  %v1780_v46 = vpop.f32.mrf.mxu3 }
 0x248   : > { %v1781_v62 = vadd.f32 %v8327_v35, %v1780_v46 }
 0x24a   : > { %v8290_v47 = vpop.f32.mrf.mxu0 }
 0x24f   : > { %v1649_v1 = vpop.f32.mrf.mxu2  ;;  %v1782_v18 = vpop.f32.mrf.mxu3 }
 0x250   : > { %v1783_v5 = vadd.f32 %v8327_v35, %v1782_v18 }
 0x252   : > { %v8292_v37 = vpop.f32.mrf.mxu0  ;;  %v1818_v39 = vpack.c.bf16 %v1783_v5, %v1783_v5 }
 0x257   : > { %v8294_v49 = vpop.f32.mrf.mxu2  ;;  %v8296_v51 = vpop.f32.mrf.mxu3 }
 0x25a   : > { %v8298_v59 = vpop.f32.mrf.mxu0 }
 0x25f   : > { %v8300_v13 = vpop.f32.mrf.mxu2  ;;  %v8302_v60 = vpop.f32.mrf.mxu3 }
 0x262   : > { %v8304_v61 = vpop.f32.mrf.mxu0 }
 0x267   : > { %v8306_v2 = vpop.f32.mrf.mxu2  ;;  %v1790_v32 = vpop.f32.mrf.mxu3 }
 0x26a   : > { %v8308_v9 = vpop.f32.mrf.mxu0 }
 0x26f   : > { %v8310_v17 = vpop.f32.mrf.mxu2  ;;  %v1792_v42 = vpop.f32.mrf.mxu3 }
 0x272   : > { %v8312_v0 = vpop.f32.mrf.mxu0 }
 0x277   : > { %v1662_v19 = vpop.f32.mrf.mxu2  ;;  %v8314_v4 = vpop.f32.mrf.mxu3 }
 0x27a   : > { %v8316_v23 = vpop.f32.mrf.mxu0 }
 0x27f   : > { %v1664_v24 = vpop.f32.mrf.mxu2  ;;  %v8318_v21 = vpop.f32.mrf.mxu3 }
 0x282   : > { %v8320_v16 = vpop.f32.mrf.mxu0 }
 0x287   : > { %v8322_v57 = vpop.f32.mrf.mxu2  ;;  %v1800_v7 = vpop.f32.mrf.mxu3 }
 0x288   : > { %v1801_v38 = vadd.f32 %v8327_v35, %v1800_v7  ;;  %v8340_v7 = vld [vmem:[%s11234_s8] ss:$0 sm:$0xff] }
 0x289   : > { %v1650_v46 = vadd.f32 %v8340_v7, %v1649_v1  ;;  %v1793_v1 = vadd.f32 %v8327_v35, %v1792_v42 }
 0x28a   : > { %v1935_v30 = vpop.f32.mrf.mxu0  ;;  %v1825_v25 = vpack.c.bf16 %v1801_v38, %v1801_v38  ;;  %v1817_v38 = vpack.c.bf16 %v1781_v62, %v1781_v62 }
 0x28c   : > { %v2030_v27 = vunpack.c.l.b16 %v1825_v25  ;;  %v2022_v5 = vunpack.c.l.b16 %v1817_v38 }
 0x28f   : > { %v8330_v28 = vpop.f32.mrf.mxu2  ;;  %v1802_v33 = vpop.f32.mrf.mxu3 }
 0x290   : > { %v1803_v12 = vadd.f32 %v8327_v35, %v1802_v33  ;;  %v2023_v33 = vunpack.c.l.b16 %v1818_v39  ;;  %v1665_v39 = vadd.f32 %v8340_v7, %v1664_v24 }
 0x292   : > { %v1826_v56 = vpack.c.bf16 %v1803_v12, %v1803_v12  ;;  %v1938_v53 = vpop.f32.mrf.mxu0  ;;  %v1648_v12 = vadd.f32 %v8340_v7, %v1647_v55  ;;  %v1691_v42 = vpack.c.bf16 %v1665_v39, %v1665_v39 }
 0x294   : > { %v2031_v36 = vunpack.c.l.b16 %v1826_v56  ;;  %v1684_v44 = vpack.c.bf16 %v1648_v12, %v1648_v12  ;;  %v1989_v39 = vunpack.c.l.b16 %v1691_v42 }
 0x296   : > { %v8335_v50 = vpack.c.b16 %v2031_v36, %v2030_v27  ;;  %v1685_v27 = vpack.c.bf16 %v1650_v46, %v1650_v46  ;;  %v8349_v36 = vpack.c.b16 %v2023_v33, %v2022_v5  ;;  %v1982_v20 = vunpack.c.l.b16 %v1684_v44 }
 0x297   : > { %v1805_v54 = vpop.f32.mrf.mxu3  ;;  %v8344_v18 = vpop.f32.mrf.mxu2  ;;  %v1791_v46 = vadd.f32 %v8327_v35, %v1790_v32  ;;  %v1663_v33 = vadd.f32 %v8340_v7, %v1662_v19  ;;  %v1776_v44 = vadd.f32 %v8327_v35, %v8280_v41 }
 0x298   : > { %2481 = vrot.lane.b32.xlu1 %v8335_v50, %s7582_s2  ;;  %v1806_v56 = vadd.f32 %v8327_v35, %v1805_v54  ;;  %v1983_v63 = vunpack.c.l.b16 %v1685_v27  ;;  %v1822_v27 = vpack.c.bf16 %v1793_v1, %v1793_v1 }
 0x299   : > { %v1821_v19 = vpack.c.bf16 %v1791_v46, %v1791_v46 }
 0x29a   : > { %v1940_v25 = vpop.f32.mrf.mxu0  ;;  %v1827_v34 = vpack.c.bf16 %v1806_v56, %v1806_v56  ;;  %v8363_v56 = vld [vmem:[%s11234_s8 + $0x2] ss:$0 sm:$0xff]  ;;  %v2027_v1 = vunpack.c.l.b16 %v1822_v27 }
 0x29b   : > { %v1936_v41 = vadd.f32 %v8363_v56, %v1935_v30  ;;  %v1939_v46 = vadd.f32 %v8363_v56, %v1938_v53  ;;  %v1934_v15 = vadd.f32 %v8363_v56, %v8320_v16 }
 0x29c   : > { %v2032_v12 = vunpack.c.l.b16 %v1827_v34  ;;  %v1690_v34 = vpack.c.bf16 %v1663_v33, %v1663_v33 }
 0x29d   : > { %v1959_v30 = vpack.c.bf16 %v1936_v41, %v1936_v41  ;;  %v1960_v53 = vpack.c.bf16 %v1939_v46, %v1939_v46  ;;  %v1958_v48 = vpack.c.bf16 %v1934_v15, %v1934_v15  ;;  %v1926_v15 = vadd.f32 %v8363_v56, %v8308_v9 }
 0x29e   : > { %v1988_v8 = vunpack.c.l.b16 %v1690_v34 }
 0x29f   : > { %v1807_v62 = vpop.f32.mrf.mxu3  ;;  %v8356_v54 = vpop.f32.mrf.mxu2  ;;  %v2370_v46 = vunpack.c.l.b16 %v1960_v53 }
 0x2a0   : > { %v1808_v26 = vadd.f32 %v8327_v35, %v1807_v62  ;;  %2473 = vrot.lane.b32.xlu1 %v8349_v36, %s7582_s2  ;;  %v8365_v62 = vpack.c.b16 %v1983_v63, %v1982_v20  ;;  %v1778_v20 = vadd.f32 %v8327_v35, %v8286_v45  ;;  %v1941_v63 = vadd.f32 %v8363_v56, %v1940_v25 }
 0x2a1   : > { %v8387_v58 = vpack.c.b16 %v1989_v39, %v1988_v8  ;;  %v1931_v8 = vadd.f32 %v8363_v56, %v8316_v23  ;;  %v2369_v39 = vunpack.c.l.b16 %v1959_v30  ;;  %v1798_v23 = vadd.f32 %v8327_v35, %v8318_v21 }
 0x2a2   : > { %v1828_v55 = vpack.c.bf16 %v1808_v26, %v1808_v26  ;;  %v1943_v38 = vpop.f32.mrf.mxu0  ;;  %v1816_v10 = vpack.c.bf16 %v1778_v20, %v1778_v20  ;;  %v1961_v25 = vpack.c.bf16 %v1941_v63, %v1941_v63 }
 0x2a3   : > { %v1944_v32 = vadd.f32 %v8363_v56, %v1943_v38  ;;  %v1815_v38 = vpack.c.bf16 %v1776_v44, %v1776_v44 }
 0x2a4   : > { %v2033_v5 = vunpack.c.l.b16 %v1828_v55  ;;  %v2371_v20 = vunpack.c.l.b16 %v1961_v25 }
 0x2a5   : > { %v1962_v33 = vpack.c.bf16 %v1944_v32, %v1944_v32  ;;  %v2020_v34 = vunpack.c.l.b16 %v1815_v38  ;;  %v1653_v38 = vadd.f32 %v8340_v7, %v8294_v49 }
 0x2a6   : > { %v8367_v26 = vpack.c.b16 %v2033_v5, %v2032_v12  ;;  %v2026_v5 = vunpack.c.l.b16 %v1821_v19  ;;  %v8415_v49 = vpack.c.b16 %v2371_v20, %v2370_v46  ;;  %v1670_v20 = vadd.f32 %v8340_v7, %v8330_v28 }
 0x2a7   : > { %v1810_v24 = vpop.f32.mrf.mxu3  ;;  %v8385_v27 = vpop.f32.mrf.mxu2  ;;  %v2372_v32 = vunpack.c.l.b16 %v1962_v33  ;;  %v2368_v33 = vunpack.c.l.b16 %v1958_v48  ;;  %v1786_v28 = vadd.f32 %v8327_v35, %v8296_v51 }
 0x2a8   : > { %2457 = vrot.lane.b32.xlu1 %v8365_v62, %s7582_s2  ;;  %2483 = vrot.lane.b32.xlu0 %v8367_v26, %s7582_s2  ;;  %v1811_v45 = vadd.f32 %v8327_v35, %v1810_v24  ;;  %v8389_v44 = vpack.c.b16 %v2027_v1, %v2026_v5  ;;  %v2021_v24 = vunpack.c.l.b16 %v1816_v10  ;;  %v1655_v1 = vadd.f32 %v8340_v7, %v8300_v13 }
 0x2a9   : > { %v1929_v10 = vadd.f32 %v8363_v56, %v8312_v0  ;;  %v1924_v13 = vadd.f32 %v8363_v56, %v8304_v61  ;;  %v1796_v5 = vadd.f32 %v8327_v35, %v8314_v4  ;;  %v2379_v21 = vpack.c.b16 %v2369_v39, %v2368_v33 }
 0x2aa   : > { %v1945_v55 = vpop.f32.mrf.mxu0  ;;  %v1829_v40 = vpack.c.bf16 %v1811_v45, %v1811_v45  ;;  %v1957_v45 = vpack.c.bf16 %v1931_v8, %v1931_v8  ;;  %v8417_v25 = vpack.c.b16 %v2021_v24, %v2020_v34  ;;  %v1687_v0 = vpack.c.bf16 %v1655_v1, %v1655_v1 }
 0x2ab   : > { %v1946_v12 = vadd.f32 %v8363_v56, %v1945_v55  ;;  %v1956_v53 = vpack.c.bf16 %v1929_v10, %v1929_v10  ;;  %v1954_v48 = vpack.c.bf16 %v1924_v13, %v1924_v13  ;;  %v1916_v4 = vadd.f32 %v8363_v56, %v8290_v47 }
 0x2ac   : > { %v1823_v34 = vpack.c.bf16 %v1796_v5, %v1796_v5  ;;  %v1985_v24 = vunpack.c.l.b16 %v1687_v0  ;;  %v1788_v47 = vadd.f32 %v8327_v35, %v8302_v60  ;;  %v1668_v10 = vadd.f32 %v8340_v7, %v8322_v57 }
 0x2ad   : > { %v1963_v42 = vpack.c.bf16 %v1946_v12, %v1946_v12  ;;  %v2034_v12 = vunpack.c.l.b16 %v1829_v40  ;;  %v1686_v40 = vpack.c.bf16 %v1653_v38, %v1653_v38  ;;  %v2366_v39 = vunpack.c.l.b16 %v1956_v53 }
 0x2ae   : > { %v2364_v38 = vunpack.c.l.b16 %v1954_v48  ;;  %v2028_v13 = vunpack.c.l.b16 %v1823_v34  ;;  %v1693_v33 = vpack.c.bf16 %v1670_v20, %v1670_v20  ;;  %v1914_v5 = vadd.f32 %v8363_v56, %v8288_v29 }
 0x2af   : > { %v2373_v55 = vunpack.c.l.b16 %v1963_v42  ;;  %v1812_v19 = vpop.f32.mrf.mxu3  ;;  %v1955_v42 = vpack.c.bf16 %v1926_v15, %v1926_v15  ;;  %v1919_v15 = vadd.f32 %v8363_v56, %v8292_v37  ;;  %v1820_v57 = vpack.c.bf16 %v1788_v47, %v1788_v47 }
 0x2b0   : > { %v1813_v16 = vadd.f32 %v8327_v35, %v1812_v19  ;;  %2463 = vrot.lane.b32.xlu1 %v8387_v58, %s7582_s2  ;;  %2477 = vrot.lane.b32.xlu0 %v8389_v44, %s7582_s2  ;;  %v1921_v19 = vadd.f32 %v8363_v56, %v8298_v59  ;;  %v1692_v0 = vpack.c.bf16 %v1668_v10, %v1668_v10  ;;  %v2088_v51 = vsel %vm2044_vm1, %v8367_v26, 0 }
 0x2b1   : > { %v8398_v63 = vpack.c.b16 %v2373_v55, %v2372_v32  ;;  %v1824_v32 = vpack.c.bf16 %v1798_v23, %v1798_v23  ;;  %v1679_v55 = vpop.f32.mrf.mxu2  ;;  %v2365_v8 = vunpack.c.l.b16 %v1955_v42  ;;  %v1678_v23 = vadd.f32 %v8340_v7, %v8385_v27 }
 0x2b2   : > { %v1830_v41 = vpack.c.bf16 %v1813_v16, %v1813_v16  ;;  %v2367_v16 = vunpack.c.l.b16 %v1957_v45  ;;  %v1680_v1 = vadd.f32 %v8340_v7, %v1679_v55  ;;  %v1953_v46 = vpack.c.bf16 %v1921_v19, %v1921_v19 }
 0x2b3   : > { %2390 = vmatpush.bf16.msra.mxu2 %v8398_v63  ;;  %v2029_v59 = vunpack.c.l.b16 %v1824_v32  ;;  %v1952_v45 = vpack.c.bf16 %v1919_v15, %v1919_v15  ;;  %v1696_v42 = vpack.c.bf16 %v1678_v23, %v1678_v23  ;;  %v1911_v35 = vadd.f32 %v8363_v56, %v8282_v52 }
 0x2b4   : > { %v2035_v9 = vunpack.c.l.b16 %v1830_v41  ;;  %v1984_v41 = vunpack.c.l.b16 %v1686_v40  ;;  %v8442_v37 = vpack.c.b16 %v2367_v16, %v2366_v39  ;;  %v1697_v60 = vpack.c.bf16 %v1680_v1, %v1680_v1 }
 0x2b5   : > { %v2040_v27 = vpack.c.b16 %v2029_v59, %v2028_v13  ;;  %v1819_v29 = vpack.c.bf16 %v1786_v28, %v1786_v28  ;;  %v1909_v53 = vadd.f32 %v8363_v56, %v8276_v43  ;;  %v1991_v32 = vunpack.c.l.b16 %v1693_v33 }
 0x2b6   : > { %v2043_v30 = vpack.c.b16 %v2035_v9, %v2034_v12  ;;  %v2377_v12 = vpack.c.b16 %v2365_v8, %v2364_v38  ;;  %v8444_v9 = vpack.c.b16 %v1985_v24, %v1984_v41  ;;  %v1995_v55 = vunpack.c.l.b16 %v1697_v60 }
 0x2b7   : > { %2391 = vmatpush.bf16.msra.mxu2 %v8415_v49  ;;  %v1645_v40 = vadd.f32 %v8340_v7, %v8284_v11  ;;  %v1950_v48 = vpack.c.bf16 %v1914_v5, %v1914_v5  ;;  %v2025_v26 = vunpack.c.l.b16 %v1820_v57  ;;  %v1643_v52 = vadd.f32 %v8340_v7, %v8278_v3 }
 0x2b8   : > { %2778 = vrot.lane.b32.xlu1 %v2379_v21, %s7582_s2  ;;  %2471 = vrot.lane.b32.xlu0 %v8417_v25, %s7582_s2  ;;  %v2091_v61 = vsel %vm2044_vm1, %v2043_v30, 0  ;;  %v1994_v19 = vunpack.c.l.b16 %v1696_v42  ;;  %v1949_v34 = vpack.c.bf16 %v1911_v35, %v1911_v35  ;;  %v2024_v24 = vunpack.c.l.b16 %v1819_v29 }
 0x2b9   : > { %2485 = vrot.lane.b32.xlu2 %v2043_v30, %s7582_s2  ;;  %2093 = vmatpush.bf16.xpose.msrb.mxu1 %v2091_v61  ;;  %v2363_v30 = vunpack.c.l.b16 %v1953_v46  ;;  %v2362_v61 = vunpack.c.l.b16 %v1952_v45  ;;  %v1948_v20 = vpack.c.bf16 %v1909_v53, %v1909_v53  ;;  %v1683_v11 = vpack.c.bf16 %v1645_v40, %v1645_v40 }
 0x2ba   : > { %v8467_v56 = vpack.c.b16 %v1995_v55, %v1994_v19  ;;  %v2360_v1 = vunpack.c.l.b16 %v1950_v48  ;;  %v2038_v15 = vpack.c.b16 %v2025_v26, %v2024_v24  ;;  %v2085_v3 = vsel %vm2044_vm1, %v8335_v50, 0 }
 0x2bb   : > { %2392 = vmatpush.bf16.msra.mxu2 %v2379_v21  ;;  %v1951_v21 = vpack.c.bf16 %v1916_v4, %v1916_v4  ;;  %v1990_v4 = vunpack.c.l.b16 %v1692_v0  ;;  %v8463_v8 = vpack.c.b16 %v2363_v30, %v2362_v61  ;;  %v1682_v47 = vpack.c.bf16 %v1643_v52, %v1643_v52 }
 0x2bc   : > { %v2359_v39 = vunpack.c.l.b16 %v1949_v34  ;;  %v2358_v41 = vunpack.c.l.b16 %v1948_v20  ;;  %v1981_v38 = vunpack.c.l.b16 %v1683_v11  ;;  %v1660_v10 = vadd.f32 %v8340_v7, %v8310_v17 }
 0x2bd   : > { %v2361_v16 = vunpack.c.l.b16 %v1951_v21  ;;  %v8465_v43 = vpack.c.b16 %v1991_v32, %v1990_v4  ;;  %v1980_v23 = vunpack.c.l.b16 %v1682_v47  ;;  %v1658_v28 = vadd.f32 %v8340_v7, %v8306_v2 }
 0x2be   : > { %v8484_v46 = vpack.c.b16 %v2359_v39, %v2358_v41  ;;  %v1689_v50 = vpack.c.bf16 %v1660_v10, %v1660_v10  ;;  %v2082_v33 = vsel %vm2044_vm1, %v2040_v27, 0  ;;  %v1673_v5 = vadd.f32 %v8340_v7, %v8344_v18  ;;  %v2159_v41 = vld [vmem:[#allocation6 + $0x8] sm:$0xff] }
 0x2bf   : > { %2393 = vmatpush.bf16.msra.mxu2 %v8442_v37  ;;  %v8477_v59 = vpack.c.b16 %v2361_v16, %v2360_v1  ;;  %v1996_v13 = vpack.c.b16 %v1981_v38, %v1980_v23  ;;  %v1688_v60 = vpack.c.bf16 %v1658_v28, %v1658_v28  ;;  %v2070_v18 = vsel %vm2044_vm1, %v8417_v25, 0 }
 0x2c0   : > { %2774 = vrot.lane.b32.xlu1 %v2377_v12, %s7582_s2  ;;  %2459 = vrot.lane.b32.xlu0 %v8444_v9, %s7582_s2  ;;  %v1987_v17 = vunpack.c.l.b16 %v1689_v50 }
 0x2c1   : > { %2479 = vrot.lane.b32.xlu2 %v2040_v27, %s7582_s2  ;;  %2094 = vmatpush.bf16.xpose.msrb.mxu1 %v2088_v51  ;;  %v1986_v2 = vunpack.c.l.b16 %v1688_v60  ;;  %v1694_v27 = vpack.c.bf16 %v1673_v5, %v1673_v5 }
 0x2c3   : > { %2394 = vmatpush.bf16.msra.mxu2 %v2377_v12  ;;  %v1675_v12 = vadd.f32 %v8340_v7, %v8356_v54  ;;  %v1999_v57 = vpack.c.b16 %v1987_v17, %v1986_v2  ;;  %v1992_v42 = vunpack.c.l.b16 %v1694_v27  ;;  %v2076_v54 = vsel %vm2044_vm1, %v2038_v15, 0 }
 0x2c4   : > { %v2073_v7 = vsel %vm2044_vm1, %v8349_v36, 0 }
 0x2c5   : > { %v1695_v45 = vpack.c.bf16 %v1675_v12, %v1675_v12 }
 0x2c7   : > { %2395 = vmatpush.bf16.msra.mxu2 %v8463_v8  ;;  %v1993_v0 = vunpack.c.l.b16 %v1695_v45 }
 0x2c8   : > { %2465 = vrot.lane.b32.xlu0 %v8465_v43, %s7582_s2  ;;  %2469 = vrot.lane.b32.xlu1 %v8467_v56, %s7582_s2 }
 0x2c9   : > { %2475 = vrot.lane.b32.xlu2 %v2038_v15, %s7582_s2  ;;  %2095 = vmatpush.bf16.xpose.msrb.mxu1 %v2085_v3  ;;  %v2002_v51 = vpack.c.b16 %v1993_v0, %v1992_v42  ;;  %v2158_v15 = vld [vmem:[#allocation6] sm:$0xff] }
 0x2cb   : > { %2396 = vmatpush.bf16.msra.mxu2 %v8477_v59 }
 0x2cf   : > { %2397 = vmatpush.bf16.msra.mxu2 %v8484_v46 }
 0x2d0   : > { %2782 = vrot.lane.b32.xlu0 %v8398_v63, %s7582_s2  ;;  %v2079_v63 = vsel %vm2044_vm1, %v8389_v44, 0 }
 0x2d1   : > { %2455 = vrot.lane.b32.xlu2 %v1996_v13, %s7582_s2  ;;  %2096 = vmatpush.bf16.xpose.msrb.mxu1 %v2082_v33  ;;  %v2161_v33 = vld [vmem:[#allocation6 + $0x18] sm:$0xff] }
 0x2d8   : > { %2776 = vrot.lane.b32.xlu0 %v8442_v37, %s7582_s2 }
 0x2d9   : > { %2461 = vrot.lane.b32.xlu2 %v1999_v57, %s7582_s2  ;;  %2097 = vmatpush.bf16.xpose.msrb.mxu1 %v2079_v63 }
 0x2e1   : > { %2467 = vrot.lane.b32.xlu2 %v2002_v51, %s7582_s2  ;;  %2098 = vmatpush.bf16.xpose.msrb.mxu1 %v2076_v54 }
 0x2e9   : > { %2780 = vrot.lane.b32.xlu2 %v8415_v49, %s7582_s2  ;;  %2099 = vmatpush.bf16.xpose.msrb.mxu1 %v2073_v7 }
 0x2f1   : > { %2100 = vmatpush.bf16.xpose.msrb.mxu1 %v2070_v18 }
 0x2f8   : > { %6358 = vmatmul.msk.bf16.vlgmr.msrb.gmra.mxu1 %vm2044_vm1, %v1996_v13 }
 0x308   : > { %6359 = vmatmul.msk.bf16.gmra.mxu1 %vm2044_vm1, %v8365_v62 }
 0x30a   : > { %v2482_v21 = vpop.permute.xlu1 %2481 }
 0x30b   : > { %v2527_v30 = vsel %vm2044_vm1, %v2482_v21, 0 }
 0x312   : > { %v2474_v62 = vpop.permute.xlu1 %2473 }
 0x313   : > { %v2486_v44 = vpop.permute.xlu2 %2485  ;;  %v2515_v16 = vsel %vm2044_vm1, %v2474_v62, 0 }
 0x314   : > { %v2533_v37 = vsel %vm2044_vm1, %v2486_v44, 0 }
 0x315   : > { %2535 = vmatpush.bf16.xpose.msra.mxu3 %v2533_v37 }
 0x318   : > { %6360 = vmatmul.msk.bf16.gmra.mxu1 %vm2044_vm1, %v8444_v9 }
 0x31a   : > { %v2484_v36 = vpop.permute.xlu0 %2483  ;;  %v2458_v48 = vpop.permute.xlu1 %2457 }
 0x31b   : > { %v2480_v35 = vpop.permute.xlu2 %2479  ;;  %v2530_v49 = vsel %vm2044_vm1, %v2484_v36, 0 }
 0x31c   : > { %v2524_v55 = vsel %vm2044_vm1, %v2480_v35, 0  ;;  %v2163_v35 = vld [vmem:[#allocation6 + $0x28] sm:$0xff] }
 0x31d   : > { %2536 = vmatpush.bf16.xpose.msra.mxu3 %v2530_v49 }
 0x322   : > { %v2478_v25 = vpop.permute.xlu0 %2477  ;;  %v2464_v19 = vpop.permute.xlu1 %2463 }
 0x323   : > { %v2476_v29 = vpop.permute.xlu2 %2475  ;;  %v2521_v61 = vsel %vm2044_vm1, %v2478_v25, 0 }
 0x324   : > { %v2518_v4 = vsel %vm2044_vm1, %v2476_v29, 0 }
 0x325   : > { %2537 = vmatpush.bf16.xpose.msra.mxu3 %v2527_v30 }
 0x328   : > { %6361 = vmatmul.msk.bf16.gmra.mxu1 %vm2044_vm1, %v1999_v57 }
 0x32a   : > { %v2472_v53 = vpop.permute.xlu0 %2471  ;;  %v2779_v20 = vpop.permute.xlu1 %2778 }
 0x32b   : > { %v2456_v32 = vpop.permute.xlu2 %2455 }
 0x32d   : > { %2538 = vmatpush.bf16.xpose.msra.mxu3 %v2524_v55 }
 0x332   : > { %v2460_v9 = vpop.permute.xlu0 %2459  ;;  %v2775_v1 = vpop.permute.xlu1 %2774 }
 0x333   : > { %v2462_v40 = vpop.permute.xlu2 %2461 }
 0x335   : > { %2539 = vmatpush.bf16.xpose.msra.mxu3 %v2521_v61 }
 0x338   : > { %6362 = vmatmul.msk.bf16.gmra.mxu1 %vm2044_vm1, %v8387_v58  ;;  %v2512_v58 = vsel %vm2044_vm1, %v2472_v53, 0  ;;  %v2162_v53 = vld [vmem:[#allocation6 + $0x20] sm:$0xff] }
 0x33a   : > { %v2466_v26 = vpop.permute.xlu0 %2465  ;;  %v2470_v12 = vpop.permute.xlu1 %2469 }
 0x33b   : > { %v2468_v52 = vpop.permute.xlu2 %2467 }
 0x33d   : > { %2540 = vmatpush.bf16.xpose.msra.mxu3 %v2518_v4 }
 0x342   : > { %v2783_v34 = vpop.permute.xlu0 %2782 }
 0x343   : > { %2792 = vmatpush.bf16.msra.mxu0 %v2783_v34  ;;  %v2781_v24 = vpop.permute.xlu2 %2780 }
 0x345   : > { %2541 = vmatpush.bf16.xpose.msra.mxu3 %v2515_v16 }
 0x347   : > { %2793 = vmatpush.bf16.msra.mxu0 %v2781_v24  ;;  %v8591_v24 = vld [vmem:[#allocation6 + $0x40] sm:$0xff] }
 0x348   : > { %6363 = vmatmul.msk.bf16.gmra.mxu1 %vm2044_vm1, %v8465_v43 }
 0x34a   : > { %v2777_v11 = vpop.permute.xlu0 %2776 }
 0x34b   : > { %2794 = vmatpush.bf16.msra.mxu0 %v2779_v20 }
 0x34d   : > { %2542 = vmatpush.bf16.xpose.msra.mxu3 %v2512_v58 }
 0x34f   : > { %2795 = vmatpush.bf16.msra.mxu0 %v2777_v11 }
 0x353   : > { %2796 = vmatpush.bf16.msra.mxu0 %v2775_v1 }
 0x354   : > { %6366 = vmatmul.msk.bf16.vlgmr.msra.gmra.mxu3 %vm2044_vm1, %v2456_v32 }
 0x358   : > { %6364 = vmatmul.msk.bf16.gmra.mxu1 %vm2044_vm1, %v2002_v51 }
 0x364   : > { %6367 = vmatmul.msk.bf16.gmra.mxu3 %vm2044_vm1, %v2458_v48 }
 0x368   : > { %6365 = vmatmul.msk.bf16.gmra.mxu1 %vm2044_vm1, %v8467_v56  ;;  %v2160_v56 = vld [vmem:[#allocation6 + $0x10] sm:$0xff] }
 0x374   : > { %6368 = vmatmul.msk.bf16.gmra.mxu3 %vm2044_vm1, %v2460_v9  ;;  %v8573_v9 = vld [vmem:[#allocation6 + $0x38] sm:$0xff] }
 0x375   : > { %v2102_v43 = vpop.f32.mrf.mxu1 }
 0x376   : > { %v2142_v3 = vmul.f32 0.125, %v2102_v43 }
 0x378   : > { %v8532_v47 = vadd.f32 %v2158_v15, %v2142_v3 }
 0x37a   : > { %2190 = vmax.xlane.f32.xlu2 %v8532_v47 }
 0x37d   : > { %v2104_v39 = vpop.f32.mrf.mxu1 }
 0x37e   : > { %v2143_v38 = vmul.f32 0.125, %v2104_v39 }
 0x380   : > { %v8535_v10 = vadd.f32 %v2159_v41, %v2143_v38 }
 0x382   : > { %2192 = vmax.xlane.f32.xlu1 %v8535_v10 }
 0x384   : > { %6369 = vmatmul.msk.bf16.gmra.mxu3 %vm2044_vm1, %v2462_v40 }
 0x385   : > { %v2107_v23 = vpop.f32.mrf.mxu1 }
 0x386   : > { %v2144_v28 = vmul.f32 0.125, %v2107_v23 }
 0x388   : > { %v8539_v50 = vadd.f32 %v2160_v56, %v2144_v28 }
 0x38a   : > { %2194 = vmax.xlane.f32.xlu1 %v8539_v50 }
 0x38d   : > { %v2109_v13 = vpop.f32.mrf.mxu1 }
 0x38e   : > { %v2145_v60 = vmul.f32 0.125, %v2109_v13 }
 0x390   : > { %v8542_v17 = vadd.f32 %v2161_v33, %v2145_v60 }
 0x392   : > { %2196 = vmax.xlane.f32.xlu0 %v8542_v17 }
 0x394   : > { %6370 = vmatmul.msk.bf16.gmra.mxu3 %vm2044_vm1, %v2464_v19  ;;  %v2164_v19 = vld [vmem:[#allocation6 + $0x30] sm:$0xff] }
 0x395   : > { %v2112_v29 = vpop.f32.mrf.mxu1 }
 0x396   : > { %v2146_v58 = vmul.f32 0.125, %v2112_v29 }
 0x398   : > { %v8597_v11 = vadd.f32 %v2162_v53, %v2146_v58 }
 0x39d   : > { %v2114_v55 = vpop.f32.mrf.mxu1 }
 0x3a4   : > { %6371 = vmatmul.msk.bf16.gmra.mxu3 %vm2044_vm1, %v2466_v26  ;;  %v8582_v26 = vld [vmem:[#allocation6 + $0x48] sm:$0xff] }
 0x3a5   : > { %v2117_v1 = vpop.f32.mrf.mxu1 }
 0x3b4   : > { %6372 = vmatmul.msk.bf16.gmra.mxu3 %vm2044_vm1, %v2468_v52 }
 0x3c4   : > { %6373 = vmatmul.msk.bf16.gmra.mxu3 %vm2044_vm1, %v2470_v12 }
 0x3d7   : > { %v2544_v2 = vpop.f32.mrf.mxu3 }
 0x3d8   : > { %v2584_v5 = vmul.f32 0.125, %v2544_v2 }
 0x3da   : > { %v8549_v45 = vadd.f32 %v2584_v5, %v2158_v15  ;;  %v2148_v15 = vmul.f32 0.125, %v2117_v1 }
 0x3dc   : > { %2616 = vmax.xlane.f32.xlu0 %v8549_v45  ;;  %v8602_v39 = vadd.f32 %v2164_v19, %v2148_v15 }
 0x3df   : > { %v2546_v57 = vpop.f32.mrf.mxu3 }
 0x3e0   : > { %v2585_v63 = vmul.f32 0.125, %v2546_v57 }
 0x3e2   : > { %v8552_v27 = vadd.f32 %v2585_v63, %v2159_v41 }
 0x3e4   : > { %2618 = vmax.xlane.f32.xlu2 %v8552_v27 }
 0x3e7   : > { %v2549_v0 = vpop.f32.mrf.mxu3 }
 0x3e8   : > { %v2586_v42 = vmul.f32 0.125, %v2549_v0 }
 0x3ea   : > { %v8555_v51 = vadd.f32 %v2586_v42, %v2160_v56 }
 0x3ec   : > { %2620 = vmax.xlane.f32.xlu1 %v8555_v51 }
 0x3ed   : > { %v2191_v41 = vpop.xlane.xlu2 %2190 }
 0x3ef   : > { %v2551_v54 = vpop.f32.mrf.mxu3 }
 0x3f0   : > { %v2587_v7 = vmul.f32 0.125, %v2551_v54 }
 0x3f2   : > { %v8558_v18 = vadd.f32 %v2587_v7, %v2161_v33 }
 0x3f4   : > { %2622 = vmax.xlane.f32.xlu0 %v8558_v18 }
 0x3f5   : > { %v2193_v3 = vpop.xlane.xlu1 %2192 }
 0x3f7   : > { %v2554_v44 = vpop.f32.mrf.mxu3 }
 0x3f8   : > { %v2588_v30 = vmul.f32 0.125, %v2554_v44  ;;  %v2223_v44 = vsub.f32 %v8535_v10, %v2193_v3  ;;  %v2222_v10 = vsub.f32 %v8532_v47, %v2191_v41 }
 0x3fc   : > { %2772 = vrot.lane.b32.xlu2 %v8463_v8, %s7582_s2  ;;  %v8570_v8 = vadd.f32 %v2588_v30, %v2162_v53  ;;  %v2119_v30 = vpop.f32.mrf.mxu1 }
 0x3fd   : > { %v8606_v13 = vpop.xlane.xlu1 %2194  ;;  %v2149_v53 = vmul.f32 0.125, %v2119_v30 }
 0x3ff   : > { %v2556_v37 = vpop.f32.mrf.mxu3 }
 0x400   : > { %v2589_v36 = vmul.f32 0.125, %v2556_v37 }
 0x402   : > { %v8563_v49 = vadd.f32 %v2589_v36, %v2163_v35 }
 0x404   : > { %2626 = vmax.xlane.f32.xlu1 %v8563_v49 }
 0x405   : > { %v8599_v43 = vpop.xlane.xlu0 %2196 }
 0x406   : > { %v2225_v41 = vsub.f32 %v8542_v17, %v8599_v43 }
 0x407   : > { %v2559_v21 = vpop.f32.mrf.mxu3 }
 0x408   : > { %2770 = vrot.lane.b32.xlu0 %v8477_v59, %s7582_s2  ;;  %v2147_v59 = vmul.f32 0.125, %v2114_v55  ;;  %v2590_v4 = vmul.f32 0.125, %v2559_v21  ;;  %v2240_v21 = vmul.f32 1.442695, %v2223_v44  ;;  %v8635_v55 = vadd.f32 %v8573_v9, %v2149_v53 }
 0x40a   : > { %v8579_v61 = vadd.f32 %v2163_v35, %v2147_v59  ;;  %v8588_v34 = vadd.f32 %v2590_v4, %v2164_v19  ;;  %v8624_v35 = vld [vmem:[#allocation6 + $0x50] sm:$0xff]  ;;  %v2122_v4 = vpop.f32.mrf.mxu1 }
 0x40f   : > { %v2561_v25 = vpop.f32.mrf.mxu3 }
 0x410   : > { %v2591_v32 = vmul.f32 0.125, %v2561_v25 }
 0x412   : > { %v8576_v40 = vadd.f32 %v2591_v32, %v8573_v9 }
 0x417   : > { %v2564_v62 = vpop.f32.mrf.mxu3 }
 0x418   : > { %v2592_v16 = vmul.f32 0.125, %v2564_v62 }
 0x41a   : > { %v8594_v20 = vadd.f32 %v2592_v16, %v8591_v24  ;;  %v8645_v16 = vld [vmem:[#allocation6 + $0x60] sm:$0xff] }
 0x41d   : > { %2768 = vrot.lane.b32.xlu1 %v8484_v46, %s7582_s2 }
 0x41f   : > { %v2566_v48 = vpop.f32.mrf.mxu3 }
 0x420   : > { %v2593_v46 = vmul.f32 0.125, %v2566_v48 }
 0x422   : > { %v8585_v52 = vadd.f32 %v2593_v46, %v8582_v26 }
 0x425   : > { %2624 = vmax.xlane.f32.xlu2 %v8570_v8 }
 0x427   : > { %v2569_v23 = vpop.f32.mrf.mxu3 }
 0x428   : > { %v2594_v37 = vmul.f32 0.125, %v2569_v23  ;;  %v8656_v23 = vld [vmem:[#allocation6 + $0x68] sm:$0xff] }
 0x42a   : > { %v8627_v25 = vadd.f32 %v2594_v37, %v8624_v35 }
 0x42d   : > { %2630 = vmax.xlane.f32.xlu2 %v8576_v40 }
 0x42f   : > { %v2571_v2 = vpop.f32.mrf.mxu3 }
 0x430   : > { %v2595_v57 = vmul.f32 0.125, %v2571_v2 }
 0x432   : > { %2200 = vmax.xlane.f32.xlu0 %v8579_v61 }
 0x435   : > { %2634 = vmax.xlane.f32.xlu2 %v8585_v52 }
 0x437   : > { %v2574_v32 = vpop.f32.mrf.mxu3 }
 0x438   : > { %v2596_v47 = vmul.f32 0.125, %v2574_v32 }
 0x43a   : > { %2628 = vmax.xlane.f32.xlu0 %v8588_v34  ;;  %v8648_v9 = vadd.f32 %v2596_v47, %v8645_v16 }
 0x43f   : > { %v2576_v1 = vpop.f32.mrf.mxu3 }
 0x442   : > { %2632 = vmax.xlane.f32.xlu0 %v8594_v20 }
 0x447   : > { %2198 = vmax.xlane.f32.xlu1 %v8597_v11  ;;  %v2579_v2 = vpop.f32.mrf.mxu3 }
 0x44f   : > { %v2617_v38 = vpop.xlane.xlu0 %2616  ;;  %2202 = vmax.xlane.f32.xlu1 %v8602_v39 }
 0x450   : > { %v2648_v56 = vsub.f32 %v8549_v45, %v2617_v38  ;;  %v8613_v45 = vld [vmem:[#allocation6 + $0x58] sm:$0xff]  ;;  %v2244_v38 = vmul.f32 1.442695, %v2225_v41 }
 0x451   : > { %v8616_v54 = vadd.f32 %v2595_v57, %v8613_v45 }
 0x452   : > { %v2664_v28 = vmul.f32 1.442695, %v2648_v56 }
 0x454   : > { %6886 = vpow2.f32 %v2664_v28 }
 0x457   : > { %v2619_v33 = vpop.xlane.xlu2 %2618 }
 0x458   : > { %v2649_v60 = vsub.f32 %v8552_v27, %v2619_v33  ;;  %v2124_v33 = vpop.f32.mrf.mxu1 }
 0x459   : > { %v2151_v17 = vmul.f32 0.125, %v2124_v33 }
 0x45a   : > { %v8609_v12 = vpop.eup %6886  ;;  %v2666_v5 = vmul.f32 1.442695, %v2649_v60  ;;  %v2224_v60 = vsub.f32 %v8539_v50, %v8606_v13 }
 0x45b   : > { %2696 = vadd.xlane.f32.xlu2 %v8609_v12 }
 0x45c   : > { %6888 = vpow2.f32 %v2666_v5  ;;  %v2242_v43 = vmul.f32 1.442695, %v2224_v60  ;;  %v8668_v5 = vadd.f32 %v8582_v26, %v2151_v17 }
 0x45f   : > { %v2773_v63 = vpop.permute.xlu2 %2772  ;;  %v2621_v0 = vpop.xlane.xlu1 %2620 }
 0x460   : > { %v2650_v42 = vsub.f32 %v8555_v51, %v2621_v0  ;;  %2797 = vmatpush.bf16.msra.mxu0 %v2773_v63 }
 0x462   : > { %v8618_v7 = vpop.eup %6888  ;;  %v2668_v27 = vmul.f32 1.442695, %v2650_v42  ;;  %v2581_v42 = vpop.f32.mrf.mxu3 }
 0x463   : > { %2698 = vadd.xlane.f32.xlu0 %v8618_v7  ;;  %2638 = vmax.xlane.f32.xlu2 %v8616_v54  ;;  %v2599_v50 = vmul.f32 0.125, %v2581_v42 }
 0x464   : > { %6890 = vpow2.f32 %v2668_v27  ;;  %v8677_v27 = vld [vmem:[#allocation6 + $0x78] sm:$0xff] }
 0x465   : > { %v8681_v44 = vadd.f32 %v2599_v50, %v8677_v27 }
 0x467   : > { %v2623_v36 = vpop.xlane.xlu0 %2622 }
 0x468   : > { %v2651_v51 = vsub.f32 %v8558_v18, %v2623_v36  ;;  %v2238_v18 = vmul.f32 1.442695, %v2222_v10  ;;  %v2127_v10 = vpop.f32.mrf.mxu1 }
 0x469   : > { %v2152_v60 = vmul.f32 0.125, %v2127_v10 }
 0x46a   : > { %v8629_v29 = vpop.eup %6890  ;;  %v2670_v62 = vmul.f32 1.442695, %v2651_v51 }
 0x46b   : > { %2636 = vmax.xlane.f32.xlu0 %v8627_v25  ;;  %2700 = vadd.xlane.f32.xlu2 %v8629_v29 }
 0x46c   : > { %6892 = vpow2.f32 %v2670_v62  ;;  %v2150_v62 = vmul.f32 0.125, %v2122_v4  ;;  %v2598_v4 = vmul.f32 0.125, %v2579_v2 }
 0x46d   : > { %6894 = vpow2.f32 %v2240_v21 }
 0x46e   : > { %6896 = vpow2.f32 %v2238_v18 }
 0x472   : > { %v8637_v59 = vpop.eup %6892 }
 0x473   : > { %v8639_v48 = vpop.eup %6894  ;;  %2702 = vadd.xlane.f32.xlu1 %v8637_v59  ;;  %2204 = vmax.xlane.f32.xlu0 %v8635_v55 }
 0x474   : > { %2272 = vadd.xlane.f32.xlu2 %v8639_v48  ;;  %v8650_v58 = vpop.eup %6896 }
 0x477   : > { %v2627_v46 = vpop.xlane.xlu1 %2626 }
 0x478   : > { %v2653_v19 = vsub.f32 %v8563_v49, %v2627_v46  ;;  %v2597_v49 = vmul.f32 0.125, %v2576_v1 }
 0x47a   : > { %v2674_v15 = vmul.f32 1.442695, %v2653_v19  ;;  %v2771_v3 = vpop.permute.xlu0 %2770  ;;  %v8659_v56 = vadd.f32 %v2597_v49, %v8656_v23  ;;  %v2129_v19 = vpop.f32.mrf.mxu1 }
 0x47b   : > { %2270 = vadd.xlane.f32.xlu0 %v8650_v58  ;;  %2640 = vmax.xlane.f32.xlu1 %v8648_v9  ;;  %v2153_v2 = vmul.f32 0.125, %v2129_v19 }
 0x47c   : > { %6898 = vpow2.f32 %v2674_v15  ;;  %2798 = vmatpush.bf16.msra.mxu0 %v2771_v3 }
 0x47d   : > { %6900 = vpow2.f32 %v2244_v38  ;;  %v8717_v50 = vadd.f32 %v8613_v45, %v2153_v2 }
 0x47e   : > { %6902 = vpow2.f32 %v2242_v43 }
 0x482   : > { %v8661_v28 = vpop.eup %6898 }
 0x483   : > { %2642 = vmax.xlane.f32.xlu0 %v8659_v56  ;;  %2706 = vadd.xlane.f32.xlu1 %v8661_v28  ;;  %v8670_v57 = vpop.eup %6900 }
 0x484   : > { %v8674_v0 = vpop.eup %6902 }
 0x48b   : > { %2276 = vadd.xlane.f32.xlu0 %v8670_v57  ;;  %2208 = vmax.xlane.f32.xlu1 %v8668_v5 }
 0x48f   : > { %v2769_v63 = vpop.permute.xlu1 %2768 }
 0x490   : > { %2799 = vmatpush.bf16.msra.mxu0 %v2769_v63  ;;  %v8710_v63 = vadd.f32 %v8624_v35, %v2152_v60 }
 0x493   : > { %2274 = vadd.xlane.f32.xlu1 %v8674_v0 }
 0x498   : > { %v2625_v13 = vpop.xlane.xlu2 %2624 }
 0x499   : > { %v2652_v26 = vsub.f32 %v8570_v8, %v2625_v13  ;;  %v8689_v8 = vadd.f32 %v8591_v24, %v2150_v62 }
 0x49b   : > { %v2672_v37 = vmul.f32 1.442695, %v2652_v26  ;;  %2646 = vmax.xlane.f32.xlu1 %v8681_v44 }
 0x49d   : > { %6904 = vpow2.f32 %v2672_v37 }
 0x4a0   : > { %v2631_v36 = vpop.xlane.xlu2 %2630 }
 0x4a1   : > { %v2655_v21 = vsub.f32 %v8576_v40, %v2631_v36 }
 0x4a3   : > { %v8684_v51 = vpop.eup %6904  ;;  %v2678_v53 = vmul.f32 1.442695, %v2655_v21 }
 0x4a4   : > { %2704 = vadd.xlane.f32.xlu2 %v8684_v51 }
 0x4a5   : > { %v2201_v30 = vpop.xlane.xlu0 %2200  ;;  %6906 = vpow2.f32 %v2678_v53 }
 0x4a6   : > { %v2227_v41 = vsub.f32 %v8579_v61, %v2201_v30 }
 0x4a8   : > { %v2635_v15 = vpop.xlane.xlu2 %2634  ;;  %v2248_v17 = vmul.f32 1.442695, %v2227_v41 }
 0x4a9   : > { %v2657_v49 = vsub.f32 %v8585_v52, %v2635_v15 }
 0x4ab   : > { %v8693_v46 = vpop.eup %6906  ;;  %v2682_v61 = vmul.f32 1.442695, %v2657_v49 }
 0x4ac   : > { %2206 = vmax.xlane.f32.xlu2 %v8689_v8 }
 0x4ad   : > { %v2629_v18 = vpop.xlane.xlu0 %2628 }
 0x4ae   : > { %v2654_v32 = vsub.f32 %v8588_v34, %v2629_v18  ;;  %v8701_v34 = vld [vmem:[#allocation6 + $0x70] sm:$0xff] }
 0x4af   : > { %v8705_v33 = vadd.f32 %v2598_v4, %v8701_v34 }
 0x4b0   : > { %v2676_v47 = vmul.f32 1.442695, %v2654_v32 }
 0x4b2   : > { %6908 = vpow2.f32 %v2676_v47 }
 0x4b4   : > { %2710 = vadd.xlane.f32.xlu2 %v8693_v46 }
 0x4b5   : > { %v2633_v40 = vpop.xlane.xlu0 %2632 }
 0x4b6   : > { %v2656_v1 = vsub.f32 %v8594_v20, %v2633_v40  ;;  %v2132_v20 = vpop.f32.mrf.mxu1 }
 0x4b7   : > { %v2154_v36 = vmul.f32 0.125, %v2132_v20 }
 0x4b8   : > { %v8697_v24 = vpop.eup %6908  ;;  %v2680_v3 = vmul.f32 1.442695, %v2656_v1 }
 0x4b9   : > { %2708 = vadd.xlane.f32.xlu0 %v8697_v24  ;;  %v8731_v62 = vadd.f32 %v8645_v16, %v2154_v36 }
 0x4ba   : > { %6910 = vpow2.f32 %v2680_v3  ;;  %v2199_v38 = vpop.xlane.xlu1 %2198 }
 0x4bb   : > { %v2226_v43 = vsub.f32 %v8597_v11, %v2199_v38  ;;  %6912 = vpow2.f32 %v2248_v17 }
 0x4bc   : > { %2644 = vmax.xlane.f32.xlu2 %v8705_v33  ;;  %6914 = vpow2.f32 %v2682_v61 }
 0x4bd   : > { %v2246_v52 = vmul.f32 1.442695, %v2226_v43 }
 0x4be   : > { %v2134_v13 = vpop.f32.mrf.mxu1 }
 0x4bf   : > { %6916 = vpow2.f32 %v2246_v52  ;;  %v2155_v45 = vmul.f32 0.125, %v2134_v13 }
 0x4c0   : > { %v8712_v42 = vpop.eup %6910 }
 0x4c1   : > { %2210 = vmax.xlane.f32.xlu0 %v8710_v63  ;;  %2712 = vadd.xlane.f32.xlu1 %v8712_v42  ;;  %v8720_v11 = vpop.eup %6912  ;;  %v8735_v18 = vadd.f32 %v8656_v23, %v2155_v45 }
 0x4c2   : > { %v8722_v35 = vpop.eup %6914  ;;  %v2203_v26 = vpop.xlane.xlu1 %2202 }
 0x4c3   : > { %v2228_v21 = vsub.f32 %v8602_v39, %v2203_v26 }
 0x4c4   : > { %2212 = vmax.xlane.f32.xlu2 %v8717_v50 }
 0x4c5   : > { %v8726_v37 = vpop.eup %6916  ;;  %v2250_v10 = vmul.f32 1.442695, %v2228_v21 }
 0x4c6   : > { %v2137_v53 = vpop.f32.mrf.mxu1 }
 0x4c7   : > { %6918 = vpow2.f32 %v2250_v10  ;;  %v2156_v43 = vmul.f32 0.125, %v2137_v53 }
 0x4c9   : > { %2714 = vadd.xlane.f32.xlu0 %v8722_v35  ;;  %2280 = vadd.xlane.f32.xlu1 %v8720_v11  ;;  %v8754_v2 = vadd.f32 %v8701_v34, %v2156_v43 }
 0x4cc   : > { %2278 = vadd.xlane.f32.xlu2 %v8726_v37 }
 0x4cd   : > { %v8739_v40 = vpop.eup %6918 }
 0x4ce   : > { %v2697_v30 = vpop.xlane.xlu2 %2696  ;;  %v2139_v4 = vpop.f32.mrf.mxu1 }
 0x4cf   : > { %6920 = vrcp.f32 %v2697_v30  ;;  %v2157_v23 = vmul.f32 0.125, %v2139_v4 }
 0x4d1   : > { %2214 = vmax.xlane.f32.xlu0 %v8731_v62  ;;  %v8749_v17 = vadd.f32 %v8677_v27, %v2157_v23 }
 0x4d4   : > { %2216 = vmax.xlane.f32.xlu2 %v8735_v18 }
 0x4d5   : > { %v6921_v16 = vpop.eup %6920 }
 0x4d6   : > { %v2699_v32 = vpop.xlane.xlu0 %2698  ;;  %v2639_v39 = vpop.xlane.xlu2 %2638  ;;  %v2744_v15 = vmul.f32 %v6921_v16, %v8609_v12 }
 0x4d7   : > { %6922 = vrcp.f32 %v2699_v32  ;;  %v2659_v47 = vsub.f32 %v8616_v54, %v2639_v39 }
 0x4d9   : > { %v2686_v19 = vmul.f32 1.442695, %v2659_v47 }
 0x4db   : > { %6924 = vpow2.f32 %v2686_v19 }
 0x4dc   : > { %2282 = vadd.xlane.f32.xlu2 %v8739_v40 }
 0x4dd   : > { %v6923_v1 = vpop.eup %6922 }
 0x4de   : > { %v2745_v3 = vmul.f32 %v6923_v1, %v8618_v7  ;;  %v2637_v41 = vpop.xlane.xlu0 %2636  ;;  %v2701_v60 = vpop.xlane.xlu2 %2700 }
 0x4df   : > { %v2658_v49 = vsub.f32 %v8627_v25, %v2637_v41 }
 0x4e0   : > { %v2760_v38 = vpack.c.bf16 %v2745_v3, %v2744_v15 }
 0x4e1   : > { %v8745_v54 = vpop.eup %6924  ;;  %v2684_v20 = vmul.f32 1.442695, %v2658_v49 }
 0x4e2   : > { %2718 = vadd.xlane.f32.xlu0 %v8745_v54  ;;  %2800 = vmatmul.bf16.vlgmr.msra.gmra.mxu0 %v2760_v38 }
 0x4e3   : > { %6926 = vpow2.f32 %v2684_v20 }
 0x4e4   : > { %2220 = vmax.xlane.f32.xlu2 %v8749_v17  ;;  %6928 = vrcp.f32 %v2701_v60 }
 0x4e6   : > { %v2205_v12 = vpop.xlane.xlu0 %2204  ;;  %v2703_v7 = vpop.xlane.xlu1 %2702 }
 0x4e7   : > { %v2229_v25 = vsub.f32 %v8635_v55, %v2205_v12  ;;  %6930 = vrcp.f32 %v2703_v7  ;;  %v2273_v13 = vpop.xlane.xlu2 %2272 }
 0x4e9   : > { %v8756_v61 = vpop.eup %6926  ;;  %v2252_v52 = vmul.f32 1.442695, %v2229_v25 }
 0x4ea   : > { %2218 = vmax.xlane.f32.xlu0 %v8754_v2  ;;  %2716 = vadd.xlane.f32.xlu1 %v8756_v61  ;;  %v6929_v27 = vpop.eup %6928 }
 0x4eb   : > { %6932 = vpow2.f32 %v2252_v52  ;;  %v2746_v55 = vmul.f32 %v6929_v27, %v8629_v29 }
 0x4ec   : > { %6934 = vrcp.f32 %v2273_v13 }
 0x4ed   : > { %v6931_v26 = vpop.eup %6930 }
 0x4ee   : > { %v2271_v36 = vpop.xlane.xlu0 %2270  ;;  %v2641_v21 = vpop.xlane.xlu1 %2640  ;;  %v2747_v45 = vmul.f32 %v6931_v26, %v8637_v59 }
 0x4ef   : > { %6936 = vrcp.f32 %v2271_v36  ;;  %v2660_v34 = vsub.f32 %v8648_v9, %v2641_v21 }
 0x4f0   : > { %v2761_v30 = vpack.c.bf16 %v2747_v45, %v2746_v55 }
 0x4f1   : > { %v8763_v10 = vpop.eup %6932  ;;  %v2688_v53 = vmul.f32 1.442695, %v2660_v34 }
 0x4f2   : > { %2284 = vadd.xlane.f32.xlu1 %v8763_v10  ;;  %2805 = vmatmul.bf16.gmra.mxu0 %v2761_v30  ;;  %v6935_v32 = vpop.eup %6934 }
 0x4f3   : > { %6938 = vpow2.f32 %v2688_v53  ;;  %v2319_v47 = vmul.f32 %v6935_v32, %v8639_v48 }
 0x4f5   : > { %v6937_v39 = vpop.eup %6936 }
 0x4f6   : > { %v2318_v19 = vmul.f32 %v6937_v39, %v8650_v58  ;;  %v2643_v29 = vpop.xlane.xlu0 %2642  ;;  %v2707_v16 = vpop.xlane.xlu1 %2706 }
 0x4f7   : > { %v2661_v59 = vsub.f32 %v8659_v56, %v2643_v29 }
 0x4f8   : > { %v2334_v4 = vpack.c.bf16 %v2319_v47, %v2318_v19 }
 0x4f9   : > { %v8769_v9 = vpop.eup %6938  ;;  %v2690_v1 = vmul.f32 1.442695, %v2661_v59 }
 0x4fa   : > { %2398 = vmatmul.bf16.vlgmr.msra.gmra.mxu2 %v2334_v4  ;;  %2720 = vadd.xlane.f32.xlu1 %v8769_v9 }
 0x4fb   : > { %6940 = vpow2.f32 %v2690_v1 }
 0x4fe   : > { %v2209_v23 = vpop.xlane.xlu1 %2208  ;;  %v2277_v41 = vpop.xlane.xlu0 %2276 }
 0x4ff   : > { %v2231_v15 = vsub.f32 %v8668_v5, %v2209_v23 }
 0x501   : > { %v8773_v3 = vpop.eup %6940  ;;  %v2256_v48 = vmul.f32 1.442695, %v2231_v15 }
 0x502   : > { %2722 = vadd.xlane.f32.xlu0 %v8773_v3 }
 0x503   : > { %6942 = vpow2.f32 %v2256_v48 }
 0x504   : > { %6944 = vrcp.f32 %v2277_v41 }
 0x506   : > { %v2275_v58 = vpop.xlane.xlu1 %2274 }
 0x507   : > { %6946 = vrcp.f32 %v2275_v58 }
 0x508   : > { %6948 = vrcp.f32 %v2707_v16 }
 0x509   : > { %v8776_v56 = vpop.eup %6942 }
 0x50a   : > { %2288 = vadd.xlane.f32.xlu1 %v8776_v56  ;;  %v6945_v49 = vpop.eup %6944 }
 0x50b   : > { %v2321_v5 = vmul.f32 %v6945_v49, %v8670_v57 }
 0x50d   : > { %v6947_v38 = vpop.eup %6946 }
 0x50e   : > { %v2320_v60 = vmul.f32 %v6947_v38, %v8674_v0  ;;  %v6949_v12 = vpop.eup %6948  ;;  %v2647_v26 = vpop.xlane.xlu1 %2646 }
 0x50f   : > { %v2749_v13 = vmul.f32 %v6949_v12, %v8661_v28  ;;  %v2663_v57 = vsub.f32 %v8681_v44, %v2647_v26 }
 0x510   : > { %v2335_v20 = vpack.c.bf16 %v2321_v5, %v2320_v60 }
 0x511   : > { %v2694_v55 = vmul.f32 1.442695, %v2663_v57 }
 0x512   : > { %2403 = vmatmul.bf16.gmra.mxu2 %v2335_v20 }
 0x517   : > { %v2705_v43 = vpop.xlane.xlu2 %2704 }
 0x518   : > { %6950 = vrcp.f32 %v2705_v43 }
 0x51e   : > { %v6951_v7 = vpop.eup %6950 }
 0x51f   : > { %v2207_v25 = vpop.xlane.xlu2 %2206  ;;  %v2748_v52 = vmul.f32 %v6951_v7, %v8684_v51 }
 0x520   : > { %v2230_v27 = vsub.f32 %v8689_v8, %v2207_v25 }
 0x521   : > { %v2762_v36 = vpack.c.bf16 %v2749_v13, %v2748_v52 }
 0x522   : > { %v2254_v21 = vmul.f32 1.442695, %v2230_v27 }
 0x523   : > { %2810 = vmatmul.bf16.gmra.mxu0 %v2762_v36 }
 0x524   : > { %6952 = vpow2.f32 %v2254_v21 }
 0x527   : > { %v2711_v0 = vpop.xlane.xlu2 %2710 }
 0x528   : > { %6954 = vrcp.f32 %v2711_v0 }
 0x529   : > { %6956 = vpow2.f32 %v2694_v55 }
 0x52a   : > { %v8785_v45 = vpop.eup %6952 }
 0x52b   : > { %2286 = vadd.xlane.f32.xlu2 %v8785_v45 }
 0x52c   : > { %v2709_v51 = vpop.xlane.xlu0 %2708 }
 0x52d   : > { %6958 = vrcp.f32 %v2709_v51 }
 0x52e   : > { %v6955_v34 = vpop.eup %6954 }
 0x52f   : > { %v2645_v28 = vpop.xlane.xlu2 %2644  ;;  %v8789_v30 = vpop.eup %6956  ;;  %v2751_v19 = vmul.f32 %v6955_v34, %v8693_v46 }
 0x530   : > { %v2662_v8 = vsub.f32 %v8705_v33, %v2645_v28 }
 0x532   : > { %v2692_v53 = vmul.f32 1.442695, %v2662_v8 }
 0x533   : > { %v6959_v32 = vpop.eup %6958  ;;  %2726 = vadd.xlane.f32.xlu2 %v8789_v30 }
 0x534   : > { %6960 = vpow2.f32 %v2692_v53  ;;  %v2211_v44 = vpop.xlane.xlu0 %2210  ;;  %v2713_v39 = vpop.xlane.xlu1 %2712  ;;  %v2750_v47 = vmul.f32 %v6959_v32, %v8697_v24 }
 0x535   : > { %v2232_v29 = vsub.f32 %v8710_v63, %v2211_v44 }
 0x536   : > { %v2763_v16 = vpack.c.bf16 %v2751_v19, %v2750_v47 }
 0x537   : > { %v2258_v59 = vmul.f32 1.442695, %v2232_v29  ;;  %v2213_v4 = vpop.xlane.xlu2 %2212 }
 0x538   : > { %v2233_v33 = vsub.f32 %v8717_v50, %v2213_v4  ;;  %2815 = vmatmul.bf16.gmra.mxu0 %v2763_v16 }
 0x539   : > { %6962 = vpow2.f32 %v2258_v59 }
 0x53a   : > { %v8796_v1 = vpop.eup %6960  ;;  %v2260_v23 = vmul.f32 1.442695, %v2233_v33  ;;  %6964 = vrcp.f32 %v2713_v39 }
 0x53b   : > { %2724 = vadd.xlane.f32.xlu0 %v8796_v1 }
 0x53c   : > { %6966 = vpow2.f32 %v2260_v23  ;;  %v2715_v15 = vpop.xlane.xlu0 %2714  ;;  %v2281_v24 = vpop.xlane.xlu1 %2280 }
 0x53d   : > { %6968 = vrcp.f32 %v2715_v15 }
 0x53e   : > { %6970 = vrcp.f32 %v2281_v24 }
 0x53f   : > { %v8799_v46 = vpop.eup %6962  ;;  %v2279_v63 = vpop.xlane.xlu2 %2278 }
 0x540   : > { %6972 = vrcp.f32 %v2279_v63  ;;  %2290 = vadd.xlane.f32.xlu1 %v8799_v46  ;;  %v6965_v50 = vpop.eup %6964 }
 0x541   : > { %v2752_v38 = vmul.f32 %v6965_v50, %v8712_v42 }
 0x542   : > { %v8802_v48 = vpop.eup %6966 }
 0x543   : > { %v6969_v41 = vpop.eup %6968  ;;  %2292 = vadd.xlane.f32.xlu0 %v8802_v48 }
 0x544   : > { %v6971_v58 = vpop.eup %6970  ;;  %v2215_v49 = vpop.xlane.xlu0 %2214  ;;  %v2753_v60 = vmul.f32 %v6969_v41, %v8722_v35 }
 0x545   : > { %v2234_v5 = vsub.f32 %v8731_v62, %v2215_v49  ;;  %v2323_v52 = vmul.f32 %v6971_v58, %v8720_v11 }
 0x546   : > { %v6973_v20 = vpop.eup %6972  ;;  %v2764_v43 = vpack.c.bf16 %v2753_v60, %v2752_v38 }
 0x547   : > { %v2262_v12 = vmul.f32 1.442695, %v2234_v5  ;;  %v2217_v7 = vpop.xlane.xlu2 %2216  ;;  %v2322_v25 = vmul.f32 %v6973_v20, %v8726_v37 }
 0x548   : > { %v2235_v13 = vsub.f32 %v8735_v18, %v2217_v7  ;;  %2820 = vmatmul.bf16.gmra.mxu0 %v2764_v43 }
 0x549   : > { %6974 = vpow2.f32 %v2262_v12  ;;  %v2336_v27 = vpack.c.bf16 %v2323_v52, %v2322_v25  ;;  %v6635_v52 = vld [vmem:[#allocation17 + $0x38] sm:$0xff] }
 0x54a   : > { %v2264_v26 = vmul.f32 1.442695, %v2235_v13  ;;  %3053 = vmatpush.bf16.msra.mxu1 %v6635_v52 }
 0x54b   : > { %2408 = vmatmul.bf16.gmra.mxu2 %v2336_v27 }
 0x54c   : > { %6976 = vpow2.f32 %v2264_v26 }
 0x54f   : > { %v8811_v42 = vpop.eup %6974  ;;  %v2283_v35 = vpop.xlane.xlu2 %2282 }
 0x550   : > { %2294 = vadd.xlane.f32.xlu2 %v8811_v42 }
 0x552   : > { %v8814_v62 = vpop.eup %6976 }
 0x553   : > { %2296 = vadd.xlane.f32.xlu1 %v8814_v62 }
 0x555   : > { %v2719_v37 = vpop.xlane.xlu0 %2718 }
 0x556   : > { %6978 = vrcp.f32 %v2719_v37 }
 0x557   : > { %v2221_v36 = vpop.xlane.xlu2 %2220 }
 0x558   : > { %v2237_v11 = vsub.f32 %v8749_v17, %v2221_v36 }
 0x55a   : > { %v2268_v18 = vmul.f32 1.442695, %v2237_v11  ;;  %v6633_v11 = vld [vmem:[#allocation17 + $0x28] sm:$0xff] }
 0x55c   : > { %6980 = vpow2.f32 %v2268_v18  ;;  %v6979_v28 = vpop.eup %6978 }
 0x55d   : > { %v2219_v21 = vpop.xlane.xlu0 %2218  ;;  %v2717_v57 = vpop.xlane.xlu1 %2716  ;;  %v2755_v32 = vmul.f32 %v6979_v28, %v8745_v54  ;;  %v6632_v28 = vld [vmem:[#allocation17 + $0x20] sm:$0xff] }
 0x55e   : > { %v2236_v0 = vsub.f32 %v8754_v2, %v2219_v21  ;;  %6982 = vrcp.f32 %v2717_v57 }
 0x55f   : > { %v2801_v55 = vpop.f32.mrf.mxu0 }
 0x560   : > { %v2266_v51 = vmul.f32 1.442695, %v2236_v0  ;;  %v2841_v44 = vpack.c.bf16 %v2801_v55, %v2801_v55 }
 0x562   : > { %v8819_v8 = vpop.eup %6980  ;;  %6984 = vpow2.f32 %v2266_v51  ;;  %v2913_v16 = vunpack.c.l.b16 %v2841_v44 }
 0x563   : > { %2300 = vadd.xlane.f32.xlu2 %v8819_v8  ;;  %6986 = vrcp.f32 %v2283_v35 }
 0x564   : > { %v6983_v34 = vpop.eup %6982 }
 0x565   : > { %v2285_v53 = vpop.xlane.xlu1 %2284  ;;  %v2754_v17 = vmul.f32 %v6983_v34, %v8756_v61 }
 0x566   : > { %6988 = vrcp.f32 %v2285_v53 }
 0x567   : > { %v2803_v39 = vpop.f32.mrf.mxu0  ;;  %v2765_v2 = vpack.c.bf16 %v2755_v32, %v2754_v17 }
 0x568   : > { %v8824_v47 = vpop.eup %6984  ;;  %v2842_v19 = vpack.c.bf16 %v2803_v39, %v2803_v39 }
 0x569   : > { %2298 = vadd.xlane.f32.xlu0 %v8824_v47  ;;  %2825 = vmatmul.bf16.gmra.mxu0 %v2765_v2  ;;  %v6987_v29 = vpop.eup %6986  ;;  %v6630_v2 = vld [vmem:[#allocation17 + $0x10] sm:$0xff] }
 0x56a   : > { %v2914_v59 = vunpack.c.l.b16 %v2842_v19  ;;  %v2324_v23 = vmul.f32 %v6987_v29, %v8739_v40  ;;  %v6629_v29 = vld [vmem:[#allocation17 + $0x8] sm:$0xff] }
 0x56c   : > { %v6989_v4 = vpop.eup %6988  ;;  %v2929_v33 = vpack.c.b16 %v2914_v59, %v2913_v16 }
 0x56d   : > { %v2325_v61 = vmul.f32 %v6989_v4, %v8763_v10  ;;  %v2721_v24 = vpop.xlane.xlu1 %2720 }
 0x56e   : > { %2937 = vrot.lane.b32.xlu1 %v2929_v33, %s7582_s2  ;;  %6990 = vrcp.f32 %v2721_v24 }
 0x56f   : > { %v2806_v54 = vpop.f32.mrf.mxu0  ;;  %v2337_v15 = vpack.c.bf16 %v2325_v61, %v2324_v23  ;;  %v6628_v23 = vld [vmem:[#allocation17] sm:$0xff] }
 0x570   : > { %v2843_v50 = vpack.c.bf16 %v2806_v54, %v2806_v54 }
 0x571   : > { %2413 = vmatmul.bf16.gmra.mxu2 %v2337_v15 }
 0x572   : > { %v2915_v38 = vunpack.c.l.b16 %v2843_v50 }
 0x574   : > { %v6991_v49 = vpop.eup %6990 }
 0x575   : > { %v2723_v63 = vpop.xlane.xlu0 %2722  ;;  %v2756_v40 = vmul.f32 %v6991_v49, %v8769_v9  ;;  %v6634_v9 = vld [vmem:[#allocation17 + $0x30] sm:$0xff] }
 0x576   : > { %6992 = vrcp.f32 %v2723_v63  ;;  %3054 = vmatpush.bf16.msra.mxu1 %v6634_v9 }
 0x577   : > { %v2808_v41 = vpop.f32.mrf.mxu0 }
 0x578   : > { %v2844_v58 = vpack.c.bf16 %v2808_v41, %v2808_v41 }
 0x57a   : > { %v2916_v60 = vunpack.c.l.b16 %v2844_v58  ;;  %3055 = vmatpush.bf16.msra.mxu1 %v6633_v11 }
 0x57c   : > { %v6993_v5 = vpop.eup %6992  ;;  %v2930_v20 = vpack.c.b16 %v2916_v60, %v2915_v38 }
 0x57d   : > { %v2757_v10 = vmul.f32 %v6993_v5, %v8773_v3  ;;  %v2289_v12 = vpop.xlane.xlu1 %2288  ;;  %v2399_v49 = vpop.f32.mrf.mxu2 }
 0x57e   : > { %2939 = vrot.lane.b32.xlu0 %v2930_v20, %s7582_s2  ;;  %6994 = vrcp.f32 %v2289_v12  ;;  %3056 = vmatpush.bf16.msra.mxu1 %v6632_v28 }
 0x57f   : > { %v2766_v43 = vpack.c.bf16 %v2757_v10, %v2756_v40 }
 0x581   : > { %2830 = vmatmul.bf16.gmra.mxu0 %v2766_v43 }
 0x584   : > { %v6995_v13 = vpop.eup %6994 }
 0x585   : > { %v2327_v35 = vmul.f32 %v6995_v13, %v8776_v56  ;;  %v6631_v56 = vld [vmem:[#allocation17 + $0x18] sm:$0xff] }
 0x586   : > { %3057 = vmatpush.bf16.msra.mxu1 %v6631_v56 }
 0x58a   : > { %3058 = vmatpush.bf16.msra.mxu1 %v6630_v2 }
 0x58e   : > { %3059 = vmatpush.bf16.msra.mxu1 %v6629_v29 }
 0x592   : > { %3060 = vmatpush.bf16.msra.mxu1 %v6628_v23 }
 0x59e   : > { %v2287_v7 = vpop.xlane.xlu2 %2286 }
 0x59f   : > { %6996 = vrcp.f32 %v2287_v7  ;;  %v2401_v7 = vpop.f32.mrf.mxu2 }
 0x5a0   : > { %v2811_v25 = vpop.f32.mrf.mxu0  ;;  %v2440_v52 = vpack.c.bf16 %v2401_v7, %v2401_v7 }
 0x5a1   : > { %v2845_v37 = vpack.c.bf16 %v2811_v25, %v2811_v25 }
 0x5a3   : > { %v2917_v57 = vunpack.c.l.b16 %v2845_v37 }
 0x5a5   : > { %v6997_v27 = vpop.eup %6996 }
 0x5a6   : > { %v2326_v26 = vmul.f32 %v6997_v27, %v8785_v45  ;;  %v2727_v21 = vpop.xlane.xlu2 %2726  ;;  %v2439_v27 = vpack.c.bf16 %v2399_v49, %v2399_v49 }
 0x5a7   : > { %6998 = vrcp.f32 %v2727_v21 }
 0x5a8   : > { %v2813_v3 = vpop.f32.mrf.mxu0  ;;  %v2338_v36 = vpack.c.bf16 %v2327_v35, %v2326_v26  ;;  %v2404_v26 = vpop.f32.mrf.mxu2  ;;  %v2874_v35 = vunpack.c.l.b16 %v2440_v52  ;;  %v2873_v37 = vunpack.c.l.b16 %v2439_v27 }
 0x5a9   : > { %v2846_v18 = vpack.c.bf16 %v2813_v3, %v2813_v3  ;;  %v2441_v28 = vpack.c.bf16 %v2404_v26, %v2404_v26 }
 0x5aa   : > { %2418 = vmatmul.bf16.gmra.mxu2 %v2338_v36 }
 0x5ab   : > { %v2918_v0 = vunpack.c.l.b16 %v2846_v18 }
 0x5ad   : > { %v2931_v55 = vpack.c.b16 %v2918_v0, %v2917_v57  ;;  %v6999_v45 = vpop.eup %6998 }
 0x5ae   : > { %v2725_v51 = vpop.xlane.xlu0 %2724  ;;  %v2759_v39 = vmul.f32 %v6999_v45, %v8789_v30  ;;  %v2875_v45 = vunpack.c.l.b16 %v2441_v28 }
 0x5af   : > { %7000 = vrcp.f32 %v2725_v51  ;;  %2941 = vrot.lane.b32.xlu2 %v2931_v55, %s7582_s2 }
 0x5b0   : > { %v2406_v18 = vpop.f32.mrf.mxu2 }
 0x5b1   : > { %v2442_v51 = vpack.c.bf16 %v2406_v18, %v2406_v18 }
 0x5b3   : > { %v2291_v34 = vpop.xlane.xlu1 %2290  ;;  %v2876_v56 = vunpack.c.l.b16 %v2442_v51 }
 0x5b4   : > { %7002 = vrcp.f32 %v2291_v34 }
 0x5b5   : > { %v7001_v53 = vpop.eup %7000  ;;  %v2816_v17 = vpop.f32.mrf.mxu0 }
 0x5b6   : > { %v2293_v32 = vpop.xlane.xlu0 %2292  ;;  %v2758_v44 = vmul.f32 %v7001_v53, %v8796_v1  ;;  %v2847_v59 = vpack.c.bf16 %v2816_v17, %v2816_v17  ;;  %v2890_v17 = vpack.c.b16 %v2876_v56, %v2875_v45  ;;  %v8858_v45 = vld [vmem:[%s11236_s10] ss:$0 sm:$0xff] }
 0x5b7   : > { %7004 = vrcp.f32 %v2293_v32 }
 0x5b8   : > { %v2767_v19 = vpack.c.bf16 %v2759_v39, %v2758_v44  ;;  %v2919_v1 = vunpack.c.l.b16 %v2847_v59 }
 0x5ba   : > { %2835 = vmatmul.bf16.gmra.mxu0 %v2767_v19  ;;  %v7003_v16 = vpop.eup %7002 }
 0x5bb   : > { %v2328_v54 = vmul.f32 %v7003_v16, %v8799_v46 }
 0x5bd   : > { %v7005_v4 = vpop.eup %7004  ;;  %v2818_v33 = vpop.f32.mrf.mxu0 }
 0x5be   : > { %v2848_v61 = vpack.c.bf16 %v2818_v33, %v2818_v33  ;;  %v2329_v15 = vmul.f32 %v7005_v4, %v8802_v48 }
 0x5c0   : > { %v2920_v24 = vunpack.c.l.b16 %v2848_v61  ;;  %v2339_v30 = vpack.c.bf16 %v2329_v15, %v2328_v54 }
 0x5c2   : > { %2423 = vmatmul.bf16.gmra.mxu2 %v2339_v30  ;;  %v2932_v63 = vpack.c.b16 %v2920_v24, %v2919_v1 }
 0x5c3   : > { %v2295_v50 = vpop.xlane.xlu2 %2294 }
 0x5c4   : > { %2943 = vrot.lane.b32.xlu0 %v2932_v63, %s7582_s2  ;;  %7006 = vrcp.f32 %v2295_v50 }
 0x5c5   : > { %v2821_v41 = vpop.f32.mrf.mxu0 }
 0x5c6   : > { %v2297_v58 = vpop.xlane.xlu1 %2296  ;;  %v2849_v60 = vpack.c.bf16 %v2821_v41, %v2821_v41 }
 0x5c7   : > { %7008 = vrcp.f32 %v2297_v58 }
 0x5c8   : > { %v2921_v10 = vunpack.c.l.b16 %v2849_v60 }
 0x5ca   : > { %v7007_v38 = vpop.eup %7006 }
 0x5cb   : > { %v2330_v48 = vmul.f32 %v7007_v38, %v8811_v42  ;;  %v2889_v42 = vpack.c.b16 %v2874_v35, %v2873_v37 }
 0x5cd   : > { %v7009_v5 = vpop.eup %7008  ;;  %v2823_v46 = vpop.f32.mrf.mxu0 }
 0x5ce   : > { %v2850_v20 = vpack.c.bf16 %v2823_v46, %v2823_v46  ;;  %v2331_v40 = vmul.f32 %v7009_v5, %v8814_v62 }
 0x5d0   : > { %v2922_v43 = vunpack.c.l.b16 %v2850_v20  ;;  %v2340_v12 = vpack.c.bf16 %v2331_v40, %v2330_v48 }
 0x5d2   : > { %v2933_v25 = vpack.c.b16 %v2922_v43, %v2921_v10  ;;  %2428 = vmatmul.bf16.gmra.mxu2 %v2340_v12 }
 0x5d4   : > { %2945 = vrot.lane.b32.xlu1 %v2933_v25, %s7582_s2 }
 0x5d6   : > { %v2301_v13 = vpop.xlane.xlu2 %2300 }
 0x5d7   : > { %7010 = vrcp.f32 %v2301_v13 }
 0x5dc   : > { %v2299_v9 = vpop.xlane.xlu0 %2298 }
 0x5dd   : > { %7012 = vrcp.f32 %v2299_v9  ;;  %v7011_v62 = vpop.eup %7010 }
 0x5de   : > { %v2333_v57 = vmul.f32 %v7011_v62, %v8819_v8 }
 0x5e0   : > { %v2938_v3 = vpop.permute.xlu1 %2937 }
 0x5e1   : > { %v2955_v36 = vsel %vm2044_vm1, %v2889_v42, %v2938_v3 }
 0x5e2   : > { %3061 = vmatmul.bf16.vlgmr.msra.gmra.mxu1 %v2955_v36 }
 0x5e3   : > { %v7013_v11 = vpop.eup %7012 }
 0x5e4   : > { %v2332_v21 = vmul.f32 %v7013_v11, %v8824_v47  ;;  %v2409_v47 = vpop.f32.mrf.mxu2 }
 0x5e5   : > { %v2443_v4 = vpack.c.bf16 %v2409_v47, %v2409_v47 }
 0x5e6   : > { %v2826_v0 = vpop.f32.mrf.mxu0  ;;  %v2341_v55 = vpack.c.bf16 %v2333_v57, %v2332_v21 }
 0x5e7   : > { %v2851_v34 = vpack.c.bf16 %v2826_v0, %v2826_v0  ;;  %v2877_v61 = vunpack.c.l.b16 %v2443_v4 }
 0x5e8   : > { %2433 = vmatmul.bf16.gmra.mxu2 %v2341_v55 }
 0x5e9   : > { %v2923_v39 = vunpack.c.l.b16 %v2851_v34 }
 0x5ec   : > { %v2411_v8 = vpop.f32.mrf.mxu2 }
 0x5ed   : > { %v2444_v59 = vpack.c.bf16 %v2411_v8, %v2411_v8 }
 0x5ee   : > { %v2828_v53 = vpop.f32.mrf.mxu0 }
 0x5ef   : > { %v2852_v32 = vpack.c.bf16 %v2828_v53, %v2828_v53  ;;  %v2878_v33 = vunpack.c.l.b16 %v2444_v59 }
 0x5f0   : > { %v2940_v44 = vpop.permute.xlu0 %2939 }
 0x5f1   : > { %v2924_v2 = vunpack.c.l.b16 %v2852_v32  ;;  %v2959_v19 = vsel %vm2044_vm1, %v2890_v17, %v2940_v44  ;;  %v2891_v1 = vpack.c.b16 %v2878_v33, %v2877_v61 }
 0x5f2   : > { %3066 = vmatmul.bf16.gmra.mxu1 %v2959_v19 }
 0x5f3   : > { %v2934_v29 = vpack.c.b16 %v2924_v2, %v2923_v39 }
 0x5f4   : > { %v2414_v58 = vpop.f32.mrf.mxu2 }
 0x5f5   : > { %2947 = vrot.lane.b32.xlu2 %v2934_v29, %s7582_s2  ;;  %v2445_v60 = vpack.c.bf16 %v2414_v58, %v2414_v58 }
 0x5f7   : > { %v2879_v20 = vunpack.c.l.b16 %v2445_v60  ;;  %v11332_v60 = vld [vmem:[#allocation30_spill] sm:$0xff] }
 0x5fc   : > { %v2416_v49 = vpop.f32.mrf.mxu2 }
 0x5fd   : > { %v2446_v38 = vpack.c.bf16 %v2416_v49, %v2416_v49 }
 0x5fe   : > { %v2831_v16 = vpop.f32.mrf.mxu0 }
 0x5ff   : > { %v2853_v23 = vpack.c.bf16 %v2831_v16, %v2831_v16  ;;  %v2880_v46 = vunpack.c.l.b16 %v2446_v38 }
 0x601   : > { %v2925_v24 = vunpack.c.l.b16 %v2853_v23  ;;  %v2892_v48 = vpack.c.b16 %v2880_v46, %v2879_v20 }
 0x606   : > { %v2833_v54 = vpop.f32.mrf.mxu0 }
 0x607   : > { %v2854_v15 = vpack.c.bf16 %v2833_v54, %v2833_v54 }
 0x609   : > { %v2926_v30 = vunpack.c.l.b16 %v2854_v15  ;;  %v2942_v63 = vpop.permute.xlu2 %2941 }
 0x60a   : > { %v2963_v50 = vsel %vm2044_vm1, %v2891_v1, %v2942_v63 }
 0x60b   : > { %v2935_v41 = vpack.c.b16 %v2926_v30, %v2925_v24  ;;  %3071 = vmatmul.bf16.gmra.mxu1 %v2963_v50 }
 0x60d   : > { %2949 = vrot.lane.b32.xlu0 %v2935_v41, %s7582_s2  ;;  %v11330_v41 = vld [vmem:[#allocation29_spill] sm:$0xff] }
 0x62d   : > { %v2419_v5 = vpop.f32.mrf.mxu2 }
 0x62e   : > { %v2447_v52 = vpack.c.bf16 %v2419_v5, %v2419_v5 }
 0x630   : > { %v2881_v37 = vunpack.c.l.b16 %v2447_v52 }
 0x635   : > { %v2421_v12 = vpop.f32.mrf.mxu2 }
 0x636   : > { %v2944_v40 = vpop.permute.xlu0 %2943  ;;  %v2448_v7 = vpack.c.bf16 %v2421_v12, %v2421_v12 }
 0x637   : > { %v2836_v10 = vpop.f32.mrf.mxu0  ;;  %v2967_v43 = vsel %vm2044_vm1, %v2892_v48, %v2944_v40 }
 0x638   : > { %3076 = vmatmul.bf16.gmra.mxu1 %v2967_v43  ;;  %v2855_v25 = vpack.c.bf16 %v2836_v10, %v2836_v10  ;;  %v2882_v26 = vunpack.c.l.b16 %v2448_v7 }
 0x63a   : > { %v2927_v35 = vunpack.c.l.b16 %v2855_v25  ;;  %v2893_v3 = vpack.c.b16 %v2882_v26, %v2881_v37 }
 0x63f   : > { %v2838_v13 = vpop.f32.mrf.mxu0 }
 0x640   : > { %v2856_v27 = vpack.c.bf16 %v2838_v13, %v2838_v13  ;;  %v11334_v13 = vld [vmem:[#allocation31_spill] sm:$0xff] }
 0x642   : > { %v2928_v9 = vunpack.c.l.b16 %v2856_v27 }
 0x644   : > { %v2936_v42 = vpack.c.b16 %v2928_v9, %v2927_v35 }
 0x645   : > { %v2424_v62 = vpop.f32.mrf.mxu2 }
 0x646   : > { %2951 = vrot.lane.b32.xlu1 %v2936_v42, %s7582_s2  ;;  %v2946_v36 = vpop.permute.xlu1 %2945  ;;  %v2449_v18 = vpack.c.bf16 %v2424_v62, %v2424_v62  ;;  %s5934_s2 = scalar_lea.hbm %s11457_s25, %s6567_s6 }
 0x647   : > { %v2971_v11 = vsel %vm2044_vm1, %v2893_v3, %v2946_v36  ;;  %v11336_v3 = vld [vmem:[#allocation33_spill] sm:$0xff]  ;;  %s5938_s14 = sshll.u32 %s5934_s2, 4  ;;  %s5939_s14 = int_to_ptr.hbm [resolvable:$true] %s5938_s14 }
 0x648   : > { %3081 = vmatmul.bf16.gmra.mxu1 %v2971_v11  ;;  %v2883_v55 = vunpack.c.l.b16 %v2449_v18  ;;  %v6464_v11 = vld [vmem:[#allocation18 + $0x70] sm:$0xf]  ;;  %v6651_v18 = vld [vmem:[#allocation18 + $0x74] sm:$0xf0] }
 0x64d   : > { %v2426_v21 = vpop.f32.mrf.mxu2 }
 0x64e   : > { %v2450_v57 = vpack.c.bf16 %v2426_v21, %v2426_v21  ;;  %v6650_v21 = vld [vmem:[#allocation18 + $0x74] sm:$0xf] }
 0x64f   : > { %v2948_v28 = vpop.permute.xlu2 %2947 }
 0x650   : > { %v2884_v0 = vunpack.c.l.b16 %v2450_v57  ;;  %v6465_v57 = vor.u32 %v6651_v18, %v6464_v11 }
 0x652   : > { %v2894_v51 = vpack.c.b16 %v2884_v0, %v2883_v55  ;;  %v6466_v0 = vld [vmem:[#allocation18 + $0x78] sm:$0xf0]  ;;  %3652 = vmatpush.bf16.msrb.mxu2 %v6465_v57 }
 0x654   : > { %v2975_v56 = vsel %vm2044_vm1, %v2894_v51, %v2948_v28  ;;  %v6469_v51 = vor.u32 %v6650_v21, %v6466_v0  ;;  %v6418_v21 = vld [vmem:[#allocation18 + $0x18] sm:$0xf0] }
 0x655   : > { %v2429_v39 = vpop.f32.mrf.mxu2 }
 0x656   : > { %v2451_v33 = vpack.c.bf16 %v2429_v39, %v2429_v39  ;;  %3701 = vmatpush.bf16.msrb.mxu3 %v6469_v51  ;;  %v11344_v51 = vld [vmem:[#allocation41_spill] sm:$0xff] }
 0x658   : > { %3086 = vmatmul.bf16.gmra.mxu1 %v2975_v56  ;;  %v2885_v15 = vunpack.c.l.b16 %v2451_v33  ;;  %v6456_v56 = vld [vmem:[#allocation18 + $0x60] sm:$0xf]  ;;  %v6450_v33 = vld [vmem:[#allocation18 + $0x58] sm:$0xf0] }
 0x65d   : > { %v2431_v16 = vpop.f32.mrf.mxu2 }
 0x65e   : > { %v2452_v59 = vpack.c.bf16 %v2431_v16, %v2431_v16  ;;  %v6647_v16 = vld [vmem:[#allocation18 + $0x54] sm:$0xf0] }
 0x65f   : > { %v3062_v34 = vpop.f32.mrf.mxu1 }
 0x660   : > { %v3063_v53 = vadd.f32 %v8858_v45, %v3062_v34  ;;  %v2886_v61 = vunpack.c.l.b16 %v2452_v59  ;;  %v6649_v34 = vld [vmem:[#allocation18 + $0x64] sm:$0xf0] }
 0x661   : > { %v6457_v39 = vor.u32 %v6649_v34, %v6456_v56  ;;  %v11345_v56 = vld [vmem:[#allocation36_spill] sm:$0xff] }
 0x662   : > { %v8862_v17 = vadd.f32 %v3063_v53, %v7909_v6  ;;  %v2895_v1 = vpack.c.b16 %v2886_v61, %v2885_v15  ;;  %v6648_v53 = vld [vmem:[#allocation18 + $0x64] sm:$0xf]  ;;  %v11340_v15 = vld [vmem:[#allocation32_spill] sm:$0xff] }
 0x663   : > { %3653 = vmatpush.bf16.msrb.mxu2 %v6457_v39  ;;  %v6637_v39 = vld [vmem:[#allocation18 + $0x4] sm:$0xf0] }
 0x664   : > { %3152 = vadd.xlane.f32.xlu2 %v8862_v17  ;;  %v3200_v47 = vmul.f32 %v8862_v17, %v8862_v17 }
 0x667   : > { %v3064_v32 = vpop.f32.mrf.mxu1 }
 0x668   : > { %v3065_v44 = vadd.f32 %v8858_v45, %v3064_v32  ;;  %v11338_v32 = vld [vmem:[#allocation34_spill] sm:$0xff] }
 0x66a   : > { %v8867_v2 = vadd.f32 %v3065_v44, %v7915_v14 }
 0x66b   : > { %v2434_v20 = vpop.f32.mrf.mxu2 }
 0x66c   : > { %3154 = vadd.xlane.f32.xlu0 %v8867_v2  ;;  %v3201_v19 = vmul.f32 %v8867_v2, %v8867_v2  ;;  %v2453_v10 = vpack.c.bf16 %v2434_v20, %v2434_v20 }
 0x66e   : > { %3218 = vadd.xlane.f32.xlu2 %v3201_v19  ;;  %v2887_v12 = vunpack.c.l.b16 %v2453_v10  ;;  %v6458_v19 = vld [vmem:[#allocation18 + $0x68] sm:$0xf0] }
 0x66f   : > { %v3067_v6 = vpop.f32.mrf.mxu1 }
 0x670   : > { %v3068_v29 = vadd.f32 %v8858_v45, %v3067_v6  ;;  %3216 = vadd.xlane.f32.xlu1 %v3200_v47  ;;  %v6461_v47 = vor.u32 %v6648_v53, %v6458_v19  ;;  %v6636_v19 = vld [vmem:[#allocation18 + $0x4] sm:$0xf] }
 0x672   : > { %v8876_v8 = vadd.f32 %v3068_v29, %v7923_v22  ;;  %3702 = vmatpush.bf16.msrb.mxu3 %v6461_v47  ;;  %v6448_v29 = vld [vmem:[#allocation18 + $0x50] sm:$0xf] }
 0x673   : > { %v2436_v48 = vpop.f32.mrf.mxu2 }
 0x674   : > { %3156 = vadd.xlane.f32.xlu0 %v8876_v8  ;;  %v3202_v14 = vmul.f32 %v8876_v8, %v8876_v8  ;;  %v2454_v40 = vpack.c.bf16 %v2436_v48, %v2436_v48  ;;  %v6434_v48 = vld [vmem:[#allocation18 + $0x38] sm:$0xf0] }
 0x676   : > { %3220 = vadd.xlane.f32.xlu2 %v3202_v14  ;;  %v2888_v43 = vunpack.c.l.b16 %v2454_v40  ;;  %v6646_v14 = vld [vmem:[#allocation18 + $0x54] sm:$0xf] }
 0x677   : > { %v3069_v4 = vpop.f32.mrf.mxu1  ;;  %v6453_v61 = vor.u32 %v6646_v14, %v6450_v33 }
 0x678   : > { %v3070_v23 = vadd.f32 %v8858_v45, %v3069_v4  ;;  %v2896_v52 = vpack.c.b16 %v2888_v43, %v2887_v12  ;;  %v6449_v4 = vor.u32 %v6647_v16, %v6448_v29  ;;  %v11342_v43 = vld [vmem:[#allocation35_spill] sm:$0xff]  ;;  %v6410_v29 = vld [vmem:[#allocation18 + $0x8] sm:$0xf0] }
 0x679   : > { %3703 = vmatpush.bf16.msrb.mxu3 %v6453_v61  ;;  %v6413_v33 = vor.u32 %v6636_v19, %v6410_v29 }
 0x67a   : > { %v8883_v54 = vadd.f32 %v3070_v23, %v7929_v31  ;;  %3654 = vmatpush.bf16.msrb.mxu2 %v6449_v4 }
 0x67c   : > { %3158 = vadd.xlane.f32.xlu1 %v8883_v54  ;;  %v3203_v22 = vmul.f32 %v8883_v54, %v8883_v54 }
 0x67e   : > { %3222 = vadd.xlane.f32.xlu0 %v3203_v22 }
 0x67f   : > { %v2950_v24 = vpop.permute.xlu0 %2949 }
 0x680   : > { %v2979_v30 = vsel %vm2044_vm1, %v2895_v1, %v2950_v24  ;;  %v6440_v1 = vld [vmem:[#allocation18 + $0x40] sm:$0xf]  ;;  %v6645_v24 = vld [vmem:[#allocation18 + $0x44] sm:$0xf0] }
 0x681   : > { %3091 = vmatmul.bf16.gmra.mxu1 %v2979_v30  ;;  %v6644_v30 = vld [vmem:[#allocation18 + $0x44] sm:$0xf] }
 0x688   : > { %v3072_v63 = vpop.f32.mrf.mxu1 }
 0x689   : > { %v3073_v50 = vadd.f32 %v8858_v45, %v3072_v63  ;;  %v6441_v63 = vor.u32 %v6645_v24, %v6440_v1 }
 0x68b   : > { %v8891_v58 = vadd.f32 %v3073_v50, %v11330_v41  ;;  %v6442_v50 = vld [vmem:[#allocation18 + $0x48] sm:$0xf0]  ;;  %3655 = vmatpush.bf16.msrb.mxu2 %v6441_v63 }
 0x68d   : > { %11331 = vst [vmem:[#allocation29_spill] sm:$0xff] %v8891_v58  ;;  %3160 = vadd.xlane.f32.xlu1 %v8891_v58  ;;  %v3204_v31 = vmul.f32 %v8891_v58, %v8891_v58 }
 0x68f   : > { %3224 = vadd.xlane.f32.xlu0 %v3204_v31  ;;  %v6445_v31 = vor.u32 %v6644_v30, %v6442_v50 }
 0x690   : > { %v3074_v49 = vpop.f32.mrf.mxu1 }
 0x691   : > { %v3075_v38 = vadd.f32 %v8858_v45, %v3074_v49  ;;  %3704 = vmatpush.bf16.msrb.mxu3 %v6445_v31  ;;  %v6432_v49 = vld [vmem:[#allocation18 + $0x30] sm:$0xf] }
 0x693   : > { %v8898_v5 = vadd.f32 %v3075_v38, %v11332_v60  ;;  %v6643_v38 = vld [vmem:[#allocation18 + $0x34] sm:$0xf0]  ;;  %v6642_v60 = vld [vmem:[#allocation18 + $0x34] sm:$0xf] }
 0x694   : > { %v6433_v20 = vor.u32 %v6643_v38, %v6432_v49  ;;  %v6437_v10 = vor.u32 %v6642_v60, %v6434_v48 }
 0x695   : > { %11333 = vst [vmem:[#allocation30_spill] sm:$0xff] %v8898_v5  ;;  %3162 = vadd.xlane.f32.xlu2 %v8898_v5  ;;  %v3205_v46 = vmul.f32 %v8898_v5, %v8898_v5 }
 0x696   : > { %3656 = vmatpush.bf16.msrb.mxu2 %v6433_v20  ;;  %3705 = vmatpush.bf16.msrb.mxu3 %v6437_v10 }
 0x697   : > { %3226 = vadd.xlane.f32.xlu1 %v3205_v46 }
 0x6b5   : > { %v3077_v7 = vpop.f32.mrf.mxu1 }
 0x6b6   : > { %v3078_v25 = vadd.f32 %v8858_v45, %v3077_v7  ;;  %v6424_v7 = vld [vmem:[#allocation18 + $0x20] sm:$0xf] }
 0x6b8   : > { %v8905_v27 = vadd.f32 %v3078_v25, %v11334_v13  ;;  %v2952_v26 = vpop.permute.xlu1 %2951  ;;  %v6641_v25 = vld [vmem:[#allocation18 + $0x24] sm:$0xf0] }
 0x6b9   : > { %v2983_v35 = vsel %vm2044_vm1, %v2896_v52, %v2952_v26  ;;  %v6640_v52 = vld [vmem:[#allocation18 + $0x24] sm:$0xf]  ;;  %v6425_v26 = vor.u32 %v6641_v25, %v6424_v7 }
 0x6ba   : > { %11335 = vst [vmem:[#allocation31_spill] sm:$0xff] %v8905_v27  ;;  %3164 = vadd.xlane.f32.xlu2 %v8905_v27  ;;  %3096 = vmatmul.bf16.gmra.mxu1 %v2983_v35  ;;  %v3206_v9 = vmul.f32 %v8905_v27, %v8905_v27  ;;  %v6426_v35 = vld [vmem:[#allocation18 + $0x28] sm:$0xf0] }
 0x6bb   : > { %3657 = vmatpush.bf16.msrb.mxu2 %v6425_v26 }
 0x6bc   : > { %3228 = vadd.xlane.f32.xlu1 %v3206_v9 }
 0x6bd   : > { %v3079_v37 = vpop.f32.mrf.mxu1 }
 0x6be   : > { %v3080_v42 = vadd.f32 %v8858_v45, %v3079_v37  ;;  %v6429_v37 = vor.u32 %v6640_v52, %v6426_v35 }
 0x6c0   : > { %v8913_v62 = vadd.f32 %v3080_v42, %v11336_v3  ;;  %3706 = vmatpush.bf16.msrb.mxu3 %v6429_v37  ;;  %v6416_v42 = vld [vmem:[#allocation18 + $0x10] sm:$0xf]  ;;  %v6639_v3 = vld [vmem:[#allocation18 + $0x14] sm:$0xf0] }
 0x6c1   : > { %v6417_v18 = vor.u32 %v6639_v3, %v6416_v42 }
 0x6c2   : > { %11337 = vst [vmem:[#allocation33_spill] sm:$0xff] %v8913_v62  ;;  %3166 = vadd.xlane.f32.xlu0 %v8913_v62  ;;  %v3207_v36 = vmul.f32 %v8913_v62, %v8913_v62 }
 0x6c3   : > { %3658 = vmatpush.bf16.msrb.mxu2 %v6417_v18 }
 0x6c4   : > { %3230 = vadd.xlane.f32.xlu2 %v3207_v36  ;;  %v6638_v36 = vld [vmem:[#allocation18 + $0x14] sm:$0xf] }
 0x6c5   : > { %v3082_v55 = vpop.f32.mrf.mxu1  ;;  %v6421_v0 = vor.u32 %v6638_v36, %v6418_v21 }
 0x6c6   : > { %v3083_v28 = vadd.f32 %v8858_v45, %v3082_v55 }
 0x6c7   : > { %3707 = vmatpush.bf16.msrb.mxu3 %v6421_v0 }
 0x6c8   : > { %v8920_v44 = vadd.f32 %v3083_v28, %v11338_v32  ;;  %v6408_v32 = vld [vmem:[#allocation18] sm:$0xf] }
 0x6ca   : > { %11339 = vst [vmem:[#allocation34_spill] sm:$0xff] %v8920_v44  ;;  %3168 = vadd.xlane.f32.xlu0 %v8920_v44  ;;  %v3208_v6 = vmul.f32 %v8920_v44, %v8920_v44 }
 0x6cb   : > { %3708 = vmatpush.bf16.msrb.mxu3 %v6413_v33 }
 0x6cc   : > { %3232 = vadd.xlane.f32.xlu2 %v3208_v6  ;;  %v6409_v6 = vor.u32 %v6637_v39, %v6408_v32 }
 0x6cd   : > { %v3084_v59 = vpop.f32.mrf.mxu1 }
 0x6ce   : > { %v3085_v23 = vadd.f32 %v8858_v45, %v3084_v59  ;;  %3659 = vmatpush.bf16.msrb.mxu2 %v6409_v6 }
 0x6d0   : > { %v8927_v22 = vadd.f32 %v3085_v23, %v11340_v15 }
 0x6d2   : > { %11341 = vst [vmem:[#allocation32_spill] sm:$0xff] %v8927_v22  ;;  %3170 = vadd.xlane.f32.xlu1 %v8927_v22  ;;  %v3209_v41 = vmul.f32 %v8927_v22, %v8927_v22 }
 0x6d4   : > { %3234 = vadd.xlane.f32.xlu0 %v3209_v41 }
 0x6d5   : > { %v3087_v46 = vpop.f32.mrf.mxu1 }
 0x6d6   : > { %v3088_v40 = vadd.f32 %v8858_v45, %v3087_v46 }
 0x6d7   : > { %v3153_v13 = vpop.xlane.xlu2 %3152 }
 0x6d8   : > { %v8934_v12 = vadd.f32 %v3088_v40, %v11342_v43  ;;  %v8941_v28 = vmul.f32 %v3153_v13, %v11344_v51 }
 0x6da   : > { %11343 = vst [vmem:[#allocation35_spill] sm:$0xff] %v8934_v12  ;;  %3172 = vadd.xlane.f32.xlu1 %v8934_v12  ;;  %v3210_v9 = vmul.f32 %v8934_v12, %v8934_v12  ;;  %v3264_v23 = vmul.f32 %v8941_v28, %v8941_v28  ;;  %v3296_v32 = vsub.f32 %v8862_v17, %v8941_v28 }
 0x6dc   : > { %3236 = vadd.xlane.f32.xlu0 %v3210_v9 }
 0x6dd   : > { %v3089_v11 = vpop.f32.mrf.mxu1 }
 0x6de   : > { %v3090_v57 = vadd.f32 %v8858_v45, %v3089_v11 }
 0x6df   : > { %v3155_v55 = vpop.xlane.xlu0 %3154 }
 0x6e0   : > { %v8944_v34 = vadd.f32 %v3090_v57, %v11345_v56  ;;  %v8947_v53 = vmul.f32 %v3155_v55, %v11344_v51  ;;  %v8975_v57 = vld [vmem:[%s11237_s11] ss:$0 sm:$0xff] }
 0x6e1   : > { %v3219_v47 = vpop.xlane.xlu2 %3218 }
 0x6e2   : > { %11346 = vst [vmem:[#allocation41_spill] sm:$0xff] %v8944_v34  ;;  %v3265_v16 = vmul.f32 %v8947_v53, %v8947_v53  ;;  %v3249_v14 = vmul.f32 %v3219_v47, %v11344_v51  ;;  %3174 = vadd.xlane.f32.xlu2 %v8944_v34  ;;  %v3211_v59 = vmul.f32 %v8944_v34, %v8944_v34 }
 0x6e3   : > { %v3217_v4 = vpop.xlane.xlu1 %3216  ;;  %v3297_v21 = vsub.f32 %v8867_v2, %v8947_v53 }
 0x6e4   : > { %v3281_v61 = vsub.f32 %v3249_v14, %v3265_v16  ;;  %v3248_v15 = vmul.f32 %v3217_v4, %v11344_v51  ;;  %3238 = vadd.xlane.f32.xlu1 %v3211_v59  ;;  %v8983_v16 = vld [vmem:[%s11347_s19] ss:$0 sm:$0xff] }
 0x6e6   : > { %v3313_v1 = vadd.f32 1e-06, %v3281_v61  ;;  %v3280_v24 = vsub.f32 %v3248_v15, %v3264_v23 }
 0x6e7   : > { %v3157_v30 = vpop.xlane.xlu0 %3156 }
 0x6e8   : > { %7014 = vrsqrt.f32 %v3313_v1  ;;  %v3312_v63 = vadd.f32 1e-06, %v3280_v24  ;;  %v8959_v50 = vmul.f32 %v3157_v30, %v11344_v51  ;;  %vm3344_vm3 = vweird.f32 %v3313_v1 }
 0x6e9   : > { %v3221_v41 = vpop.xlane.xlu2 %3220 }
 0x6ea   : > { %7016 = vrsqrt.f32 %v3312_v63  ;;  %v3266_v31 = vmul.f32 %v8959_v50, %v8959_v50  ;;  %v3250_v49 = vmul.f32 %v3221_v41, %v11344_v51  ;;  %vm3334_vm6 = vweird.f32 %v3312_v63 }
 0x6ec   : > { %v3282_v38 = vsub.f32 %v3250_v49, %v3266_v31 }
 0x6ee   : > { %v7015_v60 = vpop.eup %7014  ;;  %v3314_v20 = vadd.f32 1e-06, %v3282_v38 }
 0x6ef   : > { %v3339_v46 = vmul.f32 %v7015_v60, %v3313_v1  ;;  %v3159_v48 = vpop.xlane.xlu1 %3158  ;;  %vm3345_vm2 = vweird.f32 %v7015_v60 }
 0x6f0   : > { %v7017_v40 = vpop.eup %7016  ;;  %v8965_v10 = vmul.f32 %v3159_v48, %v11344_v51  ;;  %7018 = vrsqrt.f32 %v3314_v20  ;;  %vm3346_vm5 = vmor %vm3344_vm3, %vm3345_vm2  ;;  %vm3354_vm9 = vweird.f32 %v3314_v20 }
 0x6f1   : > { %v3340_v43 = vmul.f32 %v7015_v60, %v3339_v46  ;;  %v3329_v7 = vmul.f32 %v7017_v40, %v3312_v63  ;;  %v3223_v25 = vpop.xlane.xlu0 %3222  ;;  %vm3335_vm4 = vweird.f32 %v7017_v40  ;;  %v11348_v63 = vld [vmem:[#allocation37_spill] sm:$0xff] }
 0x6f2   : > { %v3267_v52 = vmul.f32 %v8965_v10, %v8965_v10  ;;  %v3251_v13 = vmul.f32 %v3223_v25, %v11344_v51  ;;  %vm3336_vm7 = vmor %vm3334_vm6, %vm3335_vm4 }
 0x6f3   : > { %v3341_v26 = vmul.f32 0.5, %v3340_v43  ;;  %v3330_v35 = vmul.f32 %v7017_v40, %v3329_v7 }
 0x6f4   : > { %v3283_v9 = vsub.f32 %v3251_v13, %v3267_v52  ;;  %v3298_v52 = vsub.f32 %v8876_v8, %v8959_v50 }
 0x6f5   : > { %v3342_v37 = vsub.f32 1.5, %v3341_v26  ;;  %v3331_v42 = vmul.f32 0.5, %v3330_v35 }
 0x6f6   : > { %v3315_v3 = vadd.f32 1e-06, %v3283_v9  ;;  %v7019_v36 = vpop.eup %7018 }
 0x6f7   : > { %v3343_v11 = vmul.f32 %v7015_v60, %v3342_v37  ;;  %v3332_v18 = vsub.f32 1.5, %v3331_v42  ;;  %v3349_v0 = vmul.f32 %v7019_v36, %v3314_v20  ;;  %vm3355_vm8 = vweird.f32 %v7019_v36 }
 0x6f8   : > { %7020 = vrsqrt.f32 %v3315_v3  ;;  %vm9000_vm10 = vmor %vm3354_vm9, %vm3355_vm8  ;;  %vm3364_vm12 = vweird.f32 %v3315_v3  ;;  %v3299_v37 = vsub.f32 %v8883_v54, %v8965_v10 }
 0x6f9   : > { %v3347_v55 = vsel %vm3346_vm5, %v7015_v60, %v3343_v11  ;;  %v3333_v56 = vmul.f32 %v7017_v40, %v3332_v18  ;;  %v3350_v19 = vmul.f32 %v7019_v36, %v3349_v0  ;;  %v11351_v18 = vld [vmem:[#allocation38_spill] sm:$0xff] }
 0x6fa   : > { %v3489_v39 = vmul.f32 %v3347_v55, %v3297_v21 }
 0x6fb   : > { %v3337_v47 = vsel %vm3336_vm7, %v7017_v40, %v3333_v56  ;;  %v3351_v29 = vmul.f32 0.5, %v3350_v19 }
 0x6fc   : > { %v3508_v53 = vmul.f32 %v8975_v57, %v3489_v39  ;;  %v3488_v6 = vmul.f32 %v3337_v47, %v3296_v32 }
 0x6fd   : > { %v3352_v4 = vsub.f32 1.5, %v3351_v29 }
 0x6fe   : > { %v7021_v14 = vpop.eup %7020  ;;  %v3507_v59 = vmul.f32 %v8975_v57, %v3488_v6  ;;  %v3092_v33 = vpop.f32.mrf.mxu1  ;;  %v3527_v1 = vadd.f32 %v8983_v16, %v3508_v53 }
 0x6ff   : > { %v3359_v23 = vmul.f32 %v7021_v14, %v3315_v3  ;;  %v3093_v28 = vadd.f32 %v8858_v45, %v3092_v33  ;;  %v3353_v24 = vmul.f32 %v7019_v36, %v3352_v4  ;;  %vm3365_vm11 = vweird.f32 %v7021_v14 }
 0x700   : > { %v3161_v61 = vpop.xlane.xlu1 %3160  ;;  %v3526_v15 = vadd.f32 %v8983_v16, %v3507_v59  ;;  %vm3366_vm13 = vmor %vm3364_vm12, %vm3365_vm11 }
 0x701   : > { %v3360_v30 = vmul.f32 %v7021_v14, %v3359_v23  ;;  %v8990_v41 = vadd.f32 %v3093_v28, %v11348_v63  ;;  %v8993_v31 = vmul.f32 %v3161_v61, %v11344_v51  ;;  %v3357_v20 = vsel %vm9000_vm10, %v7019_v36, %v3353_v24 }
 0x702   : > { %v3225_v49 = vpop.xlane.xlu0 %3224  ;;  %v3542_v38 = vpack.c.bf16 %v3527_v1, %v3526_v15  ;;  %v3490_v11 = vmul.f32 %v3357_v20, %v3298_v52 }
 0x703   : > { %v3361_v60 = vmul.f32 0.5, %v3360_v30  ;;  %v3268_v46 = vmul.f32 %v8993_v31, %v8993_v31  ;;  %v3252_v48 = vmul.f32 %v3225_v49, %v11344_v51  ;;  %3176 = vadd.xlane.f32.xlu2 %v8990_v41  ;;  %v3212_v43 = vmul.f32 %v8990_v41, %v8990_v41 }
 0x704   : > { %3660 = vmatmul.bf16.vlgmr.msrb.gmra.mxu2 %v3542_v38  ;;  %3709 = vmatmul.bf16.vlgmr.msrb.gmra.mxu3 %v3542_v38  ;;  %v3509_v32 = vmul.f32 %v8975_v57, %v3490_v11  ;;  %v3300_v63 = vsub.f32 %v8891_v58, %v8993_v31 }
 0x705   : > { %v3362_v7 = vsub.f32 1.5, %v3361_v60  ;;  %v3284_v25 = vsub.f32 %v3252_v48, %v3268_v46  ;;  %3240 = vadd.xlane.f32.xlu1 %v3212_v43 }
 0x706   : > { %v3094_v13 = vpop.f32.mrf.mxu1 }
 0x707   : > { %v3363_v26 = vmul.f32 %v7021_v14, %v3362_v7  ;;  %v3316_v35 = vadd.f32 1e-06, %v3284_v25  ;;  %v3095_v9 = vadd.f32 %v8858_v45, %v3094_v13 }
 0x708   : > { %v3163_v42 = vpop.xlane.xlu2 %3162 }
 0x709   : > { %v3367_v36 = vsel %vm3366_vm13, %v7021_v14, %v3363_v26  ;;  %7022 = vrsqrt.f32 %v3316_v35  ;;  %v9014_v21 = vadd.f32 %v3095_v9, %v11351_v18  ;;  %v3189_v50 = vmul.f32 %v3163_v42, %v11344_v51 }
 0x70a   : > { %v3227_v0 = vpop.xlane.xlu1 %3226  ;;  %v3491_v55 = vmul.f32 %v3367_v36, %v3299_v37  ;;  %v3528_v14 = vadd.f32 %v8983_v16, %v3509_v32  ;;  %vm3374_vm15 = vweird.f32 %v3316_v35 }
 0x70b   : > { %v3253_v3 = vmul.f32 %v3227_v0, %v11344_v51  ;;  %3178 = vadd.xlane.f32.xlu0 %v9014_v21  ;;  %v3213_v56 = vmul.f32 %v9014_v21, %v9014_v21  ;;  %v3269_v10 = vmul.f32 %v3189_v50, %v3189_v50  ;;  %v3301_v46 = vsub.f32 %v8898_v5, %v3189_v50 }
 0x70c   : > { %v3510_v39 = vmul.f32 %v8975_v57, %v3491_v55 }
 0x70d   : > { %3242 = vadd.xlane.f32.xlu2 %v3213_v56  ;;  %v3285_v19 = vsub.f32 %v3253_v3, %v3269_v10  ;;  %v11352_v10 = vld [vmem:[#allocation40_spill] sm:$0xff] }
 0x70e   : > { %v3529_v47 = vadd.f32 %v8983_v16, %v3510_v39 }
 0x70f   : > { %v7023_v53 = vpop.eup %7022  ;;  %v3317_v29 = vadd.f32 1e-06, %v3285_v19 }
 0x710   : > { %v3369_v6 = vmul.f32 %v7023_v53, %v3316_v35  ;;  %v3543_v4 = vpack.c.bf16 %v3529_v47, %v3528_v14  ;;  %vm3375_vm14 = vweird.f32 %v7023_v53 }
 0x711   : > { %7024 = vrsqrt.f32 %v3317_v29  ;;  %vm3376_vm0 = vmor %vm3374_vm15, %vm3375_vm14  ;;  %vm3384_vm2 = vweird.f32 %v3317_v29 }
 0x712   : > { %v3370_v59 = vmul.f32 %v7023_v53, %v3369_v6 }
 0x714   : > { %v3371_v33 = vmul.f32 0.5, %v3370_v59  ;;  %3665 = vmatmul.bf16.gmra.mxu2 %v3543_v4  ;;  %3714 = vmatmul.bf16.gmra.mxu3 %v3543_v4 }
 0x716   : > { %v3372_v23 = vsub.f32 1.5, %v3371_v33 }
 0x717   : > { %v7025_v28 = vpop.eup %7024 }
 0x718   : > { %v3373_v61 = vmul.f32 %v7023_v53, %v3372_v23  ;;  %v3379_v15 = vmul.f32 %v7025_v28, %v3317_v29  ;;  %vm3385_vm1 = vweird.f32 %v7025_v28 }
 0x719   : > { %vm3386_vm3 = vmor %vm3384_vm2, %vm3385_vm1 }
 0x71a   : > { %v3380_v1 = vmul.f32 %v7025_v28, %v3379_v15  ;;  %v3377_v24 = vsel %vm3376_vm0, %v7023_v53, %v3373_v61 }
 0x71b   : > { %v3492_v38 = vmul.f32 %v3377_v24, %v3300_v63 }
 0x71c   : > { %v3381_v30 = vmul.f32 0.5, %v3380_v1  ;;  %v11353_v1 = vld [vmem:[#allocation39_spill] sm:$0xff] }
 0x71d   : > { %v3511_v43 = vmul.f32 %v8975_v57, %v3492_v38 }
 0x71e   : > { %v3382_v49 = vsub.f32 1.5, %v3381_v30 }
 0x71f   : > { %v3530_v7 = vadd.f32 %v8983_v16, %v3511_v43 }
 0x720   : > { %v3383_v60 = vmul.f32 %v7025_v28, %v3382_v49 }
 0x722   : > { %v3387_v48 = vsel %vm3386_vm3, %v7025_v28, %v3383_v60 }
 0x723   : > { %v3493_v40 = vmul.f32 %v3387_v48, %v3301_v46 }
 0x725   : > { %v3512_v20 = vmul.f32 %v8975_v57, %v3493_v40 }
 0x727   : > { %v3531_v25 = vadd.f32 %v8983_v16, %v3512_v20 }
 0x729   : > { %v3544_v52 = vpack.c.bf16 %v3531_v25, %v3530_v7 }
 0x72b   : > { %3670 = vmatmul.bf16.gmra.mxu2 %v3544_v52  ;;  %3719 = vmatmul.bf16.gmra.mxu3 %v3544_v52 }
 0x72d   : > { %v3165_v31 = vpop.xlane.xlu2 %3164 }
 0x72e   : > { %v3190_v13 = vmul.f32 %v3165_v31, %v11344_v51 }
 0x72f   : > { %v3229_v26 = vpop.xlane.xlu1 %3228 }
 0x730   : > { %v3270_v35 = vmul.f32 %v3190_v13, %v3190_v13  ;;  %v3254_v9 = vmul.f32 %v3229_v26, %v11344_v51  ;;  %v3302_v31 = vsub.f32 %v8905_v27, %v3190_v13 }
 0x732   : > { %v3286_v37 = vsub.f32 %v3254_v9, %v3270_v35 }
 0x734   : > { %v3318_v42 = vadd.f32 1e-06, %v3286_v37 }
 0x735   : > { %v3167_v11 = vpop.xlane.xlu0 %3166 }
 0x736   : > { %7026 = vrsqrt.f32 %v3318_v42  ;;  %v9035_v36 = vmul.f32 %v3167_v11, %v11344_v51  ;;  %vm3394_vm5 = vweird.f32 %v3318_v42 }
 0x737   : > { %v3231_v18 = vpop.xlane.xlu2 %3230  ;;  %v3097_v50 = vpop.f32.mrf.mxu1 }
 0x738   : > { %v3271_v0 = vmul.f32 %v9035_v36, %v9035_v36  ;;  %v3255_v55 = vmul.f32 %v3231_v18, %v11344_v51  ;;  %v3098_v3 = vadd.f32 %v8858_v45, %v3097_v50 }
 0x73a   : > { %v3287_v56 = vsub.f32 %v3255_v55, %v3271_v0  ;;  %v9042_v32 = vadd.f32 %v3098_v3, %v11352_v10  ;;  %v3303_v0 = vsub.f32 %v8913_v62, %v9035_v36 }
 0x73c   : > { %v7027_v39 = vpop.eup %7026  ;;  %v3319_v19 = vadd.f32 1e-06, %v3287_v56  ;;  %3180 = vadd.xlane.f32.xlu0 %v9042_v32  ;;  %v3214_v47 = vmul.f32 %v9042_v32, %v9042_v32 }
 0x73d   : > { %v3389_v53 = vmul.f32 %v7027_v39, %v3318_v42  ;;  %v3169_v6 = vpop.xlane.xlu0 %3168  ;;  %vm3395_vm4 = vweird.f32 %v7027_v39 }
 0x73e   : > { %7028 = vrsqrt.f32 %v3319_v19  ;;  %v9048_v29 = vmul.f32 %v3169_v6, %v11344_v51  ;;  %3244 = vadd.xlane.f32.xlu2 %v3214_v47  ;;  %vm3396_vm6 = vmor %vm3394_vm5, %vm3395_vm4  ;;  %vm3404_vm8 = vweird.f32 %v3319_v19 }
 0x73f   : > { %v3390_v14 = vmul.f32 %v7027_v39, %v3389_v53  ;;  %v3233_v59 = vpop.xlane.xlu2 %3232  ;;  %v3099_v4 = vpop.f32.mrf.mxu1 }
 0x740   : > { %v3272_v33 = vmul.f32 %v9048_v29, %v9048_v29  ;;  %v3256_v23 = vmul.f32 %v3233_v59, %v11344_v51  ;;  %v3100_v28 = vadd.f32 %v8858_v45, %v3099_v4 }
 0x741   : > { %v3391_v61 = vmul.f32 0.5, %v3390_v14 }
 0x742   : > { %v3288_v15 = vsub.f32 %v3256_v23, %v3272_v33  ;;  %v9055_v24 = vadd.f32 %v3100_v28, %v11353_v1 }
 0x743   : > { %v3392_v30 = vsub.f32 1.5, %v3391_v61 }
 0x744   : > { %v7029_v63 = vpop.eup %7028  ;;  %v3320_v49 = vadd.f32 1e-06, %v3288_v15  ;;  %3182 = vadd.xlane.f32.xlu1 %v9055_v24  ;;  %v3215_v38 = vmul.f32 %v9055_v24, %v9055_v24 }
 0x745   : > { %v3393_v60 = vmul.f32 %v7027_v39, %v3392_v30  ;;  %v3399_v46 = vmul.f32 %v7029_v63, %v3319_v19  ;;  %v3171_v48 = vpop.xlane.xlu1 %3170  ;;  %vm3405_vm7 = vweird.f32 %v7029_v63 }
 0x746   : > { %7030 = vrsqrt.f32 %v3320_v49  ;;  %v9061_v45 = vmul.f32 %v3171_v48, %v11344_v51  ;;  %3246 = vadd.xlane.f32.xlu0 %v3215_v38  ;;  %vm3406_vm9 = vmor %vm3404_vm8, %vm3405_vm7  ;;  %vm3414_vm11 = vweird.f32 %v3320_v49 }
 0x747   : > { %v3400_v40 = vmul.f32 %v7029_v63, %v3399_v46  ;;  %v3235_v43 = vpop.xlane.xlu0 %3234  ;;  %v3397_v25 = vsel %vm3396_vm6, %v7027_v39, %v3393_v60 }
 0x748   : > { %v3273_v20 = vmul.f32 %v9061_v45, %v9061_v45  ;;  %v3257_v7 = vmul.f32 %v3235_v43, %v11344_v51  ;;  %v3494_v11 = vmul.f32 %v3397_v25, %v3302_v31  ;;  %v3304_v43 = vsub.f32 %v8920_v44, %v9048_v29 }
 0x749   : > { %v3401_v52 = vmul.f32 0.5, %v3400_v40 }
 0x74a   : > { %v3289_v26 = vsub.f32 %v3257_v7, %v3273_v20  ;;  %v3513_v19 = vmul.f32 %v8975_v57, %v3494_v11 }
 0x74b   : > { %v3402_v35 = vsub.f32 1.5, %v3401_v52 }
 0x74c   : > { %v7031_v9 = vpop.eup %7030  ;;  %v3321_v37 = vadd.f32 1e-06, %v3289_v26  ;;  %v3532_v33 = vadd.f32 %v8983_v16, %v3513_v19 }
 0x74d   : > { %v3403_v18 = vmul.f32 %v7029_v63, %v3402_v35  ;;  %v3409_v42 = vmul.f32 %v7031_v9, %v3320_v49  ;;  %v3173_v50 = vpop.xlane.xlu1 %3172  ;;  %vm3415_vm10 = vweird.f32 %v7031_v9  ;;  %v3305_v35 = vsub.f32 %v8927_v22, %v9061_v45 }
 0x74e   : > { %7032 = vrsqrt.f32 %v3321_v37  ;;  %v9070_v55 = vmul.f32 %v3173_v50, %v11344_v51  ;;  %vm3416_vm12 = vmor %vm3414_vm11, %vm3415_vm10  ;;  %vm3424_vm14 = vweird.f32 %v3321_v37 }
 0x74f   : > { %v3407_v3 = vsel %vm3406_vm9, %v7029_v63, %v3403_v18  ;;  %v3410_v13 = vmul.f32 %v7031_v9, %v3409_v42  ;;  %v3237_v56 = vpop.xlane.xlu0 %3236 }
 0x750   : > { %v3274_v10 = vmul.f32 %v9070_v55, %v9070_v55  ;;  %v3258_v39 = vmul.f32 %v3237_v56, %v11344_v51  ;;  %v3495_v47 = vmul.f32 %v3407_v3, %v3303_v0 }
 0x751   : > { %v3411_v53 = vmul.f32 0.5, %v3410_v13 }
 0x752   : > { %v3290_v6 = vsub.f32 %v3258_v39, %v3274_v10  ;;  %v3514_v36 = vmul.f32 %v8975_v57, %v3495_v47 }
 0x753   : > { %v3412_v14 = vsub.f32 1.5, %v3411_v53  ;;  %v3306_v53 = vsub.f32 %v8934_v12, %v9070_v55 }
 0x754   : > { %v7033_v59 = vpop.eup %7032  ;;  %v3322_v4 = vadd.f32 1e-06, %v3290_v6  ;;  %v3533_v23 = vadd.f32 %v8983_v16, %v3514_v36 }
 0x755   : > { %v3413_v28 = vmul.f32 %v7031_v9, %v3412_v14  ;;  %v3419_v61 = vmul.f32 %v7033_v59, %v3321_v37  ;;  %v3175_v15 = vpop.xlane.xlu2 %3174  ;;  %vm3425_vm13 = vweird.f32 %v7033_v59 }
 0x756   : > { %7034 = vrsqrt.f32 %v3322_v4  ;;  %v3195_v1 = vmul.f32 %v3175_v15, %v11344_v51  ;;  %v3545_v30 = vpack.c.bf16 %v3533_v23, %v3532_v33  ;;  %vm3426_vm15 = vmor %vm3424_vm14, %vm3425_vm13  ;;  %vm3434_vm1 = vweird.f32 %v3322_v4 }
 0x757   : > { %v3420_v63 = vmul.f32 %v7033_v59, %v3419_v61  ;;  %v3239_v38 = vpop.xlane.xlu1 %3238  ;;  %v3417_v48 = vsel %vm3416_vm12, %v7031_v9, %v3413_v28 }
 0x758   : > { %v3275_v60 = vmul.f32 %v3195_v1, %v3195_v1  ;;  %v3259_v46 = vmul.f32 %v3239_v38, %v11344_v51  ;;  %3675 = vmatmul.bf16.gmra.mxu2 %v3545_v30  ;;  %3724 = vmatmul.bf16.gmra.mxu3 %v3545_v30  ;;  %v3496_v31 = vmul.f32 %v3417_v48, %v3304_v43 }
 0x759   : > { %v3421_v40 = vmul.f32 0.5, %v3420_v63 }
 0x75a   : > { %v3291_v20 = vsub.f32 %v3259_v46, %v3275_v60  ;;  %v3515_v42 = vmul.f32 %v8975_v57, %v3496_v31 }
 0x75b   : > { %v3422_v7 = vsub.f32 1.5, %v3421_v40 }
 0x75c   : > { %v7035_v25 = vpop.eup %7034  ;;  %v3323_v52 = vadd.f32 1e-06, %v3291_v20  ;;  %v3534_v13 = vadd.f32 %v8983_v16, %v3515_v42 }
 0x75d   : > { %v3423_v49 = vmul.f32 %v7033_v59, %v3422_v7  ;;  %v3429_v26 = vmul.f32 %v7035_v25, %v3322_v4  ;;  %vm3435_vm0 = vweird.f32 %v7035_v25 }
 0x75e   : > { %7036 = vrsqrt.f32 %v3323_v52  ;;  %vm3436_vm2 = vmor %vm3434_vm1, %vm3435_vm0  ;;  %vm3444_vm4 = vweird.f32 %v3323_v52 }
 0x75f   : > { %v3427_v11 = vsel %vm3426_vm15, %v7033_v59, %v3423_v49  ;;  %v3430_v9 = vmul.f32 %v7035_v25, %v3429_v26  ;;  %v3307_v59 = vsub.f32 %v8944_v34, %v3195_v1 }
 0x760   : > { %v3497_v18 = vmul.f32 %v3427_v11, %v3305_v35 }
 0x761   : > { %v3431_v29 = vmul.f32 0.5, %v3430_v9 }
 0x762   : > { %v3516_v50 = vmul.f32 %v8975_v57, %v3497_v18 }
 0x763   : > { %v3432_v0 = vsub.f32 1.5, %v3431_v29 }
 0x764   : > { %v7037_v3 = vpop.eup %7036  ;;  %v3535_v37 = vadd.f32 %v8983_v16, %v3516_v50 }
 0x765   : > { %v3433_v56 = vmul.f32 %v7035_v25, %v3432_v0  ;;  %v3439_v10 = vmul.f32 %v7037_v3, %v3323_v52  ;;  %vm3445_vm3 = vweird.f32 %v7037_v3 }
 0x766   : > { %v3546_v45 = vpack.c.bf16 %v3535_v37, %v3534_v13  ;;  %vm3446_vm5 = vmor %vm3444_vm4, %vm3445_vm3 }
 0x767   : > { %v3440_v39 = vmul.f32 %v7037_v3, %v3439_v10  ;;  %v3437_v47 = vsel %vm3436_vm2, %v7035_v25, %v3433_v56 }
 0x768   : > { %3680 = vmatmul.bf16.gmra.mxu2 %v3546_v45  ;;  %3729 = vmatmul.bf16.gmra.mxu3 %v3546_v45  ;;  %v3498_v36 = vmul.f32 %v3437_v47, %v3306_v53 }
 0x769   : > { %v3441_v19 = vmul.f32 0.5, %v3440_v39 }
 0x76a   : > { %v3517_v4 = vmul.f32 %v8975_v57, %v3498_v36 }
 0x76b   : > { %v3442_v6 = vsub.f32 1.5, %v3441_v19 }
 0x76c   : > { %v3536_v61 = vadd.f32 %v8983_v16, %v3517_v4 }
 0x76d   : > { %v3443_v14 = vmul.f32 %v7037_v3, %v3442_v6 }
 0x76f   : > { %v3447_v33 = vsel %vm3446_vm5, %v7037_v3, %v3443_v14 }
 0x770   : > { %v3499_v23 = vmul.f32 %v3447_v33, %v3307_v59 }
 0x772   : > { %v3518_v28 = vmul.f32 %v8975_v57, %v3499_v23 }
 0x774   : > { %v3537_v15 = vadd.f32 %v8983_v16, %v3518_v28  ;;  %v3566_v16 = vld [vmem:[%s11354_s28] sm:$0x3]  ;;  %s6133_s28 = sshll.u32 %s7844_s29, 3 }
 0x775   : > { %v9111_v7 = vperm.slane %v3566_v16, 0  ;;  %v9113_v25 = vperm.slane %v3566_v16, 1  ;;  %s782_s24 = scalar_lea.vmem [#allocation21], %s6133_s28 }
 0x776   : > { %v3547_v30 = vpack.c.bf16 %v3537_v15, %v3536_v61  ;;  %v3177_v55 = vpop.xlane.xlu2 %3176  ;;  %s5936_s18 = sshll.u32 %s782_s24, 4  ;;  %s5937_s18 = int_to_ptr.vmem [resolvable:$true] %s5936_s18 }
 0x777   : > { %v9097_v63 = vmul.f32 %v3177_v55, %v11344_v51 }
 0x778   : > { %3685 = vmatmul.bf16.gmra.mxu2 %v3547_v30  ;;  %3734 = vmatmul.bf16.gmra.mxu3 %v3547_v30  ;;  %v3241_v38 = vpop.xlane.xlu1 %3240 }
 0x779   : > { %v3276_v1 = vmul.f32 %v9097_v63, %v9097_v63  ;;  %v3260_v60 = vmul.f32 %v3241_v38, %v11344_v51 }
 0x77b   : > { %v3292_v40 = vsub.f32 %v3260_v60, %v3276_v1 }
 0x77d   : > { %v9115_v52 = vadd.f32 1e-06, %v3292_v40 }
 0x77e   : > { %v3179_v46 = vpop.xlane.xlu0 %3178 }
 0x77f   : > { %v9103_v57 = vmul.f32 %v3179_v46, %v11344_v51  ;;  %7038 = vrsqrt.f32 %v9115_v52  ;;  %vm3454_vm6 = vweird.f32 %v9115_v52 }
 0x780   : > { %v3243_v48 = vpop.xlane.xlu2 %3242 }
 0x781   : > { %v3277_v43 = vmul.f32 %v9103_v57, %v9103_v57  ;;  %v3261_v20 = vmul.f32 %v3243_v48, %v11344_v51 }
 0x783   : > { %v3293_v31 = vsub.f32 %v3261_v20, %v3277_v43 }
 0x785   : > { %v9130_v42 = vadd.f32 1e-06, %v3293_v31  ;;  %v9141_v56 = vpop.eup %7038 }
 0x786   : > { %v3449_v14 = vmul.f32 %v9141_v56, %v9115_v52  ;;  %vm3455_vm7 = vweird.f32 %v9141_v56 }
 0x787   : > { %v3661_v49 = vpop.f32.mrf.mxu2  ;;  %v3710_v26 = vpop.f32.mrf.mxu3  ;;  %7040 = vrsqrt.f32 %v9130_v42  ;;  %vm3464_vm8 = vweird.f32 %v9130_v42  ;;  %vm9235_vm10 = vmor %vm3454_vm6, %vm3455_vm7 }
 0x788   : > { %v9118_v35 = vadd.f32 %v3661_v49, %v9111_v7  ;;  %v9121_v11 = vadd.f32 %v3710_v26, %v9113_v25  ;;  %v3450_v46 = vmul.f32 %v9141_v56, %v3449_v14 }
 0x78a   : > { %v9125_v9 = vmul.f32 0.70710677, %v9118_v35  ;;  %v9128_v18 = vmul.f32 0.70710677, %v9121_v11 }
 0x78c   : > { %v3814_v29 = vmul.f32 %v9125_v9, %v9125_v9  ;;  %v3854_v50 = vmul.f32 %v9128_v18, %v9128_v18 }
 0x78d   : > { %v9160_v61 = vpop.eup %7040 }
 0x78e   : > { %v9136_v0 = vmin.f32 %v3814_v29, 16.0  ;;  %v9138_v3 = vmin.f32 %v3854_v50, 16.0  ;;  %v3459_v43 = vmul.f32 %v9160_v61, %v9130_v42  ;;  %vm3465_vm9 = vweird.f32 %v9160_v61 }
 0x78f   : > { %v3663_v13 = vpop.f32.mrf.mxu2  ;;  %v3712_v37 = vpop.f32.mrf.mxu3  ;;  %vm9268_vm11 = vmor %vm3464_vm8, %vm3465_vm9 }
 0x790   : > { %v3816_v10 = vmul.f32 2.1237322e-06, %v9136_v0  ;;  %v3827_v45 = vmul.f32 3.8918573e-05, %v9136_v0  ;;  %v3856_v39 = vmul.f32 2.1237322e-06, %v9138_v3  ;;  %v9148_v19 = vadd.f32 %v3663_v13, %v9111_v7 }
 0x791   : > { %v3867_v47 = vmul.f32 3.8918573e-05, %v9138_v3  ;;  %v9151_v53 = vadd.f32 %v3712_v37, %v9113_v25 }
 0x792   : > { %v3817_v6 = vadd.f32 0.00028619796, %v3816_v10  ;;  %v3828_v36 = vadd.f32 0.001143296, %v3827_v45  ;;  %v3857_v59 = vadd.f32 0.00028619796, %v3856_v39 }
 0x793   : > { %v3868_v33 = vadd.f32 0.001143296, %v3867_v47  ;;  %v9158_v28 = vmul.f32 0.70710677, %v9148_v19  ;;  %v9165_v55 = vmul.f32 0.70710677, %v9151_v53 }
 0x794   : > { %v3818_v23 = vmul.f32 %v3817_v6, %v9136_v0  ;;  %v3829_v4 = vmul.f32 %v3828_v36, %v9136_v0  ;;  %v3858_v15 = vmul.f32 %v3857_v59, %v9138_v3  ;;  %v3451_v45 = vmul.f32 0.5, %v3450_v46 }
 0x795   : > { %v3869_v30 = vmul.f32 %v3868_v33, %v9138_v3  ;;  %v3894_v60 = vmul.f32 %v9158_v28, %v9158_v28  ;;  %v3934_v40 = vmul.f32 %v9165_v55, %v9165_v55  ;;  %v3460_v6 = vmul.f32 %v9160_v61, %v3459_v43 }
 0x796   : > { %v3819_v38 = vadd.f32 0.0036580483, %v3818_v23  ;;  %v3830_v1 = vadd.f32 0.014752088, %v3829_v4  ;;  %v3859_v48 = vadd.f32 0.0036580483, %v3858_v15 }
 0x797   : > { %v3870_v16 = vadd.f32 0.014752088, %v3869_v30  ;;  %v9176_v49 = vmin.f32 %v3894_v60, 16.0  ;;  %v9180_v50 = vmin.f32 %v3934_v40, 16.0 }
 0x798   : > { %v3820_v20 = vmul.f32 %v3819_v38, %v9136_v0  ;;  %v3831_v31 = vmul.f32 %v3830_v1, %v9136_v0  ;;  %v3860_v26 = vmul.f32 %v3859_v48, %v9138_v3 }
 0x799   : > { %v3871_v29 = vmul.f32 %v3870_v16, %v9138_v3  ;;  %v3896_v10 = vmul.f32 2.1237322e-06, %v9176_v49  ;;  %v3907_v47 = vmul.f32 3.8918573e-05, %v9176_v49  ;;  %v3936_v59 = vmul.f32 2.1237322e-06, %v9180_v50 }
 0x79a   : > { %v3821_v13 = vadd.f32 0.05243302, %v3820_v20  ;;  %v3832_v37 = vadd.f32 0.112945676, %v3831_v31  ;;  %v3861_v33 = vadd.f32 0.05243302, %v3860_v26 }
 0x79b   : > { %v3872_v39 = vadd.f32 0.112945676, %v3871_v29  ;;  %v3897_v14 = vadd.f32 0.00028619796, %v3896_v10  ;;  %v3908_v4 = vadd.f32 0.001143296, %v3907_v47 }
 0x79c   : > { %v3833_v36 = vmul.f32 %v3832_v37, %v9136_v0  ;;  %v3947_v15 = vmul.f32 3.8918573e-05, %v9180_v50  ;;  %v3822_v30 = vmul.f32 %v3821_v13, %v9136_v0  ;;  %v3937_v60 = vadd.f32 0.00028619796, %v3936_v59 }
 0x79d   : > { %v3873_v23 = vmul.f32 %v3872_v39, %v9138_v3  ;;  %v3898_v1 = vmul.f32 %v3897_v14, %v9176_v49  ;;  %v3909_v48 = vmul.f32 %v3908_v4, %v9176_v49  ;;  %v3461_v26 = vmul.f32 0.5, %v3460_v6  ;;  %v3666_v14 = vpop.f32.mrf.mxu2 }
 0x79e   : > { %v3834_v38 = vadd.f32 0.4994258, %v3833_v36  ;;  %v3948_v16 = vadd.f32 0.001143296, %v3947_v15  ;;  %v3938_v31 = vmul.f32 %v3937_v60, %v9180_v50  ;;  %v3452_v10 = vsub.f32 1.5, %v3451_v45 }
 0x79f   : > { %v3874_v46 = vadd.f32 0.4994258, %v3873_v23  ;;  %v3899_v20 = vadd.f32 0.0036580483, %v3898_v1  ;;  %v3910_v13 = vadd.f32 0.014752088, %v3909_v48  ;;  %v3862_v36 = vmul.f32 %v3861_v33, %v9138_v3 }
 0x7a0   : > { %v3835_v43 = vmul.f32 %v3834_v38, %v9136_v0  ;;  %v3949_v37 = vmul.f32 %v3948_v16, %v9180_v50  ;;  %v3823_v39 = vadd.f32 0.18741608, %v3822_v30  ;;  %v3939_v45 = vadd.f32 0.0036580483, %v3938_v31  ;;  %v3715_v30 = vpop.f32.mrf.mxu3 }
 0x7a1   : > { %v3875_v29 = vmul.f32 %v3874_v46, %v9138_v3  ;;  %v3900_v23 = vmul.f32 %v3899_v20, %v9176_v49  ;;  %v3911_v4 = vmul.f32 %v3910_v13, %v9176_v49  ;;  %v3462_v33 = vsub.f32 1.5, %v3461_v26 }
 0x7a2   : > { %v9198_v47 = vadd.f32 1.0, %v3835_v43  ;;  %v3950_v15 = vadd.f32 0.014752088, %v3949_v37  ;;  %v9212_v38 = vadd.f32 %v3666_v14, %v9111_v7  ;;  %v9215_v1 = vmul.f32 %v9141_v56, %v3452_v10 }
 0x7a3   : > { %v9201_v59 = vadd.f32 1.0, %v3875_v29  ;;  %v3824_v60 = vmul.f32 %v3823_v39, %v9136_v0  ;;  %v3863_v46 = vadd.f32 0.18741608, %v3862_v36  ;;  %v3901_v48 = vadd.f32 0.05243302, %v3900_v23 }
 0x7a4   : > { %7042 = vrcp.f32 %v9198_v47  ;;  %v3912_v16 = vadd.f32 0.112945676, %v3911_v4  ;;  %v3951_v43 = vmul.f32 %v3950_v15, %v9180_v50  ;;  %v9221_v20 = vadd.f32 %v3715_v30, %v9113_v25 }
 0x7a5   : > { %7044 = vrcp.f32 %v9201_v59  ;;  %v9225_v31 = vmul.f32 0.5, %v9118_v35  ;;  %v9228_v26 = vmul.f32 0.5, %v9121_v11  ;;  %v3940_v29 = vmul.f32 %v3939_v45, %v9180_v50  ;;  %v3668_v34 = vpop.f32.mrf.mxu2 }
 0x7a6   : > { %v9240_v13 = vmul.f32 %v9160_v61, %v3462_v33  ;;  %v3913_v37 = vmul.f32 %v3912_v16, %v9176_v49  ;;  %v3952_v35 = vadd.f32 0.112945676, %v3951_v43  ;;  %v9244_v10 = vmul.f32 0.70710677, %v9212_v38 }
 0x7a7   : > { %v3825_v39 = vadd.f32 1.1283791, %v3824_v60  ;;  %v3864_v36 = vmul.f32 %v3863_v46, %v9138_v3  ;;  %v9254_v14 = vmul.f32 0.5, %v9148_v19  ;;  %v3902_v15 = vmul.f32 %v3901_v48, %v9176_v49  ;;  %v6656_v3 = vld [vmem:[#allocation20 + $0x20] sm:$0xff] }
 0x7a8   : > { %v3914_v45 = vadd.f32 0.4994258, %v3913_v37  ;;  %v9262_v30 = vmul.f32 0.70710677, %v9221_v20  ;;  %v9275_v33 = vmul.f32 0.5, %v9151_v53  ;;  %v3953_v46 = vmul.f32 %v3952_v35, %v9180_v50 }
 0x7a9   : > { %v3941_v60 = vadd.f32 0.05243302, %v3940_v29  ;;  %v3974_v43 = vmul.f32 %v9244_v10, %v9244_v10  ;;  %v9286_v37 = vmul.f32 %v3825_v39, %v9125_v9  ;;  %vm3842_vm12 = vweird.f32 %v9198_v47 }
 0x7aa   : > { %v9246_v11 = vpop.eup %7042  ;;  %v3915_v42 = vmul.f32 %v3914_v45, %v9176_v49  ;;  %v3865_v53 = vadd.f32 1.1283791, %v3864_v36  ;;  %v3954_v29 = vadd.f32 0.4994258, %v3953_v46  ;;  %v3903_v6 = vadd.f32 0.18741608, %v3902_v15 }
 0x7ab   : > { %v9256_v23 = vpop.eup %7044  ;;  %v3838_v4 = vmul.f32 %v9246_v11, %v9198_v47  ;;  %v9291_v52 = vmin.f32 %v3974_v43, 16.0  ;;  %v3942_v40 = vmul.f32 %v3941_v60, %v9180_v50  ;;  %v3846_v39 = vand.u32 2147483647, %v9198_v47 }
 0x7ac   : > { %v3878_v19 = vmul.f32 %v9256_v23, %v9201_v59  ;;  %v9289_v35 = vadd.f32 1.0, %v3915_v42  ;;  %v3955_v9 = vmul.f32 %v3954_v29, %v9180_v50  ;;  %v3848_v36 = vand.u32 2147483648, %v9198_v47 }
 0x7ad   : > { %v3839_v16 = vsub.f32 1.0, %v3838_v4  ;;  %v4014_v4 = vmul.f32 %v9262_v30, %v9262_v30  ;;  %v3888_v15 = vand.u32 2147483648, %v9201_v59  ;;  %v9303_v46 = vmul.f32 %v3865_v53, %v9128_v18 }
 0x7ae   : > { %v3879_v48 = vsub.f32 1.0, %v3878_v19  ;;  %7046 = vrcp.f32 %v9289_v35  ;;  %vm3882_vm13 = vweird.f32 %v9201_v59  ;;  %v9307_v19 = vadd.f32 1.0, %v3955_v9 }
 0x7af   : > { %v3840_v45 = vmul.f32 %v9246_v11, %v3839_v16  ;;  %v3886_v16 = vand.u32 2147483647, %v9201_v59  ;;  %v3904_v60 = vmul.f32 %v3903_v6, %v9176_v49  ;;  %v3976_v42 = vmul.f32 2.1237322e-06, %v9291_v52 }
 0x7b0   : > { %v3987_v43 = vmul.f32 3.8918573e-05, %v9291_v52  ;;  %v9312_v29 = vmin.f32 %v4014_v4, 16.0  ;;  %vm3843_vm14 = vweird.f32 %v9246_v11  ;;  %v3880_v18 = vmul.f32 %v9256_v23, %v3879_v48 }
 0x7b1   : > { %v3841_v12 = vadd.f32 %v9246_v11, %v3840_v45  ;;  %v3943_v53 = vadd.f32 0.18741608, %v3942_v40  ;;  %vm9317_vm15 = vcmp.eq.f32.partialorder %v3846_v39, 8.507059e+37  ;;  %v3849_v9 = vor.u32 1.1754944e-38, %v3848_v36  ;;  %vm9339_vm1 = vmor %vm3842_vm12, %vm3843_vm14 }
 0x7b2   : > { %v3889_v49 = vor.u32 1.1754944e-38, %v3888_v15  ;;  %7048 = vrcp.f32 %v9307_v19  ;;  %vm9322_vm0 = vcmp.eq.f32.partialorder %v3886_v16, 8.507059e+37  ;;  %v9327_v4 = vmul.f32 0.5, %v9212_v38 }
 0x7b3   : > { %v3977_v45 = vadd.f32 0.00028619796, %v3976_v42  ;;  %v9330_v44 = vmul.f32 0.5, %v9221_v20  ;;  %v9333_v40 = vadd.f32 %v3668_v34, %v9111_v7  ;;  %vm3883_vm2 = vweird.f32 %v9256_v23 }
 0x7b4   : > { %v9335_v48 = vpop.eup %7046  ;;  %v3905_v36 = vadd.f32 1.1283791, %v3904_v60  ;;  %v3988_v38 = vadd.f32 0.001143296, %v3987_v43  ;;  %v4016_v15 = vmul.f32 2.1237322e-06, %v9312_v29  ;;  %v3845_v20 = vsel %vm9339_vm1, %v9246_v11, %v3841_v12  ;;  %vm9366_vm4 = vmor %vm3882_vm13, %vm3883_vm2 }
 0x7b5   : > { %v3881_v34 = vadd.f32 %v9256_v23, %v3880_v18  ;;  %v3918_v16 = vmul.f32 %v9335_v48, %v9289_v35  ;;  %v3944_v47 = vmul.f32 %v3943_v53, %v9180_v50  ;;  %vm3922_vm3 = vweird.f32 %v9289_v35 }
 0x7b6   : > { %v3926_v42 = vand.u32 2147483647, %v9289_v35  ;;  %v3978_v60 = vmul.f32 %v3977_v45, %v9291_v52  ;;  %v3989_v43 = vmul.f32 %v3988_v38, %v9291_v52  ;;  %v3928_v27 = vand.u32 2147483648, %v9289_v35 }
 0x7b7   : > { %v3919_v62 = vsub.f32 1.0, %v3918_v16  ;;  %v4017_v39 = vadd.f32 0.00028619796, %v4016_v15  ;;  %v4027_v12 = vmul.f32 3.8918573e-05, %v9312_v29  ;;  %v3850_v18 = vsel %vm9317_vm15, %v3849_v9, %v3845_v20 }
 0x7b8   : > { %v9358_v11 = vpop.eup %7048  ;;  %v3979_v53 = vadd.f32 0.0036580483, %v3978_v60  ;;  %v3990_v45 = vadd.f32 0.014752088, %v3989_v43  ;;  %v9371_v38 = vmul.f32 0.70710677, %v9333_v40  ;;  %v3885_v15 = vsel %vm9366_vm4, %v9256_v23, %v3881_v34 }
 0x7b9   : > { %v3920_v22 = vmul.f32 %v9335_v48, %v3919_v62  ;;  %vm3923_vm5 = vweird.f32 %v9335_v48  ;;  %v3958_v59 = vmul.f32 %v9358_v11, %v9307_v19  ;;  %v4018_v16 = vmul.f32 %v4017_v39, %v9312_v29 }
 0x7ba   : > { %v3980_v9 = vmul.f32 %v3979_v53, %v9291_v52  ;;  %v3991_v20 = vmul.f32 %v3990_v45, %v9291_v52  ;;  %v4028_v60 = vadd.f32 0.001143296, %v4027_v12  ;;  %v3945_v5 = vadd.f32 1.1283791, %v3944_v47  ;;  %vm9395_vm6 = vmor %vm3922_vm3, %vm3923_vm5  ;;  %v6667_v12 = vld [vmem:[#allocation20 + $0x78] sm:$0xff] }
 0x7bb   : > { %v3921_v43 = vadd.f32 %v9335_v48, %v3920_v22  ;;  %v3959_v58 = vsub.f32 1.0, %v3958_v59  ;;  %v4054_v23 = vmul.f32 %v9371_v38, %v9371_v38  ;;  %v3851_v62 = vmul.f32 %v3850_v18, %v9286_v37  ;;  %5355 = vmatpush.bf16.msrb.mxu1 %v6667_v12 }
 0x7bc   : > { %v3890_v34 = vsel %vm9322_vm0, %v3889_v49, %v3885_v15  ;;  %v3992_v50 = vadd.f32 0.112945676, %v3991_v20  ;;  %v4029_v53 = vmul.f32 %v4028_v60, %v9312_v29  ;;  %v3906_v45 = vmul.f32 %v3905_v36, %v9158_v28  ;;  %v6659_v49 = vld [vmem:[#allocation20 + $0x38] sm:$0xff]  ;;  %v6658_v60 = vld [vmem:[#allocation20 + $0x30] sm:$0xff] }
 0x7bd   : > { %vm9399_vm7 = vcmp.eq.f32.partialorder %v3926_v42, 8.507059e+37  ;;  %v3981_v37 = vadd.f32 0.05243302, %v3980_v9  ;;  %v9403_v6 = vmin.f32 %v4054_v23, 16.0  ;;  %v3925_v28 = vsel %vm9395_vm6, %v9335_v48, %v3921_v43  ;;  %5306 = vmatpush.bf16.msrb.mxu0 %v6659_v49  ;;  %v6666_v43 = vld [vmem:[#allocation20 + $0x70] sm:$0xff] }
 0x7be   : > { %v3960_v36 = vmul.f32 %v9358_v11, %v3959_v58  ;;  %v3993_v35 = vmul.f32 %v3992_v50, %v9291_v52  ;;  %v4019_v18 = vadd.f32 0.0036580483, %v4018_v16  ;;  %v3891_v15 = vmul.f32 %v3890_v34, %v9303_v46 }
 0x7bf   : > { %v3929_v42 = vor.u32 1.1754944e-38, %v3928_v27  ;;  %v4030_v22 = vadd.f32 0.014752088, %v4029_v53  ;;  %v4056_v59 = vmul.f32 2.1237322e-06, %v9403_v6  ;;  %v6470_v9 = vclamps-f32 %v3851_v62, 1.0  ;;  %v3717_v62 = vpop.f32.mrf.mxu3  ;;  %5356 = vmatpush.bf16.msrb.mxu1 %v6666_v43 }
 0x7c0   : > { %v9413_v20 = vmul.f32 %v3945_v5, %v9165_v55  ;;  %vm3962_vm8 = vweird.f32 %v9307_v19  ;;  %v3994_v48 = vadd.f32 0.4994258, %v3993_v35  ;;  %v3982_v16 = vmul.f32 %v3981_v37, %v9291_v52 }
 0x7c1   : > { %v3930_v58 = vsel %vm9399_vm7, %v3929_v42, %v3925_v28  ;;  %v4031_v46 = vmul.f32 %v4030_v22, %v9312_v29  ;;  %v4057_v27 = vadd.f32 0.00028619796, %v4056_v59  ;;  %v3961_v23 = vadd.f32 %v9358_v11, %v3960_v36  ;;  %5307 = vmatpush.bf16.msrb.mxu0 %v6658_v60  ;;  %v6665_v42 = vld [vmem:[#allocation20 + $0x68] sm:$0xff] }
 0x7c2   : > { %vm3963_vm9 = vweird.f32 %v9358_v11  ;;  %v3995_v5 = vmul.f32 %v3994_v48, %v9291_v52  ;;  %v4020_v55 = vmul.f32 %v4019_v18, %v9312_v29  ;;  %v6471_v34 = vclamps-f32 %v3891_v15, 1.0  ;;  %v6657_v15 = vld [vmem:[#allocation20 + $0x28] sm:$0xff] }
 0x7c3   : > { %v3968_v50 = vand.u32 2147483648, %v9307_v19  ;;  %v4032_v53 = vadd.f32 0.112945676, %v4031_v46  ;;  %v4058_v47 = vmul.f32 %v4057_v27, %v9403_v6  ;;  %v3931_v39 = vmul.f32 %v3930_v58, %v3906_v45  ;;  %vm9436_vm12 = vmor %vm3962_vm8, %vm3963_vm9  ;;  %5357 = vmatpush.bf16.msrb.mxu1 %v6665_v42 }
 0x7c4   : > { %v3966_v37 = vand.u32 2147483647, %v9307_v19  ;;  %v9427_v49 = vadd.f32 1.0, %v3995_v5  ;;  %v9430_v12 = vmul.f32 0.5, %v9333_v40  ;;  %v5094_v28 = vadd.f32 1.0, %v6470_v9 }
 0x7c5   : > { %v3983_v35 = vadd.f32 0.18741608, %v3982_v16  ;;  %v4033_v18 = vmul.f32 %v4032_v53, %v9312_v29  ;;  %v3718_v45 = vadd.f32 %v3717_v62, %v9113_v25  ;;  %v3965_v40 = vsel %vm9436_vm12, %v9358_v11, %v3961_v23  ;;  %5308 = vmatpush.bf16.msrb.mxu0 %v6657_v15  ;;  %v9474_v5 = vld [vmem:[%s11237_s11] ss:$0 sm:$0xff] }
 0x7c6   : > { %7050 = vrcp.f32 %v9427_v49  ;;  %v4021_v22 = vadd.f32 0.05243302, %v4020_v55  ;;  %v11373_v19 = vsub.f32 %v8990_v41, %v9097_v63  ;;  %v11374_v59 = vsel %vm9235_vm10, %v9141_v56, %v9215_v1 }
 0x7c7   : > { %v5095_v48 = vadd.f32 1.0, %v6471_v34  ;;  %v3969_v58 = vor.u32 1.1754944e-38, %v3968_v50  ;;  %v4059_v16 = vadd.f32 0.0036580483, %v4058_v47  ;;  %v11375_v46 = vsub.f32 %v9014_v21, %v9103_v57 }
 0x7c8   : > { %v3500_v9 = vmul.f32 %v11374_v59, %v11373_v19  ;;  %v11376_v11 = vsel %vm9268_vm11, %v9160_v61, %v9240_v13  ;;  %v6472_v63 = vclamps-f32 %v3931_v39, 1.0  ;;  %vm3967_vm13 = vcmp.eq.f32.partialorder %v3966_v37, 8.507059e+37 }
 0x7c9   : > { %v3501_v27 = vmul.f32 %v11376_v11, %v11375_v46  ;;  %v4034_v0 = vadd.f32 0.4994258, %v4033_v18  ;;  %v4067_v56 = vmul.f32 3.8918573e-05, %v9403_v6  ;;  %v9464_v1 = vmul.f32 %v5094_v28, %v9225_v31  ;;  %v6664_v31 = vld [vmem:[#allocation20 + $0x60] sm:$0xff]  ;;  %5309 = vmatpush.bf16.msrb.mxu0 %v6656_v3 }
 0x7ca   : > { %v3970_v60 = vsel %vm3967_vm13, %v3969_v58, %v3965_v40  ;;  %v3984_v43 = vmul.f32 %v3983_v35, %v9291_v52  ;;  %v9467_v57 = vmul.f32 0.70710677, %v3718_v45  ;;  %v4022_v23 = vmul.f32 %v4021_v22, %v9312_v29  ;;  %5358 = vmatpush.bf16.msrb.mxu1 %v6664_v31  ;;  %v9497_v35 = vld [vmem:[%s11347_s19] ss:$0 sm:$0xff] }
 0x7cb   : > { %v4035_v61 = vmul.f32 %v4034_v0, %v9312_v29  ;;  %v4068_v13 = vadd.f32 0.001143296, %v4067_v56  ;;  %v3519_v55 = vmul.f32 %v9474_v5, %v3500_v9  ;;  %v9478_v62 = vmul.f32 %v5095_v48, %v9228_v26  ;;  %v3671_v48 = vpop.f32.mrf.mxu2  ;;  %v3720_v0 = vpop.f32.mrf.mxu3 }
 0x7cc   : > { %v4060_v52 = vmul.f32 %v4059_v16, %v9403_v6  ;;  %v4094_v34 = vmul.f32 %v9467_v57, %v9467_v57  ;;  %v3520_v50 = vmul.f32 %v9474_v5, %v3501_v27  ;;  %v9484_v53 = vpop.eup %7050  ;;  %v5096_v47 = vadd.f32 1.0, %v6472_v63 }
 0x7cd   : > { %v3971_v39 = vmul.f32 %v3970_v60, %v9413_v20  ;;  %v9487_v37 = vadd.f32 1.0, %v4035_v61  ;;  %v4069_v28 = vmul.f32 %v4068_v13, %v9403_v6  ;;  %v3998_v26 = vmul.f32 %v9484_v53, %v9427_v49 }
 0x7ce   : > { %v9492_v36 = vmin.f32 %v4094_v34, 16.0  ;;  %v3538_v18 = vadd.f32 %v9497_v35, %v3519_v55  ;;  %v3539_v15 = vadd.f32 %v9497_v35, %v3520_v50  ;;  %v3985_v20 = vadd.f32 1.1283791, %v3984_v43 }
 0x7cf   : > { %v4023_v42 = vadd.f32 0.18741608, %v4022_v23  ;;  %7052 = vrcp.f32 %v9487_v37  ;;  %v9502_v40 = vmul.f32 0.5, %v3718_v45  ;;  %v3999_v22 = vsub.f32 1.0, %v3998_v26 }
 0x7d0   : > { %v4061_v19 = vadd.f32 0.05243302, %v4060_v52  ;;  %v4070_v59 = vadd.f32 0.014752088, %v4069_v28  ;;  %v3548_v9 = vpack.c.bf16 %v3539_v15, %v3538_v18  ;;  %v9505_v58 = vmul.f32 %v5096_v47, %v9254_v14 }
 0x7d1   : > { %v6473_v16 = vclamps-f32 %v3971_v39, 1.0  ;;  %v4096_v46 = vmul.f32 2.1237322e-06, %v9492_v36  ;;  %v4107_v11 = vmul.f32 3.8918573e-05, %v9492_v36  ;;  %v4000_v27 = vmul.f32 %v9484_v53, %v3999_v22 }
 0x7d2   : > { %vm4002_vm10 = vweird.f32 %v9427_v49  ;;  %v4006_v45 = vand.u32 2147483647, %v9427_v49  ;;  %v4071_v63 = vmul.f32 %v4070_v59, %v9403_v6  ;;  %3690 = vmatmul.bf16.gmra.mxu2 %v3548_v9  ;;  %3739 = vmatmul.bf16.gmra.mxu3 %v3548_v9  ;;  %vm4003_vm11 = vweird.f32 %v9484_v53 }
 0x7d3   : > { %v4097_v14 = vadd.f32 0.00028619796, %v4096_v46  ;;  %v4108_v56 = vadd.f32 0.001143296, %v4107_v11  ;;  %v9515_v60 = vadd.f32 %v3671_v48, %v9111_v7  ;;  %v4001_v43 = vadd.f32 %v9484_v53, %v4000_v27  ;;  %vm4004_vm14 = vmor %vm4002_vm10, %vm4003_vm11 }
 0x7d4   : > { %v4008_v3 = vand.u32 2147483648, %v9427_v49  ;;  %v4062_v23 = vmul.f32 %v4061_v19, %v9403_v6  ;;  %v4072_v61 = vadd.f32 0.112945676, %v4071_v63  ;;  %v9528_v34 = vadd.f32 %v3720_v0, %v9113_v25 }
 0x7d5   : > { %v9520_v13 = vpop.eup %7052  ;;  %v4098_v55 = vmul.f32 %v4097_v14, %v9492_v36  ;;  %v4109_v31 = vmul.f32 %v4108_v56, %v9492_v36  ;;  %v9525_v52 = vmul.f32 0.70710677, %v9515_v60  ;;  %v5158_v50 = vpack.c.bf16 %v9505_v58, %v9464_v1 }
 0x7d6   : > { %v5097_v47 = vadd.f32 1.0, %v6473_v16  ;;  %v3986_v39 = vmul.f32 %v3985_v20, %v9244_v10  ;;  %v4038_v28 = vmul.f32 %v9520_v13, %v9487_v37  ;;  %v4005_v26 = vsel %vm4004_vm14, %v9484_v53, %v4001_v43 }
 0x7d7   : > { %v4073_v18 = vmul.f32 %v4072_v61, %v9403_v6  ;;  %v4099_v15 = vadd.f32 0.0036580483, %v4098_v55  ;;  %v4110_v22 = vadd.f32 0.014752088, %v4109_v31  ;;  %vm4007_vm15 = vcmp.eq.f32.partialorder %v4006_v45, 8.507059e+37  ;;  %v3181_v55 = vpop.xlane.xlu0 %3180  ;;  %v6655_v31 = vld [vmem:[#allocation20 + $0x18] sm:$0xff] }
 0x7d8   : > { %v4009_v19 = vor.u32 1.1754944e-38, %v4008_v3  ;;  %v4039_v59 = vsub.f32 1.0, %v4038_v28  ;;  %v4134_v10 = vmul.f32 %v9525_v52, %v9525_v52  ;;  %v4063_v20 = vadd.f32 0.18741608, %v4062_v23  ;;  %v6663_v28 = vld [vmem:[#allocation20 + $0x58] sm:$0xff]  ;;  %5310 = vmatpush.bf16.msrb.mxu0 %v6655_v31 }
 0x7d9   : > { %v4074_v9 = vadd.f32 0.4994258, %v4073_v18  ;;  %v4111_v49 = vmul.f32 %v4110_v22, %v9492_v36  ;;  %v9545_v48 = vmul.f32 0.70710677, %v9528_v34  ;;  %v4024_v53 = vmul.f32 %v4023_v42, %v9312_v29  ;;  %5359 = vmatpush.bf16.msrb.mxu1 %v6663_v28 }
 0x7da   : > { %v4010_v16 = vsel %vm4007_vm15, %v4009_v19, %v4005_v26  ;;  %v4100_v46 = vmul.f32 %v4099_v15, %v9492_v36  ;;  %v9549_v11 = vmin.f32 %v4134_v10, 16.0  ;;  %v4040_v27 = vmul.f32 %v9520_v13, %v4039_v59 }
 0x7db   : > { %v4075_v45 = vmul.f32 %v4074_v9, %v9403_v6  ;;  %v4112_v63 = vadd.f32 0.112945676, %v4111_v49  ;;  %v4174_v0 = vmul.f32 %v9545_v48, %v9545_v48  ;;  %v9556_v14 = vmul.f32 %v5097_v47, %v9275_v33 }
 0x7dc   : > { %v4046_v56 = vand.u32 2147483647, %v9487_v37  ;;  %v4136_v43 = vmul.f32 2.1237322e-06, %v9549_v11  ;;  %v4147_v29 = vmul.f32 3.8918573e-05, %v9549_v11  ;;  %v4064_v42 = vmul.f32 %v4063_v20, %v9403_v6 }
 0x7dd   : > { %v9562_v3 = vadd.f32 1.0, %v4075_v45  ;;  %v4113_v23 = vmul.f32 %v4112_v63, %v9492_v36  ;;  %v9565_v61 = vmin.f32 %v4174_v0, 16.0  ;;  %v4011_v26 = vmul.f32 %v4010_v16, %v3986_v39  ;;  %v6653_v16 = vld [vmem:[#allocation20 + $0x8] sm:$0xff] }
 0x7de   : > { %v4101_v33 = vadd.f32 0.05243302, %v4100_v46  ;;  %v4137_v47 = vadd.f32 0.00028619796, %v4136_v43  ;;  %v4148_v18 = vadd.f32 0.001143296, %v4147_v29  ;;  %v4041_v22 = vadd.f32 %v9520_v13, %v4040_v27  ;;  %v3245_v27 = vpop.xlane.xlu2 %3244 }
 0x7df   : > { %v4025_v15 = vadd.f32 1.1283791, %v4024_v53  ;;  %vm4043_vm0 = vweird.f32 %v9520_v13  ;;  %7054 = vrcp.f32 %v9562_v3  ;;  %vm4042_vm1 = vweird.f32 %v9487_v37 }
 0x7e0   : > { %v4048_v6 = vand.u32 2147483648, %v9487_v37  ;;  %v4114_v19 = vadd.f32 0.4994258, %v4113_v23  ;;  %v9573_v59 = vmul.f32 %v3181_v55, %v11344_v51  ;;  %vm9575_vm2 = vcmp.eq.f32.partialorder %v4046_v56, 8.507059e+37  ;;  %vm9582_vm3 = vmor %vm4042_vm1, %vm4043_vm0 }
 0x7e1   : > { %v4138_v10 = vmul.f32 %v4137_v47, %v9549_v11  ;;  %v4149_v20 = vmul.f32 %v4148_v18, %v9549_v11  ;;  %v4176_v9 = vmul.f32 2.1237322e-06, %v9565_v61  ;;  %v6474_v49 = vclamps-f32 %v4011_v26, 1.0  ;;  %v6662_v47 = vld [vmem:[#allocation20 + $0x50] sm:$0xff] }
 0x7e2   : > { %v4065_v37 = vadd.f32 1.1283791, %v4064_v42  ;;  %v4102_v53 = vmul.f32 %v4101_v33, %v9492_v36  ;;  %v4115_v46 = vmul.f32 %v4114_v19, %v9492_v36  ;;  %v4045_v45 = vsel %vm9582_vm3, %v9520_v13, %v4041_v22  ;;  %v6654_v33 = vld [vmem:[#allocation20 + $0x10] sm:$0xff]  ;;  %5360 = vmatpush.bf16.msrb.mxu1 %v6662_v47  ;;  %v6660_v47 = vld [vmem:[#allocation20 + $0x40] sm:$0xff] }
 0x7e3   : > { %v4139_v63 = vadd.f32 0.0036580483, %v4138_v10  ;;  %v4150_v0 = vadd.f32 0.014752088, %v4149_v20  ;;  %v4177_v56 = vadd.f32 0.00028619796, %v4176_v9  ;;  %v3278_v42 = vmul.f32 %v9573_v59, %v9573_v59  ;;  %5311 = vmatpush.bf16.msrb.mxu0 %v6654_v33 }
 0x7e4   : > { %v4049_v43 = vor.u32 1.1754944e-38, %v4048_v6  ;;  %v9591_v29 = vadd.f32 1.0, %v4115_v46  ;;  %v4187_v23 = vmul.f32 3.8918573e-05, %v9565_v61  ;;  %v3262_v13 = vmul.f32 %v3245_v27, %v11344_v51 }
 0x7e5   : > { %v9596_v55 = vpop.eup %7054  ;;  %v4140_v31 = vmul.f32 %v4139_v63, %v9549_v11  ;;  %v4151_v28 = vmul.f32 %v4150_v0, %v9549_v11  ;;  %v4178_v26 = vmul.f32 %v4177_v56, %v9565_v61  ;;  %v5159_v18 = vpack.c.bf16 %v9556_v14, %v9478_v62 }
 0x7e6   : > { %v4026_v22 = vmul.f32 %v4025_v15, %v9262_v30  ;;  %v4050_v6 = vsel %vm9575_vm2, %v4049_v43, %v4045_v45  ;;  %v4078_v19 = vmul.f32 %v9596_v55, %v9562_v3  ;;  %v5098_v10 = vadd.f32 1.0, %v6474_v49  ;;  %v6661_v15 = vld [vmem:[#allocation20 + $0x48] sm:$0xff]  ;;  %v3673_v49 = vpop.f32.mrf.mxu2 }
 0x7e7   : > { %v9610_v20 = vmul.f32 %v4065_v37, %v9371_v38  ;;  %v4103_v9 = vadd.f32 0.18741608, %v4102_v53  ;;  %7056 = vrcp.f32 %v9591_v29  ;;  %v4141_v27 = vadd.f32 0.05243302, %v4140_v31  ;;  %5312 = vmatpush.bf16.msrb.mxu0 %v6653_v16  ;;  %5361 = vmatpush.bf16.msrb.mxu1 %v6661_v15 }
 0x7e8   : > { %v4079_v46 = vsub.f32 1.0, %v4078_v19  ;;  %v4152_v63 = vadd.f32 0.112945676, %v4151_v28  ;;  %v3294_v30 = vsub.f32 %v3262_v13, %v3278_v42  ;;  %v4051_v39 = vmul.f32 %v4050_v6, %v4026_v22  ;;  %v6652_v28 = vld [vmem:[#allocation20] sm:$0xff] }
 0x7e9   : > { %v4086_v45 = vand.u32 2147483647, %v9562_v3  ;;  %v4179_v0 = vadd.f32 0.0036580483, %v4178_v26  ;;  %v4188_v56 = vadd.f32 0.001143296, %v4187_v23  ;;  %vm4083_vm4 = vweird.f32 %v9596_v55 }
 0x7ea   : > { %v4080_v38 = vmul.f32 %v9596_v55, %v4079_v46  ;;  %v4153_v37 = vmul.f32 %v4152_v63, %v9549_v11  ;;  %v9617_v53 = vadd.f32 1e-06, %v3294_v30  ;;  %vm4082_vm5 = vweird.f32 %v9562_v3 }
 0x7eb   : > { %v4088_v43 = vand.u32 2147483648, %v9562_v3  ;;  %v4104_v42 = vmul.f32 %v4103_v9, %v9492_v36  ;;  %v4189_v31 = vmul.f32 %v4188_v56, %v9565_v61  ;;  %v4142_v26 = vmul.f32 %v4141_v27, %v9549_v11  ;;  %vm9633_vm6 = vmor %vm4082_vm5, %vm4083_vm4  ;;  %5313 = vmatpush.bf16.msrb.mxu0 %v6652_v28  ;;  %v3722_v56 = vpop.f32.mrf.mxu3  ;;  %5362 = vmatpush.bf16.msrb.mxu1 %v6660_v47 }
 0x7ec   : > { %v4081_v23 = vadd.f32 %v9596_v55, %v4080_v38  ;;  %v4154_v13 = vadd.f32 0.4994258, %v4153_v37  ;;  %v9626_v33 = vadd.f32 %v3673_v49, %v9111_v7  ;;  %v9629_v6 = vmul.f32 %v5098_v10, %v9327_v4 }
 0x7ed   : > { %v7057_v22 = vpop.eup %7056  ;;  %v4180_v3 = vmul.f32 %v4179_v0, %v9565_v61  ;;  %v4190_v19 = vadd.f32 0.014752088, %v4189_v31  ;;  %7058 = vrsqrt.f32 %v9617_v53  ;;  %v6475_v9 = vclamps-f32 %v4051_v39, 1.0 }
 0x7ee   : > { %v4085_v16 = vsel %vm9633_vm6, %v9596_v55, %v4081_v23  ;;  %vm4087_vm7 = vcmp.eq.f32.partialorder %v4086_v45, 8.507059e+37  ;;  %v4118_v4 = vmul.f32 %v7057_v22, %v9591_v29  ;;  %v4089_v10 = vor.u32 1.1754944e-38, %v4088_v43  ;;  %5314 = vmatmul.bf16.vlgmr.msrb.gmra.mxu0 %v5158_v50  ;;  %5363 = vmatmul.bf16.vlgmr.msrb.gmra.mxu1 %v5159_v18 }
 0x7ef   : > { %v4105_v46 = vadd.f32 1.1283791, %v4104_v42  ;;  %v4155_v27 = vmul.f32 %v4154_v13, %v9549_v11  ;;  %v4191_v63 = vmul.f32 %v4190_v19, %v9565_v61  ;;  %v4128_v15 = vand.u32 2147483648, %v9591_v29 }
 0x7f0   : > { %v4119_v30 = vsub.f32 1.0, %v4118_v4  ;;  %v4143_v0 = vadd.f32 0.18741608, %v4142_v26  ;;  %v9647_v39 = vmul.f32 0.70710677, %v9626_v33  ;;  %v4090_v55 = vsel %vm4087_vm7, %v4089_v10, %v4085_v16 }
 0x7f1   : > { %v9649_v45 = vadd.f32 1.0, %v4155_v27  ;;  %v4181_v49 = vadd.f32 0.05243302, %v4180_v3  ;;  %v4192_v38 = vadd.f32 0.112945676, %v4191_v63  ;;  %v5099_v37 = vadd.f32 1.0, %v6475_v9 }
 0x7f2   : > { %v4120_v43 = vmul.f32 %v7057_v22, %v4119_v30  ;;  %vm4123_vm8 = vweird.f32 %v7057_v22  ;;  %v4126_v42 = vand.u32 2147483647, %v9591_v29  ;;  %vm4122_vm9 = vweird.f32 %v9591_v29 }
 0x7f3   : > { %v9655_v31 = vpop.eup %7058  ;;  %7060 = vrcp.f32 %v9649_v45  ;;  %v4214_v28 = vmul.f32 %v9647_v39, %v9647_v39  ;;  %v9662_v23 = vadd.f32 %v3722_v56, %v9113_v25  ;;  %v4091_v26 = vmul.f32 %v4090_v55, %v9610_v20  ;;  %vm4124_vm12 = vmor %vm4122_vm9, %vm4123_vm8  ;;  %v3183_v56 = vpop.xlane.xlu1 %3182 }
 0x7f4   : > { %v4121_v1 = vadd.f32 %v7057_v22, %v4120_v43  ;;  %v4144_v58 = vmul.f32 %v4143_v0, %v9549_v11  ;;  %v4193_v50 = vmul.f32 %v4192_v38, %v9565_v61  ;;  %v4106_v29 = vmul.f32 %v4105_v46, %v9467_v57 }
 0x7f5   : > { %v4129_v13 = vor.u32 1.1754944e-38, %v4128_v15  ;;  %v4182_v47 = vmul.f32 %v4181_v49, %v9565_v61  ;;  %v3310_v36 = vsub.f32 %v9042_v32, %v9573_v59  ;;  %vm4127_vm13 = vcmp.eq.f32.partialorder %v4126_v42, 8.507059e+37 }
 0x7f6   : > { %v4125_v3 = vsel %vm4124_vm12, %v7057_v22, %v4121_v1  ;;  %v4194_v62 = vadd.f32 0.4994258, %v4193_v50  ;;  %v3469_v14 = vmul.f32 %v9655_v31, %v9617_v53  ;;  %v9677_v18 = vmul.f32 %v5099_v37, %v9330_v44 }
 0x7f7   : > { %v4130_v11 = vsel %vm4127_vm13, %v4129_v13, %v4125_v3  ;;  %v9679_v20 = vmin.f32 %v4214_v28, 16.0  ;;  %v9682_v57 = vmul.f32 0.70710677, %v9662_v23  ;;  %v6476_v19 = vclamps-f32 %v4091_v26, 1.0 }
 0x7f8   : > { %v4131_v9 = vmul.f32 %v4130_v11, %v4106_v29  ;;  %v4145_v16 = vadd.f32 1.1283791, %v4144_v58  ;;  %v4195_v4 = vmul.f32 %v4194_v62, %v9565_v61  ;;  %v4183_v10 = vadd.f32 0.18741608, %v4182_v47  ;;  %v3247_v47 = vpop.xlane.xlu0 %3246 }
 0x7f9   : > { %v9685_v22 = vpop.eup %7060  ;;  %v4216_v46 = vmul.f32 2.1237322e-06, %v9679_v20  ;;  %v4227_v27 = vmul.f32 3.8918573e-05, %v9679_v20  ;;  %v4254_v44 = vmul.f32 %v9682_v57, %v9682_v57  ;;  %v4168_v30 = vand.u32 2147483648, %v9649_v45 }
 0x7fa   : > { %v4158_v63 = vmul.f32 %v9685_v22, %v9649_v45  ;;  %v9694_v15 = vadd.f32 1.0, %v4195_v4  ;;  %v3470_v0 = vmul.f32 %v9655_v31, %v3469_v14  ;;  %v6477_v55 = vclamps-f32 %v4131_v9, 1.0 }
 0x7fb   : > { %v4217_v49 = vadd.f32 0.00028619796, %v4216_v46  ;;  %v4228_v38 = vadd.f32 0.001143296, %v4227_v27  ;;  %v9697_v37 = vmin.f32 %v4254_v44, 16.0  ;;  %v5100_v43 = vadd.f32 1.0, %v6476_v19 }
 0x7fc   : > { %v9700_v42 = vmul.f32 %v4145_v16, %v9525_v52  ;;  %v4159_v28 = vsub.f32 1.0, %v4158_v63  ;;  %7062 = vrcp.f32 %v9694_v15  ;;  %vm4162_vm10 = vweird.f32 %v9649_v45 }
 0x7fd   : > { %v4166_v26 = vand.u32 2147483647, %v9649_v45  ;;  %v4218_v1 = vmul.f32 %v4217_v49, %v9679_v20  ;;  %v9707_v58 = vmul.f32 %v3183_v56, %v11344_v51  ;;  %v4184_v50 = vmul.f32 %v4183_v10, %v9565_v61 }
 0x7fe   : > { %v3471_v29 = vmul.f32 0.5, %v3470_v0  ;;  %v4229_v13 = vmul.f32 %v4228_v38, %v9679_v20  ;;  %v4256_v52 = vmul.f32 2.1237322e-06, %v9697_v37  ;;  %v5101_v3 = vadd.f32 1.0, %v6477_v55 }
 0x7ff   : > { %v4160_v62 = vmul.f32 %v9685_v22, %v4159_v28  ;;  %v4169_v14 = vor.u32 1.1754944e-38, %v4168_v30  ;;  %v4219_v11 = vadd.f32 0.0036580483, %v4218_v1  ;;  %v5132_v19 = vmul.f32 %v5100_v43, %v9430_v12 }
 0x800   : > { %vm3474_vm11 = vweird.f32 %v9617_v53  ;;  %v4230_v9 = vadd.f32 0.014752088, %v4229_v13  ;;  %v4257_v16 = vadd.f32 0.00028619796, %v4256_v52  ;;  %v4267_v4 = vmul.f32 3.8918573e-05, %v9697_v37 }
 0x801   : > { %vm4163_vm14 = vweird.f32 %v9685_v22  ;;  %vm9717_vm15 = vcmp.eq.f32.partialorder %v4166_v26, 8.507059e+37  ;;  %v4220_v10 = vmul.f32 %v4219_v11, %v9679_v20  ;;  %v3279_v46 = vmul.f32 %v9707_v58, %v9707_v58 }
 0x802   : > { %v3263_v27 = vmul.f32 %v3247_v47, %v11344_v51  ;;  %v9725_v12 = vpop.eup %7062  ;;  %v3472_v44 = vsub.f32 1.5, %v3471_v29  ;;  %v4231_v63 = vmul.f32 %v4230_v9, %v9679_v20  ;;  %v4258_v30 = vmul.f32 %v4257_v16, %v9697_v37  ;;  %vm9741_vm1 = vmor %vm4162_vm10, %vm4163_vm14  ;;  %v3676_v16 = vpop.f32.mrf.mxu2 }
 0x803   : > { %v4268_v0 = vadd.f32 0.001143296, %v4267_v4  ;;  %v5133_v56 = vmul.f32 %v5101_v3, %v9502_v40  ;;  %v4161_v55 = vadd.f32 %v9685_v22, %v4160_v62  ;;  %v4198_v49 = vmul.f32 %v9725_v12, %v9694_v15 }
 0x804   : > { %v4221_v38 = vadd.f32 0.05243302, %v4220_v10  ;;  %vm3475_vm0 = vweird.f32 %v9655_v31  ;;  %v4232_v43 = vadd.f32 0.112945676, %v4231_v63  ;;  %v4259_v28 = vadd.f32 0.0036580483, %v4258_v30 }
 0x805   : > { %v4269_v26 = vmul.f32 %v4268_v0, %v9697_v37  ;;  %v4199_v1 = vsub.f32 1.0, %v4198_v49  ;;  %v3295_v13 = vsub.f32 %v3263_v27, %v3279_v46  ;;  %v5160_v52 = vpack.c.bf16 %v5132_v19, %v9629_v6  ;;  %vm9763_vm3 = vmor %vm3474_vm11, %vm3475_vm0 }
 0x806   : > { %v4222_v29 = vmul.f32 %v4221_v38, %v9679_v20  ;;  %v3473_v47 = vmul.f32 %v9655_v31, %v3472_v44  ;;  %v4233_v3 = vmul.f32 %v4232_v43, %v9679_v20  ;;  %v4260_v62 = vmul.f32 %v4259_v28, %v9697_v37 }
 0x807   : > { %v4270_v11 = vadd.f32 0.014752088, %v4269_v26  ;;  %v4165_v9 = vsel %vm9741_vm1, %v9685_v22, %v4161_v55  ;;  %v4200_v6 = vmul.f32 %v9725_v12, %v4199_v1  ;;  %v9752_v19 = vadd.f32 1e-06, %v3295_v13  ;;  %5319 = vmatmul.bf16.gmra.mxu0 %v5160_v52  ;;  %v3725_v55 = vpop.f32.mrf.mxu3 }
 0x808   : > { %v5161_v45 = vpack.c.bf16 %v5133_v56, %v9677_v18  ;;  %v4223_v4 = vadd.f32 0.18741608, %v4222_v29  ;;  %v4234_v10 = vadd.f32 0.4994258, %v4233_v3  ;;  %v4261_v46 = vadd.f32 0.05243302, %v4260_v62 }
 0x809   : > { %v4271_v27 = vmul.f32 %v4270_v11, %v9697_v37  ;;  %v4201_v44 = vadd.f32 %v9725_v12, %v4200_v6  ;;  %vm4203_vm2 = vweird.f32 %v9725_v12  ;;  %v4208_v63 = vand.u32 2147483648, %v9694_v15 }
 0x80a   : > { %7064 = vrsqrt.f32 %v9752_v19  ;;  %5368 = vmatmul.bf16.gmra.mxu1 %v5161_v45  ;;  %v4170_v18 = vsel %vm9717_vm15, %v4169_v14, %v4165_v9  ;;  %v3477_v30 = vsel %vm9763_vm3, %v9655_v31, %v3473_v47  ;;  %v4235_v0 = vmul.f32 %v4234_v10, %v9679_v20 }
 0x80b   : > { %v4272_v56 = vadd.f32 0.112945676, %v4271_v27  ;;  %v4185_v49 = vadd.f32 1.1283791, %v4184_v50  ;;  %vm4202_vm4 = vweird.f32 %v9694_v15  ;;  %v4206_v53 = vand.u32 2147483647, %v9694_v15 }
 0x80c   : > { %v4262_v38 = vmul.f32 %v4261_v46, %v9697_v37  ;;  %vm9777_vm5 = vmor %vm4202_vm4, %vm4203_vm2  ;;  %v4224_v14 = vmul.f32 %v4223_v4, %v9679_v20  ;;  %v9782_v61 = vadd.f32 1.0, %v4235_v0  ;;  %v9786_v28 = vmul.f32 %v4170_v18, %v9700_v42 }
 0x80d   : > { %v4273_v31 = vmul.f32 %v4272_v56, %v9697_v37  ;;  %v4205_v50 = vsel %vm9777_vm5, %v9725_v12, %v4201_v44  ;;  %v3502_v15 = vmul.f32 %v3477_v30, %v3310_v36  ;;  %v9795_v26 = vadd.f32 %v3676_v16, %v9111_v7 }
 0x80e   : > { %v4209_v1 = vor.u32 1.1754944e-38, %v4208_v63  ;;  %7066 = vrcp.f32 %v9782_v61  ;;  %v4186_v29 = vmul.f32 %v4185_v49, %v9545_v48  ;;  %vm4207_vm6 = vcmp.eq.f32.partialorder %v4206_v53, 8.507059e+37  ;;  %v3678_v48 = vpop.f32.mrf.mxu2 }
 0x80f   : > { %v4263_v42 = vadd.f32 0.18741608, %v4262_v38  ;;  %v4274_v13 = vadd.f32 0.4994258, %v4273_v31  ;;  %v4225_v40 = vadd.f32 1.1283791, %v4224_v14  ;;  %v3311_v12 = vsub.f32 %v9055_v24, %v9707_v58  ;;  %v3727_v22 = vpop.f32.mrf.mxu3 }
 0x810   : > { %v7065_v20 = vpop.eup %7064  ;;  %v4210_v52 = vsel %vm4207_vm6, %v4209_v1, %v4205_v50  ;;  %v6478_v36 = vclamps-f32 %v9786_v28, 1.0  ;;  %v3521_v3 = vmul.f32 %v9474_v5, %v3502_v15  ;;  %v9806_v62 = vmul.f32 0.70710677, %v9795_v26 }
 0x811   : > { %v3479_v59 = vmul.f32 %v7065_v20, %v9752_v19  ;;  %v4275_v47 = vmul.f32 %v4274_v13, %v9697_v37  ;;  %v4248_v11 = vand.u32 2147483648, %v9782_v61  ;;  %vm3484_vm7 = vweird.f32 %v9752_v19 }
 0x812   : > { %v9811_v6 = vadd.f32 %v3725_v55, %v9113_v25  ;;  %v9813_v58 = vmul.f32 %v4210_v52, %v4186_v29  ;;  %v4264_v45 = vmul.f32 %v4263_v42, %v9697_v37  ;;  %v4294_v4 = vmul.f32 %v9806_v62, %v9806_v62 }
 0x813   : > { %v3480_v9 = vmul.f32 %v7065_v20, %v3479_v59  ;;  %v9816_v16 = vadd.f32 1.0, %v4275_v47  ;;  %v9823_v46 = vmul.f32 %v4225_v40, %v9647_v39  ;;  %v9829_v63 = vadd.f32 %v3678_v48, %v9111_v7 }
 0x814   : > { %v9820_v10 = vpop.eup %7066  ;;  %v9826_v44 = vmul.f32 0.70710677, %v9811_v6  ;;  %vm4242_vm8 = vweird.f32 %v9782_v61  ;;  %v4246_v18 = vand.u32 2147483647, %v9782_v61  ;;  %v3540_v39 = vadd.f32 %v9497_v35, %v3521_v3 }
 0x815   : > { %v3481_v27 = vmul.f32 0.5, %v3480_v9  ;;  %v4238_v37 = vmul.f32 %v9820_v10, %v9782_v61  ;;  %7068 = vrcp.f32 %v9816_v16  ;;  %v4249_v30 = vor.u32 1.1754944e-38, %v4248_v11 }
 0x816   : > { %vm3485_vm9 = vweird.f32 %v7065_v20  ;;  %v9837_v56 = vmin.f32 %v4294_v4, 16.0  ;;  %v9839_v49 = vadd.f32 1.1283791, %v4264_v45  ;;  %v4334_v53 = vmul.f32 %v9826_v44, %v9826_v44 }
 0x817   : > { %v3482_v0 = vsub.f32 1.5, %v3481_v27  ;;  %v4239_v55 = vsub.f32 1.0, %v4238_v37  ;;  %v9844_v38 = vadd.f32 %v3727_v22, %v9113_v25  ;;  %vm4243_vm12 = vweird.f32 %v9820_v10  ;;  %vm3486_vm13 = vmor %vm3484_vm7, %vm3485_vm9 }
 0x818   : > { %v4296_v14 = vmul.f32 2.1237322e-06, %v9837_v56  ;;  %v9849_v31 = vmul.f32 0.70710677, %v9829_v63  ;;  %v4286_v15 = vand.u32 2147483647, %v9816_v16  ;;  %vm4282_vm11 = vweird.f32 %v9816_v16  ;;  %vm9881_vm15 = vmor %vm4242_vm8, %vm4243_vm12 }
 0x819   : > { %v3483_v43 = vmul.f32 %v7065_v20, %v3482_v0  ;;  %v4240_v50 = vmul.f32 %v9820_v10, %v4239_v55  ;;  %v4307_v1 = vmul.f32 3.8918573e-05, %v9837_v56  ;;  %v9856_v29 = vmin.f32 %v4334_v53, 16.0 }
 0x81a   : > { %vm9858_vm10 = vcmp.eq.f32.partialorder %v4246_v18, 8.507059e+37  ;;  %v4288_v13 = vand.u32 2147483648, %v9816_v16  ;;  %v4297_v40 = vadd.f32 0.00028619796, %v4296_v14  ;;  %v4374_v4 = vmul.f32 %v9849_v31, %v9849_v31 }
 0x81b   : > { %v3487_v52 = vsel %vm3486_vm13, %v7065_v20, %v3483_v43  ;;  %v7069_v59 = vpop.eup %7068  ;;  %v4241_v47 = vadd.f32 %v9820_v10, %v4240_v50  ;;  %v4308_v19 = vadd.f32 0.001143296, %v4307_v1  ;;  %v4336_v48 = vmul.f32 2.1237322e-06, %v9856_v29 }
 0x81c   : > { %v3503_v3 = vmul.f32 %v3487_v52, %v3311_v12  ;;  %v4278_v11 = vmul.f32 %v7069_v59, %v9816_v16  ;;  %v4298_v9 = vmul.f32 %v4297_v40, %v9837_v56  ;;  %v4347_v45 = vmul.f32 3.8918573e-05, %v9856_v29 }
 0x81d   : > { %vm9871_vm14 = vcmp.eq.f32.partialorder %v4286_v15, 8.507059e+37  ;;  %v4309_v12 = vmul.f32 %v4308_v19, %v9837_v56  ;;  %v4337_v22 = vadd.f32 0.00028619796, %v4336_v48  ;;  %vm4283_vm0 = vweird.f32 %v7069_v59 }
 0x81e   : > { %v3522_v20 = vmul.f32 %v9474_v5, %v3503_v3  ;;  %v4279_v18 = vsub.f32 1.0, %v4278_v11  ;;  %v4299_v0 = vadd.f32 0.0036580483, %v4298_v9  ;;  %v4348_v55 = vadd.f32 0.001143296, %v4347_v45  ;;  %vm4284_vm1 = vmor %vm4282_vm11, %vm4283_vm0 }
 0x81f   : > { %v4245_v53 = vsel %vm9881_vm15, %v9820_v10, %v4241_v47  ;;  %v4310_v43 = vadd.f32 0.014752088, %v4309_v12  ;;  %v4338_v14 = vmul.f32 %v4337_v22, %v9856_v29  ;;  %v9892_v1 = vmin.f32 %v4374_v4, 16.0 }
 0x820   : > { %v3541_v5 = vadd.f32 %v9497_v35, %v3522_v20  ;;  %v4280_v50 = vmul.f32 %v7069_v59, %v4279_v18  ;;  %v4300_v61 = vmul.f32 %v4299_v0, %v9837_v56  ;;  %v4349_v15 = vmul.f32 %v4348_v55, %v9856_v29 }
 0x821   : > { %v4289_v52 = vor.u32 1.1754944e-38, %v4288_v13  ;;  %v4311_v3 = vmul.f32 %v4310_v43, %v9837_v56  ;;  %v4339_v19 = vadd.f32 0.0036580483, %v4338_v14  ;;  %v4376_v35 = vmul.f32 2.1237322e-06, %v9892_v1 }
 0x822   : > { %v3549_v40 = vpack.c.bf16 %v3541_v5, %v3540_v39  ;;  %v4281_v48 = vadd.f32 %v7069_v59, %v4280_v50  ;;  %v4301_v11 = vadd.f32 0.05243302, %v4300_v61  ;;  %v4350_v10 = vadd.f32 0.014752088, %v4349_v15 }
 0x823   : > { %v4250_v47 = vsel %vm9858_vm10, %v4249_v30, %v4245_v53  ;;  %v4312_v9 = vadd.f32 0.112945676, %v4311_v3  ;;  %v4387_v39 = vmul.f32 3.8918573e-05, %v9892_v1  ;;  %v9903_v13 = vmul.f32 0.70710677, %v9844_v38 }
 0x824   : > { %3695 = vmatmul.bf16.gmra.mxu2 %v3549_v40  ;;  %3744 = vmatmul.bf16.gmra.mxu3 %v3549_v40  ;;  %v4285_v45 = vsel %vm4284_vm1, %v7069_v59, %v4281_v48  ;;  %v4340_v4 = vmul.f32 %v4339_v19, %v9856_v29  ;;  %v4351_v20 = vmul.f32 %v4350_v10, %v9856_v29  ;;  %v4377_v12 = vadd.f32 0.00028619796, %v4376_v35  ;;  %v3681_v48 = vpop.f32.mrf.mxu2 }
 0x825   : > { %v3758_v30 = vmul.f32 0.5, %v9515_v60  ;;  %v4266_v16 = vmul.f32 %v9839_v49, %v9682_v57  ;;  %v4290_v42 = vsel %vm9871_vm14, %v4289_v52, %v4285_v45  ;;  %v4313_v22 = vmul.f32 %v4312_v9, %v9837_v56 }
 0x826   : > { %v4251_v37 = vmul.f32 %v4250_v47, %v9823_v46  ;;  %v4302_v18 = vmul.f32 %v4301_v11, %v9837_v56  ;;  %v4352_v59 = vadd.f32 0.112945676, %v4351_v20  ;;  %v4378_v0 = vmul.f32 %v4377_v12, %v9892_v1 }
 0x827   : > { %v5102_v55 = vadd.f32 1.0, %v6478_v36  ;;  %v4314_v53 = vadd.f32 0.4994258, %v4313_v22  ;;  %v4388_v60 = vadd.f32 0.001143296, %v4387_v39  ;;  %v4414_v57 = vmul.f32 %v9903_v13, %v9903_v13 }
 0x828   : > { %v6479_v49 = vclamps-f32 %v9813_v58, 1.0  ;;  %v4291_v27 = vmul.f32 %v4290_v42, %v4266_v16  ;;  %v4341_v5 = vadd.f32 0.05243302, %v4340_v4  ;;  %v4353_v43 = vmul.f32 %v4352_v59, %v9856_v29 }
 0x829   : > { %v4315_v46 = vmul.f32 %v4314_v53, %v9837_v56  ;;  %v4379_v14 = vadd.f32 0.0036580483, %v4378_v0  ;;  %v4389_v50 = vmul.f32 %v4388_v60, %v9892_v1  ;;  %v9924_v61 = vmin.f32 %v4414_v57, 16.0 }
 0x82a   : > { %v3759_v28 = vmul.f32 0.5, %v9528_v34  ;;  %v6480_v36 = vclamps-f32 %v4251_v37, 1.0  ;;  %v4303_v15 = vadd.f32 0.18741608, %v4302_v18  ;;  %v4354_v52 = vadd.f32 0.4994258, %v4353_v43 }
 0x82b   : > { %v3760_v40 = vmul.f32 0.5, %v9626_v33  ;;  %v9928_v3 = vadd.f32 1.0, %v4315_v46  ;;  %v4390_v58 = vadd.f32 0.014752088, %v4389_v50  ;;  %v4416_v19 = vmul.f32 2.1237322e-06, %v9924_v61 }
 0x82c   : > { %v5103_v11 = vadd.f32 1.0, %v6479_v49  ;;  %v3761_v10 = vmul.f32 0.5, %v9662_v23  ;;  %v4342_v35 = vmul.f32 %v4341_v5, %v9856_v29  ;;  %v4355_v47 = vmul.f32 %v4354_v52, %v9856_v29 }
 0x82d   : > { %v5134_v9 = vmul.f32 %v5102_v55, %v3758_v30  ;;  %v6481_v34 = vclamps-f32 %v4291_v27, 1.0  ;;  %7070 = vrcp.f32 %v9928_v3  ;;  %v4380_v39 = vmul.f32 %v4379_v14, %v9892_v1 }
 0x82e   : > { %v5104_v33 = vadd.f32 1.0, %v6480_v36  ;;  %v9936_v45 = vadd.f32 1.0, %v4355_v47  ;;  %v4391_v4 = vmul.f32 %v4390_v58, %v9892_v1  ;;  %v9940_v20 = vadd.f32 %v3681_v48, %v9111_v7 }
 0x82f   : > { %v9943_v23 = vmul.f32 0.5, %v9795_v26  ;;  %v4304_v12 = vmul.f32 %v4303_v15, %v9837_v56  ;;  %v4417_v16 = vadd.f32 0.00028619796, %v4416_v19  ;;  %v4427_v30 = vmul.f32 3.8918573e-05, %v9924_v61 }
 0x830   : > { %v9947_v42 = vmul.f32 %v5103_v11, %v3759_v28  ;;  %v9950_v22 = vmul.f32 0.5, %v9811_v6  ;;  %v4343_v37 = vadd.f32 0.18741608, %v4342_v35  ;;  %7072 = vrcp.f32 %v9936_v45 }
 0x831   : > { %v5105_v18 = vadd.f32 1.0, %v6481_v34  ;;  %v4381_v59 = vadd.f32 0.05243302, %v4380_v39  ;;  %v4392_v0 = vadd.f32 0.112945676, %v4391_v4  ;;  %v4418_v55 = vmul.f32 %v4417_v16, %v9924_v61  ;;  %v3730_v39 = vpop.f32.mrf.mxu3 }
 0x832   : > { %v5136_v26 = vmul.f32 %v5104_v33, %v3760_v40  ;;  %v9955_v53 = vmul.f32 0.5, %v9829_v63  ;;  %v4428_v56 = vadd.f32 0.001143296, %v4427_v30  ;;  %v9958_v60 = vmul.f32 0.70710677, %v9940_v20 }
 0x833   : > { %v7071_v57 = vpop.eup %7070  ;;  %v4305_v49 = vadd.f32 1.1283791, %v4304_v12  ;;  %v4393_v6 = vmul.f32 %v4392_v0, %v9892_v1  ;;  %v9962_v27 = vmul.f32 0.5, %v9844_v38  ;;  %v4419_v5 = vadd.f32 0.0036580483, %v4418_v55 }
 0x834   : > { %v4318_v43 = vmul.f32 %v7071_v57, %v9928_v3  ;;  %v4344_v46 = vmul.f32 %v4343_v37, %v9856_v29  ;;  %v4429_v14 = vmul.f32 %v4428_v56, %v9924_v61  ;;  %v4454_v63 = vmul.f32 %v9958_v60, %v9958_v60 }
 0x835   : > { %v9969_v50 = vmul.f32 %v5105_v18, %v3761_v10  ;;  %v4382_v28 = vmul.f32 %v4381_v59, %v9892_v1  ;;  %v4394_v36 = vadd.f32 0.4994258, %v4393_v6  ;;  %v4420_v15 = vmul.f32 %v4419_v5, %v9924_v61 }
 0x836   : > { %v9973_v52 = vpop.eup %7072  ;;  %v4319_v38 = vsub.f32 1.0, %v4318_v43  ;;  %v4430_v40 = vadd.f32 0.014752088, %v4429_v14  ;;  %v9975_v58 = vmin.f32 %v4454_v63, 16.0  ;;  %v5162_v19 = vpack.c.bf16 %v5136_v26, %v5134_v9 }
 0x837   : > { %vm4322_vm2 = vweird.f32 %v9928_v3  ;;  %v4326_v29 = vand.u32 2147483647, %v9928_v3  ;;  %v4358_v48 = vmul.f32 %v9973_v52, %v9936_v45  ;;  %v4395_v11 = vmul.f32 %v4394_v36, %v9892_v1 }
 0x838   : > { %v4320_v10 = vmul.f32 %v7071_v57, %v4319_v38  ;;  %v4421_v35 = vadd.f32 0.05243302, %v4420_v15  ;;  %v4431_v47 = vmul.f32 %v4430_v40, %v9924_v61  ;;  %v4456_v34 = vmul.f32 2.1237322e-06, %v9975_v58  ;;  %5324 = vmatmul.bf16.gmra.mxu0 %v5162_v19 }
 0x839   : > { %vm4323_vm3 = vweird.f32 %v7071_v57  ;;  %v4328_v9 = vand.u32 2147483648, %v9928_v3  ;;  %v4359_v33 = vsub.f32 1.0, %v4358_v48  ;;  %v9985_v4 = vadd.f32 1.0, %v4395_v11 }
 0x83a   : > { %v4321_v12 = vadd.f32 %v7071_v57, %v4320_v10  ;;  %v4383_v16 = vadd.f32 0.18741608, %v4382_v28  ;;  %v4432_v30 = vadd.f32 0.112945676, %v4431_v47  ;;  %v4457_v37 = vadd.f32 0.00028619796, %v4456_v34  ;;  %vm9994_vm4 = vmor %vm4322_vm2, %vm4323_vm3 }
 0x83b   : > { %v4360_v18 = vmul.f32 %v9973_v52, %v4359_v33  ;;  %7074 = vrcp.f32 %v9985_v4  ;;  %v4467_v59 = vmul.f32 3.8918573e-05, %v9975_v58  ;;  %v3731_v0 = vadd.f32 %v3730_v39, %v9113_v25 }
 0x83c   : > { %v4306_v55 = vmul.f32 %v4305_v49, %v9806_v62  ;;  %v4345_v56 = vadd.f32 1.1283791, %v4344_v46  ;;  %v4422_v6 = vmul.f32 %v4421_v35, %v9924_v61  ;;  %v4433_v5 = vmul.f32 %v4432_v30, %v9924_v61 }
 0x83d   : > { %v4325_v43 = vsel %vm9994_vm4, %v7071_v57, %v4321_v12  ;;  %vm4327_vm5 = vcmp.eq.f32.partialorder %v4326_v29, 8.507059e+37  ;;  %v4329_v14 = vor.u32 1.1754944e-38, %v4328_v9  ;;  %v4458_v63 = vmul.f32 %v4457_v37, %v9975_v58 }
 0x83e   : > { %vm4363_vm6 = vweird.f32 %v9973_v52  ;;  %v4368_v62 = vand.u32 2147483648, %v9936_v45  ;;  %v4384_v3 = vmul.f32 %v4383_v16, %v9892_v1  ;;  %v4434_v49 = vadd.f32 0.4994258, %v4433_v5 }
 0x83f   : > { %v4361_v46 = vadd.f32 %v9973_v52, %v4360_v18  ;;  %v4459_v28 = vadd.f32 0.0036580483, %v4458_v63  ;;  %v4468_v36 = vadd.f32 0.001143296, %v4467_v59  ;;  %v10007_v15 = vmul.f32 0.70710677, %v3731_v0 }
 0x840   : > { %v4330_v38 = vsel %vm4327_vm5, %v4329_v14, %v4325_v43  ;;  %v4346_v57 = vmul.f32 %v4345_v56, %v9826_v44  ;;  %v4423_v40 = vadd.f32 0.18741608, %v4422_v6  ;;  %v4435_v19 = vmul.f32 %v4434_v49, %v9924_v61 }
 0x841   : > { %v10011_v29 = vpop.eup %7074  ;;  %vm4362_vm7 = vweird.f32 %v9936_v45  ;;  %v4366_v48 = vand.u32 2147483647, %v9936_v45  ;;  %v4469_v1 = vmul.f32 %v4468_v36, %v9975_v58  ;;  %v4494_v11 = vmul.f32 %v10007_v15, %v10007_v15 }
 0x842   : > { %vm10020_vm8 = vmor %vm4362_vm7, %vm4363_vm6  ;;  %v4369_v44 = vor.u32 1.1754944e-38, %v4368_v62  ;;  %v4385_v35 = vadd.f32 1.1283791, %v4384_v3  ;;  %v4398_v47 = vmul.f32 %v10011_v29, %v9985_v4  ;;  %v4460_v34 = vmul.f32 %v4459_v28, %v9975_v58 }
 0x843   : > { %v4331_v39 = vmul.f32 %v4330_v38, %v4306_v55  ;;  %v4365_v45 = vsel %vm10020_vm8, %v9973_v52, %v4361_v46  ;;  %v10030_v9 = vadd.f32 1.0, %v4435_v19  ;;  %v4470_v33 = vadd.f32 0.014752088, %v4469_v1  ;;  %v3732_v46 = vpop.f32.mrf.mxu3 }
 0x844   : > { %v4399_v12 = vsub.f32 1.0, %v4398_v47  ;;  %v4424_v16 = vmul.f32 %v4423_v40, %v9924_v61  ;;  %v10033_v30 = vmin.f32 %v4494_v11, 16.0  ;;  %v5163_v37 = vpack.c.bf16 %v9969_v50, %v9947_v42  ;;  %v3683_v61 = vpop.f32.mrf.mxu2 }
 0x845   : > { %vm4367_vm9 = vcmp.eq.f32.partialorder %v4366_v48, 8.507059e+37  ;;  %v4406_v18 = vand.u32 2147483647, %v9985_v4  ;;  %7076 = vrcp.f32 %v10030_v9  ;;  %v10040_v59 = vmul.f32 0.5, %v9940_v20 }
 0x846   : > { %v4370_v52 = vsel %vm4367_vm9, %v4369_v44, %v4365_v45  ;;  %v4400_v55 = vmul.f32 %v10011_v29, %v4399_v12  ;;  %v4461_v26 = vadd.f32 0.05243302, %v4460_v34  ;;  %v4471_v56 = vmul.f32 %v4470_v33, %v9975_v58  ;;  %5373 = vmatmul.bf16.gmra.mxu1 %v5163_v37 }
 0x847   : > { %v4386_v6 = vmul.f32 %v4385_v35, %v9849_v31  ;;  %v4408_v42 = vand.u32 2147483648, %v9985_v4  ;;  %v4496_v50 = vmul.f32 2.1237322e-06, %v10033_v30  ;;  %v4507_v5 = vmul.f32 3.8918573e-05, %v10033_v30 }
 0x848   : > { %v6482_v43 = vclamps-f32 %v4331_v39, 1.0  ;;  %v4425_v14 = vadd.f32 1.1283791, %v4424_v16  ;;  %v4472_v20 = vadd.f32 0.112945676, %v4471_v56  ;;  %v10048_v63 = vmul.f32 0.5, %v3731_v0 }
 0x849   : > { %v4371_v62 = vmul.f32 %v4370_v52, %v4346_v57  ;;  %vm4403_vm12 = vweird.f32 %v10011_v29  ;;  %v4497_v3 = vadd.f32 0.00028619796, %v4496_v50  ;;  %v4508_v49 = vadd.f32 0.001143296, %v4507_v5 }
 0x84a   : > { %v4401_v28 = vadd.f32 %v10011_v29, %v4400_v55  ;;  %v4462_v31 = vmul.f32 %v4461_v26, %v9975_v58  ;;  %v4473_v36 = vmul.f32 %v4472_v20, %v9975_v58  ;;  %v3684_v38 = vadd.f32 %v3683_v61, %v9111_v7 }
 0x84b   : > { %v10055_v40 = vpop.eup %7076  ;;  %vm4402_vm13 = vweird.f32 %v9985_v4  ;;  %vm10058_vm10 = vcmp.eq.f32.partialorder %v4406_v18, 8.507059e+37  ;;  %v4409_v57 = vor.u32 1.1754944e-38, %v4408_v42  ;;  %v4509_v19 = vmul.f32 %v4508_v49, %v10033_v30 }
 0x84c   : > { %v5106_v48 = vadd.f32 1.0, %v6482_v43  ;;  %v4438_v1 = vmul.f32 %v10055_v40, %v10030_v9  ;;  %v4498_v11 = vmul.f32 %v4497_v3, %v10033_v30  ;;  %v3733_v10 = vadd.f32 %v3732_v46, %v9113_v25  ;;  %vm10069_vm11 = vmor %vm4402_vm13, %vm4403_vm12  ;;  %v3686_v56 = vpop.f32.mrf.mxu2 }
 0x84d   : > { %v6483_v44 = vclamps-f32 %v4371_v62, 1.0  ;;  %v10074_v35 = vmul.f32 %v4425_v14, %v9903_v13  ;;  %v4474_v47 = vadd.f32 0.4994258, %v4473_v36  ;;  %v4510_v34 = vadd.f32 0.014752088, %v4509_v19  ;;  %v3735_v36 = vpop.f32.mrf.mxu3 }
 0x84e   : > { %v4405_v39 = vsel %vm10069_vm11, %v10011_v29, %v4401_v28  ;;  %v4439_v45 = vsub.f32 1.0, %v4438_v1  ;;  %v4463_v33 = vadd.f32 0.18741608, %v4462_v31  ;;  %v10079_v12 = vmul.f32 0.70710677, %v3684_v38 }
 0x84f   : > { %v4446_v16 = vand.u32 2147483647, %v10030_v9  ;;  %v4448_v37 = vand.u32 2147483648, %v10030_v9  ;;  %v4475_v18 = vmul.f32 %v4474_v47, %v9975_v58  ;;  %v4511_v52 = vmul.f32 %v4510_v34, %v10033_v30 }
 0x850   : > { %v10086_v13 = vmul.f32 %v5106_v48, %v9943_v23  ;;  %v4499_v55 = vadd.f32 0.0036580483, %v4498_v11  ;;  %v4534_v26 = vmul.f32 %v10079_v12, %v10079_v12  ;;  %v10090_v29 = vmul.f32 0.70710677, %v3733_v10 }
 0x851   : > { %v4410_v61 = vsel %vm10058_vm10, %v4409_v57, %v4405_v39  ;;  %v4440_v42 = vmul.f32 %v10055_v40, %v4439_v45  ;;  %v10095_v50 = vadd.f32 1.0, %v4475_v18  ;;  %v4512_v5 = vadd.f32 0.112945676, %v4511_v52 }
 0x852   : > { %v5107_v43 = vadd.f32 1.0, %v6483_v44  ;;  %vm4442_vm14 = vweird.f32 %v10030_v9  ;;  %v4464_v23 = vmul.f32 %v4463_v33, %v9975_v58  ;;  %v10099_v14 = vmin.f32 %v4534_v26, 16.0 }
 0x853   : > { %vm10101_vm15 = vcmp.eq.f32.partialorder %v4446_v16, 8.507059e+37  ;;  %v4449_v62 = vor.u32 1.1754944e-38, %v4448_v37  ;;  %7078 = vrcp.f32 %v10095_v50  ;;  %v4574_v3 = vmul.f32 %v10090_v29, %v10090_v29 }
 0x854   : > { %v3687_v49 = vadd.f32 %v3686_v56, %v9111_v7  ;;  %v4411_v46 = vmul.f32 %v4410_v61, %v4386_v6  ;;  %v4500_v28 = vmul.f32 %v4499_v55, %v10033_v30  ;;  %v4513_v31 = vmul.f32 %v4512_v5, %v10033_v30 }
 0x855   : > { %v4536_v58 = vmul.f32 2.1237322e-06, %v10099_v14  ;;  %v4441_v0 = vadd.f32 %v10055_v40, %v4440_v42  ;;  %vm4443_vm0 = vweird.f32 %v10055_v40  ;;  %v10114_v57 = vmul.f32 0.5, %v3684_v38 }
 0x856   : > { %v4547_v19 = vmul.f32 3.8918573e-05, %v10099_v14  ;;  %v10118_v48 = vmul.f32 %v5107_v43, %v9950_v22  ;;  %v4465_v1 = vadd.f32 1.1283791, %v4464_v23  ;;  %v4514_v6 = vadd.f32 0.4994258, %v4513_v31  ;;  %vm10129_vm1 = vmor %vm4442_vm14, %vm4443_vm0 }
 0x857   : > { %v4537_v11 = vadd.f32 0.00028619796, %v4536_v58  ;;  %v10120_v4 = vmin.f32 %v4574_v3, 16.0  ;;  %v10122_v47 = vmul.f32 0.70710677, %v3687_v49  ;;  %v10125_v34 = vadd.f32 %v3735_v36, %v9113_v25 }
 0x858   : > { %v4548_v44 = vadd.f32 0.001143296, %v4547_v19  ;;  %v6484_v39 = vclamps-f32 %v4411_v46, 1.0  ;;  %v4501_v22 = vadd.f32 0.05243302, %v4500_v28  ;;  %v4515_v45 = vmul.f32 %v4514_v6, %v10033_v30 }
 0x859   : > { %v4538_v33 = vmul.f32 %v4537_v11, %v10099_v14  ;;  %v7079_v16 = vpop.eup %7078  ;;  %v4445_v37 = vsel %vm10129_vm1, %v10055_v40, %v4441_v0  ;;  %v4576_v52 = vmul.f32 2.1237322e-06, %v10120_v4  ;;  %v4614_v9 = vmul.f32 %v10122_v47, %v10122_v47 }
 0x85a   : > { %v4549_v18 = vmul.f32 %v4548_v44, %v10099_v14  ;;  %v10143_v55 = vmul.f32 %v4465_v1, %v9958_v60  ;;  %v4478_v26 = vmul.f32 %v7079_v16, %v10095_v50  ;;  %v10146_v56 = vmul.f32 0.5, %v3733_v10 }
 0x85b   : > { %v4587_v61 = vmul.f32 3.8918573e-05, %v10120_v4  ;;  %v10149_v42 = vadd.f32 1.0, %v4515_v45  ;;  %v4539_v5 = vadd.f32 0.0036580483, %v4538_v33  ;;  %v10151_v43 = vmin.f32 %v4614_v9, 16.0 }
 0x85c   : > { %v4550_v40 = vadd.f32 0.014752088, %v4549_v18  ;;  %v10153_v23 = vadd.f32 1.0, %v6484_v39  ;;  %v4450_v3 = vsel %vm10101_vm15, %v4449_v62, %v4445_v37  ;;  %v4479_v46 = vsub.f32 1.0, %v4478_v26 }
 0x85d   : > { %v4577_v60 = vadd.f32 0.00028619796, %v4576_v52  ;;  %v4488_v28 = vand.u32 2147483648, %v10095_v50  ;;  %v4502_v10 = vmul.f32 %v4501_v22, %v10033_v30  ;;  %7080 = vrcp.f32 %v10149_v42 }
 0x85e   : > { %v10160_v31 = vmul.f32 0.5, %v3687_v49  ;;  %v4480_v58 = vmul.f32 %v7079_v16, %v4479_v46  ;;  %v4540_v36 = vmul.f32 %v4539_v5, %v10099_v14  ;;  %v4551_v0 = vmul.f32 %v4550_v40, %v10099_v14 }
 0x85f   : > { %v4578_v19 = vmul.f32 %v4577_v60, %v10120_v4  ;;  %v4451_v20 = vmul.f32 %v4450_v3, %v10074_v35  ;;  %vm4483_vm2 = vweird.f32 %v7079_v16  ;;  %v4588_v62 = vadd.f32 0.001143296, %v4587_v61 }
 0x860   : > { %v4616_v1 = vmul.f32 2.1237322e-06, %v10151_v43  ;;  %v4481_v6 = vadd.f32 %v7079_v16, %v4480_v58  ;;  %v4541_v11 = vadd.f32 0.05243302, %v4540_v36  ;;  %v4552_v44 = vadd.f32 0.112945676, %v4551_v0 }
 0x861   : > { %v4579_v39 = vadd.f32 0.0036580483, %v4578_v19  ;;  %vm4482_vm3 = vweird.f32 %v10095_v50  ;;  %v4589_v49 = vmul.f32 %v4588_v62, %v10120_v4  ;;  %v4627_v22 = vmul.f32 3.8918573e-05, %v10151_v43 }
 0x862   : > { %v4617_v38 = vadd.f32 0.00028619796, %v4616_v1  ;;  %v4486_v45 = vand.u32 2147483647, %v10095_v50  ;;  %v4503_v33 = vadd.f32 0.18741608, %v4502_v10  ;;  %v4553_v35 = vmul.f32 %v4552_v44, %v10099_v14  ;;  %vm10176_vm4 = vmor %vm4482_vm3, %vm4483_vm2 }
 0x863   : > { %v4580_v37 = vmul.f32 %v4579_v39, %v10120_v4  ;;  %v10173_v18 = vpop.eup %7080  ;;  %v4542_v9 = vmul.f32 %v4541_v11, %v10099_v14  ;;  %v4590_v26 = vadd.f32 0.014752088, %v4589_v49  ;;  %v4628_v5 = vadd.f32 0.001143296, %v4627_v22 }
 0x864   : > { %v4618_v61 = vmul.f32 %v4617_v38, %v10151_v43  ;;  %v6485_v40 = vclamps-f32 %v4451_v20, 1.0  ;;  %v4485_v50 = vsel %vm10176_vm4, %v7079_v16, %v4481_v6  ;;  %v4489_v3 = vor.u32 1.1754944e-38, %v4488_v28 }
 0x865   : > { %v4518_v46 = vmul.f32 %v10173_v18, %v10149_v42  ;;  %v4554_v60 = vadd.f32 0.4994258, %v4553_v35  ;;  %v4581_v10 = vadd.f32 0.05243302, %v4580_v37  ;;  %v4591_v58 = vmul.f32 %v4590_v26, %v10120_v4 }
 0x866   : > { %v4619_v36 = vadd.f32 0.0036580483, %v4618_v61  ;;  %vm4487_vm5 = vcmp.eq.f32.partialorder %v4486_v45, 8.507059e+37  ;;  %v4504_v0 = vmul.f32 %v4503_v33, %v10033_v30  ;;  %v4629_v62 = vmul.f32 %v4628_v5, %v10151_v43  ;;  %v3688_v5 = vpop.f32.mrf.mxu2 }
 0x867   : > { %v4519_v19 = vsub.f32 1.0, %v4518_v46  ;;  %v4490_v1 = vsel %vm4487_vm5, %v4489_v3, %v4485_v50  ;;  %v4543_v20 = vadd.f32 0.18741608, %v4542_v9  ;;  %v4555_v11 = vmul.f32 %v4554_v60, %v10099_v14 }
 0x868   : > { %v4592_v16 = vadd.f32 0.112945676, %v4591_v58  ;;  %v5109_v28 = vadd.f32 1.0, %v6485_v40  ;;  %v4582_v44 = vmul.f32 %v4581_v10, %v10120_v4  ;;  %v4630_v39 = vadd.f32 0.014752088, %v4629_v62 }
 0x869   : > { %v4520_v6 = vmul.f32 %v10173_v18, %v4519_v19  ;;  %v4528_v49 = vand.u32 2147483648, %v10149_v42  ;;  %v10193_v38 = vadd.f32 1.0, %v4555_v11  ;;  %v4620_v22 = vmul.f32 %v4619_v36, %v10151_v43 }
 0x86a   : > { %v4593_v30 = vmul.f32 %v4592_v16, %v10120_v4  ;;  %v4491_v45 = vmul.f32 %v4490_v1, %v10143_v55  ;;  %vm4523_vm6 = vweird.f32 %v10173_v18  ;;  %v4631_v35 = vmul.f32 %v4630_v39, %v10151_v43 }
 0x86b   : > { %v4521_v33 = vadd.f32 %v10173_v18, %v4520_v6  ;;  %v4505_v37 = vadd.f32 1.1283791, %v4504_v0  ;;  %v4544_v52 = vmul.f32 %v4543_v20, %v10099_v14  ;;  %7082 = vrcp.f32 %v10193_v38 }
 0x86c   : > { %v10204_v9 = vmul.f32 0.70710677, %v10125_v34  ;;  %vm4522_vm7 = vweird.f32 %v10149_v42  ;;  %v4526_v26 = vand.u32 2147483647, %v10149_v42  ;;  %v4583_v61 = vadd.f32 0.18741608, %v4582_v44 }
 0x86d   : > { %v4594_v55 = vadd.f32 0.4994258, %v4593_v30  ;;  %v5140_v40 = vmul.f32 %v10153_v23, %v9955_v53  ;;  %v10211_v50 = vmul.f32 %v5109_v28, %v9962_v27  ;;  %vm10213_vm8 = vmor %vm4522_vm7, %vm4523_vm6  ;;  %v4621_v3 = vadd.f32 0.05243302, %v4620_v22 }
 0x86e   : > { %v4632_v46 = vadd.f32 0.112945676, %v4631_v35  ;;  %v6486_v60 = vclamps-f32 %v4491_v45, 1.0  ;;  %v4525_v42 = vsel %vm10213_vm8, %v10173_v18, %v4521_v33  ;;  %v4529_v10 = vor.u32 1.1754944e-38, %v4528_v49 }
 0x86f   : > { %v4595_v58 = vmul.f32 %v4594_v55, %v10120_v4  ;;  %v4545_v36 = vadd.f32 1.1283791, %v4544_v52  ;;  %v4654_v27 = vmul.f32 %v10204_v9, %v10204_v9  ;;  %v10225_v23 = vadd.f32 %v3688_v5, %v9111_v7 }
 0x870   : > { %v4633_v53 = vmul.f32 %v4632_v46, %v10151_v43  ;;  %v4506_v0 = vmul.f32 %v4505_v37, %v10007_v15  ;;  %vm4527_vm9 = vcmp.eq.f32.partialorder %v4526_v26, 8.507059e+37  ;;  %v4584_v19 = vmul.f32 %v4583_v61, %v10120_v4  ;;  %v3737_v4 = vpop.f32.mrf.mxu3 }
 0x871   : > { %v10229_v62 = vadd.f32 1.0, %v4595_v58  ;;  %v10231_v18 = vpop.eup %7082  ;;  %v4530_v1 = vsel %vm4527_vm9, %v4529_v10, %v4525_v42  ;;  %v4622_v20 = vmul.f32 %v4621_v3, %v10151_v43  ;;  %v10234_v16 = vmin.f32 %v4654_v27, 16.0 }
 0x872   : > { %v4634_v11 = vadd.f32 0.4994258, %v4633_v53  ;;  %v10236_v28 = vadd.f32 1.0, %v6486_v60  ;;  %v4558_v6 = vmul.f32 %v10231_v18, %v10193_v38  ;;  %v10242_v15 = vmul.f32 0.70710677, %v10225_v23 }
 0x873   : > { %7084 = vrcp.f32 %v10229_v62  ;;  %v10245_v44 = vmul.f32 %v4545_v36, %v10079_v12  ;;  %vm4562_vm12 = vweird.f32 %v10193_v38  ;;  %v4566_v39 = vand.u32 2147483647, %v10193_v38 }
 0x874   : > { %v4568_v49 = vand.u32 2147483648, %v10193_v38  ;;  %v10250_v30 = vmul.f32 %v4530_v1, %v4506_v0  ;;  %v4559_v22 = vsub.f32 1.0, %v4558_v6  ;;  %v4635_v45 = vmul.f32 %v4634_v11, %v10151_v43 }
 0x875   : > { %v4656_v33 = vmul.f32 2.1237322e-06, %v10234_v16  ;;  %v4585_v35 = vadd.f32 1.1283791, %v4584_v19  ;;  %v4623_v37 = vadd.f32 0.18741608, %v4622_v20  ;;  %v10256_v12 = vadd.f32 %v3737_v4, %v9113_v25 }
 0x876   : > { %v4667_v52 = vmul.f32 3.8918573e-05, %v10234_v16  ;;  %v4560_v26 = vmul.f32 %v10231_v18, %v4559_v22  ;;  %v10259_v61 = vadd.f32 1.0, %v4635_v45  ;;  %v4694_v5 = vmul.f32 %v10242_v15, %v10242_v15 }
 0x877   : > { %v4657_v55 = vadd.f32 0.00028619796, %v4656_v33  ;;  %vm10263_vm13 = vcmp.eq.f32.partialorder %v4566_v39, 8.507059e+37  ;;  %v4569_v3 = vor.u32 1.1754944e-38, %v4568_v49  ;;  %v5164_v60 = vpack.c.bf16 %v5140_v40, %v10086_v13 }
 0x878   : > { %v4668_v46 = vadd.f32 0.001143296, %v4667_v52  ;;  %v6487_v10 = vclamps-f32 %v10250_v30, 1.0  ;;  %v4561_v58 = vadd.f32 %v10231_v18, %v4560_v26  ;;  %vm4563_vm10 = vweird.f32 %v10231_v18 }
 0x879   : > { %v7085_v42 = vpop.eup %7084  ;;  %7086 = vrcp.f32 %v10259_v61  ;;  %v4586_v36 = vmul.f32 %v4585_v35, %v10090_v29  ;;  %v4658_v27 = vmul.f32 %v4657_v55, %v10234_v16  ;;  %v10276_v0 = vmul.f32 0.70710677, %v10256_v12  ;;  %5329 = vmatmul.bf16.gmra.mxu0 %v5164_v60  ;;  %vm10287_vm11 = vmor %vm4562_vm12, %vm4563_vm10 }
 0x87a   : > { %v4598_v53 = vmul.f32 %v7085_v42, %v10229_v62  ;;  %v4606_v13 = vand.u32 2147483647, %v10229_v62  ;;  %v10280_v40 = vmul.f32 %v4623_v37, %v10151_v43  ;;  %v4669_v19 = vmul.f32 %v4668_v46, %v10234_v16 }
 0x87b   : > { %v10283_v1 = vmin.f32 %v4694_v5, 16.0  ;;  %vm4603_vm14 = vweird.f32 %v7085_v42  ;;  %v4608_v11 = vand.u32 2147483648, %v10229_v62  ;;  %v4659_v6 = vadd.f32 0.0036580483, %v4658_v27 }
 0x87c   : > { %v4599_v20 = vsub.f32 1.0, %v4598_v53  ;;  %v4565_v43 = vsel %vm10287_vm11, %v10231_v18, %v4561_v58  ;;  %v4670_v4 = vadd.f32 0.014752088, %v4669_v19  ;;  %v4734_v45 = vmul.f32 %v10276_v0, %v10276_v0 }
 0x87d   : > { %v4696_v39 = vmul.f32 2.1237322e-06, %v10283_v1  ;;  %v4707_v49 = vmul.f32 3.8918573e-05, %v10283_v1  ;;  %v4660_v38 = vmul.f32 %v4659_v6, %v10234_v16  ;;  %v5165_v33 = vpack.c.bf16 %v10211_v50, %v10118_v48 }
 0x87e   : > { %v4600_v22 = vmul.f32 %v7085_v42, %v4599_v20  ;;  %vm4602_vm15 = vweird.f32 %v10229_v62  ;;  %v4671_v18 = vmul.f32 %v4670_v4, %v10234_v16  ;;  %v4609_v55 = vor.u32 1.1754944e-38, %v4608_v11 }
 0x87f   : > { %v10302_v35 = vpop.eup %7086  ;;  %v4697_v37 = vadd.f32 0.00028619796, %v4696_v39  ;;  %v4708_v52 = vadd.f32 0.001143296, %v4707_v49  ;;  %v4661_v46 = vadd.f32 0.05243302, %v4660_v38  ;;  %5378 = vmatmul.bf16.gmra.mxu1 %v5165_v33  ;;  %v4570_v60 = vsel %vm10263_vm13, %v4569_v3, %v4565_v43  ;;  %vm4604_vm0 = vmor %vm4602_vm15, %vm4603_vm14 }
 0x880   : > { %v4601_v26 = vadd.f32 %v7085_v42, %v4600_v22  ;;  %v4638_v5 = vmul.f32 %v10302_v35, %v10259_v61  ;;  %v4672_v48 = vadd.f32 0.112945676, %v4671_v18  ;;  %vm4607_vm1 = vcmp.eq.f32.partialorder %v4606_v13, 8.507059e+37 }
 0x881   : > { %v4698_v50 = vmul.f32 %v4697_v37, %v10283_v1  ;;  %v4709_v62 = vmul.f32 %v4708_v52, %v10283_v1  ;;  %v10313_v27 = vmin.f32 %v4734_v45, 16.0  ;;  %v4662_v29 = vmul.f32 %v4661_v46, %v10234_v16 }
 0x882   : > { %v4605_v58 = vsel %vm4604_vm0, %v7085_v42, %v4601_v26  ;;  %v4639_v53 = vsub.f32 1.0, %v4638_v5  ;;  %v4673_v20 = vmul.f32 %v4672_v48, %v10234_v16  ;;  %v4571_v14 = vmul.f32 %v4570_v60, %v10245_v44 }
 0x883   : > { %v4610_v19 = vsel %vm4607_vm1, %v4609_v55, %v4605_v58  ;;  %v4699_v11 = vadd.f32 0.0036580483, %v4698_v50  ;;  %v4646_v6 = vand.u32 2147483647, %v10259_v61  ;;  %v4710_v43 = vadd.f32 0.014752088, %v4709_v62 }
 0x884   : > { %v4640_v3 = vmul.f32 %v10302_v35, %v4639_v53  ;;  %v4674_v4 = vadd.f32 0.4994258, %v4673_v20  ;;  %v4736_v13 = vmul.f32 2.1237322e-06, %v10313_v27  ;;  %v4747_v39 = vmul.f32 3.8918573e-05, %v10313_v27  ;;  %v3740_v20 = vpop.f32.mrf.mxu3 }
 0x885   : > { %v4700_v42 = vmul.f32 %v4699_v11, %v10283_v1  ;;  %v4611_v49 = vmul.f32 %v4610_v19, %v4586_v36  ;;  %vm4643_vm2 = vweird.f32 %v10302_v35  ;;  %v4711_v38 = vmul.f32 %v4710_v43, %v10283_v1 }
 0x886   : > { %v4641_v22 = vadd.f32 %v10302_v35, %v4640_v3  ;;  %v4648_v44 = vand.u32 2147483648, %v10259_v61  ;;  %v4663_v45 = vadd.f32 0.18741608, %v4662_v29  ;;  %v4675_v33 = vmul.f32 %v4674_v4, %v10234_v16 }
 0x887   : > { %v4737_v18 = vadd.f32 0.00028619796, %v4736_v13  ;;  %v6488_v37 = vclamps-f32 %v4571_v14, 1.0  ;;  %vm4642_vm3 = vweird.f32 %v10259_v61  ;;  %v4712_v52 = vadd.f32 0.112945676, %v4711_v38 }
 0x888   : > { %v4748_v26 = vadd.f32 0.001143296, %v4747_v39  ;;  %v10331_v36 = vmul.f32 %v10236_v28, %v10040_v59  ;;  %vm10333_vm4 = vmor %vm4642_vm3, %vm4643_vm2  ;;  %v10337_v5 = vadd.f32 1.0, %v4675_v33  ;;  %v4701_v46 = vadd.f32 0.05243302, %v4700_v42  ;;  %v3691_v59 = vpop.f32.mrf.mxu2 }
 0x889   : > { %v4738_v60 = vmul.f32 %v4737_v18, %v10313_v27  ;;  %v6489_v48 = vclamps-f32 %v4611_v49, 1.0  ;;  %v4625_v50 = vadd.f32 1.1283791, %v10280_v40  ;;  %v4645_v61 = vsel %vm10333_vm4, %v10302_v35, %v4641_v22 }
 0x88a   : > { %v4713_v62 = vmul.f32 %v4712_v52, %v10283_v1  ;;  %v5111_v28 = vadd.f32 1.0, %v6487_v10  ;;  %v4649_v58 = vor.u32 1.1754944e-38, %v4648_v44  ;;  %v4664_v53 = vmul.f32 %v4663_v45, %v10234_v16 }
 0x88b   : > { %7088 = vrcp.f32 %v10337_v5  ;;  %v5112_v19 = vadd.f32 1.0, %v6488_v37  ;;  %vm4647_vm5 = vcmp.eq.f32.partialorder %v4646_v6, 8.507059e+37  ;;  %v4749_v40 = vmul.f32 %v4748_v26, %v10313_v27 }
 0x88c   : > { %v4714_v29 = vadd.f32 0.4994258, %v4713_v62  ;;  %v4650_v11 = vsel %vm4647_vm5, %v4649_v58, %v4645_v61  ;;  %v4702_v35 = vmul.f32 %v4701_v46, %v10283_v1  ;;  %v4739_v14 = vadd.f32 0.0036580483, %v4738_v60 }
 0x88d   : > { %v10352_v3 = vadd.f32 %v3691_v59, %v9111_v7  ;;  %v5113_v30 = vadd.f32 1.0, %v6489_v48  ;;  %v4626_v10 = vmul.f32 %v4625_v50, %v10122_v47  ;;  %v4750_v43 = vadd.f32 0.014752088, %v4749_v40 }
 0x88e   : > { %v4715_v16 = vmul.f32 %v4714_v29, %v10283_v1  ;;  %v4665_v4 = vadd.f32 1.1283791, %v4664_v53  ;;  %v4740_v6 = vmul.f32 %v4739_v14, %v10313_v27  ;;  %v10361_v13 = vadd.f32 %v3740_v20, %v9113_v25 }
 0x88f   : > { %v10358_v42 = vmul.f32 0.70710677, %v10352_v3  ;;  %v5144_v39 = vmul.f32 %v5112_v19, %v10114_v57  ;;  %v10364_v49 = vmul.f32 %v4650_v11, %v4626_v10  ;;  %v4751_v47 = vmul.f32 %v4750_v43, %v10313_v27 }
 0x890   : > { %v10366_v22 = vadd.f32 1.0, %v4715_v16  ;;  %v4703_v44 = vadd.f32 0.18741608, %v4702_v35  ;;  %v4741_v45 = vadd.f32 0.05243302, %v4740_v6  ;;  %v5143_v37 = vmul.f32 %v5111_v28, %v10048_v63 }
 0x891   : > { %v10369_v38 = vpop.eup %7088  ;;  %v4774_v33 = vmul.f32 %v10358_v42, %v10358_v42  ;;  %v10374_v18 = vmul.f32 0.70710677, %v10361_v13  ;;  %v5145_v57 = vmul.f32 %v5113_v30, %v10146_v56  ;;  %v10382_v26 = vmul.f32 %v4665_v4, %v10204_v9 }
 0x892   : > { %v4678_v52 = vmul.f32 %v10369_v38, %v10337_v5  ;;  %7090 = vrcp.f32 %v10366_v22  ;;  %vm4682_vm6 = vweird.f32 %v10337_v5  ;;  %v4686_v55 = vand.u32 2147483647, %v10337_v5 }
 0x893   : > { %v4688_v46 = vand.u32 2147483648, %v10337_v5  ;;  %v4752_v48 = vadd.f32 0.112945676, %v4751_v47  ;;  %v10387_v50 = vmin.f32 %v4774_v33, 16.0  ;;  %v4814_v63 = vmul.f32 %v10374_v18, %v10374_v18 }
 0x894   : > { %v4679_v60 = vsub.f32 1.0, %v4678_v52  ;;  %v6490_v56 = vclamps-f32 %v10364_v49, 1.0  ;;  %v4704_v61 = vmul.f32 %v4703_v44, %v10283_v1  ;;  %v4742_v9 = vmul.f32 %v4741_v45, %v10313_v27 }
 0x895   : > { %v5166_v62 = vpack.c.bf16 %v5144_v39, %v10331_v36  ;;  %v4753_v28 = vmul.f32 %v4752_v48, %v10313_v27  ;;  %v4776_v58 = vmul.f32 2.1237322e-06, %v10387_v50  ;;  %v4787_v53 = vmul.f32 3.8918573e-05, %v10387_v50 }
 0x896   : > { %v4680_v59 = vmul.f32 %v10369_v38, %v4679_v60  ;;  %vm4683_vm7 = vweird.f32 %v10369_v38  ;;  %vm10400_vm8 = vcmp.eq.f32.partialorder %v4686_v55, 8.507059e+37  ;;  %v10404_v29 = vmin.f32 %v4814_v63, 16.0 }
 0x897   : > { %5334 = vmatmul.bf16.gmra.mxu0 %v5166_v62  ;;  %v5167_v1 = vpack.c.bf16 %v5145_v57, %v5143_v37  ;;  %v4754_v20 = vadd.f32 0.4994258, %v4753_v28  ;;  %v4777_v11 = vadd.f32 0.00028619796, %v4776_v58  ;;  %v4788_v35 = vadd.f32 0.001143296, %v4787_v53  ;;  %vm10416_vm9 = vmor %vm4682_vm6, %vm4683_vm7  ;;  %v3693_v37 = vpop.f32.mrf.mxu2 }
 0x898   : > { %v7091_v40 = vpop.eup %7090  ;;  %v4681_v36 = vadd.f32 %v10369_v38, %v4680_v59  ;;  %v4689_v14 = vor.u32 1.1754944e-38, %v4688_v46  ;;  %v4743_v10 = vadd.f32 0.18741608, %v4742_v9  ;;  %v4816_v16 = vmul.f32 2.1237322e-06, %v10404_v29 }
 0x899   : > { %v4718_v30 = vmul.f32 %v7091_v40, %v10366_v22  ;;  %5383 = vmatmul.bf16.gmra.mxu1 %v5167_v1  ;;  %v4705_v43 = vadd.f32 1.1283791, %v4704_v61  ;;  %v4755_v4 = vmul.f32 %v4754_v20, %v10313_v27  ;;  %v4778_v6 = vmul.f32 %v4777_v11, %v10387_v50 }
 0x89a   : > { %v4789_v39 = vmul.f32 %v4788_v35, %v10387_v50  ;;  %v4726_v44 = vand.u32 2147483647, %v10366_v22  ;;  %v4728_v45 = vand.u32 2147483648, %v10366_v22  ;;  %v4817_v33 = vadd.f32 0.00028619796, %v4816_v16 }
 0x89b   : > { %v4719_v47 = vsub.f32 1.0, %v4718_v30  ;;  %v4685_v57 = vsel %vm10416_vm9, %v10369_v38, %v4681_v36  ;;  %v10425_v52 = vadd.f32 1.0, %v4755_v4  ;;  %v4779_v55 = vadd.f32 0.0036580483, %v4778_v6  ;;  %v5315_v6 = vpop.f32.mrf.mxu0 }
 0x89c   : > { %v4790_v46 = vadd.f32 0.014752088, %v4789_v39  ;;  %vm4723_vm12 = vweird.f32 %v7091_v40  ;;  %v4744_v60 = vmul.f32 %v4743_v10, %v10313_v27  ;;  %v4827_v48 = vmul.f32 3.8918573e-05, %v10404_v29 }
 0x89d   : > { %v4720_v5 = vmul.f32 %v7091_v40, %v4719_v47  ;;  %vm4722_vm13 = vweird.f32 %v10366_v22  ;;  %7092 = vrcp.f32 %v10425_v52  ;;  %v4818_v63 = vmul.f32 %v4817_v33, %v10404_v29 }
 0x89e   : > { %v10433_v61 = vadd.f32 %v3693_v37, %v9111_v7  ;;  %v4690_v38 = vsel %vm10400_vm8, %v4689_v14, %v4685_v57  ;;  %v4780_v62 = vmul.f32 %v4779_v55, %v10387_v50  ;;  %v4791_v59 = vmul.f32 %v4790_v46, %v10387_v50  ;;  %vm4724_vm10 = vmor %vm4722_vm13, %vm4723_vm12  ;;  %v3742_v14 = vpop.f32.mrf.mxu3  ;;  %v5364_v37 = vpop.f32.mrf.mxu1 }
 0x89f   : > { %v4721_v9 = vadd.f32 %v7091_v40, %v4720_v5  ;;  %v5114_v27 = vadd.f32 1.0, %v6490_v56  ;;  %v4706_v28 = vmul.f32 %v4705_v43, %v10242_v15  ;;  %v4729_v22 = vor.u32 1.1754944e-38, %v4728_v45 }
 0x8a0   : > { %v4828_v58 = vadd.f32 0.001143296, %v4827_v48  ;;  %vm4727_vm11 = vcmp.eq.f32.partialorder %v4726_v44, 8.507059e+37  ;;  %v4745_v1 = vadd.f32 1.1283791, %v4744_v60  ;;  %v4691_v20 = vmul.f32 %v4690_v38, %v10382_v26 }
 0x8a1   : > { %v4725_v53 = vsel %vm4724_vm10, %v7091_v40, %v4721_v9  ;;  %v4792_v36 = vadd.f32 0.112945676, %v4791_v59  ;;  %v4819_v19 = vadd.f32 0.0036580483, %v4818_v63  ;;  %v4781_v10 = vadd.f32 0.05243302, %v4780_v62 }
 0x8a2   : > { %v4730_v11 = vsel %vm4727_vm11, %v4729_v22, %v4725_v53  ;;  %v4829_v35 = vmul.f32 %v4828_v58, %v10404_v29  ;;  %v10444_v15 = vmul.f32 0.70710677, %v10433_v61  ;;  %v10447_v40 = vmul.f32 %v5114_v27, %v10160_v31 }
 0x8a3   : > { %v4731_v30 = vmul.f32 %v4730_v11, %v4706_v28  ;;  %v4793_v56 = vmul.f32 %v4792_v36, %v10387_v50  ;;  %v7093_v16 = vpop.eup %7092  ;;  %v3771_v43 = vmul.f32 0.5, %v10125_v34  ;;  %v3772_v26 = vmul.f32 0.5, %v10225_v23  ;;  %v10481_v11 = vld [vmem:[%s11423_s22] ss:$0 sm:$0xff] }
 0x8a4   : > { %v4830_v4 = vadd.f32 0.014752088, %v4829_v35  ;;  %v4746_v49 = vmul.f32 %v4745_v1, %v10276_v0  ;;  %v4758_v47 = vmul.f32 %v7093_v16, %v10425_v52  ;;  %v10454_v44 = vadd.f32 %v3742_v14, %v9113_v25 }
 0x8a5   : > { %v6492_v39 = vclamps-f32 %v4731_v30, 1.0  ;;  %v4794_v45 = vadd.f32 0.4994258, %v4793_v56  ;;  %v4820_v33 = vmul.f32 %v4819_v19, %v10404_v29  ;;  %v4854_v34 = vmul.f32 %v10444_v15, %v10444_v15  ;;  %v5317_v19 = vpop.f32.mrf.mxu0 }
 0x8a6   : > { %v4831_v31 = vmul.f32 %v4830_v4, %v10404_v29  ;;  %v6491_v23 = vclamps-f32 %v4691_v20, 1.0  ;;  %v4759_v57 = vsub.f32 1.0, %v4758_v47  ;;  %v4768_v55 = vand.u32 2147483648, %v10425_v52 }
 0x8a7   : > { %v4782_v0 = vmul.f32 %v4781_v10, %v10387_v50  ;;  %v5116_v46 = vadd.f32 1.0, %v6492_v39  ;;  %v4795_v5 = vmul.f32 %v4794_v45, %v10387_v50  ;;  %v10463_v48 = vmin.f32 %v4854_v34, 16.0 }
 0x8a8   : > { %v4832_v60 = vadd.f32 0.112945676, %v4831_v31  ;;  %v4760_v63 = vmul.f32 %v7093_v16, %v4759_v57  ;;  %vm4763_vm14 = vweird.f32 %v7093_v16  ;;  %v4766_v38 = vand.u32 2147483647, %v10425_v52 }
 0x8a9   : > { %v10467_v9 = vmul.f32 0.70710677, %v10454_v44  ;;  %v10469_v62 = vadd.f32 1.0, %v4795_v5  ;;  %v4821_v59 = vadd.f32 0.05243302, %v4820_v33  ;;  %vm4762_vm15 = vweird.f32 %v10425_v52 }
 0x8aa   : > { %v4833_v27 = vmul.f32 %v4832_v60, %v10404_v29  ;;  %v4856_v28 = vmul.f32 2.1237322e-06, %v10463_v48  ;;  %v4761_v22 = vadd.f32 %v7093_v16, %v4760_v63  ;;  %v4783_v58 = vadd.f32 0.18741608, %v4782_v0  ;;  %vm4764_vm0 = vmor %vm4762_vm15, %vm4763_vm14 }
 0x8ab   : > { %v4867_v53 = vmul.f32 3.8918573e-05, %v10463_v48  ;;  %v5148_v1 = vmul.f32 %v5116_v46, %v3772_v26  ;;  %v4769_v36 = vor.u32 1.1754944e-38, %v4768_v55  ;;  %7094 = vrcp.f32 %v10469_v62 }
 0x8ac   : > { %v4894_v20 = vmul.f32 %v10467_v9, %v10467_v9  ;;  %v4765_v35 = vsel %vm4764_vm0, %v7093_v16, %v4761_v22  ;;  %vm4767_vm1 = vcmp.eq.f32.partialorder %v4766_v38, 8.507059e+37  ;;  %v4834_v52 = vadd.f32 0.4994258, %v4833_v27 }
 0x8ad   : > { %v4857_v14 = vadd.f32 0.00028619796, %v4856_v28  ;;  %v5115_v30 = vadd.f32 1.0, %v6491_v23  ;;  %v4770_v10 = vsel %vm4767_vm1, %v4769_v36, %v4765_v35  ;;  %v4822_v56 = vmul.f32 %v4821_v59, %v10404_v29  ;;  %v5366_v23 = vpop.f32.mrf.mxu1  ;;  %v5320_v35 = vpop.f32.mrf.mxu0 }
 0x8ae   : > { %v4868_v26 = vadd.f32 0.001143296, %v4867_v53  ;;  %v4771_v4 = vmul.f32 %v4770_v10, %v4746_v49  ;;  %v4784_v39 = vmul.f32 %v4783_v58, %v10387_v50  ;;  %v4835_v47 = vmul.f32 %v4834_v52, %v10404_v29 }
 0x8af   : > { %v4858_v45 = vmul.f32 %v4857_v14, %v10463_v48  ;;  %v10488_v31 = vmin.f32 %v4894_v20, 16.0  ;;  %v5168_v16 = vpack.c.bf16 %v5148_v1, %v10447_v40  ;;  %v5316_v34 = vadd.f32 %v10481_v11, %v5315_v6 }
 0x8b0   : > { %v4869_v33 = vmul.f32 %v4868_v26, %v10463_v48  ;;  %v3773_v57 = vmul.f32 0.5, %v10256_v12  ;;  %v6493_v55 = vclamps-f32 %v4771_v4, 1.0  ;;  %v10493_v0 = vadd.f32 1.0, %v4835_v47 }
 0x8b1   : > { %v4859_v49 = vadd.f32 0.0036580483, %v4858_v45  ;;  %v7095_v50 = vpop.eup %7094  ;;  %v5147_v46 = vmul.f32 %v5115_v30, %v3771_v43  ;;  %v4896_v60 = vmul.f32 2.1237322e-06, %v10488_v31  ;;  %v4907_v63 = vmul.f32 3.8918573e-05, %v10488_v31  ;;  %5339 = vmatmul.bf16.gmra.mxu0 %v5168_v16 }
 0x8b2   : > { %v4870_v5 = vadd.f32 0.014752088, %v4869_v33  ;;  %v5117_v38 = vadd.f32 1.0, %v6493_v55  ;;  %v4798_v40 = vmul.f32 %v7095_v50, %v10469_v62  ;;  %v4823_v59 = vadd.f32 0.18741608, %v4822_v56 }
 0x8b3   : > { %7096 = vrcp.f32 %v10493_v0  ;;  %v4785_v6 = vadd.f32 1.1283791, %v4784_v39  ;;  %v4860_v12 = vmul.f32 %v4859_v49, %v10463_v48  ;;  %v5365_v27 = vadd.f32 %v5364_v37, %v5316_v34 }
 0x8b4   : > { %v5318_v28 = vadd.f32 %v10481_v11, %v5317_v19  ;;  %v5149_v22 = vmul.f32 %v5117_v38, %v3773_v57  ;;  %v4799_v43 = vsub.f32 1.0, %v4798_v40  ;;  %v4871_v58 = vmul.f32 %v4870_v5, %v10463_v48 }
 0x8b5   : > { %v4897_v53 = vadd.f32 0.00028619796, %v4896_v60  ;;  %vm4803_vm2 = vweird.f32 %v7095_v50  ;;  %v4806_v1 = vand.u32 2147483647, %v10469_v62  ;;  %v4808_v36 = vand.u32 2147483648, %v10469_v62  ;;  %v5369_v57 = vpop.f32.mrf.mxu1 }
 0x8b6   : > { %v4908_v20 = vadd.f32 0.001143296, %v4907_v63  ;;  %v4800_v52 = vmul.f32 %v7095_v50, %v4799_v43  ;;  %v4872_v14 = vadd.f32 0.112945676, %v4871_v58  ;;  %v5169_v10 = vpack.c.bf16 %v5149_v22, %v5147_v46 }
 0x8b7   : > { %v4898_v30 = vmul.f32 %v4897_v53, %v10488_v31  ;;  %v4861_v37 = vadd.f32 0.05243302, %v4860_v12  ;;  %v10507_v56 = vadd.f32 %v5365_v27, %v8862_v17  ;;  %v5367_v26 = vadd.f32 %v5366_v23, %v5318_v28 }
 0x8b8   : > { %v4909_v19 = vmul.f32 %v4908_v20, %v10488_v31  ;;  %v4801_v39 = vadd.f32 %v7095_v50, %v4800_v52  ;;  %vm4802_vm3 = vweird.f32 %v10469_v62  ;;  %v4873_v47 = vmul.f32 %v4872_v14, %v10463_v48  ;;  %5388 = vmatmul.bf16.gmra.mxu1 %v5169_v10  ;;  %v5322_v14 = vpop.f32.mrf.mxu0 }
 0x8b9   : > { %v10509_v4 = vpop.eup %7096  ;;  %v4899_v45 = vadd.f32 0.0036580483, %v4898_v30  ;;  %vm10514_vm4 = vmor %vm4802_vm3, %vm4803_vm2  ;;  %v4809_v16 = vor.u32 1.1754944e-38, %v4808_v36  ;;  %5438 = vadd.xlane.f32.xlu1 %v10507_v56  ;;  %v5321_v23 = vadd.f32 %v10481_v11, %v5320_v35  ;;  %v10526_v46 = vadd.f32 %v5367_v26, %v8867_v2  ;;  %v3745_v26 = vpop.f32.mrf.mxu3 }
 0x8ba   : > { %v4838_v17 = vmul.f32 %v10509_v4, %v10493_v0  ;;  %v4910_v34 = vadd.f32 0.014752088, %v4909_v19  ;;  %v4805_v62 = vsel %vm10514_vm4, %v7095_v50, %v4801_v39  ;;  %v4874_v55 = vadd.f32 0.4994258, %v4873_v47  ;;  %v3696_v50 = vpop.f32.mrf.mxu2 }
 0x8bb   : > { %v4900_v49 = vmul.f32 %v4899_v45, %v10488_v31  ;;  %vm4807_vm5 = vcmp.eq.f32.partialorder %v4806_v1, 8.507059e+37  ;;  %v4862_v60 = vmul.f32 %v4861_v37, %v10463_v48  ;;  %v5486_v27 = vmul.f32 %v10507_v56, %v10507_v56  ;;  %5440 = vadd.xlane.f32.xlu2 %v10526_v46 }
 0x8bc   : > { %v4839_v5 = vsub.f32 1.0, %v4838_v17  ;;  %v4911_v63 = vmul.f32 %v4910_v34, %v10488_v31  ;;  %v4810_v38 = vsel %vm4807_vm5, %v4809_v16, %v4805_v62  ;;  %v4875_v40 = vmul.f32 %v4874_v55, %v10463_v48 }
 0x8bd   : > { %v4901_v12 = vadd.f32 0.05243302, %v4900_v49  ;;  %v4786_v28 = vmul.f32 %v4785_v6, %v10358_v42  ;;  %v5370_v43 = vadd.f32 %v5369_v57, %v5321_v23  ;;  %5502 = vadd.xlane.f32.xlu0 %v5486_v27  ;;  %v5487_v1 = vmul.f32 %v10526_v46, %v10526_v46  ;;  %v5371_v33 = vpop.f32.mrf.mxu1 }
 0x8be   : > { %v4840_v2 = vmul.f32 %v10509_v4, %v4839_v5  ;;  %v4912_v22 = vadd.f32 0.112945676, %v4911_v63  ;;  %v10536_v58 = vadd.f32 1.0, %v4875_v40  ;;  %v4824_v20 = vmul.f32 %v4823_v59, %v10404_v29 }
 0x8bf   : > { %v4902_v53 = vmul.f32 %v4901_v12, %v10488_v31  ;;  %v4811_v36 = vmul.f32 %v4810_v38, %v4786_v28  ;;  %v4863_v35 = vadd.f32 0.18741608, %v4862_v60  ;;  %vm4843_vm6 = vweird.f32 %v10509_v4 }
 0x8c0   : > { %v4913_v52 = vmul.f32 %v4912_v22, %v10488_v31  ;;  %v4841_v42 = vadd.f32 %v10509_v4, %v4840_v2  ;;  %7098 = vrcp.f32 %v10536_v58  ;;  %v10547_v6 = vadd.f32 %v5370_v43, %v8876_v8 }
 0x8c1   : > { %v3774_v30 = vmul.f32 0.5, %v10352_v3  ;;  %v4848_v10 = vand.u32 2147483648, %v10493_v0  ;;  %5504 = vadd.xlane.f32.xlu1 %v5487_v1  ;;  %vm4842_vm7 = vweird.f32 %v10493_v0  ;;  %v4846_v29 = vand.u32 2147483647, %v10493_v0 }
 0x8c2   : > { %v4914_v37 = vadd.f32 0.4994258, %v4913_v52  ;;  %v4903_v59 = vadd.f32 0.18741608, %v4902_v53  ;;  %v5323_v19 = vadd.f32 %v10481_v11, %v5322_v14  ;;  %v6494_v39 = vclamps-f32 %v4811_v36, 1.0  ;;  %vm10554_vm8 = vmor %vm4842_vm7, %vm4843_vm6  ;;  %v3698_v23 = vpop.f32.mrf.mxu2 }
 0x8c3   : > { %v4825_v47 = vadd.f32 1.1283791, %v4824_v20  ;;  %v4864_v8 = vmul.f32 %v4863_v35, %v10463_v48  ;;  %v4845_v16 = vsel %vm10554_vm8, %v10509_v4, %v4841_v42  ;;  %v5488_v17 = vmul.f32 %v10547_v6, %v10547_v6 }
 0x8c4   : > { %v4915_v3 = vmul.f32 %v4914_v37, %v10488_v31  ;;  %v5372_v0 = vadd.f32 %v5371_v33, %v5323_v19  ;;  %v10566_v34 = vadd.f32 %v3696_v50, %v9111_v7  ;;  %v4849_v57 = vor.u32 1.1754944e-38, %v4848_v10 }
 0x8c5   : > { %v10569_v62 = vmul.f32 0.5, %v10433_v61  ;;  %v10574_v55 = vadd.f32 %v3745_v26, %v9113_v25  ;;  %vm4847_vm9 = vcmp.eq.f32.partialorder %v4846_v29, 8.507059e+37  ;;  %v4904_v4 = vmul.f32 %v4903_v59, %v10488_v31  ;;  %5442 = vadd.xlane.f32.xlu0 %v10547_v6  ;;  %5506 = vadd.xlane.f32.xlu2 %v5488_v17  ;;  %v3747_v29 = vpop.f32.mrf.mxu3 }
 0x8c6   : > { %v10571_v48 = vadd.f32 1.0, %v4915_v3  ;;  %v7099_v49 = vpop.eup %7098  ;;  %v10579_v5 = vadd.f32 %v5372_v0, %v8883_v54  ;;  %v10582_v60 = vmul.f32 0.70710677, %v10566_v34  ;;  %v4826_v61 = vmul.f32 %v4825_v47, %v10374_v18 }
 0x8c7   : > { %v4850_v63 = vsel %vm4847_vm9, %v4849_v57, %v4845_v16  ;;  %v4878_v38 = vmul.f32 %v7099_v49, %v10536_v58  ;;  %v10587_v40 = vadd.f32 %v3698_v23, %v9111_v7  ;;  %v5118_v12 = vadd.f32 1.0, %v6494_v39 }
 0x8c8   : > { %v4865_v27 = vadd.f32 1.1283791, %v4864_v8  ;;  %v4886_v31 = vand.u32 2147483647, %v10536_v58  ;;  %7100 = vrcp.f32 %v10571_v48  ;;  %v4888_v50 = vand.u32 2147483648, %v10536_v58 }
 0x8c9   : > { %v4879_v54 = vsub.f32 1.0, %v4878_v38  ;;  %v4934_v28 = vmul.f32 %v10582_v60, %v10582_v60  ;;  %v10595_v18 = vmul.f32 0.70710677, %v10574_v55  ;;  %5444 = vadd.xlane.f32.xlu1 %v10579_v5  ;;  %v10598_v2 = vmul.f32 %v4850_v63, %v4826_v61 }
 0x8ca   : > { %vm4883_vm12 = vweird.f32 %v7099_v49  ;;  %v4905_v7 = vadd.f32 1.1283791, %v4904_v4  ;;  %v5489_v22 = vmul.f32 %v10579_v5, %v10579_v5  ;;  %v10607_v36 = vmul.f32 0.70710677, %v10587_v40 }
 0x8cb   : > { %v4880_v43 = vmul.f32 %v7099_v49, %v4879_v54  ;;  %v10602_v53 = vmin.f32 %v4934_v28, 16.0  ;;  %v4974_v1 = vmul.f32 %v10595_v18, %v10595_v18  ;;  %v10609_v20 = vmul.f32 %v5118_v12, %v3774_v30 }
 0x8cc   : > { %v4866_v35 = vmul.f32 %v4865_v27, %v10444_v15  ;;  %vm4882_vm13 = vweird.f32 %v10536_v58  ;;  %vm10613_vm10 = vcmp.eq.f32.partialorder %v4886_v31, 8.507059e+37  ;;  %v6495_v30 = vclamps-f32 %v10598_v2, 1.0 }
 0x8cd   : > { %v4881_v14 = vadd.f32 %v7099_v49, %v4880_v43  ;;  %v4936_v42 = vmul.f32 2.1237322e-06, %v10602_v53  ;;  %v4947_v10 = vmul.f32 3.8918573e-05, %v10602_v53  ;;  %v10619_v37 = vmin.f32 %v4974_v1, 16.0  ;;  %vm4884_vm11 = vmor %vm4882_vm13, %vm4883_vm12  ;;  %5508 = vadd.xlane.f32.xlu0 %v5489_v22 }
 0x8ce   : > { %v7101_v59 = vpop.eup %7100  ;;  %v4889_v15 = vor.u32 1.1754944e-38, %v4888_v50  ;;  %v4906_v58 = vmul.f32 %v4905_v7, %v10467_v9  ;;  %v5014_v19 = vmul.f32 %v10607_v36, %v10607_v36  ;;  %vm4922_vm14 = vweird.f32 %v10571_v48 }
 0x8cf   : > { %v4885_v26 = vsel %vm4884_vm11, %v7099_v49, %v4881_v14  ;;  %v4918_v39 = vmul.f32 %v7101_v59, %v10571_v48  ;;  %v4937_v47 = vadd.f32 0.00028619796, %v4936_v42  ;;  %v4948_v8 = vadd.f32 0.001143296, %v4947_v10 }
 0x8d0   : > { %v4890_v45 = vsel %vm10613_vm10, %v4889_v15, %v4885_v26  ;;  %v4987_v3 = vmul.f32 3.8918573e-05, %v10619_v37  ;;  %v10632_v33 = vadd.f32 %v3747_v29, %v9113_v25  ;;  %v4926_v0 = vand.u32 2147483647, %v10571_v48 }
 0x8d1   : > { %v4891_v9 = vmul.f32 %v4890_v45, %v4866_v35  ;;  %v4919_v16 = vsub.f32 1.0, %v4918_v39  ;;  %v10635_v17 = vmin.f32 %v5014_v19, 16.0  ;;  %vm4923_vm15 = vweird.f32 %v7101_v59  ;;  %v5325_v45 = vpop.f32.mrf.mxu0 }
 0x8d2   : > { %v4928_v23 = vand.u32 2147483648, %v10571_v48  ;;  %v4949_v57 = vmul.f32 %v4948_v8, %v10602_v53  ;;  %v4988_v49 = vadd.f32 0.001143296, %v4987_v3  ;;  %v4938_v63 = vmul.f32 %v4937_v47, %v10602_v53  ;;  %vm4924_vm1 = vmor %vm4922_vm14, %vm4923_vm15 }
 0x8d3   : > { %v6496_v4 = vclamps-f32 %v4891_v9, 1.0  ;;  %v4920_v61 = vmul.f32 %v7101_v59, %v4919_v16  ;;  %v5016_v38 = vmul.f32 2.1237322e-06, %v10635_v17  ;;  %v5027_v27 = vmul.f32 3.8918573e-05, %v10635_v17 }
 0x8d4   : > { %v4950_v25 = vadd.f32 0.014752088, %v4949_v57  ;;  %v4989_v12 = vmul.f32 %v4988_v49, %v10619_v37  ;;  %v10644_v31 = vmul.f32 0.70710677, %v10632_v33  ;;  %vm4927_vm0 = vcmp.eq.f32.partialorder %v4926_v0, 8.507059e+37 }
 0x8d5   : > { %v5120_v54 = vadd.f32 1.0, %v6496_v4  ;;  %v4921_v50 = vadd.f32 %v7101_v59, %v4920_v61  ;;  %v5017_v28 = vadd.f32 0.00028619796, %v5016_v38  ;;  %v4929_v2 = vor.u32 1.1754944e-38, %v4928_v23  ;;  %v5374_v38 = vpop.f32.mrf.mxu1 }
 0x8d6   : > { %v4951_v7 = vmul.f32 %v4950_v25, %v10602_v53  ;;  %v4990_v22 = vadd.f32 0.014752088, %v4989_v12  ;;  %v5028_v43 = vadd.f32 0.001143296, %v5027_v27  ;;  %v4939_v52 = vadd.f32 0.0036580483, %v4938_v63 }
 0x8d7   : > { %v5152_v1 = vmul.f32 %v5120_v54, %v10569_v62  ;;  %v4925_v35 = vsel %vm4924_vm1, %v7101_v59, %v4921_v50  ;;  %v4976_v14 = vmul.f32 2.1237322e-06, %v10619_v37  ;;  %v5054_v15 = vmul.f32 %v10644_v31, %v10644_v31 }
 0x8d8   : > { %v4930_v42 = vsel %vm4927_vm0, %v4929_v2, %v4925_v35  ;;  %v4952_v10 = vadd.f32 0.112945676, %v4951_v7  ;;  %v4991_v29 = vmul.f32 %v4990_v22, %v10619_v37  ;;  %v5018_v26 = vmul.f32 %v5017_v28, %v10635_v17 }
 0x8d9   : > { %v4931_v48 = vmul.f32 %v4930_v42, %v4906_v58  ;;  %v5170_v19 = vpack.c.bf16 %v5152_v1, %v10609_v20  ;;  %v5119_v39 = vadd.f32 1.0, %v6495_v30  ;;  %v5029_v59 = vmul.f32 %v5028_v43, %v10635_v17 }
 0x8da   : > { %v4953_v47 = vmul.f32 %v4952_v10, %v10602_v53  ;;  %v4992_v62 = vadd.f32 0.112945676, %v4991_v29  ;;  %v3775_v8 = vmul.f32 0.5, %v10361_v13  ;;  %v4940_v9 = vmul.f32 %v4939_v52, %v10602_v53  ;;  %v5327_v29 = vpop.f32.mrf.mxu0 }
 0x8db   : > { %v6497_v3 = vclamps-f32 %v4931_v48, 1.0  ;;  %v4977_v16 = vadd.f32 0.00028619796, %v4976_v14  ;;  %5344 = vmatmul.bf16.gmra.mxu0 %v5170_v19  ;;  %v5030_v20 = vadd.f32 0.014752088, %v5029_v59  ;;  %v10662_v23 = vmin.f32 %v5054_v15, 16.0 }
 0x8dc   : > { %v4954_v0 = vadd.f32 0.4994258, %v4953_v47  ;;  %v4993_v58 = vmul.f32 %v4992_v62, %v10619_v37  ;;  %v3777_v30 = vmul.f32 0.5, %v10454_v44  ;;  %v5019_v49 = vadd.f32 0.0036580483, %v5018_v26  ;;  %v11430_v26 = vld [vmem:[#allocation29_spill] sm:$0xff] }
 0x8dd   : > { %v5121_v57 = vadd.f32 1.0, %v6497_v3  ;;  %v5151_v4 = vmul.f32 %v5119_v39, %v3775_v8  ;;  %v5031_v13 = vmul.f32 %v5030_v20, %v10635_v17  ;;  %v4941_v12 = vadd.f32 0.05243302, %v4940_v9  ;;  %v5376_v9 = vpop.f32.mrf.mxu1 }
 0x8de   : > { %v4955_v61 = vmul.f32 %v4954_v0, %v10602_v53  ;;  %v4994_v63 = vadd.f32 0.4994258, %v4993_v58  ;;  %v4978_v27 = vmul.f32 %v4977_v16, %v10619_v37  ;;  %v5326_v54 = vadd.f32 %v10481_v11, %v5325_v45 }
 0x8df   : > { %v5153_v25 = vmul.f32 %v5121_v57, %v3777_v30  ;;  %v5032_v44 = vadd.f32 0.112945676, %v5031_v13  ;;  %v5056_v2 = vmul.f32 2.1237322e-06, %v10662_v23  ;;  %v5020_v22 = vmul.f32 %v5019_v49, %v10635_v17 }
 0x8e0   : > { %v10669_v50 = vadd.f32 1.0, %v4955_v61  ;;  %v4995_v28 = vmul.f32 %v4994_v63, %v10619_v37  ;;  %v5375_v35 = vadd.f32 %v5374_v38, %v5326_v54  ;;  %v4942_v52 = vmul.f32 %v4941_v12, %v10602_v53  ;;  %v11431_v63 = vld [vmem:[#allocation30_spill] sm:$0xff] }
 0x8e1   : > { %v5171_v7 = vpack.c.bf16 %v5153_v25, %v5151_v4  ;;  %v5033_v1 = vmul.f32 %v5032_v44, %v10635_v17  ;;  %v4979_v14 = vadd.f32 0.0036580483, %v4978_v27  ;;  %v5057_v42 = vadd.f32 0.00028619796, %v5056_v2 }
 0x8e2   : > { %7102 = vrcp.f32 %v10669_v50  ;;  %v10675_v43 = vadd.f32 1.0, %v4995_v28  ;;  %v5067_v10 = vmul.f32 3.8918573e-05, %v10662_v23  ;;  %v5021_v15 = vadd.f32 0.05243302, %v5020_v22 }
 0x8e3   : > { %5393 = vmatmul.bf16.gmra.mxu1 %v5171_v7  ;;  %v5034_v48 = vadd.f32 0.4994258, %v5033_v1  ;;  %v10682_v39 = vadd.f32 %v5375_v35, %v11430_v26  ;;  %v5328_v47 = vadd.f32 %v10481_v11, %v5327_v29  ;;  %v4943_v59 = vadd.f32 0.18741608, %v4942_v52 }
 0x8e4   : > { %7104 = vrcp.f32 %v10675_v43  ;;  %v5068_v19 = vadd.f32 0.001143296, %v5067_v10  ;;  %v4980_v45 = vmul.f32 %v4979_v14, %v10619_v37  ;;  %v5058_v3 = vmul.f32 %v5057_v42, %v10662_v23 }
 0x8e5   : > { %v5035_v8 = vmul.f32 %v5034_v48, %v10635_v17  ;;  %v5022_v0 = vmul.f32 %v5021_v15, %v10635_v17  ;;  %5446 = vadd.xlane.f32.xlu2 %v10682_v39  ;;  %v5377_v20 = vadd.f32 %v5376_v9, %v5328_v47  ;;  %v5490_v57 = vmul.f32 %v10682_v39, %v10682_v39 }
 0x8e6   : > { %v5069_v58 = vmul.f32 %v5068_v19, %v10662_v23  ;;  %v4981_v38 = vadd.f32 0.05243302, %v4980_v45  ;;  %v5059_v25 = vadd.f32 0.0036580483, %v5058_v3  ;;  %v4944_v12 = vmul.f32 %v4943_v59, %v10602_v53 }
 0x8e7   : > { %v10692_v30 = vadd.f32 1.0, %v5035_v8  ;;  %v10699_v13 = vadd.f32 %v5377_v20, %v11431_v63  ;;  %5510 = vadd.xlane.f32.xlu0 %v5490_v57  ;;  %v5023_v54 = vadd.f32 0.18741608, %v5022_v0  ;;  %v4968_v28 = vand.u32 2147483648, %v10669_v50 }
 0x8e8   : > { %v7103_v62 = vpop.eup %7102  ;;  %v5070_v61 = vadd.f32 0.014752088, %v5069_v58  ;;  %vm4962_vm3 = vweird.f32 %v10669_v50  ;;  %v4966_v1 = vand.u32 2147483647, %v10669_v50  ;;  %v4982_v53 = vmul.f32 %v4981_v38, %v10619_v37 }
 0x8e9   : > { %v4958_v16 = vmul.f32 %v7103_v62, %v10669_v50  ;;  %7106 = vrcp.f32 %v10692_v30  ;;  %vm4963_vm2 = vweird.f32 %v7103_v62  ;;  %v5491_v7 = vmul.f32 %v10699_v13, %v10699_v13 }
 0x8ea   : > { %v10696_v49 = vpop.eup %7104  ;;  %v5071_v2 = vmul.f32 %v5070_v61, %v10662_v23  ;;  %vm4964_vm4 = vmor %vm4962_vm3, %vm4963_vm2  ;;  %v5060_v35 = vmul.f32 %v5059_v25, %v10662_v23  ;;  %v4945_v14 = vadd.f32 1.1283791, %v4944_v12  ;;  %v4969_v29 = vor.u32 1.1754944e-38, %v4968_v28 }
 0x8eb   : > { %v4959_v4 = vsub.f32 1.0, %v4958_v16  ;;  %v4998_v44 = vmul.f32 %v10696_v49, %v10675_v43  ;;  %5512 = vadd.xlane.f32.xlu1 %v5491_v7  ;;  %v5024_v48 = vmul.f32 %v5023_v54, %v10635_v17  ;;  %vm4967_vm5 = vcmp.eq.f32.partialorder %v4966_v1, 8.507059e+37 }
 0x8ec   : > { %v5072_v52 = vadd.f32 0.112945676, %v5071_v2  ;;  %v4983_v47 = vadd.f32 0.18741608, %v4982_v53  ;;  %v5061_v59 = vadd.f32 0.05243302, %v5060_v35  ;;  %v4946_v8 = vmul.f32 %v4945_v14, %v10582_v60 }
 0x8ed   : > { %v4960_v27 = vmul.f32 %v7103_v62, %v4959_v4  ;;  %v4999_v15 = vsub.f32 1.0, %v4998_v44  ;;  %v5025_v9 = vadd.f32 1.1283791, %v5024_v48  ;;  %v5048_v16 = vand.u32 2147483648, %v10692_v30 }
 0x8ee   : > { %v5073_v19 = vmul.f32 %v5072_v52, %v10662_v23  ;;  %v5046_v57 = vand.u32 2147483647, %v10692_v30  ;;  %v4984_v4 = vmul.f32 %v4983_v47, %v10619_v37  ;;  %v5062_v61 = vmul.f32 %v5061_v59, %v10662_v23 }
 0x8ef   : > { %v4961_v22 = vadd.f32 %v7103_v62, %v4960_v27  ;;  %v7107_v10 = vpop.eup %7106  ;;  %5448 = vadd.xlane.f32.xlu0 %v10699_v13  ;;  %v5008_v60 = vand.u32 2147483648, %v10675_v43  ;;  %vm5042_vm7 = vweird.f32 %v10692_v30  ;;  %vm5003_vm8 = vweird.f32 %v10696_v49 }
 0x8f0   : > { %v5038_v26 = vmul.f32 %v7107_v10, %v10692_v30  ;;  %v5074_v45 = vadd.f32 0.4994258, %v5073_v19  ;;  %vm5043_vm6 = vweird.f32 %v7107_v10  ;;  %v5049_v27 = vor.u32 1.1754944e-38, %v5048_v16 }
 0x8f1   : > { %v4965_v42 = vsel %vm4964_vm4, %v7103_v62, %v4961_v22  ;;  %v5000_v62 = vmul.f32 %v10696_v49, %v4999_v15  ;;  %vm5044_vm9 = vmor %vm5042_vm7, %vm5043_vm6  ;;  %v5026_v54 = vmul.f32 %v5025_v9, %v10607_v36  ;;  %vm5047_vm12 = vcmp.eq.f32.partialorder %v5046_v57, 8.507059e+37  ;;  %v11435_v57 = vld [vmem:[#allocation33_spill] sm:$0xff] }
 0x8f2   : > { %v4970_v50 = vsel %vm4967_vm5, %v4969_v29, %v4965_v42  ;;  %v5039_v3 = vsub.f32 1.0, %v5038_v26  ;;  %v5075_v17 = vmul.f32 %v5074_v45, %v10662_v23  ;;  %vm5002_vm13 = vweird.f32 %v10675_v43  ;;  %v11434_v29 = vld [vmem:[#allocation31_spill] sm:$0xff] }
 0x8f3   : > { %v4971_v58 = vmul.f32 %v4970_v50, %v4946_v8  ;;  %v5001_v12 = vadd.f32 %v10696_v49, %v5000_v62  ;;  %v5006_v44 = vand.u32 2147483647, %v10675_v43  ;;  %v5063_v2 = vadd.f32 0.18741608, %v5062_v61  ;;  %vm10735_vm10 = vmor %vm5002_vm13, %vm5003_vm8 }
 0x8f4   : > { %v5040_v20 = vmul.f32 %v7107_v10, %v5039_v3  ;;  %v10724_v63 = vadd.f32 1.0, %v5075_v17  ;;  %v4985_v35 = vadd.f32 1.1283791, %v4984_v4  ;;  %v5009_v42 = vor.u32 1.1754944e-38, %v5008_v60 }
 0x8f5   : > { %v6498_v37 = vclamps-f32 %v4971_v58, 1.0  ;;  %v5005_v36 = vsel %vm10735_vm10, %v10696_v49, %v5001_v12  ;;  %v3778_v48 = vmul.f32 0.5, %v10566_v34  ;;  %vm5007_vm11 = vcmp.eq.f32.partialorder %v5006_v44, 8.507059e+37 }
 0x8f6   : > { %v5330_v0 = vpop.f32.mrf.mxu0  ;;  %v5041_v38 = vadd.f32 %v7107_v10, %v5040_v20  ;;  %7108 = vrcp.f32 %v10724_v63  ;;  %v3780_v19 = vmul.f32 0.5, %v10587_v40  ;;  %v5064_v26 = vmul.f32 %v5063_v2, %v10662_v23 }
 0x8f7   : > { %v5331_v25 = vadd.f32 %v10481_v11, %v5330_v0  ;;  %v5122_v14 = vadd.f32 1.0, %v6498_v37  ;;  %v5010_v50 = vsel %vm5007_vm11, %v5009_v42, %v5005_v36  ;;  %v4986_v45 = vmul.f32 %v4985_v35, %v10595_v18  ;;  %v11436_v36 = vld [vmem:[#allocation34_spill] sm:$0xff] }
 0x8f8   : > { %v5045_v28 = vsel %vm5044_vm9, %v7107_v10, %v5041_v38  ;;  %v5065_v34 = vadd.f32 1.1283791, %v5064_v26  ;;  %v5086_v16 = vand.u32 2147483647, %v10724_v63  ;;  %v5088_v40 = vand.u32 2147483648, %v10724_v63 }
 0x8f9   : > { %v5050_v30 = vsel %vm5047_vm12, %v5049_v27, %v5045_v28  ;;  %v5154_v8 = vmul.f32 %v5122_v14, %v3778_v48  ;;  %v5011_v9 = vmul.f32 %v5010_v50, %v4986_v45  ;;  %vm5082_vm15 = vweird.f32 %v10724_v63 }
 0x8fa   : > { %v5051_v1 = vmul.f32 %v5050_v30, %v5026_v54  ;;  %v5089_v61 = vor.u32 1.1754944e-38, %v5088_v40  ;;  %v5066_v38 = vmul.f32 %v5065_v34, %v10644_v31  ;;  %vm5087_vm1 = vcmp.eq.f32.partialorder %v5086_v16, 8.507059e+37 }
 0x8fb   : > { %v6499_v60 = vclamps-f32 %v5011_v9, 1.0  ;;  %v3779_v54 = vmul.f32 0.5, %v10574_v55  ;;  %v3781_v28 = vmul.f32 0.5, %v10632_v33 }
 0x8fc   : > { %v5379_v7 = vpop.f32.mrf.mxu1  ;;  %v6500_v10 = vclamps-f32 %v5051_v1, 1.0  ;;  %v7109_v15 = vpop.eup %7108 }
 0x8fd   : > { %v5380_v53 = vadd.f32 %v5379_v7, %v5331_v25  ;;  %v5078_v59 = vmul.f32 %v7109_v15, %v10724_v63  ;;  %vm5083_vm14 = vweird.f32 %v7109_v15  ;;  %v5123_v63 = vadd.f32 1.0, %v6499_v60 }
 0x8fe   : > { %v5332_v52 = vpop.f32.mrf.mxu0  ;;  %v5124_v47 = vadd.f32 1.0, %v6500_v10  ;;  %vm5084_vm0 = vmor %vm5082_vm15, %vm5083_vm14  ;;  %vm5907_vm15 = vcmask 1041409  }
 0x8ff   : > { %v10743_v43 = vadd.f32 %v5380_v53, %v11434_v29  ;;  %v5333_v49 = vadd.f32 %v10481_v11, %v5332_v52  ;;  %v5079_v62 = vsub.f32 1.0, %v5078_v59  ;;  %v5155_v2 = vmul.f32 %v5123_v63, %v3779_v54  ;;  %v11437_v29 = vld [vmem:[#allocation32_spill] sm:$0xff] }
 0x900   : > { %v5156_v3 = vmul.f32 %v5124_v47, %v3780_v19 }
 0x901   : > { %5450 = vadd.xlane.f32.xlu1 %v10743_v43  ;;  %v5080_v17 = vmul.f32 %v7109_v15, %v5079_v62  ;;  %v5492_v4 = vmul.f32 %v10743_v43, %v10743_v43 }
 0x902   : > { %v5172_v0 = vpack.c.bf16 %v5156_v3, %v5154_v8 }
 0x903   : > { %v5081_v20 = vadd.f32 %v7109_v15, %v5080_v17 }
 0x904   : > { %v5381_v23 = vpop.f32.mrf.mxu1  ;;  %5349 = vmatmul.bf16.gmra.mxu0 %v5172_v0 }
 0x905   : > { %v5382_v58 = vadd.f32 %v5381_v23, %v5333_v49  ;;  %v5085_v25 = vsel %vm5084_vm0, %v7109_v15, %v5081_v20  ;;  %v11438_v20 = vld [vmem:[#allocation35_spill] sm:$0xff] }
 0x906   : > { %v5090_v12 = vsel %vm5087_vm1, %v5089_v61, %v5085_v25 }
 0x907   : > { %v10756_v18 = vadd.f32 %v5382_v58, %v11435_v57  ;;  %v5091_v27 = vmul.f32 %v5090_v12, %v5066_v38 }
 0x909   : > { %5452 = vadd.xlane.f32.xlu2 %v10756_v18  ;;  %5514 = vadd.xlane.f32.xlu1 %v5492_v4  ;;  %v6501_v37 = vclamps-f32 %v5091_v27, 1.0  ;;  %v5493_v30 = vmul.f32 %v10756_v18, %v10756_v18 }
 0x90b   : > { %v5125_v44 = vadd.f32 1.0, %v6501_v37 }
 0x90d   : > { %v5157_v7 = vmul.f32 %v5125_v44, %v3781_v28 }
 0x90f   : > { %v5173_v31 = vpack.c.bf16 %v5157_v7, %v5155_v2  ;;  %v11439_v7 = vld [vmem:[#allocation41_spill] sm:$0xff] }
 0x911   : > { %5516 = vadd.xlane.f32.xlu2 %v5493_v30  ;;  %5398 = vmatmul.bf16.gmra.mxu1 %v5173_v31 }
 0x914   : > { %v5335_v22 = vpop.f32.mrf.mxu0 }
 0x915   : > { %v5336_v1 = vadd.f32 %v10481_v11, %v5335_v22 }
 0x916   : > { %v5384_v53 = vpop.f32.mrf.mxu1 }
 0x917   : > { %v5385_v35 = vadd.f32 %v5384_v53, %v5336_v1 }
 0x919   : > { %v10768_v52 = vadd.f32 %v5385_v35, %v11436_v36 }
 0x91b   : > { %5454 = vadd.xlane.f32.xlu1 %v10768_v52  ;;  %v5494_v55 = vmul.f32 %v10768_v52, %v10768_v52 }
 0x91c   : > { %v5337_v33 = vpop.f32.mrf.mxu0 }
 0x91d   : > { %v5338_v14 = vadd.f32 %v10481_v11, %v5337_v33  ;;  %5518 = vadd.xlane.f32.xlu2 %v5494_v55 }
 0x91e   : > { %v5386_v42 = vpop.f32.mrf.mxu1 }
 0x91f   : > { %v5387_v10 = vadd.f32 %v5386_v42, %v5338_v14 }
 0x921   : > { %v10775_v15 = vadd.f32 %v5387_v10, %v11437_v29 }
 0x923   : > { %v5495_v48 = vmul.f32 %v10775_v15, %v10775_v15 }
 0x925   : > { %5520 = vadd.xlane.f32.xlu0 %v5495_v48  ;;  %5456 = vadd.xlane.f32.xlu2 %v10775_v15 }
 0x92c   : > { %v5439_v19 = vpop.xlane.xlu1 %5438 }
 0x92d   : > { %v10781_v26 = vmul.f32 %v5439_v19, %v11344_v51 }
 0x92e   : > { %v5340_v50 = vpop.f32.mrf.mxu0  ;;  %v5441_v47 = vpop.xlane.xlu2 %5440 }
 0x92f   : > { %v5550_v59 = vmul.f32 %v10781_v26, %v10781_v26  ;;  %v10786_v49 = vmul.f32 %v5441_v47, %v11344_v51  ;;  %v5341_v8 = vadd.f32 %v10481_v11, %v5340_v50 }
 0x930   : > { %v5503_v45 = vpop.xlane.xlu0 %5502 }
 0x931   : > { %v5534_v3 = vmul.f32 %v5503_v45, %v11344_v51  ;;  %v5551_v62 = vmul.f32 %v10786_v49, %v10786_v49  ;;  %v5582_v45 = vsub.f32 %v10507_v56, %v10781_v26  ;;  %v10830_v26 = vld [vmem:[%s11441_s3] ss:$0 sm:$0xff] }
 0x933   : > { %v5566_v9 = vsub.f32 %v5534_v3, %v5550_v59  ;;  %v10823_v3 = vld [vmem:[%s11440_s27] ss:$0 sm:$0xff]  ;;  %s7491_s27 = sshra.s32 %s5939_s14, 4  ;;  %s7492_s27 = int_to_ptr.hbm [resolvable:$true] %s7491_s27 }
 0x934   : > { %v5505_v34 = vpop.xlane.xlu1 %5504  ;;  %s7493_s4 = scalar_lea.hbm %s7492_s27, 8  ;;  %p7498_p12 = scmp.lt.s32.totalorder %s7492_s27, %s11457_s25 }
 0x935   : > { %v5389_v16 = vpop.f32.mrf.mxu1  ;;  %v5535_v40 = vmul.f32 %v5505_v34, %v11344_v51  ;;  %v5598_v17 = vadd.f32 1e-06, %v5566_v9  ;;  %p7494_p1 = scmp.ne.s32.totalorder %s7492_s27, %s7493_s4  ;;  %p7499_p7 = scmp.lt.s32.totalorder %s7497_s13, %s7493_s4 }
 0x936   : > { %v5390_v23 = vadd.f32 %v5389_v16, %v5341_v8  ;;  %v5342_v0 = vpop.f32.mrf.mxu0 }
 0x937   : > { %v5567_v58 = vsub.f32 %v5535_v40, %v5551_v62  ;;  %7110 = vrsqrt.f32 %v5598_v17  ;;  %v5343_v38 = vadd.f32 %v10481_v11, %v5342_v0  ;;  %vm5620_vm3 = vweird.f32 %v5598_v17  ;;  %p7495_p3 = pnand %p7494_p1, %p7810_p4  ;;  %p7500_p8 = por %p7499_p7, %p7498_p12 }
 0x938   : > { %v10794_v57 = vadd.f32 %v5390_v23, %v11438_v20  ;;  %v5443_v61 = vpop.xlane.xlu0 %5442  ;;  %v5507_v60 = vpop.xlane.xlu2 %5506  ;;  %v5583_v40 = vsub.f32 %v10526_v46, %v10786_v49 }
 0x939   : > { %v5599_v4 = vadd.f32 1e-06, %v5567_v58  ;;  %v10801_v12 = vmul.f32 %v5443_v61, %v11344_v51  ;;  %v5536_v27 = vmul.f32 %v5507_v60, %v11344_v51  ;;  %p7496_p5 = pneg %p7495_p3 }
 0x93a   : > { %v5496_v25 = vmul.f32 %v10794_v57, %v10794_v57  ;;  %5458 = vadd.xlane.f32.xlu2 %v10794_v57 }
 0x93b   : > { %7112 = vrsqrt.f32 %v5599_v4  ;;  %v5552_v63 = vmul.f32 %v10801_v12, %v10801_v12  ;;  %vm5630_vm6 = vweird.f32 %v5599_v4  ;;  %p7501_p9 = pnand %p7500_p8, %p7496_p5 }
 0x93c   : > { %5522 = vadd.xlane.f32.xlu0 %v5496_v25  ;;  %v5445_v37 = vpop.xlane.xlu1 %5444 }
 0x93d   : > { %v5391_v54 = vpop.f32.mrf.mxu1  ;;  %v10807_v28 = vmul.f32 %v5445_v37, %v11344_v51  ;;  %v7111_v11 = vpop.eup %7110  ;;  %v5568_v30 = vsub.f32 %v5536_v27, %v5552_v63  ;;  %v7583_v27 = vmov 16.0  }
 0x93e   : > { %v5392_v44 = vadd.f32 %v5391_v54, %v5343_v38  ;;  %v5615_v2 = vmul.f32 %v7111_v11, %v5598_v17  ;;  %vm5621_vm2 = vweird.f32 %v7111_v11 }
 0x93f   : > { %v5600_v22 = vadd.f32 1e-06, %v5568_v30  ;;  %v5553_v35 = vmul.f32 %v10807_v28, %v10807_v28  ;;  %vm5622_vm4 = vmor %vm5620_vm3, %vm5621_vm2 }
 0x940   : > { %v10810_v31 = vadd.f32 %v5392_v44, %v11439_v7  ;;  %v5616_v53 = vmul.f32 %v7111_v11, %v5615_v2  ;;  %v5509_v36 = vpop.xlane.xlu0 %5508 }
 0x941   : > { %v7113_v1 = vpop.eup %7112  ;;  %7114 = vrsqrt.f32 %v5600_v22  ;;  %v5537_v42 = vmul.f32 %v5509_v36, %v11344_v51  ;;  %vm5640_vm9 = vweird.f32 %v5600_v22 }
 0x942   : > { %v5625_v55 = vmul.f32 %v7113_v1, %v5599_v4  ;;  %v5497_v33 = vmul.f32 %v10810_v31, %v10810_v31  ;;  %v5617_v14 = vmul.f32 0.5, %v5616_v53  ;;  %vm5631_vm5 = vweird.f32 %v7113_v1 }
 0x943   : > { %v5569_v48 = vsub.f32 %v5537_v42, %v5553_v35  ;;  %vm5632_vm7 = vmor %vm5630_vm6, %vm5631_vm5 }
 0x944   : > { %v5626_v10 = vmul.f32 %v7113_v1, %v5625_v55  ;;  %5524 = vadd.xlane.f32.xlu1 %v5497_v33  ;;  %5460 = vadd.xlane.f32.xlu0 %v10810_v31  ;;  %v5618_v29 = vsub.f32 1.5, %v5617_v14 }
 0x945   : > { %v5601_v47 = vadd.f32 1e-06, %v5569_v48 }
 0x946   : > { %v5627_v19 = vmul.f32 0.5, %v5626_v10  ;;  %v5619_v50 = vmul.f32 %v7111_v11, %v5618_v29 }
 0x947   : > { %v7115_v59 = vpop.eup %7114  ;;  %7116 = vrsqrt.f32 %v5601_v47  ;;  %vm5650_vm10 = vweird.f32 %v5601_v47 }
 0x948   : > { %v5628_v8 = vsub.f32 1.5, %v5627_v19  ;;  %v5623_v62 = vsel %vm5622_vm4, %v7111_v11, %v5619_v50  ;;  %v5635_v9 = vmul.f32 %v7115_v59, %v5600_v22  ;;  %vm5641_vm8 = vweird.f32 %v7115_v59 }
 0x949   : > { %v5774_v34 = vmul.f32 %v5623_v62, %v5582_v45  ;;  %7118 = vrcp.f32 %v7583_v27  ;;  %vm5642_vm12 = vmor %vm5640_vm9, %vm5641_vm8  ;;  %v5584_v11 = vsub.f32 %v10547_v6, %v10801_v12  ;;  %v5585_v22 = vsub.f32 %v10579_v5, %v10807_v28  ;;  %v7146_v12 = vld [vmem:[%s11423_s22] ss:$0 sm:$0xff] }
 0x94a   : > { %v5629_v16 = vmul.f32 %v7113_v1, %v5628_v8  ;;  %v5636_v23 = vmul.f32 %v7115_v59, %v5635_v9 }
 0x94b   : > { %v5793_v17 = vmul.f32 %v10823_v3, %v5774_v34 }
 0x94c   : > { %v5633_v56 = vsel %vm5632_vm7, %v7113_v1, %v5629_v16  ;;  %v5637_v58 = vmul.f32 0.5, %v5636_v23 }
 0x94d   : > { %v5775_v0 = vmul.f32 %v5633_v56, %v5583_v40  ;;  %v7117_v20 = vpop.eup %7116  ;;  %v5812_v46 = vadd.f32 %v10830_v26, %v5793_v17 }
 0x94e   : > { %v5638_v60 = vsub.f32 1.5, %v5637_v58  ;;  %v5645_v4 = vmul.f32 %v7117_v20, %v5601_v47  ;;  %vm5651_vm13 = vweird.f32 %v7117_v20 }
 0x94f   : > { %v5794_v61 = vmul.f32 %v10823_v3, %v5775_v0  ;;  %v7119_v53 = vpop.eup %7118  ;;  %vm5652_vm11 = vmor %vm5650_vm10, %vm5651_vm13 }
 0x950   : > { %v5639_v38 = vmul.f32 %v7115_v59, %v5638_v60  ;;  %v5646_v25 = vmul.f32 %v7117_v20, %v5645_v4  ;;  %v5885_v14 = vmul.f32 16.0, %v7119_v53  ;;  %vm5889_vm14 = vweird.f32 %v7119_v53 }
 0x951   : > { %v5813_v49 = vadd.f32 %v10830_v26, %v5794_v61 }
 0x952   : > { %v5643_v37 = vsel %vm5642_vm12, %v7115_v59, %v5639_v38  ;;  %v5647_v54 = vmul.f32 0.5, %v5646_v25  ;;  %v5886_v5 = vsub.f32 1.0, %v5885_v14 }
 0x953   : > { %v5828_v63 = vadd.f32 %v5813_v49, %v5812_v46  ;;  %v5776_v2 = vmul.f32 %v5643_v37, %v5584_v11 }
 0x954   : > { %v5648_v44 = vsub.f32 1.5, %v5647_v54  ;;  %v5887_v62 = vmul.f32 %v7119_v53, %v5886_v5 }
 0x955   : > { %v5829_v30 = vrot.slane %v5828_v63, 4  ;;  %v5795_v55 = vmul.f32 %v10823_v3, %v5776_v2 }
 0x956   : > { %v5649_v7 = vmul.f32 %v7117_v20, %v5648_v44  ;;  %v5888_v56 = vadd.f32 %v7119_v53, %v5887_v62 }
 0x957   : > { %v5830_v36 = vadd.f32 %v5829_v30, %v5828_v63  ;;  %v5814_v29 = vadd.f32 %v10830_v26, %v5795_v55 }
 0x958   : > { %v5345_v1 = vpop.f32.mrf.mxu0  ;;  %v5653_v35 = vsel %vm5652_vm11, %v7117_v20, %v5649_v7  ;;  %v10856_v60 = vsel %vm5889_vm14, %v7119_v53, %v5888_v56 }
 0x959   : > { %v5777_v33 = vmul.f32 %v5653_v35, %v5585_v22  ;;  %v5346_v42 = vadd.f32 %v7146_v12, %v5345_v1  ;;  %v5831_v10 = vrot.slane %v5830_v36, 2 }
 0x95a   : > { %v5511_v22 = vpop.xlane.xlu0 %5510 }
 0x95b   : > { %v5796_v6 = vmul.f32 %v10823_v3, %v5777_v33  ;;  %v5832_v59 = vadd.f32 %v5831_v10, %v5830_v36 }
 0x95d   : > { %v5815_v48 = vadd.f32 %v10830_v26, %v5796_v6  ;;  %v5833_v40 = vrot.slane %v5832_v59, 1 }
 0x95e   : > { %v5513_v35 = vpop.xlane.xlu1 %5512 }
 0x95f   : > { %v5835_v19 = vadd.f32 %v5815_v48, %v5814_v29  ;;  %v5834_v20 = vadd.f32 %v5833_v40, %v5832_v59  ;;  %v5539_v59 = vmul.f32 %v5513_v35, %v11344_v51 }
 0x960   : > { %v5394_v28 = vpop.f32.mrf.mxu1  ;;  %v5347_v47 = vpop.f32.mrf.mxu0 }
 0x961   : > { %v5395_v50 = vadd.f32 %v5394_v28, %v5346_v42  ;;  %v5836_v45 = vrot.slane %v5835_v19, 4  ;;  %v5348_v34 = vadd.f32 %v7146_v12, %v5347_v47  ;;  %v5891_v49 = vmul.f32 %v10856_v60, %v5834_v20 }
 0x962   : > { %v5449_v55 = vpop.xlane.xlu0 %5448  ;;  %v5538_v47 = vmul.f32 %v5511_v22, %v11344_v51 }
 0x963   : > { %v10848_v8 = vadd.f32 %v5395_v50, %v8990_v41  ;;  %v5837_v9 = vadd.f32 %v5836_v45, %v5835_v19  ;;  %v10878_v29 = vmul.f32 %v5449_v55, %v11344_v51 }
 0x965   : > { %5462 = vadd.xlane.f32.xlu0 %v10848_v8  ;;  %v5498_v16 = vmul.f32 %v10848_v8, %v10848_v8  ;;  %v5838_v23 = vrot.slane %v5837_v9, 2  ;;  %v5555_v19 = vmul.f32 %v10878_v29, %v10878_v29 }
 0x967   : > { %5526 = vadd.xlane.f32.xlu2 %v5498_v16  ;;  %v5839_v0 = vadd.f32 %v5838_v23, %v5837_v9  ;;  %v5571_v62 = vsub.f32 %v5539_v59, %v5555_v19 }
 0x968   : > { %v5396_v17 = vpop.f32.mrf.mxu1 }
 0x969   : > { %v5397_v58 = vadd.f32 %v5396_v17, %v5348_v34  ;;  %v5840_v61 = vrot.slane %v5839_v0, 1  ;;  %v10893_v23 = vadd.f32 1e-06, %v5571_v62 }
 0x96b   : > { %v10854_v41 = vadd.f32 %v5397_v58, %v9014_v21  ;;  %v5841_v4 = vadd.f32 %v5840_v61, %v5839_v0  ;;  %7120 = vrsqrt.f32 %v10893_v23  ;;  %vm5670_vm2 = vweird.f32 %v10893_v23 }
 0x96d   : > { %5464 = vadd.xlane.f32.xlu1 %v10854_v41  ;;  %v5499_v46 = vmul.f32 %v10854_v41, %v10854_v41  ;;  %v5892_v38 = vmul.f32 %v10856_v60, %v5841_v4 }
 0x96f   : > { %5528 = vadd.xlane.f32.xlu0 %v5499_v46  ;;  %v10863_v25 = vsel %vm5907_vm15, %v5892_v38, %v5891_v49 }
 0x970   : > { %11442 = vst [vmem:[#allocation36_spill] sm:$0xff] %v10863_v25 }
 0x971   : > { %v10933_v35 = vpop.eup %7120 }
 0x972   : > { %v5665_v19 = vmul.f32 %v10933_v35, %v10893_v23  ;;  %vm5671_vm0 = vweird.f32 %v10933_v35  ;;  %v5587_v23 = vsub.f32 %v10699_v13, %v10878_v29 }
 0x973   : > { %vm5672_vm3 = vmor %vm5670_vm2, %vm5671_vm0 }
 0x974   : > { %v5451_v33 = vpop.xlane.xlu1 %5450 }
 0x975   : > { %v10890_v9 = vmul.f32 %v5451_v33, %v11344_v51 }
 0x977   : > { %v5556_v56 = vmul.f32 %v10890_v9, %v10890_v9 }
 0x981   : > { %v5350_v27 = vpop.f32.mrf.mxu0 }
 0x982   : > { %v5351_v63 = vadd.f32 %v7146_v12, %v5350_v27 }
 0x989   : > { %v5352_v54 = vpop.f32.mrf.mxu0 }
 0x98a   : > { %v5353_v44 = vadd.f32 %v7146_v12, %v5352_v54 }
 0x98e   : > { %v5399_v21 = vpop.f32.mrf.mxu1 }
 0x98f   : > { %v5400_v37 = vadd.f32 %v5399_v21, %v5351_v63 }
 0x991   : > { %v10866_v11 = vadd.f32 %v5400_v37, %v9042_v32  ;;  %v5447_v32 = vpop.xlane.xlu2 %5446 }
 0x992   : > { %v10881_v48 = vmul.f32 %v5447_v32, %v11344_v51 }
 0x993   : > { %5466 = vadd.xlane.f32.xlu1 %v10866_v11  ;;  %v5500_v1 = vmul.f32 %v10866_v11, %v10866_v11 }
 0x994   : > { %v5554_v50 = vmul.f32 %v10881_v48, %v10881_v48  ;;  %v5586_v29 = vsub.f32 %v10682_v39, %v10881_v48 }
 0x996   : > { %v5401_v30 = vpop.f32.mrf.mxu1  ;;  %v5570_v34 = vsub.f32 %v5538_v47, %v5554_v50 }
 0x997   : > { %v5402_v2 = vadd.f32 %v5401_v30, %v5353_v44 }
 0x998   : > { %v5521_v6 = vpop.xlane.xlu0 %5520  ;;  %v10897_v0 = vadd.f32 1e-06, %v5570_v34 }
 0x999   : > { %v10870_v7 = vadd.f32 %v5402_v2, %v9055_v24  ;;  %v5453_v36 = vpop.xlane.xlu2 %5452  ;;  %v5515_v24 = vpop.xlane.xlu1 %5514  ;;  %v5543_v2 = vmul.f32 %v5521_v6, %v11344_v51 }
 0x99a   : > { %v5540_v16 = vmul.f32 %v5515_v24, %v11344_v51  ;;  %v10903_v20 = vmul.f32 %v5453_v36, %v11344_v51  ;;  %7122 = vrsqrt.f32 %v10897_v0  ;;  %vm5660_vm4 = vweird.f32 %v10897_v0 }
 0x99b   : > { %5468 = vadd.xlane.f32.xlu2 %v10870_v7  ;;  %5530 = vadd.xlane.f32.xlu1 %v5500_v1  ;;  %v5501_v53 = vmul.f32 %v10870_v7, %v10870_v7 }
 0x99c   : > { %v5572_v61 = vsub.f32 %v5540_v16, %v5556_v56  ;;  %v5557_v21 = vmul.f32 %v10903_v20, %v10903_v20  ;;  %v5589_v39 = vsub.f32 %v10756_v18, %v10903_v20 }
 0x99e   : > { %v10921_v37 = vadd.f32 1e-06, %v5572_v61  ;;  %v5666_v61 = vmul.f32 %v10933_v35, %v5665_v19 }
 0x9a0   : > { %7124 = vrsqrt.f32 %v10921_v37  ;;  %vm5680_vm7 = vweird.f32 %v10921_v37 }
 0x9a1   : > { %v5517_v14 = vpop.xlane.xlu2 %5516  ;;  %v5455_v10 = vpop.xlane.xlu1 %5454 }
 0x9a2   : > { %v5541_v46 = vmul.f32 %v5517_v14, %v11344_v51  ;;  %v10912_v38 = vmul.f32 %v5455_v10, %v11344_v51 }
 0x9a3   : > { %5532 = vadd.xlane.f32.xlu2 %v5501_v53 }
 0x9a4   : > { %v5573_v53 = vsub.f32 %v5541_v46, %v5557_v21  ;;  %v5558_v36 = vmul.f32 %v10912_v38, %v10912_v38 }
 0x9a6   : > { %v10951_v50 = vadd.f32 1e-06, %v5573_v53 }
 0x9a8   : > { %7126 = vrsqrt.f32 %v10951_v50  ;;  %vm5690_vm9 = vweird.f32 %v10951_v50 }
 0x9a9   : > { %v5519_v12 = vpop.xlane.xlu2 %5518 }
 0x9aa   : > { %v5542_v30 = vmul.f32 %v5519_v12, %v11344_v51  ;;  %v10944_v12 = vpop.eup %7122 }
 0x9ab   : > { %vm5661_vm1 = vweird.f32 %v10944_v12 }
 0x9ac   : > { %v5574_v10 = vsub.f32 %v5542_v30, %v5558_v36  ;;  %v5667_v30 = vmul.f32 0.5, %v5666_v61  ;;  %vm11019_vm5 = vmor %vm5660_vm4, %vm5661_vm1 }
 0x9ae   : > { %v5668_v36 = vsub.f32 1.5, %v5667_v30 }
 0x9af   : > { %v5523_v42 = vpop.xlane.xlu0 %5522 }
 0x9b0   : > { %v5544_v47 = vmul.f32 %v5523_v42, %v11344_v51  ;;  %v5669_v19 = vmul.f32 %v10933_v35, %v5668_v36 }
 0x9b1   : > { %v5457_v5 = vpop.xlane.xlu2 %5456 }
 0x9b2   : > { %v10900_v58 = vmul.f32 %v5457_v5, %v11344_v51  ;;  %v5673_v30 = vsel %vm5672_vm3, %v10933_v35, %v5669_v19 }
 0x9b4   : > { %v5559_v27 = vmul.f32 %v10900_v58, %v10900_v58 }
 0x9b6   : > { %v5575_v55 = vsub.f32 %v5543_v2, %v5559_v27 }
 0x9b7   : > { %v5461_v28 = vpop.xlane.xlu0 %5460  ;;  %v5525_v45 = vpop.xlane.xlu1 %5524 }
 0x9b8   : > { %v10908_v49 = vmul.f32 %v5461_v28, %v11344_v51  ;;  %v5545_v24 = vmul.f32 %v5525_v45, %v11344_v51  ;;  %v10954_v62 = vadd.f32 1e-06, %v5575_v55  ;;  %v5655_v45 = vmul.f32 %v10944_v12, %v10897_v0 }
 0x9b9   : > { %v5459_v17 = vpop.xlane.xlu2 %5458 }
 0x9ba   : > { %v10924_v54 = vmul.f32 %v5459_v17, %v11344_v51  ;;  %v5561_v32 = vmul.f32 %v10908_v49, %v10908_v49  ;;  %v10960_v17 = vpop.eup %7124  ;;  %7128 = vrsqrt.f32 %v10954_v62  ;;  %v5656_v46 = vmul.f32 %v10944_v12, %v5655_v45 }
 0x9bb   : > { %v5675_v21 = vmul.f32 %v10960_v17, %v10921_v37  ;;  %v10979_v2 = vpop.eup %7126  ;;  %vm5681_vm6 = vweird.f32 %v10960_v17  ;;  %vm5710_vm15 = vweird.f32 %v10954_v62 }
 0x9bc   : > { %v5560_v6 = vmul.f32 %v10924_v54, %v10924_v54  ;;  %v5577_v59 = vsub.f32 %v5545_v24, %v5561_v32  ;;  %v5657_v53 = vmul.f32 0.5, %v5656_v46  ;;  %vm5682_vm8 = vmor %vm5680_vm7, %vm5681_vm6  ;;  %vm5691_vm12 = vweird.f32 %v10979_v2 }
 0x9bd   : > { %vm11066_vm14 = vmor %vm5690_vm9, %vm5691_vm12 }
 0x9be   : > { %v5576_v16 = vsub.f32 %v5544_v47, %v5560_v6  ;;  %v5658_v6 = vsub.f32 1.5, %v5657_v53 }
 0x9c0   : > { %v10970_v27 = vadd.f32 1e-06, %v5576_v16  ;;  %v10982_v32 = vpop.eup %7128  ;;  %v5659_v16 = vmul.f32 %v10944_v12, %v5658_v6 }
 0x9c1   : > { %v5705_v24 = vmul.f32 %v10982_v32, %v10954_v62  ;;  %vm5711_vm13 = vweird.f32 %v10982_v32 }
 0x9c2   : > { %v5663_v0 = vsel %vm11019_vm5, %v10944_v12, %v5659_v16  ;;  %vm11080_vm0 = vmor %vm5710_vm15, %vm5711_vm13  ;;  %vm5720_vm9 = vweird.f32 %v10970_v27 }
 0x9c3   : > { %v11038_v16 = vmul.f32 %v5663_v0, %v5586_v29 }
 0x9d8   : > { %v5463_v40 = vpop.xlane.xlu0 %5462 }
 0x9d9   : > { %v10929_v1 = vmul.f32 %v5463_v40, %v11344_v51  ;;  %v10958_v40 = vadd.f32 1e-06, %v5574_v10 }
 0x9da   : > { %v5527_v22 = vpop.xlane.xlu2 %5526 }
 0x9db   : > { %v5562_v5 = vmul.f32 %v10929_v1, %v10929_v1  ;;  %v5546_v28 = vmul.f32 %v5527_v22, %v11344_v51  ;;  %7130 = vrsqrt.f32 %v10958_v40  ;;  %v5676_v22 = vmul.f32 %v10960_v17, %v5675_v21 }
 0x9dc   : > { %vm5700_vm10 = vweird.f32 %v10958_v40 }
 0x9dd   : > { %v5578_v56 = vsub.f32 %v5546_v28, %v5562_v5  ;;  %v5677_v5 = vmul.f32 0.5, %v5676_v22 }
 0x9df   : > { %v5678_v46 = vsub.f32 1.5, %v5677_v5  ;;  %v5779_v5 = vmul.f32 %v5673_v30, %v5587_v23  ;;  %v5590_v30 = vsub.f32 %v10768_v52, %v10912_v38  ;;  %v5591_v52 = vsub.f32 %v10775_v15, %v10900_v58 }
 0x9e0   : > { %v5465_v4 = vpop.xlane.xlu1 %5464 }
 0x9e1   : > { %v10917_v63 = vmul.f32 %v5465_v4, %v11344_v51  ;;  %v10964_v4 = vadd.f32 1e-06, %v5577_v59  ;;  %v10986_v55 = vpop.eup %7130  ;;  %v5679_v19 = vmul.f32 %v10960_v17, %v5678_v46 }
 0x9e2   : > { %v5529_v44 = vpop.xlane.xlu0 %5528  ;;  %vm5701_vm11 = vweird.f32 %v10986_v55 }
 0x9e3   : > { %v5563_v33 = vmul.f32 %v10917_v63, %v10917_v63  ;;  %v5547_v14 = vmul.f32 %v5529_v44, %v11344_v51  ;;  %v10975_v44 = vadd.f32 1e-06, %v5578_v56  ;;  %7132 = vrsqrt.f32 %v10964_v4  ;;  %vm11095_vm3 = vmor %vm5700_vm10, %vm5701_vm11 }
 0x9e4   : > { %v5706_v56 = vmul.f32 %v10982_v32, %v5705_v24  ;;  %v5683_v48 = vsel %vm5682_vm8, %v10960_v17, %v5679_v19  ;;  %vm5730_vm5 = vweird.f32 %v10964_v4 }
 0x9e5   : > { %v5579_v34 = vsub.f32 %v5547_v14, %v5563_v33  ;;  %v5685_v33 = vmul.f32 %v10979_v2, %v10951_v50  ;;  %vm5740_vm10 = vweird.f32 %v10975_v44 }
 0x9e6   : > { %v5707_v35 = vmul.f32 0.5, %v5706_v56  ;;  %v5588_v56 = vsub.f32 %v10743_v43, %v10890_v9 }
 0x9e7   : > { %v10967_v42 = vadd.f32 1e-06, %v5579_v34  ;;  %v5686_v59 = vmul.f32 %v10979_v2, %v5685_v33  ;;  %v5695_v34 = vmul.f32 %v10986_v55, %v10958_v40 }
 0x9e9   : > { %7134 = vrsqrt.f32 %v10967_v42  ;;  %v10990_v14 = vpop.eup %7132  ;;  %v5687_v36 = vmul.f32 0.5, %v5686_v59  ;;  %v5696_v33 = vmul.f32 %v10986_v55, %v5695_v34  ;;  %vm5750_vm8 = vweird.f32 %v10967_v42 }
 0x9ea   : > { %7136 = vrsqrt.f32 %v10970_v27  ;;  %v5725_v45 = vmul.f32 %v10990_v14, %v10964_v4  ;;  %vm5731_vm1 = vweird.f32 %v10990_v14 }
 0x9eb   : > { %7138 = vrsqrt.f32 %v10975_v44  ;;  %v5688_v34 = vsub.f32 1.5, %v5687_v36  ;;  %v5697_v12 = vmul.f32 0.5, %v5696_v33  ;;  %v11056_v36 = vmul.f32 %v5683_v48, %v5588_v56  ;;  %vm11103_vm7 = vmor %vm5730_vm5, %vm5731_vm1 }
 0x9ec   : > { %v5726_v6 = vmul.f32 %v10990_v14, %v5725_v45  ;;  %v5593_v56 = vsub.f32 %v10810_v31, %v10908_v49  ;;  %v5595_v31 = vsub.f32 %v10854_v41, %v10917_v63  ;;  %v5797_v48 = vmul.f32 %v10823_v3, %v11038_v16 }
 0x9ed   : > { %v5689_v9 = vmul.f32 %v10979_v2, %v5688_v34  ;;  %v5698_v22 = vsub.f32 1.5, %v5697_v12  ;;  %vm5911_vm5 = vcmask 1043459  }
 0x9ee   : > { %v5727_v45 = vmul.f32 0.5, %v5726_v6 }
 0x9ef   : > { %v10994_v10 = vpop.eup %7134  ;;  %v5693_v15 = vsel %vm11066_vm14, %v10979_v2, %v5689_v9  ;;  %v5699_v58 = vmul.f32 %v10986_v55, %v5698_v22 }
 0x9f0   : > { %v10996_v28 = vpop.eup %7136  ;;  %v5745_v61 = vmul.f32 %v10994_v10, %v10967_v42  ;;  %v5728_v23 = vsub.f32 1.5, %v5727_v45  ;;  %vm5751_vm2 = vweird.f32 %v10994_v10  ;;  %v5781_v34 = vmul.f32 %v5693_v15, %v5589_v39 }
 0x9f1   : > { %v11000_v47 = vpop.eup %7138  ;;  %v5715_v21 = vmul.f32 %v10996_v28, %v10970_v27  ;;  %vm5721_vm4 = vweird.f32 %v10996_v28  ;;  %v5703_v4 = vsel %vm11095_vm3, %v10986_v55, %v5699_v58  ;;  %vm11123_vm12 = vmor %vm5750_vm8, %vm5751_vm2  ;;  %vm5917_vm8 = vcmask 1046534  }
 0x9f2   : > { %v5735_v53 = vmul.f32 %v11000_v47, %v10975_v44  ;;  %v5746_v24 = vmul.f32 %v10994_v10, %v5745_v61  ;;  %v5708_v61 = vsub.f32 1.5, %v5707_v35  ;;  %v5729_v62 = vmul.f32 %v10990_v14, %v5728_v23  ;;  %vm11127_vm13 = vmor %vm5720_vm9, %vm5721_vm4 }
 0x9f3   : > { %v5716_v25 = vmul.f32 %v10996_v28, %v5715_v21  ;;  %v11043_v21 = vmul.f32 %v10823_v3, %v5779_v5  ;;  %vm5741_vm6 = vweird.f32 %v11000_v47  ;;  %vm5909_vm4 = vcmask 1042434  }
 0x9f4   : > { %v5736_v59 = vmul.f32 %v11000_v47, %v5735_v53  ;;  %v5747_v46 = vmul.f32 0.5, %v5746_v24  ;;  %v5709_v18 = vmul.f32 %v10982_v32, %v5708_v61  ;;  %v5733_v12 = vsel %vm11103_vm7, %v10990_v14, %v5729_v62  ;;  %vm5742_vm11 = vmor %vm5740_vm10, %vm5741_vm6 }
 0x9f5   : > { %v5717_v37 = vmul.f32 0.5, %v5716_v25  ;;  %v5592_v14 = vsub.f32 %v10794_v57, %v10924_v54  ;;  %v5785_v44 = vmul.f32 %v5733_v12, %v5593_v56  ;;  %v5782_v57 = vmul.f32 %v5703_v4, %v5590_v30 }
 0x9f6   : > { %v5737_v53 = vmul.f32 0.5, %v5736_v59  ;;  %v5748_v25 = vsub.f32 1.5, %v5747_v46  ;;  %v5713_v24 = vsel %vm11080_vm0, %v10982_v32, %v5709_v18  ;;  %v5594_v54 = vsub.f32 %v10848_v8, %v10929_v1 }
 0x9f7   : > { %v5718_v20 = vsub.f32 1.5, %v5717_v37  ;;  %v5783_v55 = vmul.f32 %v5713_v24, %v5591_v52  ;;  %v5800_v37 = vmul.f32 %v10823_v3, %v5781_v34  ;;  %v5817_v22 = vadd.f32 %v10830_v26, %v11043_v21 }
 0x9f8   : > { %v5738_v6 = vsub.f32 1.5, %v5737_v53  ;;  %v5749_v5 = vmul.f32 %v10994_v10, %v5748_v25  ;;  %v5804_v8 = vmul.f32 %v10823_v3, %v5785_v44  ;;  %v5801_v30 = vmul.f32 %v10823_v3, %v5782_v57 }
 0x9f9   : > { %v5802_v53 = vmul.f32 %v10823_v3, %v5783_v55  ;;  %v5816_v18 = vadd.f32 %v10830_v26, %v5797_v48  ;;  %v5819_v25 = vadd.f32 %v10830_v26, %v5800_v37  ;;  %vm5913_vm6 = vcmask 1044484  }
 0x9fa   : > { %v5739_v29 = vmul.f32 %v11000_v47, %v5738_v6  ;;  %v5753_v27 = vsel %vm11123_vm12, %v10994_v10, %v5749_v5  ;;  %v5823_v33 = vadd.f32 %v10830_v26, %v5804_v8  ;;  %v5820_v6 = vadd.f32 %v10830_v26, %v5801_v30 }
 0x9fb   : > { %v5821_v21 = vadd.f32 %v10830_v26, %v5802_v53  ;;  %vm5915_vm7 = vcmask 1045509   ;;  %vm5919_vm9 = vcmask 1047559  }
 0x9fc   : > { %v5743_v10 = vsel %vm5742_vm11, %v11000_v47, %v5739_v29 }
 0x9fd   : > { %v5786_v47 = vmul.f32 %v5743_v10, %v5594_v54  ;;  %v5856_v50 = vadd.f32 %v5821_v21, %v5820_v6 }
 0x9ff   : > { %v5857_v4 = vrot.slane %v5856_v50, 4 }
 0xa06   : > { %v5467_v13 = vpop.xlane.xlu1 %5466 }
 0xa07   : > { %v11052_v43 = vmul.f32 %v5467_v13, %v11344_v51  ;;  %v5719_v13 = vmul.f32 %v10996_v28, %v5718_v20 }
 0xa09   : > { %v5564_v0 = vmul.f32 %v11052_v43, %v11052_v43  ;;  %v5723_v61 = vsel %vm11127_vm13, %v10996_v28, %v5719_v13  ;;  %v5787_v28 = vmul.f32 %v5753_v27, %v5595_v31  ;;  %v5858_v31 = vadd.f32 %v5857_v4, %v5856_v50  ;;  %v11458_v50 = vld [vmem:[#allocation36_spill] sm:$0xff] }
 0xa0a   : > { %v5784_v41 = vmul.f32 %v5723_v61, %v5592_v14  ;;  %v5596_v61 = vsub.f32 %v10866_v11, %v11052_v43 }
 0xa0b   : > { %v5806_v16 = vmul.f32 %v10823_v3, %v5787_v28  ;;  %v5859_v28 = vrot.slane %v5858_v31, 2 }
 0xa0c   : > { %v5803_v52 = vmul.f32 %v10823_v3, %v5784_v41 }
 0xa0e   : > { %v5469_v38 = vpop.xlane.xlu2 %5468  ;;  %v5531_v17 = vpop.xlane.xlu1 %5530  ;;  %v5822_v58 = vadd.f32 %v10830_v26, %v5803_v52 }
 0xa0f   : > { %v5548_v35 = vmul.f32 %v5531_v17, %v11344_v51  ;;  %v11110_v40 = vmul.f32 %v5469_v38, %v11344_v51  ;;  %v5842_v38 = vadd.f32 %v5817_v22, %v5816_v18 }
 0xa10   : > { %v5863_v19 = vadd.f32 %v5823_v33, %v5822_v58 }
 0xa11   : > { %v5580_v2 = vsub.f32 %v5548_v35, %v5564_v0  ;;  %v5565_v46 = vmul.f32 %v11110_v40, %v11110_v40  ;;  %v5825_v0 = vadd.f32 %v10830_v26, %v5806_v16  ;;  %v5597_v54 = vsub.f32 %v10870_v7, %v11110_v40 }
 0xa12   : > { %v5864_v42 = vrot.slane %v5863_v19, 4 }
 0xa13   : > { %v11112_v59 = vadd.f32 1e-06, %v5580_v2  ;;  %v5843_v2 = vrot.slane %v5842_v38, 4 }
 0xa14   : > { %v5865_v44 = vadd.f32 %v5864_v42, %v5863_v19 }
 0xa15   : > { %7140 = vrsqrt.f32 %v11112_v59  ;;  %vm5760_vm15 = vweird.f32 %v11112_v59  ;;  %v5844_v45 = vadd.f32 %v5843_v2, %v5842_v38 }
 0xa16   : > { %v5533_v49 = vpop.xlane.xlu2 %5532  ;;  %v5866_v37 = vrot.slane %v5865_v44, 2 }
 0xa17   : > { %v5549_v39 = vmul.f32 %v5533_v49, %v11344_v51  ;;  %v5799_v51 = vmul.f32 %v10823_v3, %v11056_v36  ;;  %v5805_v36 = vmul.f32 %v10823_v3, %v5786_v47 }
 0xa18   : > { %v5867_v8 = vadd.f32 %v5866_v37, %v5865_v44 }
 0xa19   : > { %v5581_v63 = vsub.f32 %v5549_v39, %v5565_v46  ;;  %v5818_v17 = vadd.f32 %v10830_v26, %v5799_v51  ;;  %v5824_v62 = vadd.f32 %v10830_v26, %v5805_v36  ;;  %v5845_v46 = vrot.slane %v5844_v45, 2 }
 0xa1a   : > { %v5868_v18 = vrot.slane %v5867_v8, 1 }
 0xa1b   : > { %v7141_v9 = vpop.eup %7140  ;;  %v5613_v1 = vadd.f32 1e-06, %v5581_v63  ;;  %v5849_v15 = vadd.f32 %v5819_v25, %v5818_v17  ;;  %v5870_v13 = vadd.f32 %v5825_v0, %v5824_v62  ;;  %v5846_v43 = vadd.f32 %v5845_v46, %v5844_v45 }
 0xa1c   : > { %v5755_v23 = vmul.f32 %v7141_v9, %v11112_v59  ;;  %vm5761_vm14 = vweird.f32 %v7141_v9 }
 0xa1d   : > { %7142 = vrsqrt.f32 %v5613_v1  ;;  %v5850_v34 = vrot.slane %v5849_v15, 4  ;;  %vm5762_vm0 = vmor %vm5760_vm15, %vm5761_vm14  ;;  %v5871_v56 = vrot.slane %v5870_v13, 4  ;;  %vm5770_vm2 = vweird.f32 %v5613_v1 }
 0xa1e   : > { %v5756_v20 = vmul.f32 %v7141_v9, %v5755_v23  ;;  %v5847_v7 = vrot.slane %v5846_v43, 1 }
 0xa1f   : > { %v5851_v14 = vadd.f32 %v5850_v34, %v5849_v15  ;;  %v5872_v39 = vadd.f32 %v5871_v56, %v5870_v13 }
 0xa20   : > { %v5757_v35 = vmul.f32 0.5, %v5756_v20  ;;  %v5848_v25 = vadd.f32 %v5847_v7, %v5846_v43  ;;  %v5869_v20 = vadd.f32 %v5868_v18, %v5867_v8 }
 0xa21   : > { %v5852_v59 = vrot.slane %v5851_v14, 2  ;;  %v5873_v63 = vrot.slane %v5872_v39, 2 }
 0xa22   : > { %v5758_v24 = vsub.f32 1.5, %v5757_v35  ;;  %v5896_v15 = vmul.f32 %v10856_v60, %v5869_v20 }
 0xa23   : > { %v7143_v5 = vpop.eup %7142  ;;  %v5853_v53 = vadd.f32 %v5852_v59, %v5851_v14  ;;  %v5874_v40 = vadd.f32 %v5873_v63, %v5872_v39 }
 0xa24   : > { %v5759_v32 = vmul.f32 %v7141_v9, %v5758_v24  ;;  %v5765_v29 = vmul.f32 %v7143_v5, %v5613_v1  ;;  %vm5771_vm1 = vweird.f32 %v7143_v5 }
 0xa25   : > { %vm5772_vm3 = vmor %vm5770_vm2, %vm5771_vm1  ;;  %v5854_v1 = vrot.slane %v5853_v53, 1  ;;  %v5875_v52 = vrot.slane %v5874_v40, 1 }
 0xa26   : > { %v5766_v12 = vmul.f32 %v7143_v5, %v5765_v29  ;;  %v5763_v27 = vsel %vm5762_vm0, %v7141_v9, %v5759_v32  ;;  %v5860_v9 = vadd.f32 %v5859_v28, %v5858_v31 }
 0xa27   : > { %v5788_v10 = vmul.f32 %v5763_v27, %v5596_v61  ;;  %v5855_v21 = vadd.f32 %v5854_v1, %v5853_v53  ;;  %v5876_v17 = vadd.f32 %v5875_v52, %v5874_v40 }
 0xa28   : > { %v5767_v55 = vmul.f32 0.5, %v5766_v12  ;;  %v5861_v16 = vrot.slane %v5860_v9, 1 }
 0xa29   : > { %v5807_v41 = vmul.f32 %v10823_v3, %v5788_v10  ;;  %v5894_v6 = vmul.f32 %v10856_v60, %v5855_v21  ;;  %v5897_v58 = vmul.f32 %v10856_v60, %v5876_v17 }
 0xa2a   : > { %v5768_v49 = vsub.f32 1.5, %v5767_v55 }
 0xa2b   : > { %v5826_v22 = vadd.f32 %v10830_v26, %v5807_v41 }
 0xa2c   : > { %v5769_v57 = vmul.f32 %v7143_v5, %v5768_v49 }
 0xa2e   : > { %v5773_v48 = vsel %vm5772_vm3, %v7143_v5, %v5769_v57 }
 0xa2f   : > { %v5789_v11 = vmul.f32 %v5773_v48, %v5597_v54 }
 0xa31   : > { %v5808_v47 = vmul.f32 %v10823_v3, %v5789_v11  ;;  %v5862_v3 = vadd.f32 %v5861_v16, %v5860_v9 }
 0xa33   : > { %v5827_v51 = vadd.f32 %v10830_v26, %v5808_v47  ;;  %v5893_v26 = vmul.f32 %v10856_v60, %v5848_v25  ;;  %v5895_v0 = vmul.f32 %v10856_v60, %v5862_v3 }
 0xa35   : > { %v5877_v30 = vadd.f32 %v5827_v51, %v5826_v22  ;;  %v5910_v62 = vsel %vm5909_vm4, %v5893_v26, %v11458_v50 }
 0xa36   : > { %v5912_v5 = vsel %vm5911_vm5, %v5894_v6, %v5910_v62 }
 0xa37   : > { %v5878_v23 = vrot.slane %v5877_v30, 4  ;;  %v5914_v2 = vsel %vm5913_vm6, %v5895_v0, %v5912_v5 }
 0xa38   : > { %v5916_v13 = vsel %vm5915_vm7, %v5896_v15, %v5914_v2 }
 0xa39   : > { %v5879_v36 = vadd.f32 %v5878_v23, %v5877_v30  ;;  %v5918_v32 = vsel %vm5917_vm8, %v5897_v58, %v5916_v13 }
 0xa3b   : > { %v5880_v38 = vrot.slane %v5879_v36, 2 }
 0xa3d   : > { %v5881_v33 = vadd.f32 %v5880_v38, %v5879_v36 }
 0xa3f   : > { %v5882_v35 = vrot.slane %v5881_v33, 1 }
 0xa41   : > { %v5883_v24 = vadd.f32 %v5882_v35, %v5881_v33 }
 0xa43   : > { %v5898_v19 = vmul.f32 %v10856_v60, %v5883_v24 }
 0xa45   : > { %v5920_v29 = vsel %vm5919_vm9, %v5898_v19, %v5918_v32 }
 0xa46   : > { %5922 = vst [vmem:[%s782_s24] sm:$0xff] %v5920_v29 }
 0xa47   : > { %7504 = shalt.err (!%p7501_p9)
}
 0xa48   : > { %6726 = dma.vmem_to_hbm [thread:$0]  (%p7810_p4), %s5937_s18, 128, %s5939_s14, %s5924_s5  }
 0xa49 PF: > { %s5950_s29 = sand.u32 1, %s7551_s0   ;;  %p11459_p10 = scmp.ge.s32.totalorder %s7563_s21, 2 }
 0xa4a   : > { %s5951_s6 = scalar_lea.sflag [#allocation5], %s5950_s29 }
 0xa4b   : > { %p6764_p13 = pnand %p11459_p10, %p7814_p6 }
 0xa4d   : > { %p6765_p11 = pneg %p6764_p13 }
 0xa4f   : > { %7546 = dma.done.wait (%p6765_p11), %s5951_s6, 128  }
 0xa50   : > { %7548 = vsyncadd (%p6765_p11), %s5951_s6, 4294967168  ;;  %p37_p0 = scmp.ge.s32.totalorder %s7784_s12, 4   ;;  %s11460_s0 = smov %s7555_s30 }
 0xa51   : > { %s11461_s30 = smov %s7559_s20  ;;  %s11462_s20 = smov %s7795_s26 }
 0xa52   : > { %s11463_s21 = smov %s7784_s12  ;;  %39 = sbr.rel (!%p37_p0) target bundleno = 28 (0x1c), region = 181 }
 0xa57   :  { %5957 = vsyncpa [#allocation4], 1 }
 0xa58   :  { %5959 = vsyncpa [#allocation4 + $0x1], 1 }
 0xa59   :  { %5960 = vsyncpa [#allocation7], 1 }
 0xa5a   :  { %5961 = vsyncpa [#allocation10], 1 }
 0xa5b   :  { %5962 = vsyncpa [#allocation13], 1 }
 0xa5c   :  { %5963 = vsyncpa [#allocation16], 1 }
 0xa5d   :  { %5964 = vsyncpa [#allocation19], 1 }
 0xa5e   :  { %5965 = vsyncpa [#allocation5], 1 }
 0xa5f   :  { %5967 = vsyncpa [#allocation5 + $0x1], 1 }

</bundles_post_ra>
